<compile_context>
chip_gen: v6e
topology: v6e:2x2x1
jax: 0.10.0
libtpu: 0.0.40
codegen_flags: <defaults>
</compile_context>

<pallas_src>
import jax
import jax.numpy as jnp
from jax.experimental import pallas as pl
from jax.experimental.pallas import tpu as pltpu


LATENT_DIM = 16
CONDITION_DIM = 16
OUTPUT_DIM = 64
H1, H2, H3 = 256, 512, 1024
LEAK = 0.2


def _round_up(x, m):
    return ((x + m - 1) // m) * m


def _leaky_relu(x):
    # Kept in f32 (dot accumulators are f32); v5e VPU has no bf16 path.
    return jnp.where(x > 0, x, LEAK * x)


def generator_kernel(z_ref, c_ref,
                     w1z_ref, w1c_ref, b1_ref,
                     w2_ref, b2_ref,
                     w3_ref, b3_ref,
                     w4_ref, b4_ref,
                     o_ref):
    # Fused concat: cat(z, c) @ W1 == z @ W1[:latent] + c @ W1[latent:].
    zb = z_ref[...].astype(jnp.bfloat16)
    cb = c_ref[...].astype(jnp.bfloat16)
    h = (jnp.dot(zb, w1z_ref[...], preferred_element_type=jnp.float32)
         + jnp.dot(cb, w1c_ref[...], preferred_element_type=jnp.float32)
         + b1_ref[...])
    h = _leaky_relu(h).astype(jnp.bfloat16)
    h = jnp.dot(h, w2_ref[...], preferred_element_type=jnp.float32) + b2_ref[...]
    h = _leaky_relu(h).astype(jnp.bfloat16)
    h = jnp.dot(h, w3_ref[...], preferred_element_type=jnp.float32) + b3_ref[...]
    h = _leaky_relu(h).astype(jnp.bfloat16)
    # Final layer: output padded to 128 lanes -> unmasked vector stores.
    o_ref[...] = (jnp.dot(h, w4_ref[...], preferred_element_type=jnp.float32)
                  + b4_ref[...])


def init_params(key, latent_dim=LATENT_DIM, condition_dim=CONDITION_DIM,
                output_dim=OUTPUT_DIM):
    """Deterministic synthetic params. Weights are (in, out); biases are (1, out)."""
    dims = [(latent_dim + condition_dim, H1), (H1, H2), (H2, H3), (H3, output_dim)]
    params = []
    for (fan_in, fan_out) in dims:
        key, kw, kb = jax.random.split(key, 3)
        bound = 1.0 / jnp.sqrt(fan_in)  # mimic torch nn.Linear default init range
        w = jax.random.uniform(kw, (fan_in, fan_out), jnp.float32, -bound, bound)
        b = jax.random.uniform(kb, (1, fan_out), jnp.float32, -bound, bound)
        params += [w, b]
    return params


def generator_forward(z, conditions, params, *, batch_tile=256):
    w1, b1, w2, b2, w3, b3, w4, b4 = params
    B, latent_dim = z.shape
    cond_dim = conditions.shape[1]
    out_dim = w4.shape[1]
    out_pad = _round_up(out_dim, 128)            # lane-dense output width

    z = z.astype(jnp.float32)
    c = conditions.astype(jnp.float32)

    # Robust batch tiling: tile must be a multiple of 8 sublanes; pad B up to a
    # multiple of the tile and slice the result afterwards.
    tb = min(batch_tile, _round_up(B, 8))
    b_pad = _round_up(B, tb)
    if b_pad != B:
        z = jnp.pad(z, ((0, b_pad - B), (0, 0)))
        c = jnp.pad(c, ((0, b_pad - B), (0, 0)))

    # bf16 weights feed the MXU; f32 biases are added to the f32 accumulators.
    w1z = w1[:latent_dim].astype(jnp.bfloat16)           # (latent, 256)
    w1c = w1[latent_dim:].astype(jnp.bfloat16)           # (cond,   256)
    w2b = w2.astype(jnp.bfloat16)
    w3b = w3.astype(jnp.bfloat16)
    w4p = jnp.pad(w4.astype(jnp.bfloat16), ((0, 0), (0, out_pad - out_dim)))
    b1f = b1.astype(jnp.float32)
    b2f = b2.astype(jnp.float32)
    b3f = b3.astype(jnp.float32)
    b4p = jnp.pad(b4.astype(jnp.float32), ((0, 0), (0, out_pad - out_dim)))

    grid = (b_pad // tb,)

    def full(arr):
        # Whole-array block, same block every grid step -> fetched once,
        # stays resident in VMEM (weights / biases).
        return pl.BlockSpec(arr.shape, lambda i: (0, 0))

    in_specs = [
        pl.BlockSpec((tb, latent_dim), lambda i: (i, 0)),   # z batch tile
        pl.BlockSpec((tb, cond_dim), lambda i: (i, 0)),     # conditions batch tile
        full(w1z), full(w1c), full(b1f),
        full(w2b), full(b2f),
        full(w3b), full(b3f),
        full(w4p), full(b4p),
    ]
    out_specs = pl.BlockSpec((tb, out_pad), lambda i: (i, 0))

    flops = 2 * b_pad * (latent_dim * H1 + cond_dim * H1
                         + H1 * H2 + H2 * H3 + H3 * out_pad)
    bytes_accessed = (
        sum(int(a.size) * a.dtype.itemsize
            for a in (w1z, w1c, b1f, w2b, b2f, w3b, b3f, w4p, b4p))
        + b_pad * (latent_dim + cond_dim) * 4    # inputs
        + b_pad * out_pad * 4                    # output
    )

    out = pl.pallas_call(
        generator_kernel,
        out_shape=jax.ShapeDtypeStruct((b_pad, out_pad), jnp.float32),
        grid_spec=pltpu.PrefetchScalarGridSpec(
            num_scalar_prefetch=0,
            grid=grid,
            in_specs=in_specs,
            out_specs=out_specs,
        ),
        compiler_params=pltpu.CompilerParams(
            dimension_semantics=("parallel",),
            vmem_limit_bytes=32 * 1024 * 1024,
        ),
        cost_estimate=pl.CostEstimate(
            flops=flops, transcendentals=0, bytes_accessed=bytes_accessed),
    )(z, c, w1z, w1c, b1f, w2b, b2f, w3b, b3f, w4p, b4p)

    return out[:B, :out_dim]


def reference_forward(z, conditions, params):
    # Pure-f32 reference of the exact torch math.
    x = jnp.concatenate([z, conditions], axis=1).astype(jnp.float32)
    w1, b1, w2, b2, w3, b3, w4, b4 = params
    h = jnp.where((t := x @ w1 + b1) > 0, t, LEAK * t)
    h = jnp.where((t := h @ w2 + b2) > 0, t, LEAK * t)
    h = jnp.where((t := h @ w3 + b3) > 0, t, LEAK * t)
    return h @ w4 + b4


if __name__ == "__main__":
    key = jax.random.PRNGKey(0)
    kp, kz, kc = jax.random.split(key, 3)

    params = init_params(kp)

    B = 512  # 2 grid steps at the default 256-row batch tile
    z = jax.random.normal(kz, (B, LATENT_DIM), jnp.float32)
    conditions = jax.random.normal(kc, (B, CONDITION_DIM), jnp.float32)

    out = generator_forward(z, conditions, params)
    out = jax.block_until_ready(out)

    ref = reference_forward(z, conditions, params)
    assert out.shape == (B, OUTPUT_DIM)
    # bf16 weights/activations in the MXU -> loosened tolerance vs f32 reference.
    assert jnp.allclose(out, ref, atol=5e-2, rtol=5e-2), "mismatch vs JAX reference"

    print("KERNEL_OK")
</pallas_src>

<mosaic_0001>
module attributes {stable_mosaic.version = 11 : i64} {
  func.func @generator_kernel(%arg0: i32, %arg1: memref<256x16xf32, #tpu.memory_space<vmem>>, %arg2: memref<256x16xf32, #tpu.memory_space<vmem>>, %arg3: memref<16x256xbf16, #tpu.memory_space<vmem>>, %arg4: memref<16x256xbf16, #tpu.memory_space<vmem>>, %arg5: memref<1x256xf32, #tpu.memory_space<vmem>>, %arg6: memref<256x512xbf16, #tpu.memory_space<vmem>>, %arg7: memref<1x512xf32, #tpu.memory_space<vmem>>, %arg8: memref<512x1024xbf16, #tpu.memory_space<vmem>>, %arg9: memref<1x1024xf32, #tpu.memory_space<vmem>>, %arg10: memref<1024x128xbf16, #tpu.memory_space<vmem>>, %arg11: memref<1x128xf32, #tpu.memory_space<vmem>>, %arg12: memref<256x128xf32, #tpu.memory_space<vmem>>) attributes {dimension_semantics = [#tpu.dimension_semantics<parallel>], iteration_bounds = array<i64: 2>, scalar_prefetch = 0 : i64, scratch_operands = 0 : i64, tpu.core_type = #tpu.core_type<tc>, window_params = [{transform_indices = @transform_0, window_bounds = array<i64: 256, 16>}, {transform_indices = @transform_1, window_bounds = array<i64: 256, 16>}, {pipeline_mode = #tpu.pipeline_mode<synchronous>, transform_indices = @transform_2, window_bounds = array<i64: 16, 256>}, {pipeline_mode = #tpu.pipeline_mode<synchronous>, transform_indices = @transform_3, window_bounds = array<i64: 16, 256>}, {pipeline_mode = #tpu.pipeline_mode<synchronous>, transform_indices = @transform_4, window_bounds = array<i64: 1, 256>}, {pipeline_mode = #tpu.pipeline_mode<synchronous>, transform_indices = @transform_5, window_bounds = array<i64: 256, 512>}, {pipeline_mode = #tpu.pipeline_mode<synchronous>, transform_indices = @transform_6, window_bounds = array<i64: 1, 512>}, {pipeline_mode = #tpu.pipeline_mode<synchronous>, transform_indices = @transform_7, window_bounds = array<i64: 512, 1024>}, {pipeline_mode = #tpu.pipeline_mode<synchronous>, transform_indices = @transform_8, window_bounds = array<i64: 1, 1024>}, {pipeline_mode = #tpu.pipeline_mode<synchronous>, transform_indices = @transform_9, window_bounds = array<i64: 1024, 128>}, {pipeline_mode = #tpu.pipeline_mode<synchronous>, transform_indices = @transform_10, window_bounds = array<i64: 1, 128>}, {transform_indices = @transform_11, window_bounds = array<i64: 256, 128>}]} {
    %c0 = arith.constant 0 : index
    %c0_0 = arith.constant 0 : index
    %0 = vector.load %arg1[%c0, %c0_0] : memref<256x16xf32, #tpu.memory_space<vmem>>, vector<256x16xf32>
    %1 = arith.truncf %0 : vector<256x16xf32> to vector<256x16xbf16>
    %c0_1 = arith.constant 0 : index
    %c0_2 = arith.constant 0 : index
    %2 = vector.load %arg2[%c0_1, %c0_2] : memref<256x16xf32, #tpu.memory_space<vmem>>, vector<256x16xf32>
    %3 = arith.truncf %2 : vector<256x16xf32> to vector<256x16xbf16>
    %c0_3 = arith.constant 0 : index
    %c0_4 = arith.constant 0 : index
    %4 = vector.load %arg3[%c0_3, %c0_4] : memref<16x256xbf16, #tpu.memory_space<vmem>>, vector<16x256xbf16>
    %cst = arith.constant dense<0.000000e+00> : vector<256x256xf32>
    %5 = tpu.matmul %1, %4, %cst {dimension_numbers = #tpu.dot_dimension_numbers<[1], [0], [0], [1], [0, 0, 1, 1], [], []>} : vector<256x16xbf16>, vector<16x256xbf16>, vector<256x256xf32> -> vector<256x256xf32>
    %c0_5 = arith.constant 0 : index
    %c0_6 = arith.constant 0 : index
    %6 = vector.load %arg4[%c0_5, %c0_6] : memref<16x256xbf16, #tpu.memory_space<vmem>>, vector<16x256xbf16>
    %cst_7 = arith.constant dense<0.000000e+00> : vector<256x256xf32>
    %7 = tpu.matmul %3, %6, %cst_7 {dimension_numbers = #tpu.dot_dimension_numbers<[1], [0], [0], [1], [0, 0, 1, 1], [], []>} : vector<256x16xbf16>, vector<16x256xbf16>, vector<256x256xf32> -> vector<256x256xf32>
    %8 = arith.addf %5, %7 : vector<256x256xf32>
    %c0_8 = arith.constant 0 : index
    %c0_9 = arith.constant 0 : index
    %9 = vector.load %arg5[%c0_8, %c0_9] : memref<1x256xf32, #tpu.memory_space<vmem>>, vector<1x256xf32>
    %10 = vector.broadcast %9 : vector<1x256xf32> to vector<256x256xf32>
    %11 = arith.addf %8, %10 : vector<256x256xf32>
    %cst_10 = arith.constant 0.000000e+00 : f32
    %12 = vector.broadcast %cst_10 : f32 to vector<256x256xf32>
    %13 = arith.cmpf ogt, %11, %12 : vector<256x256xf32>
    %cst_11 = arith.constant 2.000000e-01 : f32
    %14 = vector.broadcast %cst_11 : f32 to vector<256x256xf32>
    %15 = arith.mulf %14, %11 : vector<256x256xf32>
    %16 = arith.select %13, %11, %15 : vector<256x256xi1>, vector<256x256xf32>
    %17 = arith.truncf %16 : vector<256x256xf32> to vector<256x256xbf16>
    %c0_12 = arith.constant 0 : index
    %c0_13 = arith.constant 0 : index
    %18 = vector.load %arg6[%c0_12, %c0_13] : memref<256x512xbf16, #tpu.memory_space<vmem>>, vector<256x512xbf16>
    %cst_14 = arith.constant dense<0.000000e+00> : vector<256x512xf32>
    %19 = tpu.matmul %17, %18, %cst_14 {dimension_numbers = #tpu.dot_dimension_numbers<[1], [0], [0], [1], [0, 0, 1, 1], [], []>} : vector<256x256xbf16>, vector<256x512xbf16>, vector<256x512xf32> -> vector<256x512xf32>
    %c0_15 = arith.constant 0 : index
    %c0_16 = arith.constant 0 : index
    %20 = vector.load %arg7[%c0_15, %c0_16] : memref<1x512xf32, #tpu.memory_space<vmem>>, vector<1x512xf32>
    %21 = vector.broadcast %20 : vector<1x512xf32> to vector<256x512xf32>
    %22 = arith.addf %19, %21 : vector<256x512xf32>
    %cst_17 = arith.constant 0.000000e+00 : f32
    %23 = vector.broadcast %cst_17 : f32 to vector<256x512xf32>
    %24 = arith.cmpf ogt, %22, %23 : vector<256x512xf32>
    %cst_18 = arith.constant 2.000000e-01 : f32
    %25 = vector.broadcast %cst_18 : f32 to vector<256x512xf32>
    %26 = arith.mulf %25, %22 : vector<256x512xf32>
    %27 = arith.select %24, %22, %26 : vector<256x512xi1>, vector<256x512xf32>
    %28 = arith.truncf %27 : vector<256x512xf32> to vector<256x512xbf16>
    %c0_19 = arith.constant 0 : index
    %c0_20 = arith.constant 0 : index
    %29 = vector.load %arg8[%c0_19, %c0_20] : memref<512x1024xbf16, #tpu.memory_space<vmem>>, vector<512x1024xbf16>
    %cst_21 = arith.constant dense<0.000000e+00> : vector<256x1024xf32>
    %30 = tpu.matmul %28, %29, %cst_21 {dimension_numbers = #tpu.dot_dimension_numbers<[1], [0], [0], [1], [0, 0, 1, 1], [], []>} : vector<256x512xbf16>, vector<512x1024xbf16>, vector<256x1024xf32> -> vector<256x1024xf32>
    %c0_22 = arith.constant 0 : index
    %c0_23 = arith.constant 0 : index
    %31 = vector.load %arg9[%c0_22, %c0_23] : memref<1x1024xf32, #tpu.memory_space<vmem>>, vector<1x1024xf32>
    %32 = vector.broadcast %31 : vector<1x1024xf32> to vector<256x1024xf32>
    %33 = arith.addf %30, %32 : vector<256x1024xf32>
    %cst_24 = arith.constant 0.000000e+00 : f32
    %34 = vector.broadcast %cst_24 : f32 to vector<256x1024xf32>
    %35 = arith.cmpf ogt, %33, %34 : vector<256x1024xf32>
    %cst_25 = arith.constant 2.000000e-01 : f32
    %36 = vector.broadcast %cst_25 : f32 to vector<256x1024xf32>
    %37 = arith.mulf %36, %33 : vector<256x1024xf32>
    %38 = arith.select %35, %33, %37 : vector<256x1024xi1>, vector<256x1024xf32>
    %39 = arith.truncf %38 : vector<256x1024xf32> to vector<256x1024xbf16>
    %c0_26 = arith.constant 0 : index
    %c0_27 = arith.constant 0 : index
    %40 = vector.load %arg10[%c0_26, %c0_27] : memref<1024x128xbf16, #tpu.memory_space<vmem>>, vector<1024x128xbf16>
    %cst_28 = arith.constant dense<0.000000e+00> : vector<256x128xf32>
    %41 = tpu.matmul %39, %40, %cst_28 {dimension_numbers = #tpu.dot_dimension_numbers<[1], [0], [0], [1], [0, 0, 1, 1], [], []>} : vector<256x1024xbf16>, vector<1024x128xbf16>, vector<256x128xf32> -> vector<256x128xf32>
    %c0_29 = arith.constant 0 : index
    %c0_30 = arith.constant 0 : index
    %42 = vector.load %arg11[%c0_29, %c0_30] : memref<1x128xf32, #tpu.memory_space<vmem>>, vector<1x128xf32>
    %43 = vector.broadcast %42 : vector<1x128xf32> to vector<256x128xf32>
    %44 = arith.addf %41, %43 : vector<256x128xf32>
    %c0_31 = arith.constant 0 : index
    %c0_32 = arith.constant 0 : index
    %45 = vector.load %arg12[%c0_31, %c0_32] : memref<256x128xf32, #tpu.memory_space<vmem>>, vector<256x128xf32>
    tpu.vector_store %arg12[%c0_31, %c0_32], %44 {strides = array<i32>} : memref<256x128xf32, #tpu.memory_space<vmem>>, vector<256x128xf32>,
    return
  }
  func.func @transform_0(%arg0: i32) -> (i32, i32) {
    %c0_i32 = arith.constant 0 : i32
    %c0_i32_0 = arith.constant 0 : i32
    return %arg0, %c0_i32 : i32, i32
  }
  func.func @transform_1(%arg0: i32) -> (i32, i32) {
    %c0_i32 = arith.constant 0 : i32
    %c0_i32_0 = arith.constant 0 : i32
    return %arg0, %c0_i32 : i32, i32
  }
  func.func @transform_2(%arg0: i32) -> (i32, i32) {
    %c0_i32 = arith.constant 0 : i32
    %c0_i32_0 = arith.constant 0 : i32
    %c0_i32_1 = arith.constant 0 : i32
    return %c0_i32, %c0_i32_0 : i32, i32
  }
  func.func @transform_3(%arg0: i32) -> (i32, i32) {
    %c0_i32 = arith.constant 0 : i32
    %c0_i32_0 = arith.constant 0 : i32
    %c0_i32_1 = arith.constant 0 : i32
    return %c0_i32, %c0_i32_0 : i32, i32
  }
  func.func @transform_4(%arg0: i32) -> (i32, i32) {
    %c0_i32 = arith.constant 0 : i32
    %c0_i32_0 = arith.constant 0 : i32
    %c0_i32_1 = arith.constant 0 : i32
    return %c0_i32, %c0_i32_0 : i32, i32
  }
  func.func @transform_5(%arg0: i32) -> (i32, i32) {
    %c0_i32 = arith.constant 0 : i32
    %c0_i32_0 = arith.constant 0 : i32
    %c0_i32_1 = arith.constant 0 : i32
    return %c0_i32, %c0_i32_0 : i32, i32
  }
  func.func @transform_6(%arg0: i32) -> (i32, i32) {
    %c0_i32 = arith.constant 0 : i32
    %c0_i32_0 = arith.constant 0 : i32
    %c0_i32_1 = arith.constant 0 : i32
    return %c0_i32, %c0_i32_0 : i32, i32
  }
  func.func @transform_7(%arg0: i32) -> (i32, i32) {
    %c0_i32 = arith.constant 0 : i32
    %c0_i32_0 = arith.constant 0 : i32
    %c0_i32_1 = arith.constant 0 : i32
    return %c0_i32, %c0_i32_0 : i32, i32
  }
  func.func @transform_8(%arg0: i32) -> (i32, i32) {
    %c0_i32 = arith.constant 0 : i32
    %c0_i32_0 = arith.constant 0 : i32
    %c0_i32_1 = arith.constant 0 : i32
    return %c0_i32, %c0_i32_0 : i32, i32
  }
  func.func @transform_9(%arg0: i32) -> (i32, i32) {
    %c0_i32 = arith.constant 0 : i32
    %c0_i32_0 = arith.constant 0 : i32
    %c0_i32_1 = arith.constant 0 : i32
    return %c0_i32, %c0_i32_0 : i32, i32
  }
  func.func @transform_10(%arg0: i32) -> (i32, i32) {
    %c0_i32 = arith.constant 0 : i32
    %c0_i32_0 = arith.constant 0 : i32
    %c0_i32_1 = arith.constant 0 : i32
    return %c0_i32, %c0_i32_0 : i32, i32
  }
  func.func @transform_11(%arg0: i32) -> (i32, i32) {
    %c0_i32 = arith.constant 0 : i32
    %c0_i32_0 = arith.constant 0 : i32
    return %arg0, %c0_i32 : i32, i32
  }
}

</mosaic_0001>

<bundles_post_ra>
// kernel: tpu_custom_call.1
= control target key start
LH: loop header
LB: loop body
LE: loop exit
PB: predicated region body
PF: predicated region fallthrough
CT: control target
= control target key end

     0   :  { %s13280_s0 = inlined_call_operand.vmem [shape: f32[512,16], index: 0, kind: input, shape index: {}]   ;;  %s13281_s1 = inlined_call_operand.vmem [shape: f32[512,16], index: 1, kind: input, shape index: {}]   ;;  %s13282_s2 = inlined_call_operand.vmem [shape: bf16[16,256], index: 2, kind: input, shape index: {}]   ;;  %s13283_s3 = inlined_call_operand.vmem [shape: bf16[16,256], index: 3, kind: input, shape index: {}]   ;;  %s13284_s4 = inlined_call_operand.vmem [shape: f32[1,256], index: 4, kind: input, shape index: {}]   ;;  %s13285_s5 = inlined_call_operand.vmem [shape: bf16[256,512], index: 5, kind: input, shape index: {}]   ;;  %s13286_s6 = inlined_call_operand.vmem [shape: f32[1,512], index: 6, kind: input, shape index: {}]   ;;  %s13287_s7 = inlined_call_operand.hbm [shape: bf16[512,1024], index: 7, kind: input, shape index: {}]   ;;  %s13288_s8 = inlined_call_operand.vmem [shape: f32[1,1024], index: 8, kind: input, shape index: {}]   ;;  %s13289_s9 = inlined_call_operand.vmem [shape: bf16[1024,128], index: 9, kind: input, shape index: {}]   ;;  %s13290_s10 = inlined_call_operand.vmem [shape: f32[1,128], index: 10, kind: input, shape index: {}]   ;;  %s13291_s11 = inlined_call_operand.hbm [shape: f32[512,128], index: 11, kind: output, shape index: {}]  }
   0x1   :  { %13586 = sst [smem:[#allocation128_spill]] %s13280_s0 }
   0x2   :  { %13587 = sst [smem:[#allocation129_spill]] %s13281_s1 }
   0x3   :  { %13588 = sst [smem:[#allocation130_spill]] %s13287_s7 }
   0x4   :  { %16 = vsyncpa [#allocation3], 0 }
   0x5   :  { %17 = vsyncpa [#allocation4], 0 }
   0x6   :  { %19 = vsyncpa [#allocation4 + $0x1], 0  ;;  %s9151_s17 = smov 0   ;;  %s9153_s18 = smov 0  }
   0x7   :  { %s9155_s19 = smov 0   ;;  %s9157_s20 = smov 0  }
   0x8 LB: > { %s9172_s21 = sadd.s32 4294967295, %s9082_s20   ;;  %s7882_s22 = sadd.s32 4294967294, %s9082_s20   ;;  %s9082_s20 = sphi %s9157_s20, %s14277_s20   ;;  %s9078_s19 = sphi %s9155_s19, %s14276_s19   ;;  %s9074_s18 = sphi %s9153_s18, %s14275_s18   ;;  %s9070_s17 = sphi %s9151_s17, %s14274_s17  }
   0x9   : > { %s9176_s23 = sadd.s32 1, %s9082_s20   ;;  %s273_s24 = sadd.s32 1, %s9078_s19 }
   0xa   : > { %s270_s25 = ssub.s32 %s9082_s20, %s9176_s23  ;;  %p283_p0 = scmp.ne.s32.totalorder %s9078_s19, %s9074_s18 }
   0xb   : > { %p271_p1 = scmp.eq.s32.totalorder %s270_s25, 0  ;;  %p284_p2 = scmp.eq.s32.totalorder %s9172_s21, 1 }
   0xc   : > { %p289_p3 = scmp.ne.s32.totalorder %s9074_s18, %s9070_s17  ;;  %p290_p4 = scmp.eq.s32.totalorder %s7882_s22, 1 }
   0xd   : > { %s9187_s26 = scalar_select %p271_p1, %s9078_s19, %s273_s24  }
   0xe   : > { %p9189_p5 = por %p284_p2, %p283_p0  ;;  %p9193_p6 = por %p290_p4, %p289_p3 }
   0xf   : > { %13589 = sst [smem:[#allocation8_spill]] %s9187_s26  ;;  %p7883_p7 = scmp.ge.s32.totalorder %s9082_s20, 1 }
  0x10   : > { %s13591_s28 = scalar_select %p9193_p6, 1, 0 }
  0x11   : > { %p297_p8 = scmp.lt.s32.totalorder %s9082_s20, 3  ;;  %p8782_p9 = scmp.eq.s32.totalorder %s9172_s21, 0 }
  0x12   : > { %s9084_s30 = smov [#allocation2]  }
  0x13   : > { %p9200_p10 = pnand %p7883_p7, %p297_p8  ;;  %s324_s12 = sshll.u32 %s9084_s30, 4  ;;  %s325_s12 = int_to_ptr.vmem [resolvable:$true] %s324_s12 }
  0x14   : > { %s9003_s13 = scalar_lea.vmem %s325_s12, 32768  ;;  %p9011_p3 = scmp.lt.s32.totalorder %s325_s12, %s325_s12 }
  0x15   : > { %p8774_p11 = pneg %p9200_p10  ;;  %p9004_p0 = scmp.ne.s32.totalorder %s325_s12, %s9003_s13 }
  0x16   : > { %p9012_p4 = scmp.lt.s32.totalorder %s9003_s13, %s9003_s13 }
  0x17   : > { %p8775_p12 = pnand %p8782_p9, %p8774_p11 }
  0x18   : > { %p9013_p6 = por %p9012_p4, %p9011_p3 }
  0x19   : > { %p8994_p13 = pneg %p8775_p12 }
  0x1b   : > { %p9006_p1 = pnand %p9004_p0, %p8994_p13 }
  0x1d   : > { %p9007_p2 = pneg %p9006_p1 }
  0x1f   : > { %p9014_p7 = pnand %p9013_p6, %p9007_p2 }
  0x21   : > { %9017 = shalt.err (!%p9014_p7)
}
  0x22   : > { %s9085_s14 = smov 512   ;;  %s9086_s15 = smov 32  }
  0x23   : > { %s13593_s7 = sld [smem:[#allocation130_spill]] }
  0x25   : > { %367 = sbr.rel (%p9200_p10) target bundleno = 1484 (0x5cc), region = 64 }
  0x29   : > { %8777 = dma.hbm_to_vmem [thread:$0]  (!%p8775_p12), %s13593_s7, 32768, %s325_s12, [#allocation3], %s9085_s14, %s9085_s14, %s9086_s15  }
  0x2a   : > { %9061 = dma.done.wait (%p8782_p9), [#allocation3], 32768  }
  0x2b   : > { %9063 = vsyncadd (%p8782_p9), [#allocation3], 4294934528  ;;  %s7889_s24 = sshll.u32 %s9172_s21, 5  ;;  %v9087_v0 = vmov 0   ;;  %s13594_s1 = sld [smem:[#allocation129_spill]]  ;;  %vm536_vm0 = vcmask 130048  }
  0x2c   : > { %617 = vmatprep.mubr.bf16.mxu0 %v9087_v0  ;;  %868 = vmatprep.mubr.bf16.mxu1 %v9087_v0  ;;  %p413_p6 = scmp.lt.s32.totalorder %s7889_s24, 63  ;;  %v8823_v1 = vld [vmem:[%s13283_s3 + $0x4] ss:$8 sps:$4 sm:$0xff]   ;;  %s13595_s0 = sld [smem:[#allocation128_spill]]  ;;  %v8827_v3 = vld [vmem:[%s13283_s3] ss:$8 sps:$4 sm:$0xff]  }
  0x2d   : > { %v8825_v2 = vld [vmem:[%s13282_s2 + $0x4] ss:$8 sps:$4 sm:$0xff]   ;;  %599 = vmatprep.subr.bf16.mxu0 %v8823_v1  ;;  %v8828_v4 = vld [vmem:[%s13282_s2] ss:$8 sps:$4 sm:$0xff]   ;;  %s409_s7 = sand.u32 1, %s9074_s18   ;;  %s8319_s14 = sshll.u32 %s9172_s21, 12 }
  0x2e   : > { %s14279_s24 = smov (!%p413_p6, %s7889_s24), 63  ;;  %850 = vmatprep.subr.bf16.mxu1 %v8825_v2  ;;  %600 = vmatpush1.bf16.msra.mxu0 %v8827_v3  ;;  %v8829_v21 = vld [vmem:[%s13285_s5 + $0xe0] ss:$16 sps:$4 sm:$0xff]   ;;  %v8831_v22 = vld [vmem:[%s13285_s5 + $0xe4] ss:$16 sps:$4 sm:$0xff]   ;;  %s7888_s26 = sshll.u32 %s409_s7, 8 }
  0x2f   : > { %s7890_s25 = sshll.u32 %s14279_s24, 3  ;;  %851 = vmatpush1.bf16.msra.mxu1 %v8828_v4  ;;  %v8832_v25 = vld [vmem:[%s13285_s5 + $0xe8] ss:$16 sps:$4 sm:$0xff]   ;;  %v8834_v26 = vld [vmem:[%s13285_s5 + $0xec] ss:$16 sps:$4 sm:$0xff]   ;;  %1735 = vmatprep.subr.bf16.mxu0 %v8831_v22  ;;  %s13233_s30 = scalar_lea.hbm %s13291_s11, %s8319_s14 }
  0x30   : > { %1928 = vmatprep.subr.bf16.mxu1 %v8834_v26  ;;  %v8835_v28 = vld [vmem:[%s13285_s5 + $0xc0] ss:$16 sps:$4 sm:$0xff]   ;;  %v8837_v29 = vld [vmem:[%s13285_s5 + $0xc4] ss:$16 sps:$4 sm:$0xff]   ;;  %v8838_v30 = vld [vmem:[%s13285_s5 + $0xc8] ss:$16 sps:$4 sm:$0xff]  }
  0x31   : > { %s9223_s29 = scalar_lea.vmem %s13594_s1, %s7890_s25  ;;  %v8840_v31 = vld [vmem:[%s13285_s5 + $0xcc] ss:$16 sps:$4 sm:$0xff]   ;;  %v8841_v35 = vld [vmem:[%s13285_s5 + $0xa0] ss:$16 sps:$4 sm:$0xff]   ;;  %v8843_v36 = vld [vmem:[%s13285_s5 + $0xa4] ss:$16 sps:$4 sm:$0xff]  }
  0x32   : > { %s9231_s22 = scalar_lea.vmem %s13595_s0, %s7890_s25  ;;  %v474_v5 = vld [vmem:[%s9223_s29] sm:$0xff]  ;;  %v475_v6 = vld [vmem:[%s9223_s29 + $0x8] sm:$0xff]  ;;  %v476_v11 = vld [vmem:[%s9223_s29 + $0x10] sm:$0xff]  ;;  %s13164_s25 = scalar_lea.vmem [#allocation5], %s7888_s26 }
  0x33   : > { %v426_v7 = vld [vmem:[%s9231_s22] sm:$0xff]  ;;  %v427_v8 = vld [vmem:[%s9231_s22 + $0x8] sm:$0xff]  ;;  %v506_v9 = vpack.c.bf16 %v475_v6, %v474_v5  ;;  %v477_v12 = vld [vmem:[%s9223_s29 + $0x18] sm:$0xff]  ;;  %s7796_s15 = sshll.u32 %s13164_s25, 4  ;;  %s13240_s12 = scalar_lea.sflag [#allocation4], %s409_s7  ;;  %s13235_s15 = int_to_ptr.vmem [resolvable:$true] %s7796_s15 }
  0x34   : > { %v458_v10 = vpack.c.bf16 %v427_v8, %v426_v7  ;;  %v428_v13 = vld [vmem:[%s9231_s22 + $0x10] sm:$0xff]  ;;  %v429_v14 = vld [vmem:[%s9231_s22 + $0x18] sm:$0xff]  ;;  %v507_v15 = vpack.c.bf16 %v477_v12, %v476_v11  ;;  %v478_v17 = vld [vmem:[%s9223_s29 + $0x20] sm:$0xff]  ;;  %s9018_s21 = scalar_lea.vmem %s13235_s15, 4096  ;;  %s9088_s13 = smov [#allocation5]  }
  0x35   : > { %7895 = vmatmul.mubr.msk.bf16.vlgmr.msra.gmra.mxu0 %vm536_vm0, %v506_v9  ;;  %v459_v16 = vpack.c.bf16 %v429_v14, %v428_v13  ;;  %v479_v18 = vld [vmem:[%s9223_s29 + $0x28] sm:$0xff]  ;;  %v430_v19 = vld [vmem:[%s9231_s22 + $0x20] sm:$0xff]  ;;  %v480_v27 = vld [vmem:[%s9223_s29 + $0x30] sm:$0xff]  ;;  %p9019_p8 = scmp.ne.s32.totalorder %s13235_s15, %s9018_s21  ;;  %s9022_s0 = sshll.u32 %s9088_s13, 4  ;;  %s9023_s0 = int_to_ptr.vmem [resolvable:$false] %s9022_s0 }
  0x36   : > { %7913 = vmatmul.mubr.msk.bf16.vlgmr.msra.gmra.mxu1 %vm536_vm0, %v458_v10  ;;  %627 = vmatprep.mubr.bf16.mxu0 %v9087_v0  ;;  %v431_v20 = vld [vmem:[%s9231_s22 + $0x28] sm:$0xff]  ;;  %v508_v23 = vpack.c.bf16 %v479_v18, %v478_v17  ;;  %v481_v32 = vld [vmem:[%s9223_s29 + $0x38] sm:$0xff]  ;;  %v432_v33 = vld [vmem:[%s9231_s22 + $0x30] sm:$0xff]  ;;  %s9024_s1 = scalar_lea.vmem %s9023_s0, 8192  ;;  %p9025_p11 = scmp.lt.s32.totalorder %s13235_s15, %s9023_s0 }
  0x37   : > { %878 = vmatprep.mubr.bf16.mxu1 %v9087_v0  ;;  %v460_v24 = vpack.c.bf16 %v431_v20, %v430_v19  ;;  %1736 = vmatpush1.bf16.msra.mxu0 %v8829_v21  ;;  %v433_v34 = vld [vmem:[%s9231_s22 + $0x38] sm:$0xff]  ;;  %v509_v37 = vpack.c.bf16 %v481_v32, %v480_v27  ;;  %v482_v41 = vld [vmem:[%s9223_s29 + $0x40] sm:$0xff]  ;;  %v483_v46 = vld [vmem:[%s9223_s29 + $0x48] sm:$0xff]  ;;  %p9020_p9 = pnand %p9019_p8, %p9189_p5  ;;  %p9026_p12 = scmp.lt.s32.totalorder %s9024_s1, %s9018_s21 }
  0x38   : > { %1929 = vmatpush1.bf16.msra.mxu1 %v8832_v25  ;;  %1737 = vmatprep.subr.bf16.mxu0 %v8837_v29  ;;  %v461_v38 = vpack.c.bf16 %v433_v34, %v432_v33  ;;  %v8844_v39 = vld [vmem:[%s13285_s5 + $0xa8] ss:$16 sps:$4 sm:$0xff]   ;;  %v8846_v40 = vld [vmem:[%s13285_s5 + $0xac] ss:$16 sps:$4 sm:$0xff]   ;;  %v8847_v42 = vld [vmem:[%s13285_s5 + $0x80] ss:$16 sps:$4 sm:$0xff]   ;;  %v510_v51 = vpack.c.bf16 %v483_v46, %v482_v41 }
  0x39   : > { %1930 = vmatprep.subr.bf16.mxu1 %v8840_v31  ;;  %v8849_v43 = vld [vmem:[%s13285_s5 + $0x84] ss:$16 sps:$4 sm:$0xff]   ;;  %v8850_v44 = vld [vmem:[%s13285_s5 + $0x88] ss:$16 sps:$4 sm:$0xff]   ;;  %v8852_v45 = vld [vmem:[%s13285_s5 + $0x8c] ss:$16 sps:$4 sm:$0xff]   ;;  %p9021_p10 = pneg %p9020_p9  ;;  %p9027_p13 = por %p9026_p12, %p9025_p11 }
  0x3a   : > { %v434_v47 = vld [vmem:[%s9231_s22 + $0x40] sm:$0xff]  ;;  %v435_v48 = vld [vmem:[%s9231_s22 + $0x48] sm:$0xff]  ;;  %v484_v55 = vld [vmem:[%s9223_s29 + $0x50] sm:$0xff] }
  0x3b   : > { %1738 = vmatpush1.bf16.msra.mxu0 %v8835_v28  ;;  %v8853_v49 = vld [vmem:[%s13285_s5 + $0x60] ss:$16 sps:$4 sm:$0xff]   ;;  %v8855_v50 = vld [vmem:[%s13285_s5 + $0x64] ss:$16 sps:$4 sm:$0xff]   ;;  %v462_v52 = vpack.c.bf16 %v435_v48, %v434_v47  ;;  %v8856_v53 = vld [vmem:[%s13285_s5 + $0x68] ss:$16 sps:$4 sm:$0xff]   ;;  %p9028_p0 = pnand %p9027_p13, %p9021_p10 }
  0x3c   : > { %1931 = vmatpush1.bf16.msra.mxu1 %v8838_v30  ;;  %1739 = vmatprep.subr.bf16.mxu0 %v8843_v36  ;;  %v8858_v54 = vld [vmem:[%s13285_s5 + $0x6c] ss:$16 sps:$4 sm:$0xff]   ;;  %v436_v57 = vld [vmem:[%s9231_s22 + $0x50] sm:$0xff]  ;;  %v8862_v61 = vld [vmem:[%s13285_s5 + $0x48] ss:$16 sps:$4 sm:$0xff]  }
  0x3d   : > { %7896 = vmatmul.mubr.msk.bf16.gmra.mxu0 %vm536_vm0, %v507_v15  ;;  %1932 = vmatprep.subr.bf16.mxu1 %v8846_v40  ;;  %v485_v56 = vld [vmem:[%s9223_s29 + $0x58] sm:$0xff]  ;;  %v8859_v59 = vld [vmem:[%s13285_s5 + $0x40] ss:$16 sps:$4 sm:$0xff]   ;;  %v8861_v60 = vld [vmem:[%s13285_s5 + $0x44] ss:$16 sps:$4 sm:$0xff]  }
  0x3e   : > { %7914 = vmatmul.mubr.msk.bf16.gmra.mxu1 %vm536_vm0, %v459_v16  ;;  %637 = vmatprep.mubr.bf16.mxu0 %v9087_v0  ;;  %v437_v58 = vld [vmem:[%s9231_s22 + $0x58] sm:$0xff]  ;;  %v8865_v63 = vld [vmem:[%s13285_s5 + $0x20] ss:$16 sps:$4 sm:$0xff]   ;;  %v8867_v1 = vld [vmem:[%s13285_s5 + $0x24] ss:$16 sps:$4 sm:$0xff]   ;;  %v511_v4 = vpack.c.bf16 %v485_v56, %v484_v55 }
  0x3f   : > { %888 = vmatprep.mubr.bf16.mxu1 %v9087_v0  ;;  %1740 = vmatpush1.bf16.msra.mxu0 %v8841_v35  ;;  %v8864_v62 = vld [vmem:[%s13285_s5 + $0x4c] ss:$16 sps:$4 sm:$0xff]   ;;  %v8868_v2 = vld [vmem:[%s13285_s5 + $0x28] ss:$16 sps:$4 sm:$0xff]   ;;  %v463_v5 = vpack.c.bf16 %v437_v58, %v436_v57  ;;  %v8873_v6 = vld [vmem:[%s13285_s5 + $0x4] ss:$16 sps:$4 sm:$0xff]  }
  0x40   : > { %1933 = vmatpush1.bf16.msra.mxu1 %v8844_v39  ;;  %1741 = vmatprep.subr.bf16.mxu0 %v8849_v43  ;;  %v8870_v3 = vld [vmem:[%s13285_s5 + $0x2c] ss:$16 sps:$4 sm:$0xff]   ;;  %v486_v8 = vld [vmem:[%s9223_s29 + $0x60] sm:$0xff]  ;;  %v8874_v12 = vld [vmem:[%s13285_s5 + $0x8] ss:$16 sps:$4 sm:$0xff]  }
  0x41   : > { %1934 = vmatprep.subr.bf16.mxu1 %v8852_v45  ;;  %v8876_v7 = vld [vmem:[%s13285_s5 + $0xc] ss:$16 sps:$4 sm:$0xff]   ;;  %v438_v10 = vld [vmem:[%s9231_s22 + $0x60] sm:$0xff]  ;;  %v8880_v17 = vld [vmem:[%s13285_s5 + $0x1e8] ss:$16 sps:$4 sm:$0xff]  }
  0x42   : > { %v487_v9 = vld [vmem:[%s9223_s29 + $0x68] sm:$0xff]  ;;  %v8871_v11 = vld [vmem:[%s13285_s5] ss:$16 sps:$4 sm:$0xff]   ;;  %v8879_v13 = vld [vmem:[%s13285_s5 + $0x1e4] ss:$16 sps:$4 sm:$0xff]  }
  0x43   : > { %1742 = vmatpush1.bf16.msra.mxu0 %v8847_v42  ;;  %v8882_v14 = vld [vmem:[%s13285_s5 + $0x1ec] ss:$16 sps:$4 sm:$0xff]   ;;  %v8877_v16 = vld [vmem:[%s13285_s5 + $0x1e0] ss:$16 sps:$4 sm:$0xff]   ;;  %v512_v18 = vpack.c.bf16 %v487_v9, %v486_v8  ;;  %v8885_v20 = vld [vmem:[%s13285_s5 + $0x1c4] ss:$16 sps:$4 sm:$0xff]  }
  0x44   : > { %1935 = vmatpush1.bf16.msra.mxu1 %v8850_v44  ;;  %1743 = vmatprep.subr.bf16.mxu0 %v8855_v50  ;;  %v439_v15 = vld [vmem:[%s9231_s22 + $0x68] sm:$0xff]  ;;  %v488_v22 = vld [vmem:[%s9223_s29 + $0x70] sm:$0xff]  ;;  %v441_v29 = vld [vmem:[%s9231_s22 + $0x78] sm:$0xff] }
  0x45   : > { %7897 = vmatmul.mubr.msk.bf16.gmra.mxu0 %vm536_vm0, %v508_v23  ;;  %1936 = vmatprep.subr.bf16.mxu1 %v8858_v54  ;;  %v464_v19 = vpack.c.bf16 %v439_v15, %v438_v10  ;;  %v8888_v21 = vld [vmem:[%s13285_s5 + $0x1cc] ss:$16 sps:$4 sm:$0xff]   ;;  %v8883_v25 = vld [vmem:[%s13285_s5 + $0x1c0] ss:$16 sps:$4 sm:$0xff]   ;;  %v8886_v26 = vld [vmem:[%s13285_s5 + $0x1c8] ss:$16 sps:$4 sm:$0xff]  }
  0x46   : > { %7915 = vmatmul.mubr.msk.bf16.gmra.mxu1 %vm536_vm0, %v460_v24  ;;  %647 = vmatprep.mubr.bf16.mxu0 %v9087_v0  ;;  %v489_v23 = vld [vmem:[%s9223_s29 + $0x78] sm:$0xff]  ;;  %v440_v24 = vld [vmem:[%s9231_s22 + $0x70] sm:$0xff]  ;;  %v490_v40 = vld [vmem:[%s9223_s29 + $0x80] sm:$0xff] }
  0x47   : > { %898 = vmatprep.mubr.bf16.mxu1 %v9087_v0  ;;  %1744 = vmatpush1.bf16.msra.mxu0 %v8853_v49  ;;  %v8891_v27 = vld [vmem:[%s13285_s5 + $0x1a4] ss:$16 sps:$4 sm:$0xff]   ;;  %v8894_v28 = vld [vmem:[%s13285_s5 + $0x1ac] ss:$16 sps:$4 sm:$0xff]   ;;  %v8889_v30 = vld [vmem:[%s13285_s5 + $0x1a0] ss:$16 sps:$4 sm:$0xff]   ;;  %v513_v32 = vpack.c.bf16 %v489_v23, %v488_v22  ;;  %v465_v33 = vpack.c.bf16 %v441_v29, %v440_v24 }
  0x48   : > { %1937 = vmatpush1.bf16.msra.mxu1 %v8856_v53  ;;  %1745 = vmatprep.subr.bf16.mxu0 %v8861_v60  ;;  %v8892_v31 = vld [vmem:[%s13285_s5 + $0x1a8] ss:$16 sps:$4 sm:$0xff]   ;;  %v8897_v34 = vld [vmem:[%s13285_s5 + $0x184] ss:$16 sps:$4 sm:$0xff]   ;;  %v8895_v35 = vld [vmem:[%s13285_s5 + $0x180] ss:$16 sps:$4 sm:$0xff]  }
  0x49   : > { %1938 = vmatprep.subr.bf16.mxu1 %v8864_v62  ;;  %v8898_v36 = vld [vmem:[%s13285_s5 + $0x188] ss:$16 sps:$4 sm:$0xff]   ;;  %v8906_v39 = vld [vmem:[%s13285_s5 + $0x16c] ss:$16 sps:$4 sm:$0xff]   ;;  %v442_v42 = vld [vmem:[%s9231_s22 + $0x80] sm:$0xff] }
  0x4a   : > { %v491_v41 = vld [vmem:[%s9223_s29 + $0x88] sm:$0xff]  ;;  %v8901_v44 = vld [vmem:[%s13285_s5 + $0x160] ss:$16 sps:$4 sm:$0xff]   ;;  %v8909_v48 = vld [vmem:[%s13285_s5 + $0x144] ss:$16 sps:$4 sm:$0xff]  }
  0x4b   : > { %1746 = vmatpush1.bf16.msra.mxu0 %v8859_v59  ;;  %v443_v43 = vld [vmem:[%s9231_s22 + $0x88] sm:$0xff]  ;;  %v514_v46 = vpack.c.bf16 %v491_v41, %v490_v40  ;;  %v8907_v49 = vld [vmem:[%s13285_s5 + $0x140] ss:$16 sps:$4 sm:$0xff]   ;;  %v445_v55 = vld [vmem:[%s9231_s22 + $0x98] sm:$0xff] }
  0x4c   : > { %1939 = vmatpush1.bf16.msra.mxu1 %v8862_v61  ;;  %1747 = vmatprep.subr.bf16.mxu0 %v8867_v1  ;;  %v8904_v45 = vld [vmem:[%s13285_s5 + $0x168] ss:$16 sps:$4 sm:$0xff]   ;;  %v466_v47 = vpack.c.bf16 %v443_v43, %v442_v42  ;;  %v8912_v50 = vld [vmem:[%s13285_s5 + $0x14c] ss:$16 sps:$4 sm:$0xff]   ;;  %v444_v54 = vld [vmem:[%s9231_s22 + $0x90] sm:$0xff] }
  0x4d   : > { %7898 = vmatmul.mubr.msk.bf16.gmra.mxu0 %vm536_vm0, %v509_v37  ;;  %1940 = vmatprep.subr.bf16.mxu1 %v8870_v3  ;;  %v8900_v37 = vld [vmem:[%s13285_s5 + $0x18c] ss:$16 sps:$4 sm:$0xff]   ;;  %v8910_v53 = vld [vmem:[%s13285_s5 + $0x148] ss:$16 sps:$4 sm:$0xff]   ;;  %v467_v57 = vpack.c.bf16 %v445_v55, %v444_v54  ;;  %v494_v58 = vld [vmem:[%s9223_s29 + $0xa0] sm:$0xff] }
  0x4e   : > { %7916 = vmatmul.mubr.msk.bf16.gmra.mxu1 %vm536_vm0, %v461_v38  ;;  %657 = vmatprep.mubr.bf16.mxu0 %v9087_v0  ;;  %v8903_v38 = vld [vmem:[%s13285_s5 + $0x164] ss:$16 sps:$4 sm:$0xff]   ;;  %v495_v59 = vld [vmem:[%s9223_s29 + $0xa8] sm:$0xff]  ;;  %v8913_v62 = vld [vmem:[%s13285_s5 + $0x120] ss:$16 sps:$4 sm:$0xff]  }
  0x4f   : > { %908 = vmatprep.mubr.bf16.mxu1 %v9087_v0  ;;  %1748 = vmatpush1.bf16.msra.mxu0 %v8865_v63  ;;  %v446_v60 = vld [vmem:[%s9231_s22 + $0xa0] sm:$0xff]  ;;  %v447_v61 = vld [vmem:[%s9231_s22 + $0xa8] sm:$0xff]  ;;  %v516_v3 = vpack.c.bf16 %v495_v59, %v494_v58  ;;  %v496_v9 = vld [vmem:[%s9223_s29 + $0xb0] sm:$0xff] }
  0x50   : > { %1941 = vmatpush1.bf16.msra.mxu1 %v8868_v2  ;;  %1749 = vmatprep.subr.bf16.mxu0 %v8873_v6  ;;  %v8915_v63 = vld [vmem:[%s13285_s5 + $0x124] ss:$16 sps:$4 sm:$0xff]   ;;  %v8916_v1 = vld [vmem:[%s13285_s5 + $0x128] ss:$16 sps:$4 sm:$0xff]   ;;  %v8918_v2 = vld [vmem:[%s13285_s5 + $0x12c] ss:$16 sps:$4 sm:$0xff]  }
  0x51   : > { %1942 = vmatprep.subr.bf16.mxu1 %v8876_v7  ;;  %v8924_v6 = vld [vmem:[%s13285_s5 + $0x10c] ss:$16 sps:$4 sm:$0xff]   ;;  %v8919_v7 = vld [vmem:[%s13285_s5 + $0x100] ss:$16 sps:$4 sm:$0xff]   ;;  %v8922_v8 = vld [vmem:[%s13285_s5 + $0x108] ss:$16 sps:$4 sm:$0xff]  }
  0x52   : > { %v497_v10 = vld [vmem:[%s9223_s29 + $0xb8] sm:$0xff]  ;;  %v498_v15 = vld [vmem:[%s9223_s29 + $0xc0] sm:$0xff]  ;;  %v452_v23 = vld [vmem:[%s9231_s22 + $0xd0] sm:$0xff] }
  0x53   : > { %1750 = vmatpush1.bf16.msra.mxu0 %v8871_v11  ;;  %v448_v11 = vld [vmem:[%s9231_s22 + $0xb0] sm:$0xff]  ;;  %v501_v22 = vld [vmem:[%s9223_s29 + $0xd8] sm:$0xff]  ;;  %v454_v29 = vld [vmem:[%s9231_s22 + $0xe0] sm:$0xff] }
  0x54   : > { %1943 = vmatpush1.bf16.msra.mxu1 %v8874_v12  ;;  %1751 = vmatprep.subr.bf16.mxu0 %v8879_v13  ;;  %v449_v12 = vld [vmem:[%s9231_s22 + $0xb8] sm:$0xff]  ;;  %v517_v13 = vpack.c.bf16 %v497_v10, %v496_v9  ;;  %v9562_v40 = vld [vmem:[#allocation2 + $0x1e0] sm:$0xff] }
  0x55   : > { %7899 = vmatmul.mubr.msk.bf16.gmra.mxu0 %vm536_vm0, %v510_v51  ;;  %1944 = vmatprep.subr.bf16.mxu1 %v8882_v14  ;;  %v492_v51 = vld [vmem:[%s9223_s29 + $0x90] sm:$0xff]  ;;  %v469_v14 = vpack.c.bf16 %v449_v12, %v448_v11  ;;  %v453_v24 = vld [vmem:[%s9231_s22 + $0xd8] sm:$0xff]  ;;  %v9566_v42 = vld [vmem:[#allocation2 + $0x5c0] sm:$0xff] }
  0x56   : > { %7917 = vmatmul.mubr.msk.bf16.gmra.mxu1 %vm536_vm0, %v462_v52  ;;  %667 = vmatprep.mubr.bf16.mxu0 %v9087_v0  ;;  %v493_v52 = vld [vmem:[%s9223_s29 + $0x98] sm:$0xff] }
  0x57   : > { %918 = vmatprep.mubr.bf16.mxu1 %v9087_v0  ;;  %1752 = vmatpush2.bf16.msra.mxu0 %v8877_v16  ;;  %v515_v56 = vpack.c.bf16 %v493_v52, %v492_v51  ;;  %v499_v16 = vld [vmem:[%s9223_s29 + $0xc8] sm:$0xff] }
  0x58   : > { %1945 = vmatpush2.bf16.msra.mxu1 %v8880_v17  ;;  %1753 = vmatprep.subr.bf16.mxu0 %v8885_v20  ;;  %v450_v17 = vld [vmem:[%s9231_s22 + $0xc0] sm:$0xff] }
  0x59   : > { %1946 = vmatprep.subr.bf16.mxu1 %v8888_v21  ;;  %v500_v21 = vld [vmem:[%s9223_s29 + $0xd0] sm:$0xff] }
  0x5b   : > { %1754 = vmatpush2.bf16.msra.mxu0 %v8883_v25  ;;  %v519_v25 = vpack.c.bf16 %v501_v22, %v500_v21 }
  0x5c   : > { %1947 = vmatpush2.bf16.msra.mxu1 %v8886_v26  ;;  %1755 = vmatprep.subr.bf16.mxu0 %v8891_v27  ;;  %v471_v26 = vpack.c.bf16 %v453_v24, %v452_v23  ;;  %v502_v27 = vld [vmem:[%s9223_s29 + $0xe0] sm:$0xff] }
  0x5d   : > { %7900 = vmatmul.mubr.msk.bf16.gmra.mxu0 %vm536_vm0, %v511_v4  ;;  %1948 = vmatprep.subr.bf16.mxu1 %v8894_v28  ;;  %v468_v4 = vpack.c.bf16 %v447_v61, %v446_v60  ;;  %v503_v28 = vld [vmem:[%s9223_s29 + $0xe8] sm:$0xff]  ;;  %v9598_v23 = vld [vmem:[#allocation2 + $0x1a0] sm:$0xff] }
  0x5e   : > { %7918 = vmatmul.mubr.msk.bf16.gmra.mxu1 %vm536_vm0, %v463_v5  ;;  %677 = vmatprep.mubr.bf16.mxu0 %v9087_v0  ;;  %v8921_v5 = vld [vmem:[%s13285_s5 + $0x104] ss:$16 sps:$4 sm:$0xff]  }
  0x5f   : > { %928 = vmatprep.mubr.bf16.mxu1 %v9087_v0  ;;  %1756 = vmatpush2.bf16.msra.mxu0 %v8889_v30  ;;  %v455_v30 = vld [vmem:[%s9231_s22 + $0xe8] sm:$0xff]  ;;  %v9600_v24 = vld [vmem:[#allocation2 + $0x580] sm:$0xff] }
  0x60   : > { %1949 = vmatpush2.bf16.msra.mxu1 %v8892_v31  ;;  %1757 = vmatprep.subr.bf16.mxu0 %v8897_v34  ;;  %v520_v31 = vpack.c.bf16 %v503_v28, %v502_v27  ;;  %v505_v34 = vld [vmem:[%s9223_s29 + $0xf8] sm:$0xff] }
  0x61   : > { %1950 = vmatprep.subr.bf16.mxu1 %v8900_v37 }
  0x63   : > { %1758 = vmatpush2.bf16.msra.mxu0 %v8895_v35  ;;  %v456_v35 = vld [vmem:[%s9231_s22 + $0xf0] sm:$0xff] }
  0x64   : > { %1951 = vmatpush2.bf16.msra.mxu1 %v8898_v36  ;;  %1759 = vmatprep.subr.bf16.mxu0 %v8903_v38  ;;  %v457_v36 = vld [vmem:[%s9231_s22 + $0xf8] sm:$0xff] }
  0x65   : > { %7901 = vmatmul.mubr.msk.bf16.gmra.mxu0 %vm536_vm0, %v512_v18  ;;  %1952 = vmatprep.subr.bf16.mxu1 %v8906_v39  ;;  %v451_v18 = vld [vmem:[%s9231_s22 + $0xc8] sm:$0xff]  ;;  %v473_v38 = vpack.c.bf16 %v457_v36, %v456_v35  ;;  %v9560_v39 = vld [vmem:[#allocation2 + $0x1c0] sm:$0xff] }
  0x66   : > { %7919 = vmatmul.mubr.msk.bf16.gmra.mxu1 %vm536_vm0, %v464_v19  ;;  %687 = vmatprep.mubr.bf16.mxu0 %v9087_v0  ;;  %v518_v19 = vpack.c.bf16 %v499_v16, %v498_v15  ;;  %v470_v20 = vpack.c.bf16 %v451_v18, %v450_v17  ;;  %v8050_v41 = vcombine.high %v9560_v39, %v9562_v40  ;;  %v9593_v17 = vld [vmem:[#allocation2 + $0x180] sm:$0xff] }
  0x67   : > { %938 = vmatprep.mubr.bf16.mxu1 %v9087_v0  ;;  %1760 = vmatpush2.bf16.msra.mxu0 %v8901_v44  ;;  %v1031_v44 = vlaneseq }
  0x68   : > { %1953 = vmatpush2.bf16.msra.mxu1 %v8904_v45  ;;  %1761 = vmatprep.subr.bf16.mxu0 %v8909_v48 }
  0x69   : > { %1954 = vmatprep.subr.bf16.mxu1 %v8912_v50  ;;  %v9572_v45 = vshrl.u32 %v1031_v44, 7  ;;  %v1029_v50 = vld [vmem:[%s13284_s4] sm:$0x3] }
  0x6b   : > { %1762 = vmatpush2.bf16.msra.mxu0 %v8907_v49  ;;  %13596 = vst [vmem:[#allocation9_spill] sm:$0xff] %v9572_v45 }
  0x6c   : > { %1955 = vmatpush2.bf16.msra.mxu1 %v8910_v53  ;;  %1763 = vmatprep.subr.bf16.mxu0 %v8915_v63 }
  0x6d   : > { %7902 = vmatmul.mubr.msk.bf16.gmra.mxu0 %vm536_vm0, %v513_v32  ;;  %1956 = vmatprep.subr.bf16.mxu1 %v8918_v2  ;;  %v472_v32 = vpack.c.bf16 %v455_v30, %v454_v29  ;;  %v8049_v29 = vcombine.low %v9560_v39, %v9562_v40  ;;  %v9618_v39 = vld [vmem:[#allocation2 + $0x160] sm:$0xff] }
  0x6e   : > { %7920 = vmatmul.mubr.msk.bf16.gmra.mxu1 %vm536_vm0, %v465_v33  ;;  %697 = vmatprep.mubr.bf16.mxu0 %v9087_v0  ;;  %v504_v33 = vld [vmem:[%s9223_s29 + $0xf0] sm:$0xff] }
  0x6f   : > { %948 = vmatprep.mubr.bf16.mxu1 %v9087_v0  ;;  %1764 = vmatpush2.bf16.msra.mxu0 %v8913_v62  ;;  %v521_v37 = vpack.c.bf16 %v505_v34, %v504_v33 }
  0x70   : > { %1957 = vmatpush2.bf16.msra.mxu1 %v8916_v1  ;;  %1765 = vmatprep.subr.bf16.mxu0 %v8921_v5 }
  0x71   : > { %1958 = vmatprep.subr.bf16.mxu1 %v8924_v6 }
  0x73   : > { %1766 = vmatpush2.bf16.msra.mxu0 %v8919_v7 }
  0x74   : > { %1959 = vmatpush2.bf16.msra.mxu1 %v8922_v8  ;;  %4147 = vmatprep.subr.bf16.mxu0 %v8050_v41 }
  0x75   : > { %7903 = vmatmul.mubr.msk.bf16.gmra.mxu0 %vm536_vm0, %v514_v46  ;;  %v9575_v46 = vsub.s32 0, %v9572_v45 }
  0x76   : > { %7921 = vmatmul.mubr.msk.bf16.gmra.mxu1 %vm536_vm0, %v466_v47  ;;  %707 = vmatprep.mubr.bf16.mxu0 %v9087_v0  ;;  %v9578_v47 = vsub.s32 1, %v9572_v45 }
  0x77   : > { %958 = vmatprep.mubr.bf16.mxu1 %v9087_v0  ;;  %13597 = vst [vmem:[#allocation10_spill] sm:$0xff] %v9575_v46  ;;  %v9584_v54 = vrot.slane %v1029_v50, %v9575_v46 }
  0x78   : > { %13598 = vst [vmem:[#allocation11_spill] sm:$0xff] %v9578_v47 }
  0x7d   : > { %7904 = vmatmul.mubr.msk.bf16.gmra.mxu0 %vm536_vm0, %v515_v56  ;;  %v9587_v56 = vrot.slane %v1029_v50, %v9578_v47  ;;  %v9625_v50 = vld [vmem:[#allocation2 + $0x540] sm:$0xff] }
  0x7e   : > { %7922 = vmatmul.mubr.msk.bf16.gmra.mxu1 %vm536_vm0, %v467_v57  ;;  %717 = vmatprep.mubr.bf16.mxu0 %v9087_v0 }
  0x7f   : > { %968 = vmatprep.mubr.bf16.mxu1 %v9087_v0 }
  0x85   : > { %7905 = vmatmul.mubr.msk.bf16.gmra.mxu0 %vm536_vm0, %v516_v3 }
  0x86   : > { %7923 = vmatmul.mubr.msk.bf16.gmra.mxu1 %vm536_vm0, %v468_v4  ;;  %727 = vmatprep.mubr.bf16.mxu0 %v9087_v0 }
  0x87   : > { %978 = vmatprep.mubr.bf16.mxu1 %v9087_v0 }
  0x8d   : > { %7906 = vmatmul.mubr.msk.bf16.gmra.mxu0 %vm536_vm0, %v517_v13 }
  0x8e   : > { %7924 = vmatmul.mubr.msk.bf16.gmra.mxu1 %vm536_vm0, %v469_v14  ;;  %737 = vmatprep.mubr.bf16.mxu0 %v9087_v0 }
  0x8f   : > { %988 = vmatprep.mubr.bf16.mxu1 %v9087_v0 }
  0x95   : > { %7907 = vmatmul.mubr.msk.bf16.gmra.mxu0 %vm536_vm0, %v518_v19 }
  0x96   : > { %7925 = vmatmul.mubr.msk.bf16.gmra.mxu1 %vm536_vm0, %v470_v20  ;;  %747 = vmatprep.mubr.bf16.mxu0 %v9087_v0 }
  0x97   : > { %998 = vmatprep.mubr.bf16.mxu1 %v9087_v0 }
  0x9d   : > { %7908 = vmatmul.mubr.msk.bf16.gmra.mxu0 %vm536_vm0, %v519_v25  ;;  %v9602_v25 = vld [vmem:[#allocation2 + $0x5a0] sm:$0xff] }
  0x9e   : > { %7926 = vmatmul.mubr.msk.bf16.gmra.mxu1 %vm536_vm0, %v471_v26  ;;  %757 = vmatprep.mubr.bf16.mxu0 %v9087_v0  ;;  %v8170_v41 = vcombine.high %v9600_v24, %v9602_v25 }
  0x9f   : > { %1008 = vmatprep.mubr.bf16.mxu1 %v9087_v0 }
  0xa5   : > { %7909 = vmatmul.mubr.msk.bf16.gmra.mxu0 %vm536_vm0, %v520_v31 }
  0xa6   : > { %7927 = vmatmul.mubr.msk.bf16.gmra.mxu1 %vm536_vm0, %v472_v32  ;;  %767 = vmatprep.mubr.bf16.mxu0 %v9087_v0 }
  0xa7   : > { %1018 = vmatprep.mubr.bf16.mxu1 %v9087_v0  ;;  %v9568_v0 = vld [vmem:[#allocation2 + $0x5e0] sm:$0xff] }
  0xa8   : > { %v8178_v43 = vcombine.high %v9566_v42, %v9568_v0  ;;  %v8177_v35 = vcombine.low %v9566_v42, %v9568_v0  ;;  %v8041_v0 = vcombine.low %v9593_v17, %v9598_v23 }
  0xaa   : > { %4340 = vmatprep.subr.bf16.mxu1 %v8178_v43  ;;  %v9616_v43 = vld [vmem:[#allocation2 + $0x140] sm:$0xff] }
  0xad   : > { %7910 = vmatmul.mubr.msk.bf16.gmra.mxu0 %vm536_vm0, %v521_v37 }
  0xae   : > { %7928 = vmatmul.mubr.msk.bf16.gmra.mxu1 %vm536_vm0, %v473_v38  ;;  %v8042_v38 = vcombine.high %v9593_v17, %v9598_v23  ;;  %v9664_v23 = vld [vmem:[#allocation2 + $0xc0] sm:$0xff] }
  0xf5   : > { %v619_v48 = vpop.f32.mrf.mxu0 }
  0xf6   : > { %v870_v49 = vpop.f32.mrf.mxu1 }
  0xf7   : > { %v621_v51 = vpop.f32.mrf.mxu0  ;;  %v871_v53 = vadd.f32 %v870_v49, %v619_v48  ;;  %v8169_v49 = vcombine.low %v9600_v24, %v9602_v25  ;;  %v9666_v24 = vld [vmem:[#allocation2 + $0xe0] sm:$0xff] }
  0xf8   : > { %v872_v52 = vpop.f32.mrf.mxu1 }
  0xf9   : > { %v873_v55 = vadd.f32 %v872_v52, %v621_v51  ;;  %v623_v57 = vpop.f32.mrf.mxu0  ;;  %v1041_v62 = vadd.f32 %v9584_v54, %v871_v53  ;;  %v9627_v51 = vld [vmem:[#allocation2 + $0x560] sm:$0xff] }
  0xfa   : > { %v874_v58 = vpop.f32.mrf.mxu1 }
  0xfb   : > { %v875_v59 = vadd.f32 %v874_v58, %v623_v57  ;;  %v625_v60 = vpop.f32.mrf.mxu0  ;;  %v1042_v63 = vadd.f32 %v9587_v56, %v873_v55  ;;  %v1169_v9 = vmul.f32 0.2, %v1041_v62  ;;  %vm1105_vm4 = vcmp.gt.f32.partialorder %v1041_v62, 0.0 }
  0xfc   : > { %v876_v61 = vpop.f32.mrf.mxu1 }
  0xfd   : > { %v1043_v1 = vadd.f32 %v9584_v54, %v875_v59  ;;  %v877_v2 = vadd.f32 %v876_v61, %v625_v60  ;;  %v629_v3 = vpop.f32.mrf.mxu0  ;;  %v1170_v10 = vmul.f32 0.2, %v1042_v63  ;;  %vm1106_vm2 = vcmp.gt.f32.partialorder %v1042_v63, 0.0  ;;  %v9632_v61 = vld [vmem:[#allocation2 + $0x100] sm:$0xff] }
  0xfe   : > { %v880_v4 = vpop.f32.mrf.mxu1  ;;  %v1233_v30 = vsel %vm1105_vm4, %v1041_v62, %v1169_v9  ;;  %v8033_v60 = vcombine.low %v9616_v43, %v9618_v39  ;;  %v9634_v62 = vld [vmem:[#allocation2 + $0x120] sm:$0xff] }
  0xff   : > { %v1171_v5 = vmul.f32 0.2, %v1043_v1  ;;  %v1044_v6 = vadd.f32 %v9587_v56, %v877_v2  ;;  %v631_v7 = vpop.f32.mrf.mxu0  ;;  %vm1107_vm1 = vcmp.gt.f32.partialorder %v1043_v1, 0.0  ;;  %v881_v13 = vadd.f32 %v880_v4, %v629_v3  ;;  %v9647_v9 = vld [vmem:[#allocation2 + $0x500] sm:$0xff] }
 0x100   : > { %v882_v8 = vpop.f32.mrf.mxu1  ;;  %v1234_v28 = vsel %vm1106_vm2, %v1042_v63, %v1170_v10  ;;  %v8162_v2 = vcombine.high %v9625_v50, %v9627_v51  ;;  %v9649_v10 = vld [vmem:[#allocation2 + $0x520] sm:$0xff] }
 0x101   : > { %v883_v11 = vadd.f32 %v882_v8, %v631_v7  ;;  %v1172_v12 = vmul.f32 0.2, %v1044_v6  ;;  %v633_v14 = vpop.f32.mrf.mxu0  ;;  %vm1108_vm3 = vcmp.gt.f32.partialorder %v1044_v6, 0.0  ;;  %v1235_v18 = vsel %vm1107_vm1, %v1043_v1, %v1171_v5 }
 0x102   : > { %v884_v15 = vpop.f32.mrf.mxu1  ;;  %v1045_v31 = vadd.f32 %v9584_v54, %v881_v13  ;;  %v1297_v36 = vpack.c.bf16 %v1235_v18, %v1233_v30  ;;  %v8034_v1 = vcombine.high %v9616_v43, %v9618_v39  ;;  %v8161_v8 = vcombine.low %v9625_v50, %v9627_v51  ;;  %v9681_v43 = vld [vmem:[#allocation2 + $0x80] sm:$0xff] }
 0x103   : > { %v885_v16 = vadd.f32 %v884_v15, %v633_v14  ;;  %v9596_v19 = vadd.f32 %v9587_v56, %v883_v11  ;;  %v635_v20 = vpop.f32.mrf.mxu0  ;;  %v1236_v22 = vsel %vm1108_vm3, %v1044_v6, %v1172_v12  ;;  %v8026_v14 = vcombine.high %v9632_v61, %v9634_v62  ;;  %v9683_v39 = vld [vmem:[#allocation2 + $0xa0] sm:$0xff] }
 0x104   : > { %v886_v21 = vpop.f32.mrf.mxu1  ;;  %v1298_v34 = vpack.c.bf16 %v1236_v22, %v1234_v28  ;;  %v1173_v55 = vmul.f32 0.2, %v1045_v31  ;;  %vm1109_vm8 = vcmp.gt.f32.partialorder %v1045_v31, 0.0  ;;  %v8153_v30 = vcombine.low %v9647_v9, %v9649_v10 }
 0x105   : > { %v1047_v26 = vadd.f32 %v9584_v54, %v885_v16  ;;  %v887_v27 = vadd.f32 %v886_v21, %v635_v20  ;;  %v639_v32 = vpop.f32.mrf.mxu0  ;;  %v1174_v40 = vmul.f32 0.2, %v9596_v19  ;;  %vm1110_vm7 = vcmp.gt.f32.partialorder %v9596_v19, 0.0 }
 0x106   : > { %v890_v33 = vpop.f32.mrf.mxu1  ;;  %1767 = vmatprep.mubr.bf16.mxu0 %v1298_v34  ;;  %1960 = vmatprep.mubr.bf16.mxu1 %v1298_v34  ;;  %v1237_v20 = vsel %vm1109_vm8, %v1045_v31, %v1173_v55  ;;  %v9673_v31 = vld [vmem:[#allocation2 + $0x4c0] sm:$0xff] }
 0x107   : > { %v1048_v37 = vadd.f32 %v9587_v56, %v887_v27  ;;  %v1175_v44 = vmul.f32 0.2, %v1047_v26  ;;  %v641_v48 = vpop.f32.mrf.mxu0  ;;  %vm1111_vm5 = vcmp.gt.f32.partialorder %v1047_v26, 0.0  ;;  %1768 = vmatmul.mubr.bf16.vlgmr.msra.gmra.mxu0 %v1297_v36  ;;  %1961 = vmatmul.mubr.bf16.vlgmr.msra.gmra.mxu1 %v1297_v36  ;;  %v891_v57 = vadd.f32 %v890_v33, %v639_v32  ;;  %v9675_v32 = vld [vmem:[#allocation2 + $0x4e0] sm:$0xff] }
 0x108   : > { %v892_v42 = vpop.f32.mrf.mxu1  ;;  %4148 = vmatpush1.bf16.msra.mxu0 %v8049_v29  ;;  %4341 = vmatpush1.bf16.msra.mxu1 %v8177_v35  ;;  %v1238_v13 = vsel %vm1110_vm7, %v9596_v19, %v1174_v40  ;;  %v8154_v19 = vcombine.high %v9647_v9, %v9649_v10  ;;  %v8025_v29 = vcombine.low %v9632_v61, %v9634_v62  ;;  %v9699_v55 = vld [vmem:[#allocation2 + $0x4a0] sm:$0xff] }
 0x109   : > { %v1176_v52 = vmul.f32 0.2, %v1048_v37  ;;  %v893_v53 = vadd.f32 %v892_v42, %v641_v48  ;;  %vm1112_vm6 = vcmp.gt.f32.partialorder %v1048_v37, 0.0  ;;  %v643_v58 = vpop.f32.mrf.mxu0  ;;  %4149 = vmatprep.subr.bf16.mxu0 %v8042_v38  ;;  %4342 = vmatprep.subr.bf16.mxu1 %v8170_v41  ;;  %v1239_v7 = vsel %vm1111_vm5, %v1047_v26, %v1175_v44 }
 0x10a   : > { %v894_v59 = vpop.f32.mrf.mxu1  ;;  %v9658_v15 = vadd.f32 %v9584_v54, %v891_v57  ;;  %v1299_v22 = vpack.c.bf16 %v1239_v7, %v1237_v20  ;;  %v8017_v41 = vcombine.low %v9664_v23, %v9666_v24  ;;  %v8018_v44 = vcombine.high %v9664_v23, %v9666_v24  ;;  %v9718_v7 = vld [vmem:[#allocation2 + $0x60] sm:$0xff] }
 0x10b   : > { %v895_v63 = vadd.f32 %v894_v59, %v643_v58  ;;  %v9641_v3 = vadd.f32 %v9587_v56, %v893_v53  ;;  %v645_v4 = vpop.f32.mrf.mxu0  ;;  %v1240_v6 = vsel %vm1112_vm6, %v1048_v37, %v1176_v52  ;;  %v8146_v48 = vcombine.high %v9673_v31, %v9675_v32  ;;  %v9697_v53 = vld [vmem:[#allocation2 + $0x480] sm:$0xff] }
 0x10c   : > { %v896_v5 = vpop.f32.mrf.mxu1  ;;  %v1300_v18 = vpack.c.bf16 %v1240_v6, %v1238_v13  ;;  %4150 = vmatpush1.bf16.msra.mxu0 %v8041_v0  ;;  %4343 = vmatpush1.bf16.msra.mxu1 %v8169_v49  ;;  %v1177_v35 = vmul.f32 0.2, %v9658_v15  ;;  %vm1113_vm12 = vcmp.gt.f32.partialorder %v9658_v15, 0.0  ;;  %v8145_v52 = vcombine.low %v9673_v31, %v9675_v32  ;;  %v9716_v6 = vld [vmem:[#allocation2 + $0x40] sm:$0xff] }
 0x10d   : > { %v1051_v11 = vadd.f32 %v9584_v54, %v895_v63  ;;  %v897_v12 = vadd.f32 %v896_v5, %v645_v4  ;;  %v649_v16 = vpop.f32.mrf.mxu0  ;;  %4151 = vmatprep.subr.bf16.mxu0 %v8034_v1  ;;  %4344 = vmatprep.subr.bf16.mxu1 %v8162_v2  ;;  %v1178_v25 = vmul.f32 0.2, %v9641_v3  ;;  %vm1114_vm11 = vcmp.gt.f32.partialorder %v9641_v3, 0.0  ;;  %v9733_v23 = vld [vmem:[#allocation2] sm:$0xff] }
 0x10e   : > { %v900_v17 = vpop.f32.mrf.mxu1  ;;  %1777 = vmatprep.mubr.bf16.mxu0 %v1300_v18  ;;  %1970 = vmatprep.mubr.bf16.mxu1 %v1300_v18  ;;  %v1241_v2 = vsel %vm1113_vm12, %v9658_v15, %v1177_v35  ;;  %v8137_v13 = vcombine.low %v9697_v53, %v9699_v55  ;;  %v9727_v15 = vld [vmem:[#allocation2 + $0x460] sm:$0xff] }
 0x10f   : > { %v1052_v21 = vadd.f32 %v9587_v56, %v897_v12  ;;  %v1179_v26 = vmul.f32 0.2, %v1051_v11  ;;  %v651_v27 = vpop.f32.mrf.mxu0  ;;  %vm1115_vm9 = vcmp.gt.f32.partialorder %v1051_v11, 0.0  ;;  %1778 = vmatmul.mubr.bf16.gmra.mxu0 %v1299_v22  ;;  %1971 = vmatmul.mubr.bf16.gmra.mxu1 %v1299_v22  ;;  %v901_v36 = vadd.f32 %v900_v17, %v649_v16  ;;  %v9735_v24 = vld [vmem:[#allocation2 + $0x20] sm:$0xff] }
 0x110   : > { %v902_v28 = vpop.f32.mrf.mxu1  ;;  %4152 = vmatpush1.bf16.msra.mxu0 %v8033_v60  ;;  %4345 = vmatpush1.bf16.msra.mxu1 %v8161_v8  ;;  %v1242_v59 = vsel %vm1114_vm11, %v9641_v3, %v1178_v25  ;;  %v8010_v60 = vcombine.high %v9681_v43, %v9683_v39  ;;  %v8138_v3 = vcombine.high %v9697_v53, %v9699_v55  ;;  %v9751_v35 = vld [vmem:[#allocation2 + $0x420] sm:$0xff] }
 0x111   : > { %v1180_v33 = vmul.f32 0.2, %v1052_v21  ;;  %v903_v34 = vadd.f32 %v902_v28, %v651_v27  ;;  %vm1116_vm10 = vcmp.gt.f32.partialorder %v1052_v21, 0.0  ;;  %v653_v37 = vpop.f32.mrf.mxu0  ;;  %4153 = vmatprep.subr.bf16.mxu0 %v8026_v14  ;;  %4346 = vmatprep.subr.bf16.mxu1 %v8154_v19  ;;  %v1243_v51 = vsel %vm1115_vm9, %v1051_v11, %v1179_v26  ;;  %v9725_v14 = vld [vmem:[#allocation2 + $0x440] sm:$0xff] }
 0x112   : > { %v904_v38 = vpop.f32.mrf.mxu1  ;;  %v9708_v61 = vadd.f32 %v9584_v54, %v901_v36  ;;  %v1301_v5 = vpack.c.bf16 %v1243_v51, %v1241_v2  ;;  %v8009_v12 = vcombine.low %v9681_v43, %v9683_v39  ;;  %v8001_v19 = vcombine.low %v9716_v6, %v9718_v7  ;;  %v9770_v51 = vld [vmem:[#allocation2 + $0x3e0] sm:$0xff] }
 0x113   : > { %v905_v40 = vadd.f32 %v904_v38, %v653_v37  ;;  %v9691_v42 = vadd.f32 %v9587_v56, %v903_v34  ;;  %v655_v0 = vpop.f32.mrf.mxu0  ;;  %v1244_v50 = vsel %vm1116_vm10, %v1052_v21, %v1180_v33  ;;  %v8002_v26 = vcombine.high %v9716_v6, %v9718_v7  ;;  %v9749_v34 = vld [vmem:[#allocation2 + $0x400] sm:$0xff] }
 0x114   : > { %v906_v49 = vpop.f32.mrf.mxu1  ;;  %v1302_v1 = vpack.c.bf16 %v1244_v50, %v1242_v59  ;;  %4154 = vmatpush1.bf16.msra.mxu0 %v8025_v29  ;;  %4347 = vmatpush1.bf16.msra.mxu1 %v8153_v30  ;;  %v1181_v18 = vmul.f32 0.2, %v9708_v61  ;;  %vm1117_vm0 = vcmp.gt.f32.partialorder %v9708_v61, 0.0  ;;  %v8130_v27 = vcombine.high %v9725_v14, %v9727_v15  ;;  %v9768_v50 = vld [vmem:[#allocation2 + $0x3c0] sm:$0xff] }
 0x115   : > { %v1055_v57 = vadd.f32 %v9584_v54, %v905_v40  ;;  %v907_v58 = vadd.f32 %v906_v49, %v655_v0  ;;  %v659_v62 = vpop.f32.mrf.mxu0  ;;  %4155 = vmatprep.subr.bf16.mxu0 %v8018_v44  ;;  %4348 = vmatprep.subr.bf16.mxu1 %v8146_v48  ;;  %v1182_v8 = vmul.f32 0.2, %v9691_v42  ;;  %vm1118_vm15 = vcmp.gt.f32.partialorder %v9691_v42, 0.0  ;;  %v9785_v6 = vld [vmem:[#allocation2 + $0x380] sm:$0xff] }
 0x116   : > { %v910_v63 = vpop.f32.mrf.mxu1  ;;  %1787 = vmatprep.mubr.bf16.mxu0 %v1302_v1  ;;  %1980 = vmatprep.mubr.bf16.mxu1 %v1302_v1  ;;  %v8129_v33 = vcombine.low %v9725_v14, %v9727_v15  ;;  %v1245_v48 = vsel %vm1117_vm0, %v9708_v61, %v1181_v18  ;;  %v8121_v59 = vcombine.low %v9749_v34, %v9751_v35  ;;  %v9779_v61 = vld [vmem:[#allocation2 + $0x7e0] sm:$0xff] }
 0x117   : > { %v1056_v4 = vadd.f32 %v9587_v56, %v907_v58  ;;  %v1183_v9 = vmul.f32 0.2, %v1055_v57  ;;  %v661_v10 = vpop.f32.mrf.mxu0  ;;  %vm1119_vm13 = vcmp.gt.f32.partialorder %v1055_v57, 0.0  ;;  %1788 = vmatmul.mubr.bf16.gmra.mxu0 %v1301_v5  ;;  %1981 = vmatmul.mubr.bf16.gmra.mxu1 %v1301_v5  ;;  %v911_v20 = vadd.f32 %v910_v63, %v659_v62  ;;  %v9787_v7 = vld [vmem:[#allocation2 + $0x3a0] sm:$0xff] }
 0x118   : > { %v912_v11 = vpop.f32.mrf.mxu1  ;;  %4156 = vmatpush1.bf16.msra.mxu0 %v8017_v41  ;;  %4349 = vmatpush1.bf16.msra.mxu1 %v8145_v52  ;;  %v1246_v38 = vsel %vm1118_vm15, %v9691_v42, %v1182_v8  ;;  %v7994_v41 = vcombine.high %v9733_v23, %v9735_v24  ;;  %v8122_v42 = vcombine.high %v9749_v34, %v9751_v35  ;;  %v9803_v18 = vld [vmem:[#allocation2 + $0x7a0] sm:$0xff] }
 0x119   : > { %v1184_v16 = vmul.f32 0.2, %v1056_v4  ;;  %v913_v17 = vadd.f32 %v912_v11, %v661_v10  ;;  %vm1120_vm14 = vcmp.gt.f32.partialorder %v1056_v4, 0.0  ;;  %v663_v21 = vpop.f32.mrf.mxu0  ;;  %4157 = vmatprep.subr.bf16.mxu0 %v8010_v60  ;;  %4350 = vmatprep.subr.bf16.mxu1 %v8138_v3  ;;  %v1247_v32 = vsel %vm1119_vm13, %v1055_v57, %v1183_v9  ;;  %v9777_v60 = vld [vmem:[#allocation2 + $0x7c0] sm:$0xff] }
 0x11a   : > { %v914_v22 = vpop.f32.mrf.mxu1  ;;  %v9760_v43 = vadd.f32 %v9584_v54, %v911_v20  ;;  %v1303_v49 = vpack.c.bf16 %v1247_v32, %v1245_v48  ;;  %v7993_v58 = vcombine.low %v9733_v23, %v9735_v24  ;;  %v8113_v3 = vcombine.low %v9768_v50, %v9770_v51  ;;  %v9822_v32 = vld [vmem:[#allocation2 + $0x360] sm:$0xff] }
 0x11b   : > { %v915_v25 = vadd.f32 %v914_v22, %v663_v21  ;;  %v9743_v28 = vadd.f32 %v9587_v56, %v913_v17  ;;  %v665_v29 = vpop.f32.mrf.mxu0  ;;  %v1248_v31 = vsel %vm1120_vm14, %v1056_v4, %v1184_v16  ;;  %v8114_v9 = vcombine.high %v9768_v50, %v9770_v51  ;;  %v9801_v17 = vld [vmem:[#allocation2 + $0x780] sm:$0xff] }
 0x11c   : > { %v916_v30 = vpop.f32.mrf.mxu1  ;;  %v1304_v44 = vpack.c.bf16 %v1248_v31, %v1246_v38  ;;  %4158 = vmatpush1.bf16.msra.mxu0 %v8009_v12  ;;  %4351 = vmatpush1.bf16.msra.mxu1 %v8137_v13  ;;  %v1185_v1 = vmul.f32 0.2, %v9760_v43  ;;  %vm1121_vm4 = vcmp.gt.f32.partialorder %v9760_v43, 0.0  ;;  %v8242_v10 = vcombine.high %v9777_v60, %v9779_v61  ;;  %v9820_v31 = vld [vmem:[#allocation2 + $0x340] sm:$0xff] }
 0x11d   : > { %v1059_v36 = vadd.f32 %v9584_v54, %v915_v25  ;;  %v917_v37 = vadd.f32 %v916_v30, %v665_v29  ;;  %v669_v39 = vpop.f32.mrf.mxu0  ;;  %4159 = vmatprep.subr.bf16.mxu0 %v8002_v26  ;;  %4352 = vmatprep.subr.bf16.mxu1 %v8130_v27  ;;  %v1186_v52 = vmul.f32 0.2, %v9743_v28  ;;  %vm1122_vm3 = vcmp.gt.f32.partialorder %v9743_v28, 0.0  ;;  %v9837_v50 = vld [vmem:[#allocation2 + $0x300] sm:$0xff] }
 0x11e   : > { %v920_v40 = vpop.f32.mrf.mxu1  ;;  %1797 = vmatprep.mubr.bf16.mxu0 %v1304_v44  ;;  %1990 = vmatprep.mubr.bf16.mxu1 %v1304_v44  ;;  %v8241_v16 = vcombine.low %v9777_v60, %v9779_v61  ;;  %v1249_v27 = vsel %vm1121_vm4, %v9760_v43, %v1185_v1  ;;  %v8233_v38 = vcombine.low %v9801_v17, %v9803_v18  ;;  %v9831_v43 = vld [vmem:[#allocation2 + $0x760] sm:$0xff] }
 0x11f   : > { %v1060_v0 = vadd.f32 %v9587_v56, %v917_v37  ;;  %v1187_v53 = vmul.f32 0.2, %v1059_v36  ;;  %v671_v55 = vpop.f32.mrf.mxu0  ;;  %vm1123_vm1 = vcmp.gt.f32.partialorder %v1059_v36, 0.0  ;;  %1798 = vmatmul.mubr.bf16.gmra.mxu0 %v1303_v49  ;;  %1991 = vmatmul.mubr.bf16.gmra.mxu1 %v1303_v49  ;;  %v921_v2 = vadd.f32 %v920_v40, %v669_v39  ;;  %v9839_v51 = vld [vmem:[#allocation2 + $0x320] sm:$0xff] }
 0x120   : > { %v922_v57 = vpop.f32.mrf.mxu1  ;;  %4160 = vmatpush1.bf16.msra.mxu0 %v8001_v19  ;;  %4353 = vmatpush1.bf16.msra.mxu1 %v8129_v33  ;;  %v1250_v22 = vsel %vm1122_vm3, %v9743_v28, %v1186_v52  ;;  %v8106_v19 = vcombine.high %v9785_v6, %v9787_v7  ;;  %v8234_v28 = vcombine.high %v9801_v17, %v9803_v18  ;;  %v9855_v1 = vld [vmem:[#allocation2 + $0x720] sm:$0xff] }
 0x121   : > { %v1188_v62 = vmul.f32 0.2, %v1060_v0  ;;  %v923_v63 = vadd.f32 %v922_v57, %v671_v55  ;;  %vm1124_vm2 = vcmp.gt.f32.partialorder %v1060_v0, 0.0  ;;  %v673_v4 = vpop.f32.mrf.mxu0  ;;  %4161 = vmatprep.subr.bf16.mxu0 %v7994_v41  ;;  %4354 = vmatprep.subr.bf16.mxu1 %v8122_v42  ;;  %v1251_v15 = vsel %vm1123_vm1, %v1059_v36, %v1187_v53  ;;  %v9829_v41 = vld [vmem:[#allocation2 + $0x740] sm:$0xff] }
 0x122   : > { %v924_v5 = vpop.f32.mrf.mxu1  ;;  %v9812_v23 = vadd.f32 %v9584_v54, %v921_v2  ;;  %v1305_v30 = vpack.c.bf16 %v1251_v15, %v1249_v27  ;;  %v8105_v37 = vcombine.low %v9785_v6, %v9787_v7  ;;  %v8097_v42 = vcombine.low %v9820_v31, %v9822_v32  ;;  %v9874_v15 = vld [vmem:[#allocation2 + $0x2e0] sm:$0xff] }
 0x123   : > { %v925_v8 = vadd.f32 %v924_v5, %v673_v4  ;;  %v9795_v11 = vadd.f32 %v9587_v56, %v923_v63  ;;  %v675_v12 = vpop.f32.mrf.mxu0  ;;  %v1252_v14 = vsel %vm1124_vm2, %v1060_v0, %v1188_v62  ;;  %v8098_v53 = vcombine.high %v9820_v31, %v9822_v32  ;;  %v9853_v63 = vld [vmem:[#allocation2 + $0x700] sm:$0xff] }
 0x124   : > { %v926_v13 = vpop.f32.mrf.mxu1  ;;  %v1306_v26 = vpack.c.bf16 %v1252_v14, %v1250_v22  ;;  %4162 = vmatpush1.bf16.msra.mxu0 %v7993_v58  ;;  %4355 = vmatpush1.bf16.msra.mxu1 %v8121_v59  ;;  %v1189_v44 = vmul.f32 0.2, %v9812_v23  ;;  %vm1125_vm8 = vcmp.gt.f32.partialorder %v9812_v23, 0.0  ;;  %v8226_v55 = vcombine.high %v9829_v41, %v9831_v43  ;;  %v9872_v14 = vld [vmem:[#allocation2 + $0x2c0] sm:$0xff] }
 0x125   : > { %v1063_v20 = vadd.f32 %v9584_v54, %v925_v8  ;;  %v927_v21 = vadd.f32 %v926_v13, %v675_v12  ;;  %v679_v24 = vpop.f32.mrf.mxu0  ;;  %4163 = vmatprep.subr.bf16.mxu0 %v8114_v9  ;;  %4356 = vmatprep.subr.bf16.mxu1 %v8242_v10  ;;  %v1190_v33 = vmul.f32 0.2, %v9795_v11  ;;  %vm1126_vm7 = vcmp.gt.f32.partialorder %v9795_v11, 0.0  ;;  %v9889_v31 = vld [vmem:[#allocation2 + $0x280] sm:$0xff] }
 0x126   : > { %v930_v25 = vpop.f32.mrf.mxu1  ;;  %1807 = vmatprep.mubr.bf16.mxu0 %v1306_v26  ;;  %2000 = vmatprep.mubr.bf16.mxu1 %v1306_v26  ;;  %v8225_v62 = vcombine.low %v9829_v41, %v9831_v43  ;;  %v1253_v10 = vsel %vm1125_vm8, %v9812_v23, %v1189_v44  ;;  %v8217_v22 = vcombine.low %v9853_v63, %v9855_v1  ;;  %v9883_v23 = vld [vmem:[#allocation2 + $0x6e0] sm:$0xff] }
 0x127   : > { %v1064_v29 = vadd.f32 %v9587_v56, %v927_v21  ;;  %v1191_v34 = vmul.f32 0.2, %v1063_v20  ;;  %v681_v35 = vpop.f32.mrf.mxu0  ;;  %vm1127_vm5 = vcmp.gt.f32.partialorder %v1063_v20, 0.0  ;;  %1808 = vmatmul.mubr.bf16.gmra.mxu0 %v1305_v30  ;;  %2001 = vmatmul.mubr.bf16.gmra.mxu1 %v1305_v30  ;;  %v931_v48 = vadd.f32 %v930_v25, %v679_v24  ;;  %v9891_v32 = vld [vmem:[#allocation2 + $0x2a0] sm:$0xff] }
 0x128   : > { %v932_v36 = vpop.f32.mrf.mxu1  ;;  %4164 = vmatpush2.bf16.msra.mxu0 %v8113_v3  ;;  %4357 = vmatpush2.bf16.msra.mxu1 %v8241_v16  ;;  %v1254_v5 = vsel %vm1126_vm7, %v9795_v11, %v1190_v33  ;;  %v8090_v3 = vcombine.high %v9837_v50, %v9839_v51  ;;  %v8218_v11 = vcombine.high %v9853_v63, %v9855_v1  ;;  %v2781_v44 = vld [vmem:[#allocation2 + $0x6a0] sm:$0xff] }
 0x129   : > { %v1192_v39 = vmul.f32 0.2, %v1064_v29  ;;  %v933_v40 = vadd.f32 %v932_v36, %v681_v35  ;;  %vm1128_vm6 = vcmp.gt.f32.partialorder %v1064_v29, 0.0  ;;  %v683_v0 = vpop.f32.mrf.mxu0  ;;  %4165 = vmatprep.subr.bf16.mxu0 %v8106_v19  ;;  %4358 = vmatprep.subr.bf16.mxu1 %v8234_v28  ;;  %v1255_v61 = vsel %vm1127_vm5, %v1063_v20, %v1191_v34  ;;  %v9881_v19 = vld [vmem:[#allocation2 + $0x6c0] sm:$0xff] }
 0x12a   : > { %v934_v49 = vpop.f32.mrf.mxu1  ;;  %v9864_v6 = vadd.f32 %v9584_v54, %v931_v48  ;;  %v1307_v13 = vpack.c.bf16 %v1255_v61, %v1253_v10  ;;  %v8089_v21 = vcombine.low %v9837_v50, %v9839_v51  ;;  %v8081_v28 = vcombine.low %v9872_v14, %v9874_v15 }
 0x12b   : > { %v935_v52 = vadd.f32 %v934_v49, %v683_v0  ;;  %v9847_v57 = vadd.f32 %v9587_v56, %v933_v40  ;;  %v685_v58 = vpop.f32.mrf.mxu0  ;;  %v1256_v60 = vsel %vm1128_vm6, %v1064_v29, %v1192_v39  ;;  %v8082_v34 = vcombine.high %v9872_v14, %v9874_v15  ;;  %v2777_v40 = vld [vmem:[#allocation2 + $0x680] sm:$0xff] }
 0x12c   : > { %v936_v59 = vpop.f32.mrf.mxu1  ;;  %v1308_v9 = vpack.c.bf16 %v1256_v60, %v1254_v5  ;;  %4166 = vmatpush2.bf16.msra.mxu0 %v8105_v37  ;;  %4359 = vmatpush2.bf16.msra.mxu1 %v8233_v38  ;;  %v1193_v26 = vmul.f32 0.2, %v9864_v6  ;;  %vm1129_vm12 = vcmp.gt.f32.partialorder %v9864_v6, 0.0  ;;  %v8210_v35 = vcombine.high %v9881_v19, %v9883_v23 }
 0x12d   : > { %v1067_v2 = vadd.f32 %v9584_v54, %v935_v52  ;;  %v937_v4 = vadd.f32 %v936_v59, %v685_v58  ;;  %v689_v7 = vpop.f32.mrf.mxu0  ;;  %4167 = vmatprep.subr.bf16.mxu0 %v8098_v53  ;;  %4360 = vmatprep.subr.bf16.mxu1 %v8226_v55  ;;  %v1194_v16 = vmul.f32 0.2, %v9847_v57  ;;  %vm1130_vm11 = vcmp.gt.f32.partialorder %v9847_v57, 0.0 }
 0x12e   : > { %v940_v8 = vpop.f32.mrf.mxu1  ;;  %1817 = vmatprep.mubr.bf16.mxu0 %v1308_v9  ;;  %2010 = vmatprep.mubr.bf16.mxu1 %v1308_v9  ;;  %v8209_v39 = vcombine.low %v9881_v19, %v9883_v23  ;;  %v1257_v55 = vsel %vm1129_vm12, %v9864_v6, %v1193_v26  ;;  %v8073_v1 = vcombine.low %v9889_v31, %v9891_v32 }
 0x12f   : > { %v1068_v12 = vadd.f32 %v9587_v56, %v937_v4  ;;  %v1195_v17 = vmul.f32 0.2, %v1067_v2  ;;  %v691_v18 = vpop.f32.mrf.mxu0  ;;  %vm1131_vm9 = vcmp.gt.f32.partialorder %v1067_v2, 0.0  ;;  %1818 = vmatmul.mubr.bf16.gmra.mxu0 %v1307_v13  ;;  %2011 = vmatmul.mubr.bf16.gmra.mxu1 %v1307_v13  ;;  %v941_v27 = vadd.f32 %v940_v8, %v689_v7  ;;  %v2645_v4 = vld [vmem:[#allocation2 + $0x260] sm:$0xff] }
 0x130   : > { %v942_v20 = vpop.f32.mrf.mxu1  ;;  %4168 = vmatpush2.bf16.msra.mxu0 %v8097_v42  ;;  %4361 = vmatpush2.bf16.msra.mxu1 %v8225_v62  ;;  %v1258_v49 = vsel %vm1130_vm11, %v9847_v57, %v1194_v16  ;;  %v8074_v42 = vcombine.high %v9889_v31, %v9891_v32  ;;  %v8202_v57 = vcombine.high %v2777_v40, %v2781_v44 }
 0x131   : > { %v1196_v24 = vmul.f32 0.2, %v1068_v12  ;;  %v943_v25 = vadd.f32 %v942_v20, %v691_v18  ;;  %vm1132_vm10 = vcmp.gt.f32.partialorder %v1068_v12, 0.0  ;;  %v693_v29 = vpop.f32.mrf.mxu0  ;;  %4169 = vmatprep.subr.bf16.mxu0 %v8090_v3  ;;  %4362 = vmatprep.subr.bf16.mxu1 %v8218_v11  ;;  %v1259_v43 = vsel %vm1131_vm9, %v1067_v2, %v1195_v17  ;;  %v2641_v2 = vld [vmem:[#allocation2 + $0x240] sm:$0xff] }
 0x132   : > { %v944_v30 = vpop.f32.mrf.mxu1  ;;  %v1069_v50 = vadd.f32 %v9584_v54, %v941_v27  ;;  %v1309_v59 = vpack.c.bf16 %v1259_v43, %v1257_v55  ;;  %v8201_v10 = vcombine.low %v2777_v40, %v2781_v44  ;;  %v8066_v13 = vcombine.high %v2641_v2, %v2645_v4 }
 0x133   : > { %v945_v33 = vadd.f32 %v944_v30, %v693_v29  ;;  %v1070_v36 = vadd.f32 %v9587_v56, %v943_v25  ;;  %v695_v37 = vpop.f32.mrf.mxu0  ;;  %v1260_v41 = vsel %vm1132_vm10, %v1068_v12, %v1196_v24 }
 0x134   : > { %v946_v38 = vpop.f32.mrf.mxu1  ;;  %v1310_v53 = vpack.c.bf16 %v1260_v41, %v1258_v49  ;;  %4170 = vmatpush2.bf16.msra.mxu0 %v8089_v21  ;;  %4363 = vmatpush2.bf16.msra.mxu1 %v8217_v22  ;;  %v1197_v6 = vmul.f32 0.2, %v1069_v50  ;;  %vm1133_vm0 = vcmp.gt.f32.partialorder %v1069_v50, 0.0  ;;  %v8065_v22 = vcombine.low %v2641_v2, %v2645_v4 }
 0x135   : > { %v1071_v48 = vadd.f32 %v9584_v54, %v945_v33  ;;  %v947_v0 = vadd.f32 %v946_v38, %v695_v37  ;;  %v699_v51 = vpop.f32.mrf.mxu0  ;;  %4171 = vmatprep.subr.bf16.mxu0 %v8082_v34  ;;  %4364 = vmatprep.subr.bf16.mxu1 %v8210_v35  ;;  %v1198_v60 = vmul.f32 0.2, %v1070_v36  ;;  %vm1134_vm15 = vcmp.gt.f32.partialorder %v1070_v36, 0.0 }
 0x136   : > { %v950_v52 = vpop.f32.mrf.mxu1  ;;  %1827 = vmatprep.mubr.bf16.mxu0 %v1310_v53  ;;  %2020 = vmatprep.mubr.bf16.mxu1 %v1310_v53  ;;  %v1261_v26 = vsel %vm1133_vm0, %v1069_v50, %v1197_v6 }
 0x137   : > { %v1072_v58 = vadd.f32 %v9587_v56, %v947_v0  ;;  %v1199_v61 = vmul.f32 0.2, %v1071_v48  ;;  %v701_v62 = vpop.f32.mrf.mxu0  ;;  %vm1135_vm13 = vcmp.gt.f32.partialorder %v1071_v48, 0.0  ;;  %1828 = vmatmul.mubr.bf16.gmra.mxu0 %v1309_v59  ;;  %2021 = vmatmul.mubr.bf16.gmra.mxu1 %v1309_v59  ;;  %v951_v7 = vadd.f32 %v950_v52, %v699_v51 }
 0x138   : > { %v952_v63 = vpop.f32.mrf.mxu1  ;;  %4172 = vmatpush2.bf16.msra.mxu0 %v8081_v28  ;;  %4365 = vmatpush2.bf16.msra.mxu1 %v8209_v39  ;;  %v1262_v21 = vsel %vm1134_vm15, %v1070_v36, %v1198_v60 }
 0x139   : > { %v1200_v5 = vmul.f32 0.2, %v1072_v58  ;;  %v953_v3 = vadd.f32 %v952_v63, %v701_v62  ;;  %vm1136_vm14 = vcmp.gt.f32.partialorder %v1072_v58, 0.0  ;;  %v703_v8 = vpop.f32.mrf.mxu0  ;;  %4173 = vmatprep.subr.bf16.mxu0 %v8074_v42  ;;  %4366 = vmatprep.subr.bf16.mxu1 %v8202_v57  ;;  %v1263_v17 = vsel %vm1135_vm13, %v1071_v48, %v1199_v61 }
 0x13a   : > { %v954_v9 = vpop.f32.mrf.mxu1  ;;  %v1073_v19 = vadd.f32 %v9584_v54, %v951_v7  ;;  %v1311_v29 = vpack.c.bf16 %v1263_v17, %v1261_v26 }
 0x13b   : > { %v955_v12 = vadd.f32 %v954_v9, %v703_v8  ;;  %v1074_v11 = vadd.f32 %v9587_v56, %v953_v3  ;;  %v705_v14 = vpop.f32.mrf.mxu0  ;;  %v1264_v16 = vsel %vm1136_vm14, %v1072_v58, %v1200_v5 }
 0x13c   : > { %v956_v15 = vpop.f32.mrf.mxu1  ;;  %v1312_v25 = vpack.c.bf16 %v1264_v16, %v1262_v21  ;;  %4174 = vmatpush2.bf16.msra.mxu0 %v8073_v1  ;;  %4367 = vmatpush2.bf16.msra.mxu1 %v8201_v10  ;;  %v1201_v35 = vmul.f32 0.2, %v1073_v19  ;;  %vm1137_vm4 = vcmp.gt.f32.partialorder %v1073_v19, 0.0  ;;  %v2773_v16 = vld [vmem:[#allocation2 + $0x660] sm:$0xff] }
 0x13d   : > { %v1075_v18 = vadd.f32 %v9584_v54, %v955_v12  ;;  %v957_v20 = vadd.f32 %v956_v15, %v705_v14  ;;  %v709_v23 = vpop.f32.mrf.mxu0  ;;  %4175 = vmatprep.subr.bf16.mxu0 %v8066_v13  ;;  %v1202_v30 = vmul.f32 0.2, %v1074_v11  ;;  %vm1138_vm3 = vcmp.gt.f32.partialorder %v1074_v11, 0.0  ;;  %v2769_v15 = vld [vmem:[#allocation2 + $0x640] sm:$0xff] }
 0x13e   : > { %v960_v24 = vpop.f32.mrf.mxu1  ;;  %1837 = vmatprep.mubr.bf16.mxu0 %v1312_v25  ;;  %2030 = vmatprep.mubr.bf16.mxu1 %v1312_v25  ;;  %v1265_v55 = vsel %vm1137_vm4, %v1073_v19, %v1201_v35  ;;  %v8194_v19 = vcombine.high %v2769_v15, %v2773_v16  ;;  %v8193_v25 = vcombine.low %v2769_v15, %v2773_v16 }
 0x13f   : > { %v1076_v27 = vadd.f32 %v9587_v56, %v957_v20  ;;  %v1203_v28 = vmul.f32 0.2, %v1075_v18  ;;  %v711_v31 = vpop.f32.mrf.mxu0  ;;  %vm1139_vm1 = vcmp.gt.f32.partialorder %v1075_v18, 0.0  ;;  %1838 = vmatmul.mubr.bf16.gmra.mxu0 %v1311_v29  ;;  %2031 = vmatmul.mubr.bf16.gmra.mxu1 %v1311_v29  ;;  %v961_v36 = vadd.f32 %v960_v24, %v709_v23 }
 0x140   : > { %v962_v32 = vpop.f32.mrf.mxu1  ;;  %4176 = vmatpush2.bf16.msra.mxu0 %v8065_v22  ;;  %v1266_v42 = vsel %vm1138_vm3, %v1074_v11, %v1202_v30  ;;  %4368 = vmatprep.subr.bf16.mxu1 %v8194_v19 }
 0x141   : > { %v1204_v33 = vmul.f32 0.2, %v1076_v27  ;;  %v963_v34 = vadd.f32 %v962_v32, %v711_v31  ;;  %vm1140_vm2 = vcmp.gt.f32.partialorder %v1076_v27, 0.0  ;;  %v713_v37 = vpop.f32.mrf.mxu0  ;;  %v1267_v48 = vsel %vm1139_vm1, %v1075_v18, %v1203_v28  ;;  %4369 = vmatpush2.bf16.msra.mxu1 %v8193_v25 }
 0x142   : > { %v964_v38 = vpop.f32.mrf.mxu1  ;;  %v1077_v50 = vadd.f32 %v9584_v54, %v961_v36  ;;  %v1313_v59 = vpack.c.bf16 %v1267_v48, %v1265_v55 }
 0x143   : > { %v965_v41 = vadd.f32 %v964_v38, %v713_v37  ;;  %v1078_v43 = vadd.f32 %v9587_v56, %v963_v34  ;;  %v715_v39 = vpop.f32.mrf.mxu0  ;;  %v1268_v44 = vsel %vm1140_vm2, %v1076_v27, %v1204_v33  ;;  %v2633_v37 = vld [vmem:[#allocation2 + $0x200] sm:$0xff] }
 0x144   : > { %v966_v40 = vpop.f32.mrf.mxu1  ;;  %v1314_v53 = vpack.c.bf16 %v1268_v44, %v1266_v42  ;;  %v1205_v2 = vmul.f32 0.2, %v1077_v50  ;;  %vm1141_vm8 = vcmp.gt.f32.partialorder %v1077_v50, 0.0  ;;  %v2637_v38 = vld [vmem:[#allocation2 + $0x220] sm:$0xff] }
 0x145   : > { %v1079_v0 = vadd.f32 %v9584_v54, %v965_v41  ;;  %v967_v49 = vadd.f32 %v966_v40, %v715_v39  ;;  %v719_v51 = vpop.f32.mrf.mxu0  ;;  %v1206_v57 = vmul.f32 0.2, %v1078_v43  ;;  %vm1142_vm7 = vcmp.gt.f32.partialorder %v1078_v43, 0.0 }
 0x146   : > { %v970_v52 = vpop.f32.mrf.mxu1  ;;  %1847 = vmatprep.mubr.bf16.mxu0 %v1314_v53  ;;  %2040 = vmatprep.mubr.bf16.mxu1 %v1314_v53  ;;  %v1269_v22 = vsel %vm1141_vm8, %v1077_v50, %v1205_v2  ;;  %v8058_v48 = vcombine.high %v2633_v37, %v2637_v38 }
 0x147   : > { %v1080_v58 = vadd.f32 %v9587_v56, %v967_v49  ;;  %v1207_v60 = vmul.f32 0.2, %v1079_v0  ;;  %v721_v61 = vpop.f32.mrf.mxu0  ;;  %vm1143_vm5 = vcmp.gt.f32.partialorder %v1079_v0, 0.0  ;;  %1848 = vmatmul.mubr.bf16.gmra.mxu0 %v1313_v59  ;;  %2041 = vmatmul.mubr.bf16.gmra.mxu1 %v1313_v59  ;;  %v971_v4 = vadd.f32 %v970_v52, %v719_v51  ;;  %v2765_v49 = vld [vmem:[#allocation2 + $0x620] sm:$0xff] }
 0x148   : > { %v972_v62 = vpop.f32.mrf.mxu1  ;;  %v1270_v14 = vsel %vm1142_vm7, %v1078_v43, %v1206_v57  ;;  %v8057_v57 = vcombine.low %v2633_v37, %v2637_v38  ;;  %4177 = vmatprep.subr.bf16.mxu0 %v8058_v48  ;;  %v9955_v37 = vld [vmem:[#allocation2 + $0x5c8] sm:$0xff] }
 0x149   : > { %v1208_v63 = vmul.f32 0.2, %v1080_v58  ;;  %v973_v1 = vadd.f32 %v972_v62, %v721_v61  ;;  %vm1144_vm6 = vcmp.gt.f32.partialorder %v1080_v58, 0.0  ;;  %v723_v5 = vpop.f32.mrf.mxu0  ;;  %v1271_v12 = vsel %vm1143_vm5, %v1079_v0, %v1207_v60  ;;  %v2761_v0 = vld [vmem:[#allocation2 + $0x600] sm:$0xff]  ;;  %v9957_v38 = vld [vmem:[#allocation2 + $0x5e8] sm:$0xff] }
 0x14a   : > { %v974_v3 = vpop.f32.mrf.mxu1  ;;  %v1081_v17 = vadd.f32 %v9584_v54, %v971_v4  ;;  %v1315_v24 = vpack.c.bf16 %v1271_v12, %v1269_v22  ;;  %4178 = vmatpush2.bf16.msra.mxu0 %v8057_v57 }
 0x14b   : > { %v975_v6 = vadd.f32 %v974_v3, %v723_v5  ;;  %v1082_v7 = vadd.f32 %v9587_v56, %v973_v1  ;;  %v725_v8 = vpop.f32.mrf.mxu0  ;;  %v1272_v10 = vsel %vm1144_vm6, %v1080_v58, %v1208_v63  ;;  %v8185_v63 = vcombine.low %v2761_v0, %v2765_v49 }
 0x14c   : > { %v976_v9 = vpop.f32.mrf.mxu1  ;;  %v1316_v21 = vpack.c.bf16 %v1272_v10, %v1270_v14  ;;  %v1209_v32 = vmul.f32 0.2, %v1081_v17  ;;  %vm1145_vm12 = vcmp.gt.f32.partialorder %v1081_v17, 0.0  ;;  %v8186_v3 = vcombine.high %v2761_v0, %v2765_v49 }
 0x14d   : > { %v1083_v13 = vadd.f32 %v9584_v54, %v975_v6  ;;  %v977_v11 = vadd.f32 %v976_v9, %v725_v8  ;;  %v729_v18 = vpop.f32.mrf.mxu0  ;;  %v1210_v26 = vmul.f32 0.2, %v1082_v7  ;;  %vm1146_vm11 = vcmp.gt.f32.partialorder %v1082_v7, 0.0 }
 0x14e   : > { %v980_v20 = vpop.f32.mrf.mxu1  ;;  %1857 = vmatprep.mubr.bf16.mxu0 %v1316_v21  ;;  %2050 = vmatprep.mubr.bf16.mxu1 %v1316_v21  ;;  %v1273_v59 = vsel %vm1145_vm12, %v1081_v17, %v1209_v32 }
 0x14f   : > { %v1084_v23 = vadd.f32 %v9587_v56, %v977_v11  ;;  %v1211_v27 = vmul.f32 0.2, %v1083_v13  ;;  %v731_v29 = vpop.f32.mrf.mxu0  ;;  %vm1147_vm9 = vcmp.gt.f32.partialorder %v1083_v13, 0.0  ;;  %1858 = vmatmul.mubr.bf16.gmra.mxu0 %v1315_v24  ;;  %2051 = vmatmul.mubr.bf16.gmra.mxu1 %v1315_v24  ;;  %v981_v33 = vadd.f32 %v980_v20, %v729_v18 }
 0x150   : > { %v982_v30 = vpop.f32.mrf.mxu1  ;;  %v1274_v51 = vsel %vm1146_vm11, %v1082_v7, %v1210_v26  ;;  %4370 = vmatprep.subr.bf16.mxu1 %v8186_v3 }
 0x151   : > { %v1212_v28 = vmul.f32 0.2, %v1084_v23  ;;  %v983_v31 = vadd.f32 %v982_v30, %v731_v29  ;;  %vm1148_vm10 = vcmp.gt.f32.partialorder %v1084_v23, 0.0  ;;  %v733_v34 = vpop.f32.mrf.mxu0  ;;  %v1275_v44 = vsel %vm1147_vm9, %v1083_v13, %v1211_v27  ;;  %4371 = vmatpush2.bf16.msra.mxu1 %v8185_v63  ;;  %v9946_v27 = vld [vmem:[#allocation2 + $0x1c8] sm:$0xff] }
 0x152   : > { %v984_v35 = vpop.f32.mrf.mxu1  ;;  %v1085_v52 = vadd.f32 %v9584_v54, %v981_v33  ;;  %v1317_v62 = vpack.c.bf16 %v1275_v44, %v1273_v59  ;;  %v9948_v29 = vld [vmem:[#allocation2 + $0x1e8] sm:$0xff] }
 0x153   : > { %v985_v36 = vadd.f32 %v984_v35, %v733_v34  ;;  %v1086_v41 = vadd.f32 %v9587_v56, %v983_v31  ;;  %v735_v43 = vpop.f32.mrf.mxu0  ;;  %v1276_v40 = vsel %vm1148_vm10, %v1084_v23, %v1212_v28  ;;  %v8052_v34 = vcombine.high %v9946_v27, %v9948_v29 }
 0x154   : > { %v986_v39 = vpop.f32.mrf.mxu1  ;;  %v1318_v58 = vpack.c.bf16 %v1276_v40, %v1274_v51  ;;  %v1213_v8 = vmul.f32 0.2, %v1085_v52  ;;  %vm1149_vm0 = vcmp.gt.f32.partialorder %v1085_v52, 0.0  ;;  %v8180_v51 = vcombine.high %v9955_v37, %v9957_v38 }
 0x155   : > { %v1087_v42 = vadd.f32 %v9584_v54, %v985_v36  ;;  %v987_v50 = vadd.f32 %v986_v39, %v735_v43  ;;  %v739_v53 = vpop.f32.mrf.mxu0  ;;  %v1214_v1 = vmul.f32 0.2, %v1086_v41  ;;  %vm1150_vm15 = vcmp.gt.f32.partialorder %v1086_v41, 0.0  ;;  %4533 = vmatprep.subr.bf16.mxu0 %v8052_v34 }
 0x156   : > { %v990_v55 = vpop.f32.mrf.mxu1  ;;  %1867 = vmatprep.mubr.bf16.mxu0 %v1318_v58  ;;  %2060 = vmatprep.mubr.bf16.mxu1 %v1318_v58  ;;  %v1277_v24 = vsel %vm1149_vm0, %v1085_v52, %v1213_v8 }
 0x157   : > { %v1088_v60 = vadd.f32 %v9587_v56, %v987_v50  ;;  %v991_v61 = vadd.f32 %v990_v55, %v739_v53  ;;  %v1215_v2 = vmul.f32 0.2, %v1087_v42  ;;  %v741_v4 = vpop.f32.mrf.mxu0  ;;  %vm1151_vm13 = vcmp.gt.f32.partialorder %v1087_v42, 0.0  ;;  %1868 = vmatmul.mubr.bf16.gmra.mxu0 %v1317_v62  ;;  %2061 = vmatmul.mubr.bf16.gmra.mxu1 %v1317_v62 }
 0x158   : > { %v992_v5 = vpop.f32.mrf.mxu1  ;;  %v1278_v20 = vsel %vm1150_vm15, %v1086_v41, %v1214_v1  ;;  %4726 = vmatprep.subr.bf16.mxu1 %v8180_v51 }
 0x159   : > { %v1216_v6 = vmul.f32 0.2, %v1088_v60  ;;  %v993_v7 = vadd.f32 %v992_v5, %v741_v4  ;;  %vm1152_vm14 = vcmp.gt.f32.partialorder %v1088_v60, 0.0  ;;  %v743_v9 = vpop.f32.mrf.mxu0  ;;  %v1089_v12 = vadd.f32 %v9584_v54, %v991_v61 }
 0x15a   : > { %v994_v10 = vpop.f32.mrf.mxu1  ;;  %v1279_v16 = vsel %vm1151_vm13, %v1087_v42, %v1215_v2 }
 0x15b   : > { %v995_v13 = vadd.f32 %v994_v10, %v743_v9  ;;  %v745_v11 = vpop.f32.mrf.mxu0  ;;  %v1280_v15 = vsel %vm1152_vm14, %v1088_v60, %v1216_v6  ;;  %v1090_v17 = vadd.f32 %v9587_v56, %v993_v7  ;;  %v1217_v25 = vmul.f32 0.2, %v1089_v12 }
 0x15c   : > { %v996_v14 = vpop.f32.mrf.mxu1  ;;  %v1320_v23 = vpack.c.bf16 %v1280_v15, %v1278_v20  ;;  %v1319_v26 = vpack.c.bf16 %v1279_v16, %v1277_v24  ;;  %vm1153_vm4 = vcmp.gt.f32.partialorder %v1089_v12, 0.0 }
 0x15d   : > { %v1091_v18 = vadd.f32 %v9584_v54, %v995_v13  ;;  %v997_v21 = vadd.f32 %v996_v14, %v745_v11  ;;  %v749_v22 = vpop.f32.mrf.mxu0  ;;  %vm1154_vm1 = vcmp.gt.f32.partialorder %v1090_v17, 0.0  ;;  %v1218_v35 = vmul.f32 0.2, %v1090_v17 }
 0x15e   : > { %v1000_v19 = vpop.f32.mrf.mxu1  ;;  %1877 = vmatprep.mubr.bf16.mxu0 %v1320_v23  ;;  %2070 = vmatprep.mubr.bf16.mxu1 %v1320_v23  ;;  %v1281_v58 = vsel %vm1153_vm4, %v1089_v12, %v1217_v25 }
 0x15f   : > { %v1219_v30 = vmul.f32 0.2, %v1091_v18  ;;  %v1092_v28 = vadd.f32 %v9587_v56, %v997_v21  ;;  %v751_v31 = vpop.f32.mrf.mxu0  ;;  %vm1155_vm2 = vcmp.gt.f32.partialorder %v1091_v18, 0.0  ;;  %1878 = vmatmul.mubr.bf16.gmra.mxu0 %v1319_v26  ;;  %2071 = vmatmul.mubr.bf16.gmra.mxu1 %v1319_v26  ;;  %v1001_v43 = vadd.f32 %v1000_v19, %v749_v22 }
 0x160   : > { %v1002_v32 = vpop.f32.mrf.mxu1  ;;  %v1282_v55 = vsel %vm1154_vm1, %v1090_v17, %v1218_v35 }
 0x161   : > { %v1003_v36 = vadd.f32 %v1002_v32, %v751_v31  ;;  %v1220_v41 = vmul.f32 0.2, %v1092_v28  ;;  %v753_v39 = vpop.f32.mrf.mxu0  ;;  %vm1156_vm3 = vcmp.gt.f32.partialorder %v1092_v28, 0.0  ;;  %v1283_v0 = vsel %vm1155_vm2, %v1091_v18, %v1219_v30 }
 0x162   : > { %v1004_v40 = vpop.f32.mrf.mxu1  ;;  %v1093_v59 = vadd.f32 %v9584_v54, %v1001_v43  ;;  %v1321_v63 = vpack.c.bf16 %v1283_v0, %v1281_v58 }
 0x163   : > { %v1005_v48 = vadd.f32 %v1004_v40, %v753_v39  ;;  %v755_v49 = vpop.f32.mrf.mxu0  ;;  %v1284_v50 = vsel %vm1156_vm3, %v1092_v28, %v1220_v41  ;;  %v1094_v52 = vadd.f32 %v9587_v56, %v1003_v36 }
 0x164   : > { %v1006_v42 = vpop.f32.mrf.mxu1  ;;  %v1322_v62 = vpack.c.bf16 %v1284_v50, %v1282_v55  ;;  %v1221_v8 = vmul.f32 0.2, %v1093_v59  ;;  %vm1157_vm8 = vcmp.gt.f32.partialorder %v1093_v59, 0.0 }
 0x165   : > { %v1095_v53 = vadd.f32 %v9584_v54, %v1005_v48  ;;  %v1007_v57 = vadd.f32 %v1006_v42, %v755_v49  ;;  %v759_v60 = vpop.f32.mrf.mxu0  ;;  %v1222_v3 = vmul.f32 0.2, %v1094_v52  ;;  %vm1158_vm6 = vcmp.gt.f32.partialorder %v1094_v52, 0.0 }
 0x166   : > { %v1010_v61 = vpop.f32.mrf.mxu1  ;;  %1887 = vmatprep.mubr.bf16.mxu0 %v1322_v62  ;;  %2080 = vmatprep.mubr.bf16.mxu1 %v1322_v62  ;;  %v1285_v22 = vsel %vm1157_vm8, %v1093_v59, %v1221_v8  ;;  %v13293_v8 = vsub.s32 2, %v9572_v45 }
 0x167   : > { %v1223_v1 = vmul.f32 0.2, %v1095_v53  ;;  %v1096_v2 = vadd.f32 %v9587_v56, %v1007_v57  ;;  %v761_v4 = vpop.f32.mrf.mxu0  ;;  %vm1159_vm5 = vcmp.gt.f32.partialorder %v1095_v53, 0.0  ;;  %v1011_v6 = vadd.f32 %v1010_v61, %v759_v60  ;;  %1888 = vmatmul.mubr.bf16.gmra.mxu0 %v1321_v63  ;;  %2081 = vmatmul.mubr.bf16.gmra.mxu1 %v1321_v63 }
 0x168   : > { %v1012_v5 = vpop.f32.mrf.mxu1  ;;  %v1286_v21 = vsel %vm1158_vm6, %v1094_v52, %v1222_v3 }
 0x169   : > { %v1013_v7 = vadd.f32 %v1012_v5, %v761_v4  ;;  %v1224_v9 = vmul.f32 0.2, %v1096_v2  ;;  %v763_v10 = vpop.f32.mrf.mxu0  ;;  %vm1160_vm7 = vcmp.gt.f32.partialorder %v1096_v2, 0.0  ;;  %v1287_v11 = vsel %vm1159_vm5, %v1095_v53, %v1223_v1 }
 0x16a   : > { %v1014_v12 = vpop.f32.mrf.mxu1  ;;  %v1097_v17 = vadd.f32 %v9584_v54, %v1011_v6  ;;  %v1323_v26 = vpack.c.bf16 %v1287_v11, %v1285_v22  ;;  %v9987_v11 = vld [vmem:[#allocation2 + $0x5a8] sm:$0xff] }
 0x16b   : > { %v1015_v13 = vadd.f32 %v1014_v12, %v763_v10  ;;  %v765_v14 = vpop.f32.mrf.mxu0  ;;  %v1288_v16 = vsel %vm1160_vm7, %v1096_v2, %v1224_v9  ;;  %v1098_v18 = vadd.f32 %v9587_v56, %v1013_v7  ;;  %v13292_v9 = vsub.s32 3, %v9572_v45  ;;  %v9981_v10 = vld [vmem:[#allocation2 + $0x188] sm:$0xff] }
 0x16c   : > { %v1016_v15 = vpop.f32.mrf.mxu1  ;;  %v1324_v25 = vpack.c.bf16 %v1288_v16, %v1286_v21  ;;  %v1225_v34 = vmul.f32 0.2, %v1097_v17  ;;  %vm1161_vm12 = vcmp.gt.f32.partialorder %v1097_v17, 0.0  ;;  %v9983_v12 = vld [vmem:[#allocation2 + $0x1a8] sm:$0xff] }
 0x16d   : > { %v1099_v20 = vadd.f32 %v9584_v54, %v1015_v13  ;;  %v1017_v19 = vadd.f32 %v1016_v15, %v765_v14  ;;  %v769_v23 = vpop.f32.mrf.mxu0  ;;  %v1226_v35 = vmul.f32 0.2, %v1098_v18  ;;  %vm1162_vm10 = vcmp.gt.f32.partialorder %v1098_v18, 0.0  ;;  %v9985_v13 = vld [vmem:[#allocation2 + $0x588] sm:$0xff] }
 0x16e   : > { %v1020_v24 = vpop.f32.mrf.mxu1  ;;  %1897 = vmatprep.mubr.bf16.mxu0 %v1324_v25  ;;  %2090 = vmatprep.mubr.bf16.mxu1 %v1324_v25  ;;  %v1289_v55 = vsel %vm1161_vm12, %v1097_v17, %v1225_v34  ;;  %v9989_v14 = vld [vmem:[#allocation2 + $0x148] sm:$0xff] }
 0x16f   : > { %v1227_v30 = vmul.f32 0.2, %v1099_v20  ;;  %v1100_v28 = vadd.f32 %v9587_v56, %v1017_v19  ;;  %v771_v31 = vpop.f32.mrf.mxu0  ;;  %vm1163_vm9 = vcmp.gt.f32.partialorder %v1099_v20, 0.0  ;;  %1898 = vmatmul.mubr.bf16.gmra.mxu0 %v1323_v26  ;;  %2091 = vmatmul.mubr.bf16.gmra.mxu1 %v1323_v26  ;;  %v1021_v43 = vadd.f32 %v1020_v24, %v769_v23  ;;  %v9991_v15 = vld [vmem:[#allocation2 + $0x168] sm:$0xff] }
 0x170   : > { %v1022_v32 = vpop.f32.mrf.mxu1  ;;  %v1290_v53 = vsel %vm1162_vm10, %v1098_v18, %v1226_v35  ;;  %v9993_v16 = vld [vmem:[#allocation2 + $0x548] sm:$0xff] }
 0x171   : > { %v1023_v36 = vadd.f32 %v1022_v32, %v771_v31  ;;  %v1228_v41 = vmul.f32 0.2, %v1100_v28  ;;  %v773_v39 = vpop.f32.mrf.mxu0  ;;  %vm1164_vm11 = vcmp.gt.f32.partialorder %v1100_v28, 0.0  ;;  %v1291_v0 = vsel %vm1163_vm9, %v1099_v20, %v1227_v30  ;;  %v9995_v17 = vld [vmem:[#allocation2 + $0x568] sm:$0xff] }
 0x172   : > { %v1024_v40 = vpop.f32.mrf.mxu1  ;;  %v1101_v58 = vadd.f32 %v9584_v54, %v1021_v43  ;;  %v1325_v60 = vpack.c.bf16 %v1291_v0, %v1289_v55  ;;  %v9997_v18 = vld [vmem:[#allocation2 + $0x108] sm:$0xff] }
 0x173   : > { %v1025_v48 = vadd.f32 %v1024_v40, %v773_v39  ;;  %v1102_v49 = vadd.f32 %v9587_v56, %v1023_v36  ;;  %v775_v42 = vpop.f32.mrf.mxu0  ;;  %v1292_v51 = vsel %vm1164_vm11, %v1100_v28, %v1228_v41  ;;  %v9999_v20 = vld [vmem:[#allocation2 + $0x128] sm:$0xff] }
 0x174   : > { %v1026_v50 = vpop.f32.mrf.mxu1  ;;  %v1326_v57 = vpack.c.bf16 %v1292_v51, %v1290_v53  ;;  %v1229_v1 = vmul.f32 0.2, %v1101_v58  ;;  %vm1165_vm0 = vcmp.gt.f32.partialorder %v1101_v58, 0.0  ;;  %v10001_v21 = vld [vmem:[#allocation2 + $0x508] sm:$0xff] }
 0x175   : > { %v1103_v52 = vadd.f32 %v9584_v54, %v1025_v48  ;;  %v1027_v59 = vadd.f32 %v1026_v50, %v775_v42  ;;  %v1230_v61 = vmul.f32 0.2, %v1102_v49  ;;  %vm1166_vm13 = vcmp.gt.f32.partialorder %v1102_v49, 0.0  ;;  %v10003_v22 = vld [vmem:[#allocation2 + $0x528] sm:$0xff] }
 0x176   : > { %1907 = vmatprep.mubr.bf16.mxu0 %v1326_v57  ;;  %2100 = vmatprep.mubr.bf16.mxu1 %v1326_v57  ;;  %v1293_v6 = vsel %vm1165_vm0, %v1101_v58, %v1229_v1  ;;  %v10005_v19 = vld [vmem:[#allocation2 + $0xc8] sm:$0xff] }
 0x177   : > { %v1231_v62 = vmul.f32 0.2, %v1103_v52  ;;  %v1104_v63 = vadd.f32 %v9587_v56, %v1027_v59  ;;  %vm1167_vm14 = vcmp.gt.f32.partialorder %v1103_v52, 0.0  ;;  %1908 = vmatmul.mubr.bf16.gmra.mxu0 %v1325_v60  ;;  %2101 = vmatmul.mubr.bf16.gmra.mxu1 %v1325_v60  ;;  %v1294_v5 = vsel %vm1166_vm13, %v1102_v49, %v1230_v61  ;;  %v1393_v56 = vld [vmem:[%s13286_s6] sm:$0xf]  ;;  %v10007_v23 = vld [vmem:[#allocation2 + $0xe8] sm:$0xff] }
 0x178   : > { %v10009_v24 = vld [vmem:[#allocation2 + $0x4c8] sm:$0xff]  ;;  %v10012_v25 = vrot.slane %v1393_v56, %v9575_v46  ;;  %v10016_v26 = vrot.slane %v1393_v56, %v13293_v8  ;;  %v10019_v30 = vrot.slane %v1393_v56, %v9578_v47  ;;  %v10023_v28 = vrot.slane %v1393_v56, %v13292_v9 }
 0x179   : > { %v1232_v2 = vmul.f32 0.2, %v1104_v63  ;;  %vm1168_vm15 = vcmp.gt.f32.partialorder %v1104_v63, 0.0  ;;  %v1295_v4 = vsel %vm1167_vm14, %v1103_v52, %v1231_v62  ;;  %v10025_v31 = vld [vmem:[#allocation2 + $0x4e8] sm:$0xff] }
 0x17a   : > { %v1327_v7 = vpack.c.bf16 %v1295_v4, %v1293_v6  ;;  %v10027_v32 = vld [vmem:[#allocation2 + $0x88] sm:$0xff] }
 0x17b   : > { %v1296_v54 = vsel %vm1168_vm15, %v1104_v63, %v1232_v2  ;;  %v10029_v34 = vld [vmem:[#allocation2 + $0xa8] sm:$0xff] }
 0x17c   : > { %v1328_v3 = vpack.c.bf16 %v1296_v54, %v1294_v5  ;;  %v10039_v39 = vld [vmem:[#allocation2 + $0x488] sm:$0xff] }
 0x17d   : > { %v10041_v40 = vld [vmem:[#allocation2 + $0x4a8] sm:$0xff] }
 0x17e   : > { %1917 = vmatprep.mubr.bf16.mxu0 %v1328_v3  ;;  %2110 = vmatprep.mubr.bf16.mxu1 %v1328_v3  ;;  %v10043_v48 = vld [vmem:[#allocation2 + $0x48] sm:$0xff] }
 0x17f   : > { %1918 = vmatmul.mubr.bf16.gmra.mxu0 %v1327_v7  ;;  %2111 = vmatmul.mubr.bf16.gmra.mxu1 %v1327_v7  ;;  %v10053_v51 = vld [vmem:[#allocation2 + $0x68] sm:$0xff] }
 0x180   : > { %v10055_v52 = vld [vmem:[#allocation2 + $0x448] sm:$0xff] }
 0x181   : > { %v10057_v53 = vld [vmem:[#allocation2 + $0x468] sm:$0xff] }
 0x182   : > { %v10067_v60 = vld [vmem:[#allocation2 + $0x8] sm:$0xff] }
 0x183   : > { %v10069_v61 = vld [vmem:[#allocation2 + $0x28] sm:$0xff] }
 0x184   : > { %v10071_v62 = vld [vmem:[#allocation2 + $0x408] sm:$0xff] }
 0x185   : > { %v10081_v5 = vld [vmem:[#allocation2 + $0x428] sm:$0xff] }
 0x186   : > { %v10083_v54 = vld [vmem:[#allocation2 + $0x3c8] sm:$0xff] }
 0x187   : > { %13599 = vst [vmem:[#allocation12_spill] sm:$0xff] %v10083_v54  ;;  %v10085_v3 = vld [vmem:[#allocation2 + $0x3e8] sm:$0xff] }
 0x188   : > { %13600 = vst [vmem:[#allocation13_spill] sm:$0xff] %v10085_v3  ;;  %v10095_v8 = vld [vmem:[#allocation2 + $0x7c8] sm:$0xff] }
 0x189   : > { %13601 = vst [vmem:[#allocation14_spill] sm:$0xff] %v10095_v8  ;;  %v10097_v2 = vld [vmem:[#allocation2 + $0x7e8] sm:$0xff] }
 0x18a   : > { %13602 = vst [vmem:[#allocation15_spill] sm:$0xff] %v10097_v2  ;;  %v10099_v63 = vld [vmem:[#allocation2 + $0x388] sm:$0xff] }
 0x18b   : > { %13603 = vst [vmem:[#allocation16_spill] sm:$0xff] %v10099_v63  ;;  %v10109_v1 = vld [vmem:[#allocation2 + $0x3a8] sm:$0xff] }
 0x18c   : > { %13604 = vst [vmem:[#allocation17_spill] sm:$0xff] %v10109_v1  ;;  %v10111_v9 = vld [vmem:[#allocation2 + $0x788] sm:$0xff] }
 0x18d   : > { %13605 = vst [vmem:[#allocation18_spill] sm:$0xff] %v10111_v9  ;;  %v10113_v59 = vld [vmem:[#allocation2 + $0x7a8] sm:$0xff] }
 0x18e   : > { %13606 = vst [vmem:[#allocation19_spill] sm:$0xff] %v10113_v59  ;;  %v10123_v57 = vld [vmem:[#allocation2 + $0x348] sm:$0xff] }
 0x18f   : > { %13607 = vst [vmem:[#allocation20_spill] sm:$0xff] %v10123_v57  ;;  %v10125_v56 = vld [vmem:[#allocation2 + $0x368] sm:$0xff] }
 0x190   : > { %13608 = vst [vmem:[#allocation21_spill] sm:$0xff] %v10125_v56  ;;  %v10127_v58 = vld [vmem:[#allocation2 + $0x748] sm:$0xff] }
 0x191   : > { %13609 = vst [vmem:[#allocation22_spill] sm:$0xff] %v10127_v58  ;;  %v10137_v0 = vld [vmem:[#allocation2 + $0x768] sm:$0xff] }
 0x192   : > { %13610 = vst [vmem:[#allocation23_spill] sm:$0xff] %v10137_v0  ;;  %v10139_v7 = vld [vmem:[#allocation2 + $0x308] sm:$0xff] }
 0x193   : > { %13611 = vst [vmem:[#allocation24_spill] sm:$0xff] %v10139_v7  ;;  %v10141_v50 = vld [vmem:[#allocation2 + $0x328] sm:$0xff] }
 0x194   : > { %13612 = vst [vmem:[#allocation25_spill] sm:$0xff] %v10141_v50  ;;  %v10151_v35 = vld [vmem:[#allocation2 + $0x708] sm:$0xff] }
 0x195   : > { %13613 = vst [vmem:[#allocation26_spill] sm:$0xff] %v10151_v35  ;;  %v10153_v43 = vld [vmem:[#allocation2 + $0x728] sm:$0xff] }
 0x196   : > { %13614 = vst [vmem:[#allocation27_spill] sm:$0xff] %v10153_v43  ;;  %v10171_v42 = vld [vmem:[#allocation2 + $0x2e8] sm:$0xff] }
 0x197   : > { %13616 = vst [vmem:[#allocation29_spill] sm:$0xff] %v10171_v42 }
 0x1c7   : > { %v1769_v49 = vpop.f32.mrf.mxu0  ;;  %v1962_v41 = vpop.f32.mrf.mxu1 }
 0x1c8   : > { %v1770_v36 = vadd.f32 %v1769_v49, %v10012_v25  ;;  %v1963_v44 = vadd.f32 %v1962_v41, %v10016_v26  ;;  %v10169_v49 = vld [vmem:[#allocation2 + $0x2c8] sm:$0xff] }
 0x1c9   : > { %v1771_v33 = vpop.f32.mrf.mxu0  ;;  %v1964_v45 = vpop.f32.mrf.mxu1  ;;  %13615 = vst [vmem:[#allocation28_spill] sm:$0xff] %v10169_v49 }
 0x1ca   : > { %vm2121_vm1 = vcmp.gt.f32.partialorder %v1770_v36, 0.0  ;;  %v2249_v55 = vmul.f32 0.2, %v1770_v36  ;;  %vm2123_vm2 = vcmp.gt.f32.partialorder %v1963_v44, 0.0  ;;  %v2251_v6 = vmul.f32 0.2, %v1963_v44 }
 0x1cb   : > { %v1772_v0 = vadd.f32 %v1771_v33, %v10019_v30  ;;  %v1965_v47 = vadd.f32 %v1964_v45, %v10023_v28  ;;  %v1773_v58 = vpop.f32.mrf.mxu0  ;;  %v1966_v41 = vpop.f32.mrf.mxu1 }
 0x1cc   : > { %v1774_v50 = vadd.f32 %v1773_v58, %v10012_v25  ;;  %v1967_v7 = vadd.f32 %v1966_v41, %v10016_v26  ;;  %v2377_v58 = vsel %vm2121_vm1, %v1770_v36, %v2249_v55  ;;  %v2379_v41 = vsel %vm2123_vm2, %v1963_v44, %v2251_v6 }
 0x1cd   : > { %vm2122_vm3 = vcmp.gt.f32.partialorder %v1772_v0, 0.0  ;;  %v2250_v4 = vmul.f32 0.2, %v1772_v0  ;;  %vm2124_vm4 = vcmp.gt.f32.partialorder %v1965_v47, 0.0  ;;  %v2252_v43 = vmul.f32 0.2, %v1965_v47  ;;  %v1775_v35 = vpop.f32.mrf.mxu0  ;;  %v1968_v33 = vpop.f32.mrf.mxu1 }
 0x1ce   : > { %vm2125_vm5 = vcmp.gt.f32.partialorder %v1774_v50, 0.0  ;;  %v2253_v45 = vmul.f32 0.2, %v1774_v50  ;;  %vm2127_vm6 = vcmp.gt.f32.partialorder %v1967_v7, 0.0  ;;  %v2255_v57 = vmul.f32 0.2, %v1967_v7 }
 0x1cf   : > { %v1776_v59 = vadd.f32 %v1775_v35, %v10019_v30  ;;  %v1969_v56 = vadd.f32 %v1968_v33, %v10023_v28  ;;  %v1779_v9 = vpop.f32.mrf.mxu0  ;;  %v1972_v46 = vpop.f32.mrf.mxu1  ;;  %v2378_v42 = vsel %vm2122_vm3, %v1772_v0, %v2250_v4  ;;  %v2380_v49 = vsel %vm2124_vm4, %v1965_v47, %v2252_v43 }
 0x1d0   : > { %v1780_v1 = vadd.f32 %v1779_v9, %v10012_v25  ;;  %v1973_v63 = vadd.f32 %v1972_v46, %v10016_v26  ;;  %v2381_v2 = vsel %vm2125_vm5, %v1774_v50, %v2253_v45  ;;  %v2383_v8 = vsel %vm2127_vm6, %v1967_v7, %v2255_v57 }
 0x1d1   : > { %vm2126_vm7 = vcmp.gt.f32.partialorder %v1776_v59, 0.0  ;;  %v2254_v3 = vmul.f32 0.2, %v1776_v59  ;;  %v1781_v36 = vpop.f32.mrf.mxu0  ;;  %v1974_v55 = vpop.f32.mrf.mxu1  ;;  %vm2128_vm8 = vcmp.gt.f32.partialorder %v1969_v56, 0.0  ;;  %v2256_v44 = vmul.f32 0.2, %v1969_v56 }
 0x1d2   : > { %vm2129_vm9 = vcmp.gt.f32.partialorder %v1780_v1, 0.0  ;;  %v2257_v35 = vmul.f32 0.2, %v1780_v1  ;;  %vm2131_vm10 = vcmp.gt.f32.partialorder %v1973_v63, 0.0  ;;  %v2259_v33 = vmul.f32 0.2, %v1973_v63 }
 0x1d3   : > { %v2382_v6 = vsel %vm2126_vm7, %v1776_v59, %v2254_v3  ;;  %v1782_v0 = vadd.f32 %v1781_v36, %v10019_v30  ;;  %v1783_v47 = vpop.f32.mrf.mxu0  ;;  %v1976_v43 = vpop.f32.mrf.mxu1  ;;  %v10193_v9 = vpack.c.bf16 %v2381_v2, %v2377_v58  ;;  %v2384_v50 = vsel %vm2128_vm8, %v1969_v56, %v2256_v44 }
 0x1d4   : > { %v10195_v46 = vpack.c.bf16 %v2382_v6, %v2378_v42  ;;  %v1975_v57 = vadd.f32 %v1974_v55, %v10023_v28  ;;  %v10198_v4 = vpack.c.bf16 %v2383_v8, %v2379_v41  ;;  %v10200_v7 = vpack.c.bf16 %v2384_v50, %v2380_v49 }
 0x1d5   : > { %vm2130_vm11 = vcmp.gt.f32.partialorder %v1782_v0, 0.0  ;;  %v2258_v45 = vmul.f32 0.2, %v1782_v0  ;;  %v1785_v59 = vpop.f32.mrf.mxu0  ;;  %v1978_v3 = vpop.f32.mrf.mxu1  ;;  %v2385_v54 = vsel %vm2129_vm9, %v1780_v1, %v2257_v35  ;;  %v2387_v36 = vsel %vm2131_vm10, %v1973_v63, %v2259_v33 }
 0x1d6   : > { %13617 = vst [vmem:[#allocation30_spill] sm:$0xff] %v10195_v46  ;;  %13618 = vst [vmem:[#allocation31_spill] sm:$0xff] %v10200_v7  ;;  %v1784_v2 = vadd.f32 %v1783_v47, %v10012_v25  ;;  %v1977_v42 = vadd.f32 %v1976_v43, %v10016_v26  ;;  %4179 = vmatprep.mubr.bf16.mxu0 %v10195_v46  ;;  %vm2132_vm12 = vcmp.gt.f32.partialorder %v1975_v57, 0.0  ;;  %v2260_v56 = vmul.f32 0.2, %v1975_v57 }
 0x1d7   : > { %v1786_v8 = vadd.f32 %v1785_v59, %v10019_v30  ;;  %v1979_v49 = vadd.f32 %v1978_v3, %v10023_v28  ;;  %4372 = vmatprep.mubr.bf16.mxu1 %v10200_v7  ;;  %4180 = vmatmul.mubr.bf16.vlgmr.msra.gmra.mxu0 %v10193_v9  ;;  %v1789_v58 = vpop.f32.mrf.mxu0  ;;  %v1982_v1 = vpop.f32.mrf.mxu1  ;;  %v2386_v63 = vsel %vm2130_vm11, %v1782_v0, %v2258_v45 }
 0x1d8   : > { %vm2133_vm13 = vcmp.gt.f32.partialorder %v1784_v2, 0.0  ;;  %v2261_v41 = vmul.f32 0.2, %v1784_v2  ;;  %vm2135_vm14 = vcmp.gt.f32.partialorder %v1977_v42, 0.0  ;;  %4373 = vmatmul.mubr.bf16.vlgmr.msra.gmra.mxu1 %v10198_v4  ;;  %v13619_v55 = vcombine.low %v9946_v27, %v9948_v29 }
 0x1d9   : > { %v2263_v44 = vmul.f32 0.2, %v1977_v42  ;;  %vm2134_vm15 = vcmp.gt.f32.partialorder %v1786_v8, 0.0  ;;  %v2262_v35 = vmul.f32 0.2, %v1786_v8  ;;  %vm2136_vm0 = vcmp.gt.f32.partialorder %v1979_v49, 0.0  ;;  %v1791_v33 = vpop.f32.mrf.mxu0  ;;  %v1984_v47 = vpop.f32.mrf.mxu1 }
 0x1da   : > { %4534 = vmatpush1.bf16.msra.mxu0 %v13619_v55  ;;  %v13620_v6 = vcombine.low %v9955_v37, %v9957_v38  ;;  %v13621_v0 = vcombine.high %v9981_v10, %v9983_v12  ;;  %v2389_v43 = vsel %vm2133_vm13, %v1784_v2, %v2261_v41  ;;  %v2264_v50 = vmul.f32 0.2, %v1979_v49 }
 0x1db   : > { %v1790_v45 = vadd.f32 %v1789_v58, %v10012_v25  ;;  %v1983_v27 = vadd.f32 %v1982_v1, %v10016_v26  ;;  %v13622_v29 = vcombine.high %v9985_v13, %v9987_v11  ;;  %v2388_v59 = vsel %vm2132_vm12, %v1975_v57, %v2260_v56  ;;  %v1793_v55 = vpop.f32.mrf.mxu0 }
 0x1dc   : > { %4727 = vmatpush1.bf16.msra.mxu1 %v13620_v6  ;;  %4535 = vmatprep.subr.bf16.mxu0 %v13621_v0  ;;  %v2391_v37 = vsel %vm2135_vm14, %v1977_v42, %v2263_v44  ;;  %v2390_v38 = vsel %vm2134_vm15, %v1786_v8, %v2262_v35  ;;  %v1792_v3 = vadd.f32 %v1791_v33, %v10019_v30  ;;  %v1986_v6 = vpop.f32.mrf.mxu1 }
 0x1dd   : > { %4728 = vmatprep.subr.bf16.mxu1 %v13622_v29  ;;  %v10230_v0 = vpack.c.bf16 %v2389_v43, %v2385_v54  ;;  %v10232_v2 = vpack.c.bf16 %v2390_v38, %v2386_v63  ;;  %v2392_v58 = vsel %vm2136_vm0, %v1979_v49, %v2264_v50  ;;  %vm2137_vm1 = vcmp.gt.f32.partialorder %v1790_v45, 0.0  ;;  %v1795_v56 = vpop.f32.mrf.mxu0 }
 0x1de   : > { %v13623_v1 = vcombine.low %v9981_v10, %v9983_v12  ;;  %v10238_v41 = vpack.c.bf16 %v2392_v58, %v2388_v59  ;;  %v2265_v57 = vmul.f32 0.2, %v1790_v45  ;;  %vm2139_vm2 = vcmp.gt.f32.partialorder %v1983_v27, 0.0  ;;  %v1988_v8 = vpop.f32.mrf.mxu1 }
 0x1df   : > { %v2267_v42 = vmul.f32 0.2, %v1983_v27  ;;  %v13625_v54 = vcombine.low %v9985_v13, %v9987_v11  ;;  %v13626_v63 = vcombine.high %v9989_v14, %v9991_v15  ;;  %v10246_v49 = vpack.c.bf16 %v2391_v37, %v2387_v36  ;;  %4189 = vmatprep.mubr.bf16.mxu0 %v10232_v2  ;;  %v1799_v36 = vpop.f32.mrf.mxu0 }
 0x1e0   : > { %4536 = vmatpush1.bf16.msra.mxu0 %v13623_v1  ;;  %13624 = vst [vmem:[#allocation32_spill] sm:$0xff] %v10238_v41  ;;  %v2266_v44 = vmul.f32 0.2, %v1792_v3  ;;  %v1985_v10 = vadd.f32 %v1984_v47, %v10023_v28  ;;  %v1794_v12 = vadd.f32 %v1793_v55, %v10012_v25  ;;  %v13627_v35 = vcombine.high %v9993_v16, %v9995_v17  ;;  %v1992_v43 = vpop.f32.mrf.mxu1 }
 0x1e1   : > { %4729 = vmatpush1.bf16.msra.mxu1 %v13625_v54  ;;  %4537 = vmatprep.subr.bf16.mxu0 %v13626_v63  ;;  %v2393_v13 = vsel %vm2137_vm1, %v1790_v45, %v2265_v57  ;;  %vm2138_vm3 = vcmp.gt.f32.partialorder %v1792_v3, 0.0  ;;  %v1987_v11 = vadd.f32 %v1986_v6, %v10016_v26  ;;  %v1796_v33 = vadd.f32 %v1795_v56, %v10019_v30  ;;  %v1801_v59 = vpop.f32.mrf.mxu0 }
 0x1e2   : > { %4730 = vmatprep.subr.bf16.mxu1 %v13627_v35  ;;  %4382 = vmatprep.mubr.bf16.mxu1 %v10238_v41  ;;  %v2395_v47 = vsel %vm2139_vm2, %v1983_v27, %v2267_v42  ;;  %vm2140_vm4 = vcmp.gt.f32.partialorder %v1985_v10, 0.0  ;;  %v2268_v50 = vmul.f32 0.2, %v1985_v10  ;;  %vm2141_vm5 = vcmp.gt.f32.partialorder %v1794_v12, 0.0  ;;  %v1994_v37 = vpop.f32.mrf.mxu1 }
 0x1e3   : > { %4190 = vmatmul.mubr.bf16.gmra.mxu0 %v10230_v0  ;;  %4383 = vmatmul.mubr.bf16.gmra.mxu1 %v10246_v49  ;;  %v2269_v29 = vmul.f32 0.2, %v1794_v12  ;;  %vm2143_vm6 = vcmp.gt.f32.partialorder %v1987_v11, 0.0  ;;  %v2271_v45 = vmul.f32 0.2, %v1987_v11  ;;  %vm2142_vm7 = vcmp.gt.f32.partialorder %v1796_v33, 0.0 }
 0x1e4   : > { %v13628_v38 = vcombine.low %v9989_v14, %v9991_v15  ;;  %v13629_v27 = vcombine.low %v9993_v16, %v9995_v17  ;;  %v2394_v55 = vsel %vm2138_vm3, %v1792_v3, %v2266_v44  ;;  %v2270_v6 = vmul.f32 0.2, %v1796_v33  ;;  %v1803_v3 = vpop.f32.mrf.mxu0  ;;  %v1996_v56 = vpop.f32.mrf.mxu1 }
 0x1e5   : > { %v1989_v58 = vadd.f32 %v1988_v8, %v10023_v28  ;;  %v1800_v1 = vadd.f32 %v1799_v36, %v10012_v25  ;;  %v13630_v57 = vcombine.high %v9997_v18, %v9999_v20  ;;  %v13631_v42 = vcombine.high %v10001_v21, %v10003_v22 }
 0x1e6   : > { %4538 = vmatpush1.bf16.msra.mxu0 %v13628_v38  ;;  %4731 = vmatpush1.bf16.msra.mxu1 %v13629_v27  ;;  %v2397_v14 = vsel %vm2141_vm5, %v1794_v12, %v2269_v29  ;;  %v2399_v15 = vsel %vm2143_vm6, %v1987_v11, %v2271_v45  ;;  %v1993_v16 = vadd.f32 %v1992_v43, %v10016_v26  ;;  %v1805_v12 = vpop.f32.mrf.mxu0  ;;  %v1998_v11 = vpop.f32.mrf.mxu1 }
 0x1e7   : > { %4539 = vmatprep.subr.bf16.mxu0 %v13630_v57  ;;  %4732 = vmatprep.subr.bf16.mxu1 %v13631_v42  ;;  %v1802_v17 = vadd.f32 %v1801_v59, %v10019_v30  ;;  %v2396_v8 = vsel %vm2140_vm4, %v1985_v10, %v2268_v50  ;;  %v10280_v54 = vpack.c.bf16 %v2397_v14, %v2393_v13  ;;  %vm2144_vm8 = vcmp.gt.f32.partialorder %v1989_v58, 0.0 }
 0x1e8   : > { %v2398_v63 = vsel %vm2142_vm7, %v1796_v33, %v2270_v6  ;;  %v2272_v35 = vmul.f32 0.2, %v1989_v58  ;;  %vm2145_vm9 = vcmp.gt.f32.partialorder %v1800_v1, 0.0  ;;  %v2273_v36 = vmul.f32 0.2, %v1800_v1 }
 0x1e9   : > { %v10283_v44 = vpack.c.bf16 %v2398_v63, %v2394_v55  ;;  %v13632_v43 = vcombine.low %v9997_v18, %v9999_v20  ;;  %v13633_v29 = vcombine.low %v10001_v21, %v10003_v22  ;;  %v10291_v10 = vpack.c.bf16 %v2399_v15, %v2395_v47  ;;  %v1809_v22 = vpop.f32.mrf.mxu0  ;;  %v2002_v47 = vpop.f32.mrf.mxu1 }
 0x1ea   : > { %vm2147_vm10 = vcmp.gt.f32.partialorder %v1993_v16, 0.0  ;;  %v2275_v13 = vmul.f32 0.2, %v1993_v16  ;;  %vm2146_vm11 = vcmp.gt.f32.partialorder %v1802_v17, 0.0  ;;  %v13634_v33 = vcombine.high %v10005_v19, %v10007_v23 }
 0x1eb   : > { %4540 = vmatpush1.bf16.msra.mxu0 %v13632_v43  ;;  %4733 = vmatpush1.bf16.msra.mxu1 %v13633_v29  ;;  %v13635_v50 = vcombine.high %v10009_v24, %v10025_v31  ;;  %v2400_v45 = vsel %vm2144_vm8, %v1989_v58, %v2272_v35  ;;  %v2274_v18 = vmul.f32 0.2, %v1802_v17  ;;  %v1995_v20 = vadd.f32 %v1994_v37, %v10023_v28  ;;  %v1811_v37 = vpop.f32.mrf.mxu0  ;;  %v2004_v57 = vpop.f32.mrf.mxu1 }
 0x1ec   : > { %4541 = vmatprep.subr.bf16.mxu0 %v13634_v33  ;;  %v1804_v21 = vadd.f32 %v1803_v3, %v10012_v25  ;;  %4199 = vmatprep.mubr.bf16.mxu0 %v10283_v44  ;;  %v10302_v59 = vpack.c.bf16 %v2400_v45, %v2396_v8  ;;  %v2401_v38 = vsel %vm2145_vm9, %v1800_v1, %v2273_v36 }
 0x1ed   : > { %4734 = vmatprep.subr.bf16.mxu1 %v13635_v50  ;;  %v2403_v27 = vsel %vm2147_vm10, %v1993_v16, %v2275_v13  ;;  %v1997_v55 = vadd.f32 %v1996_v56, %v10016_v26  ;;  %4200 = vmatmul.mubr.bf16.gmra.mxu0 %v10280_v54  ;;  %vm2148_vm12 = vcmp.gt.f32.partialorder %v1995_v20, 0.0  ;;  %v2276_v6 = vmul.f32 0.2, %v1995_v20  ;;  %v2006_v8 = vpop.f32.mrf.mxu1 }
 0x1ee   : > { %vm2149_vm13 = vcmp.gt.f32.partialorder %v1804_v21, 0.0  ;;  %v2277_v58 = vmul.f32 0.2, %v1804_v21  ;;  %v13636_v42 = vcombine.low %v10005_v19, %v10007_v23  ;;  %v13637_v14 = vcombine.low %v10009_v24, %v10025_v31  ;;  %4392 = vmatprep.mubr.bf16.mxu1 %v10302_v59  ;;  %v1813_v31 = vpop.f32.mrf.mxu0 }
 0x1ef   : > { %vm2151_vm14 = vcmp.gt.f32.partialorder %v1997_v55, 0.0  ;;  %v2279_v1 = vmul.f32 0.2, %v1997_v55  ;;  %v1806_v15 = vadd.f32 %v1805_v12, %v10019_v30  ;;  %v1999_v16 = vadd.f32 %v1998_v11, %v10023_v28  ;;  %4393 = vmatmul.mubr.bf16.gmra.mxu1 %v10291_v10  ;;  %v2008_v29 = vpop.f32.mrf.mxu1 }
 0x1f0   : > { %4542 = vmatpush1.bf16.msra.mxu0 %v13636_v42  ;;  %4735 = vmatpush1.bf16.msra.mxu1 %v13637_v14  ;;  %v13638_v3 = vcombine.high %v10027_v32, %v10029_v34  ;;  %v2402_v56 = vsel %vm2146_vm11, %v1802_v17, %v2274_v18  ;;  %v2405_v19 = vsel %vm2149_vm13, %v1804_v21, %v2277_v58  ;;  %v1815_v43 = vpop.f32.mrf.mxu0 }
 0x1f1   : > { %v1810_v23 = vadd.f32 %v1809_v22, %v10012_v25  ;;  %v2003_v24 = vadd.f32 %v2002_v47, %v10016_v26  ;;  %v2404_v63 = vsel %vm2148_vm12, %v1995_v20, %v2276_v6  ;;  %v2407_v35 = vsel %vm2151_vm14, %v1997_v55, %v2279_v1 }
 0x1f2   : > { %4543 = vmatprep.subr.bf16.mxu0 %v13638_v3  ;;  %vm2150_vm15 = vcmp.gt.f32.partialorder %v1806_v15, 0.0  ;;  %v2278_v36 = vmul.f32 0.2, %v1806_v15  ;;  %v13639_v12 = vcombine.high %v10039_v39, %v10041_v40  ;;  %v10327_v11 = vpack.c.bf16 %v2405_v19, %v2401_v38  ;;  %v2012_v38 = vpop.f32.mrf.mxu1 }
 0x1f3   : > { %vm2152_vm0 = vcmp.gt.f32.partialorder %v1999_v16, 0.0  ;;  %v2280_v17 = vmul.f32 0.2, %v1999_v16  ;;  %vm2153_vm1 = vcmp.gt.f32.partialorder %v1810_v23, 0.0  ;;  %v13640_v13 = vcombine.low %v10027_v32, %v10029_v34 }
 0x1f4   : > { %4736 = vmatprep.subr.bf16.mxu1 %v13639_v12  ;;  %v13641_v33 = vcombine.low %v10039_v39, %v10041_v40  ;;  %v10335_v50 = vpack.c.bf16 %v2407_v35, %v2403_v27  ;;  %v2406_v45 = vsel %vm2150_vm15, %v1806_v15, %v2278_v36  ;;  %v2281_v18 = vmul.f32 0.2, %v1810_v23  ;;  %v1819_v40 = vpop.f32.mrf.mxu0  ;;  %v2014_v1 = vpop.f32.mrf.mxu1 }
 0x1f5   : > { %4544 = vmatpush1.bf16.msra.mxu0 %v13640_v13  ;;  %v2283_v20 = vmul.f32 0.2, %v2003_v24  ;;  %v13642_v21 = vcombine.high %v10043_v48, %v10053_v51  ;;  %v13643_v22 = vcombine.high %v10055_v52, %v10057_v53  ;;  %v10343_v47 = vpack.c.bf16 %v2406_v45, %v2402_v56  ;;  %v13650_v45 = vld [vmem:[#allocation12_spill] sm:$0xff] }
 0x1f6   : > { %4737 = vmatpush1.bf16.msra.mxu1 %v13641_v33  ;;  %v2408_v32 = vsel %vm2152_vm0, %v1999_v16, %v2280_v17  ;;  %v1812_v34 = vadd.f32 %v1811_v37, %v10019_v30  ;;  %v2005_v39 = vadd.f32 %v2004_v57, %v10023_v28  ;;  %v2409_v55 = vsel %vm2153_vm1, %v1810_v23, %v2281_v18  ;;  %v1821_v14 = vpop.f32.mrf.mxu0  ;;  %v2016_v23 = vpop.f32.mrf.mxu1  ;;  %v13651_v18 = vld [vmem:[#allocation13_spill] sm:$0xff] }
 0x1f7   : > { %4545 = vmatprep.subr.bf16.mxu0 %v13642_v21  ;;  %4738 = vmatprep.subr.bf16.mxu1 %v13643_v22  ;;  %v10347_v27 = vpack.c.bf16 %v2408_v32, %v2404_v63  ;;  %vm2155_vm2 = vcmp.gt.f32.partialorder %v2003_v24, 0.0  ;;  %v1814_v6 = vadd.f32 %v1813_v31, %v10012_v25  ;;  %v13644_v37 = vcombine.low %v10043_v48, %v10053_v51 }
 0x1f8   : > { %vm2154_vm3 = vcmp.gt.f32.partialorder %v1812_v34, 0.0  ;;  %v2282_v58 = vmul.f32 0.2, %v1812_v34  ;;  %vm2156_vm4 = vcmp.gt.f32.partialorder %v2005_v39, 0.0  ;;  %v2284_v42 = vmul.f32 0.2, %v2005_v39  ;;  %4209 = vmatprep.mubr.bf16.mxu0 %v10343_v47  ;;  %v1823_v51 = vpop.f32.mrf.mxu0 }
 0x1f9   : > { %4546 = vmatpush1.bf16.msra.mxu0 %v13644_v37  ;;  %vm2157_vm5 = vcmp.gt.f32.partialorder %v1814_v6, 0.0  ;;  %v2285_v57 = vmul.f32 0.2, %v1814_v6  ;;  %v2007_v15 = vadd.f32 %v2006_v8, %v10016_v26  ;;  %v1816_v16 = vadd.f32 %v1815_v43, %v10019_v30  ;;  %4402 = vmatprep.mubr.bf16.mxu1 %v10347_v27  ;;  %v2018_v43 = vpop.f32.mrf.mxu1 }
 0x1fa   : > { %4210 = vmatmul.mubr.bf16.gmra.mxu0 %v10327_v11  ;;  %v2411_v3 = vsel %vm2155_vm2, %v2003_v24, %v2283_v20  ;;  %v2410_v56 = vsel %vm2154_vm3, %v1812_v34, %v2282_v58  ;;  %v2009_v19 = vadd.f32 %v2008_v29, %v10023_v28  ;;  %4403 = vmatmul.mubr.bf16.gmra.mxu1 %v10335_v50  ;;  %v1825_v17 = vpop.f32.mrf.mxu0 }
 0x1fb   : > { %v1820_v48 = vadd.f32 %v1819_v40, %v10012_v25  ;;  %v2413_v31 = vsel %vm2157_vm5, %v1814_v6, %v2285_v57  ;;  %vm2159_vm6 = vcmp.gt.f32.partialorder %v2007_v15, 0.0  ;;  %v2287_v8 = vmul.f32 0.2, %v2007_v15  ;;  %v2022_v34 = vpop.f32.mrf.mxu1 }
 0x1fc   : > { %vm2158_vm7 = vcmp.gt.f32.partialorder %v1816_v16, 0.0  ;;  %v13645_v63 = vcombine.low %v10055_v52, %v10057_v53  ;;  %v13646_v24 = vcombine.high %v10067_v60, %v10069_v61  ;;  %v2412_v35 = vsel %vm2156_vm4, %v2005_v39, %v2284_v42 }
 0x1fd   : > { %v2286_v36 = vmul.f32 0.2, %v1816_v16  ;;  %vm2160_vm8 = vcmp.gt.f32.partialorder %v2009_v19, 0.0  ;;  %v2288_v12 = vmul.f32 0.2, %v2009_v19  ;;  %v13647_v29 = vcombine.low %v10067_v60, %v10069_v61  ;;  %v1829_v61 = vpop.f32.mrf.mxu0 }
 0x1fe   : > { %4739 = vmatpush1.bf16.msra.mxu1 %v13645_v63  ;;  %4547 = vmatprep.subr.bf16.mxu0 %v13646_v24  ;;  %v13648_v13 = vcombine.high %v10071_v62, %v10081_v5  ;;  %v10376_v52 = vpack.c.bf16 %v2413_v31, %v2409_v55  ;;  %v2415_v53 = vsel %vm2159_vm6, %v2007_v15, %v2287_v8  ;;  %vm2161_vm9 = vcmp.gt.f32.partialorder %v1820_v48, 0.0  ;;  %v13656_v15 = vld [vmem:[#allocation14_spill] sm:$0xff] }
 0x1ff   : > { %4548 = vmatpush1.bf16.msra.mxu0 %v13647_v29  ;;  %v2013_v33 = vadd.f32 %v2012_v38, %v10016_v26  ;;  %v13652_v20 = vcombine.high %v13650_v45, %v13651_v18  ;;  %v2414_v21 = vsel %vm2158_vm7, %v1816_v16, %v2286_v36  ;;  %v2416_v22 = vsel %vm2160_vm8, %v2009_v19, %v2288_v12  ;;  %v1831_v37 = vpop.f32.mrf.mxu0  ;;  %v13657_v16 = vld [vmem:[#allocation15_spill] sm:$0xff]  ;;  %v13660_v36 = vld [vmem:[#allocation17_spill] sm:$0xff] }
 0x200   : > { %4740 = vmatprep.subr.bf16.mxu1 %v13648_v13  ;;  %13649 = vst [vmem:[#allocation33_spill] sm:$0xff] %v10376_v52  ;;  %v2289_v32 = vmul.f32 0.2, %v1820_v48  ;;  %v1822_v60 = vadd.f32 %v1821_v14, %v10019_v30  ;;  %v10384_v39 = vpack.c.bf16 %v2415_v53, %v2411_v3  ;;  %v10386_v40 = vpack.c.bf16 %v2414_v21, %v2410_v56  ;;  %v2024_v14 = vpop.f32.mrf.mxu1  ;;  %v13664_v21 = vld [vmem:[#allocation18_spill] sm:$0xff] }
 0x201   : > { %4549 = vmatprep.subr.bf16.mxu0 %v13652_v20  ;;  %v10388_v55 = vpack.c.bf16 %v2416_v22, %v2412_v35  ;;  %vm2163_vm10 = vcmp.gt.f32.partialorder %v2013_v33, 0.0  ;;  %v13654_v38 = vcombine.low %v10071_v62, %v10081_v5  ;;  %v2291_v6 = vmul.f32 0.2, %v2013_v33  ;;  %v1833_v63 = vpop.f32.mrf.mxu0  ;;  %v13659_v35 = vld [vmem:[#allocation16_spill] sm:$0xff]  ;;  %v13665_v22 = vld [vmem:[#allocation19_spill] sm:$0xff] }
 0x202   : > { %13653 = vst [vmem:[#allocation12_spill] sm:$0xff] %v10384_v39  ;;  %vm2162_vm11 = vcmp.gt.f32.partialorder %v1822_v60, 0.0  ;;  %v2290_v58 = vmul.f32 0.2, %v1822_v60  ;;  %v2015_v42 = vadd.f32 %v2014_v1, %v10023_v28  ;;  %v13655_v57 = vcombine.low %v13650_v45, %v13651_v18  ;;  %4219 = vmatprep.mubr.bf16.mxu0 %v10386_v40 }
 0x203   : > { %4741 = vmatpush1.bf16.msra.mxu1 %v13654_v38  ;;  %v13658_v3 = vcombine.high %v13656_v15, %v13657_v16  ;;  %v1824_v56 = vadd.f32 %v1823_v51, %v10012_v25  ;;  %v2017_v62 = vadd.f32 %v2016_v23, %v10016_v26  ;;  %v1826_v5 = vadd.f32 %v1825_v17, %v10019_v30  ;;  %v2026_v51 = vpop.f32.mrf.mxu1  ;;  %v13668_v38 = vld [vmem:[#allocation21_spill] sm:$0xff] }
 0x204   : > { %4550 = vmatpush2.bf16.msra.mxu0 %v13655_v57  ;;  %v2019_v19 = vadd.f32 %v2018_v43, %v10023_v28  ;;  %v2417_v1 = vsel %vm2161_vm9, %v1820_v48, %v2289_v32  ;;  %v2419_v31 = vsel %vm2163_vm10, %v2013_v33, %v2291_v6  ;;  %vm2164_vm12 = vcmp.gt.f32.partialorder %v2015_v42, 0.0  ;;  %4412 = vmatprep.mubr.bf16.mxu1 %v10388_v55  ;;  %v1835_v43 = vpop.f32.mrf.mxu0 }
 0x205   : > { %4742 = vmatprep.subr.bf16.mxu1 %v13658_v3  ;;  %v2292_v8 = vmul.f32 0.2, %v2015_v42  ;;  %4220 = vmatmul.mubr.bf16.gmra.mxu0 %v10376_v52  ;;  %vm2165_vm13 = vcmp.gt.f32.partialorder %v1824_v56, 0.0  ;;  %v2293_v23 = vmul.f32 0.2, %v1824_v56  ;;  %vm2167_vm14 = vcmp.gt.f32.partialorder %v2017_v62, 0.0  ;;  %v2028_v29 = vpop.f32.mrf.mxu1 }
 0x206   : > { %v2295_v24 = vmul.f32 0.2, %v2017_v62  ;;  %4413 = vmatmul.mubr.bf16.gmra.mxu1 %v10384_v39  ;;  %v13661_v12 = vcombine.high %v13659_v35, %v13660_v36  ;;  %v2418_v48 = vsel %vm2162_vm11, %v1822_v60, %v2290_v58  ;;  %vm2166_vm15 = vcmp.gt.f32.partialorder %v1826_v5, 0.0  ;;  %v13667_v60 = vld [vmem:[#allocation20_spill] sm:$0xff]  ;;  %v1839_v3 = vpop.f32.mrf.mxu0 }
 0x207   : > { %v2294_v17 = vmul.f32 0.2, %v1826_v5  ;;  %vm2168_vm0 = vcmp.gt.f32.partialorder %v2019_v19, 0.0  ;;  %v13662_v13 = vcombine.low %v13656_v15, %v13657_v16  ;;  %v13663_v53 = vcombine.low %v13659_v35, %v13660_v36 }
 0x208   : > { %4551 = vmatprep.subr.bf16.mxu0 %v13661_v12  ;;  %v2421_v33 = vsel %vm2165_vm13, %v1824_v56, %v2293_v23  ;;  %v2423_v45 = vsel %vm2167_vm14, %v2017_v62, %v2295_v24  ;;  %v2296_v18 = vmul.f32 0.2, %v2019_v19  ;;  %v1830_v20 = vadd.f32 %v1829_v61, %v10012_v25  ;;  %v2032_v56 = vpop.f32.mrf.mxu1 }
 0x209   : > { %4743 = vmatpush2.bf16.msra.mxu1 %v13662_v13  ;;  %4552 = vmatpush2.bf16.msra.mxu0 %v13663_v53  ;;  %v13666_v32 = vcombine.high %v13664_v21, %v13665_v22  ;;  %v13669_v6 = vcombine.high %v13667_v60, %v13668_v38  ;;  %v2420_v58 = vsel %vm2164_vm12, %v2015_v42, %v2292_v8  ;;  %v1841_v42 = vpop.f32.mrf.mxu0 }
 0x20a   : > { %v10428_v57 = vpack.c.bf16 %v2421_v33, %v2417_v1  ;;  %v2422_v15 = vsel %vm2166_vm15, %v1826_v5, %v2294_v17  ;;  %v2023_v16 = vadd.f32 %v2022_v34, %v10016_v26  ;;  %v2424_v61 = vsel %vm2168_vm0, %v2019_v19, %v2296_v18  ;;  %v2034_v1 = vpop.f32.mrf.mxu1 }
 0x20b   : > { %4744 = vmatprep.subr.bf16.mxu1 %v13666_v32  ;;  %4553 = vmatprep.subr.bf16.mxu0 %v13669_v6  ;;  %v10431_v62 = vpack.c.bf16 %v2422_v15, %v2418_v48  ;;  %vm2169_vm1 = vcmp.gt.f32.partialorder %v1830_v20, 0.0  ;;  %v2297_v23 = vmul.f32 0.2, %v1830_v20  ;;  %v10434_v24 = vpack.c.bf16 %v2423_v45, %v2419_v31  ;;  %v1843_v13 = vpop.f32.mrf.mxu0  ;;  %v13681_v32 = vld [vmem:[#allocation25_spill] sm:$0xff] }
 0x20c   : > { %13670 = vst [vmem:[#allocation13_spill] sm:$0xff] %v10428_v57  ;;  %v10436_v35 = vpack.c.bf16 %v2424_v61, %v2420_v58  ;;  %v1832_v36 = vadd.f32 %v1831_v37, %v10019_v30  ;;  %v13674_v5 = vcombine.low %v13664_v21, %v13665_v22  ;;  %v13675_v34 = vcombine.low %v13667_v60, %v13668_v38  ;;  %v2036_v53 = vpop.f32.mrf.mxu1  ;;  %v13680_v22 = vld [vmem:[#allocation24_spill] sm:$0xff] }
 0x20d   : > { %13671 = vst [vmem:[#allocation14_spill] sm:$0xff] %v10431_v62  ;;  %13672 = vst [vmem:[#allocation15_spill] sm:$0xff] %v10434_v24  ;;  %v2299_v8 = vmul.f32 0.2, %v2023_v16  ;;  %v2025_v19 = vadd.f32 %v2024_v14, %v10023_v28  ;;  %v1834_v31 = vadd.f32 %v1833_v63, %v10012_v25  ;;  %v2027_v12 = vadd.f32 %v2026_v51, %v10016_v26  ;;  %v13676_v63 = vld [vmem:[#allocation22_spill] sm:$0xff]  ;;  %v13677_v51 = vld [vmem:[#allocation23_spill] sm:$0xff] }
 0x20e   : > { %13673 = vst [vmem:[#allocation16_spill] sm:$0xff] %v10436_v35  ;;  %4745 = vmatpush2.bf16.msra.mxu1 %v13674_v5  ;;  %4554 = vmatpush2.bf16.msra.mxu0 %v13675_v34  ;;  %v2425_v37 = vsel %vm2169_vm1, %v1830_v20, %v2297_v23  ;;  %vm2171_vm2 = vcmp.gt.f32.partialorder %v2023_v16, 0.0  ;;  %v2298_v48 = vmul.f32 0.2, %v1832_v36  ;;  %v1836_v17 = vadd.f32 %v1835_v43, %v10019_v30  ;;  %v1845_v43 = vpop.f32.mrf.mxu0  ;;  %v2038_v20 = vpop.f32.mrf.mxu1  ;;  %v13684_v23 = vld [vmem:[#allocation26_spill] sm:$0xff]  ;;  %v13685_v5 = vld [vmem:[#allocation27_spill] sm:$0xff] }
 0x20f   : > { %4229 = vmatprep.mubr.bf16.mxu0 %v10431_v62  ;;  %4422 = vmatprep.mubr.bf16.mxu1 %v10436_v35  ;;  %vm2170_vm3 = vcmp.gt.f32.partialorder %v1832_v36, 0.0  ;;  %v2300_v33 = vmul.f32 0.2, %v2025_v19  ;;  %vm2173_vm4 = vcmp.gt.f32.partialorder %v1834_v31, 0.0  ;;  %v2301_v14 = vmul.f32 0.2, %v1834_v31 }
 0x210   : > { %4230 = vmatmul.mubr.bf16.gmra.mxu0 %v10428_v57  ;;  %4423 = vmatmul.mubr.bf16.gmra.mxu1 %v10434_v24  ;;  %v13678_v45 = vcombine.high %v13676_v63, %v13677_v51  ;;  %vm2172_vm5 = vcmp.gt.f32.partialorder %v2025_v19, 0.0  ;;  %vm2175_vm6 = vcmp.gt.f32.partialorder %v2027_v12, 0.0  ;;  %v2303_v18 = vmul.f32 0.2, %v2027_v12 }
 0x211   : > { %vm2174_vm7 = vcmp.gt.f32.partialorder %v1836_v17, 0.0  ;;  %v13679_v21 = vcombine.low %v13676_v63, %v13677_v51  ;;  %v13682_v60 = vcombine.high %v13680_v22, %v13681_v32  ;;  %v2427_v38 = vsel %vm2171_vm2, %v2023_v16, %v2299_v8  ;;  %v1849_v16 = vpop.f32.mrf.mxu0  ;;  %v2042_v8 = vpop.f32.mrf.mxu1 }
 0x212   : > { %4746 = vmatprep.subr.bf16.mxu1 %v13678_v45  ;;  %v2429_v6 = vsel %vm2173_vm4, %v1834_v31, %v2301_v14  ;;  %v2302_v58 = vmul.f32 0.2, %v1836_v17  ;;  %v2029_v15 = vadd.f32 %v2028_v29, %v10023_v28  ;;  %v13683_v61 = vcombine.low %v13680_v22, %v13681_v32  ;;  %v13687_v31 = vld [vmem:[#allocation28_spill] sm:$0xff]  ;;  %v13688_v14 = vld [vmem:[#allocation29_spill] sm:$0xff] }
 0x213   : > { %4747 = vmatpush2.bf16.msra.mxu1 %v13679_v21  ;;  %4555 = vmatprep.subr.bf16.mxu0 %v13682_v60  ;;  %v13686_v34 = vcombine.high %v13684_v23, %v13685_v5  ;;  %v2426_v63 = vsel %vm2170_vm3, %v1832_v36, %v2298_v48  ;;  %v2431_v51 = vsel %vm2175_vm6, %v2027_v12, %v2303_v18  ;;  %v1851_v12 = vpop.f32.mrf.mxu0 }
 0x214   : > { %4556 = vmatpush2.bf16.msra.mxu0 %v13683_v61  ;;  %v1840_v45 = vadd.f32 %v1839_v3, %v10012_v25  ;;  %v2033_v21 = vadd.f32 %v2032_v56, %v10016_v26  ;;  %v13689_v29 = vcombine.high %v13687_v31, %v13688_v14  ;;  %v2428_v22 = vsel %vm2172_vm5, %v2025_v19, %v2300_v33  ;;  %v2044_v56 = vpop.f32.mrf.mxu1 }
 0x215   : > { %4748 = vmatprep.subr.bf16.mxu1 %v13686_v34  ;;  %v2430_v32 = vsel %vm2174_vm7, %v1836_v17, %v2302_v58  ;;  %vm2176_vm8 = vcmp.gt.f32.partialorder %v2029_v15, 0.0  ;;  %v2304_v60 = vmul.f32 0.2, %v2029_v15  ;;  %v10478_v61 = vpack.c.bf16 %v2429_v6, %v2425_v37 }
 0x216   : > { %4557 = vmatprep.subr.bf16.mxu0 %v13689_v29  ;;  %v10480_v36 = vpack.c.bf16 %v2430_v32, %v2426_v63  ;;  %vm2177_vm9 = vcmp.gt.f32.partialorder %v1840_v45, 0.0  ;;  %v2305_v3 = vmul.f32 0.2, %v1840_v45  ;;  %v13692_v48 = vcombine.low %v13684_v23, %v13685_v5  ;;  %v2046_v23 = vpop.f32.mrf.mxu1 }
 0x217   : > { %13690 = vst [vmem:[#allocation17_spill] sm:$0xff] %v10478_v61  ;;  %v10485_v18 = vpack.c.bf16 %v2431_v51, %v2427_v38  ;;  %v2432_v34 = vsel %vm2176_vm8, %v2029_v15, %v2304_v60  ;;  %v1842_v19 = vadd.f32 %v1841_v42, %v10019_v30  ;;  %v2035_v17 = vadd.f32 %v2034_v1, %v10023_v28  ;;  %v1853_v38 = vpop.f32.mrf.mxu0 }
 0x218   : > { %13691 = vst [vmem:[#allocation18_spill] sm:$0xff] %v10480_v36  ;;  %4749 = vmatpush2.bf16.msra.mxu1 %v13692_v48  ;;  %v13694_v37 = vcombine.low %v13687_v31, %v13688_v14  ;;  %v10492_v33 = vpack.c.bf16 %v2432_v34, %v2428_v22  ;;  %v2307_v6 = vmul.f32 0.2, %v2033_v21  ;;  %v1844_v58 = vadd.f32 %v1843_v13, %v10012_v25  ;;  %v2048_v51 = vpop.f32.mrf.mxu1 }
 0x219   : > { %13693 = vst [vmem:[#allocation19_spill] sm:$0xff] %v10485_v18  ;;  %v2037_v63 = vadd.f32 %v2036_v53, %v10016_v26  ;;  %4239 = vmatprep.mubr.bf16.mxu0 %v10480_v36  ;;  %v2433_v15 = vsel %vm2177_vm9, %v1840_v45, %v2305_v3  ;;  %vm2179_vm10 = vcmp.gt.f32.partialorder %v2033_v21, 0.0  ;;  %vm2178_vm11 = vcmp.gt.f32.partialorder %v1842_v19, 0.0  ;;  %v1855_v13 = vpop.f32.mrf.mxu0 }
 0x21a   : > { %4558 = vmatpush2.bf16.msra.mxu0 %v13694_v37  ;;  %13695 = vst [vmem:[#allocation20_spill] sm:$0xff] %v10492_v33  ;;  %v2306_v42 = vmul.f32 0.2, %v1842_v19  ;;  %vm2180_vm12 = vcmp.gt.f32.partialorder %v2035_v17, 0.0  ;;  %v2308_v1 = vmul.f32 0.2, %v2035_v17  ;;  %4432 = vmatprep.mubr.bf16.mxu1 %v10492_v33  ;;  %v1846_v31 = vadd.f32 %v1845_v43, %v10019_v30  ;;  %v2052_v3 = vpop.f32.mrf.mxu1 }
 0x21b   : > { %4240 = vmatmul.mubr.bf16.gmra.mxu0 %v10478_v61  ;;  %vm2181_vm13 = vcmp.gt.f32.partialorder %v1844_v58, 0.0  ;;  %v2309_v5 = vmul.f32 0.2, %v1844_v58  ;;  %vm2183_vm14 = vcmp.gt.f32.partialorder %v2037_v63, 0.0  ;;  %v2311_v53 = vmul.f32 0.2, %v2037_v63  ;;  %4433 = vmatmul.mubr.bf16.gmra.mxu1 %v10485_v18  ;;  %v1859_v60 = vpop.f32.mrf.mxu0 }
 0x21c   : > { %v2039_v14 = vadd.f32 %v2038_v20, %v10023_v28  ;;  %v2435_v45 = vsel %vm2179_vm10, %v2033_v21, %v2307_v6  ;;  %v2434_v29 = vsel %vm2178_vm11, %v1842_v19, %v2306_v42  ;;  %v1850_v22 = vadd.f32 %v1849_v16, %v10012_v25  ;;  %v2054_v21 = vpop.f32.mrf.mxu1 }
 0x21d   : > { %v2043_v32 = vadd.f32 %v2042_v8, %v10016_v26  ;;  %v2436_v48 = vsel %vm2180_vm12, %v2035_v17, %v2308_v1  ;;  %v2437_v34 = vsel %vm2181_vm13, %v1844_v58, %v2309_v5  ;;  %vm2182_vm15 = vcmp.gt.f32.partialorder %v1846_v31, 0.0  ;;  %v1861_v18 = vpop.f32.mrf.mxu0 }
 0x21e   : > { %v2310_v43 = vmul.f32 0.2, %v1846_v31  ;;  %v2439_v37 = vsel %vm2183_vm14, %v2037_v63, %v2311_v53  ;;  %vm2184_vm0 = vcmp.gt.f32.partialorder %v2039_v14, 0.0  ;;  %v2312_v20 = vmul.f32 0.2, %v2039_v14  ;;  %v2056_v1 = vpop.f32.mrf.mxu1 }
 0x21f   : > { %vm2185_vm1 = vcmp.gt.f32.partialorder %v1850_v22, 0.0  ;;  %v2313_v19 = vmul.f32 0.2, %v1850_v22  ;;  %vm2187_vm2 = vcmp.gt.f32.partialorder %v2043_v32, 0.0  ;;  %v2315_v16 = vmul.f32 0.2, %v2043_v32  ;;  %v1863_v58 = vpop.f32.mrf.mxu0 }
 0x220   : > { %v2438_v6 = vsel %vm2182_vm15, %v1846_v31, %v2310_v43  ;;  %v2440_v8 = vsel %vm2184_vm0, %v2039_v14, %v2312_v20  ;;  %v1852_v61 = vadd.f32 %v1851_v12, %v10019_v30  ;;  %v2045_v17 = vadd.f32 %v2044_v56, %v10023_v28  ;;  %v2058_v14 = vpop.f32.mrf.mxu1 }
 0x221   : > { %v10509_v42 = vpack.c.bf16 %v2438_v6, %v2434_v29  ;;  %v10513_v5 = vpack.c.bf16 %v2437_v34, %v2433_v15  ;;  %v10515_v63 = vpack.c.bf16 %v2439_v37, %v2435_v45  ;;  %v10517_v53 = vpack.c.bf16 %v2440_v8, %v2436_v48  ;;  %v1865_v12 = vpop.f32.mrf.mxu0 }
 0x222   : > { %v1854_v31 = vadd.f32 %v1853_v38, %v10012_v25  ;;  %v2441_v43 = vsel %vm2185_vm1, %v1850_v22, %v2313_v19  ;;  %v2443_v33 = vsel %vm2187_vm2, %v2043_v32, %v2315_v16  ;;  %vm2186_vm3 = vcmp.gt.f32.partialorder %v1852_v61, 0.0  ;;  %v10529_v34 = vpop.f32.mrf.mxu1 }
 0x223   : > { %13696 = vst [vmem:[#allocation21_spill] sm:$0xff] %v10509_v42  ;;  %13697 = vst [vmem:[#allocation22_spill] sm:$0xff] %v10513_v5  ;;  %v2314_v29 = vmul.f32 0.2, %v1852_v61  ;;  %4249 = vmatprep.mubr.bf16.mxu0 %v10509_v42  ;;  %v2047_v15 = vadd.f32 %v2046_v23, %v10016_v26  ;;  %v1856_v45 = vadd.f32 %v1855_v13, %v10019_v30  ;;  %4442 = vmatprep.mubr.bf16.mxu1 %v10517_v53  ;;  %v1869_v48 = vpop.f32.mrf.mxu0 }
 0x224   : > { %13698 = vst [vmem:[#allocation23_spill] sm:$0xff] %v10515_v63  ;;  %13699 = vst [vmem:[#allocation24_spill] sm:$0xff] %v10517_v53  ;;  %vm2189_vm4 = vcmp.gt.f32.partialorder %v1854_v31, 0.0  ;;  %v2317_v56 = vmul.f32 0.2, %v1854_v31  ;;  %4250 = vmatmul.mubr.bf16.gmra.mxu0 %v10513_v5  ;;  %vm2188_vm5 = vcmp.gt.f32.partialorder %v2045_v17, 0.0  ;;  %v2049_v22 = vadd.f32 %v2048_v51, %v10023_v28  ;;  %4443 = vmatmul.mubr.bf16.gmra.mxu1 %v10515_v63  ;;  %v10535_v51 = vpop.f32.mrf.mxu1 }
 0x225   : > { %v2316_v38 = vmul.f32 0.2, %v2045_v17  ;;  %v1860_v32 = vadd.f32 %v1859_v60, %v10012_v25  ;;  %v2442_v37 = vsel %vm2186_vm3, %v1852_v61, %v2314_v29  ;;  %vm2191_vm6 = vcmp.gt.f32.partialorder %v2047_v15, 0.0  ;;  %v10533_v19 = vpop.f32.mrf.mxu0 }
 0x226   : > { %v2319_v23 = vmul.f32 0.2, %v2047_v15  ;;  %vm2190_vm7 = vcmp.gt.f32.partialorder %v1856_v45, 0.0  ;;  %v2445_v13 = vsel %vm2189_vm4, %v1854_v31, %v2317_v56  ;;  %v2318_v20 = vmul.f32 0.2, %v1856_v45  ;;  %v2066_v31 = vpop.f32.mrf.mxu1 }
 0x227   : > { %vm2192_vm8 = vcmp.gt.f32.partialorder %v2049_v22, 0.0  ;;  %v2320_v6 = vmul.f32 0.2, %v2049_v22  ;;  %vm2193_vm9 = vcmp.gt.f32.partialorder %v1860_v32, 0.0  ;;  %v2321_v60 = vmul.f32 0.2, %v1860_v32  ;;  %v1873_v53 = vpop.f32.mrf.mxu0 }
 0x228   : > { %v2447_v16 = vsel %vm2191_vm6, %v2047_v15, %v2319_v23  ;;  %v2053_v8 = vadd.f32 %v2052_v3, %v10016_v26  ;;  %v2444_v63 = vsel %vm2188_vm5, %v2045_v17, %v2316_v38  ;;  %v2446_v61 = vsel %vm2190_vm7, %v1856_v45, %v2318_v20  ;;  %v10549_v45 = vpop.f32.mrf.mxu1 }
 0x229   : > { %v2448_v29 = vsel %vm2192_vm8, %v2049_v22, %v2320_v6  ;;  %v1862_v5 = vadd.f32 %v1861_v18, %v10019_v30  ;;  %v10540_v56 = vpack.c.bf16 %v2445_v13, %v2441_v43  ;;  %v10542_v42 = vpack.c.bf16 %v2447_v16, %v2443_v33  ;;  %v1875_v17 = vpop.f32.mrf.mxu0 }
 0x22a   : > { %v10544_v36 = vpack.c.bf16 %v2446_v61, %v2442_v37  ;;  %v10546_v24 = vpack.c.bf16 %v2448_v29, %v2444_v63  ;;  %v2449_v15 = vsel %vm2193_vm9, %v1860_v32, %v2321_v60  ;;  %vm2195_vm10 = vcmp.gt.f32.partialorder %v2053_v8, 0.0  ;;  %v10560_v32 = vpop.f32.mrf.mxu1 }
 0x22b   : > { %13700 = vst [vmem:[#allocation25_spill] sm:$0xff] %v10540_v56  ;;  %13701 = vst [vmem:[#allocation26_spill] sm:$0xff] %v10542_v42  ;;  %v2323_v23 = vmul.f32 0.2, %v2053_v8  ;;  %v2055_v3 = vadd.f32 %v2054_v21, %v10023_v28  ;;  %v1864_v18 = vadd.f32 %v1863_v58, %v10012_v25  ;;  %v2057_v38 = vadd.f32 %v2056_v1, %v10016_v26  ;;  %v10558_v21 = vpop.f32.mrf.mxu0 }
 0x22c   : > { %13702 = vst [vmem:[#allocation27_spill] sm:$0xff] %v10544_v36  ;;  %13703 = vst [vmem:[#allocation28_spill] sm:$0xff] %v10546_v24  ;;  %v1866_v43 = vadd.f32 %v1865_v12, %v10019_v30  ;;  %v2059_v33 = vadd.f32 %v2058_v14, %v10023_v28  ;;  %4259 = vmatprep.mubr.bf16.mxu0 %v10544_v36  ;;  %vm2194_vm11 = vcmp.gt.f32.partialorder %v1862_v5, 0.0  ;;  %v2322_v63 = vmul.f32 0.2, %v1862_v5  ;;  %v10566_v13 = vpop.f32.mrf.mxu1 }
 0x22d   : > { %vm2196_vm12 = vcmp.gt.f32.partialorder %v2055_v3, 0.0  ;;  %v2324_v22 = vmul.f32 0.2, %v2055_v3  ;;  %4452 = vmatprep.mubr.bf16.mxu1 %v10546_v24  ;;  %4260 = vmatmul.mubr.bf16.gmra.mxu0 %v10540_v56  ;;  %vm2197_vm13 = vcmp.gt.f32.partialorder %v1864_v18, 0.0  ;;  %v2325_v58 = vmul.f32 0.2, %v1864_v18  ;;  %v10564_v37 = vpop.f32.mrf.mxu0 }
 0x22e   : > { %vm2199_vm14 = vcmp.gt.f32.partialorder %v2057_v38, 0.0  ;;  %v2327_v1 = vmul.f32 0.2, %v2057_v38  ;;  %4453 = vmatmul.mubr.bf16.gmra.mxu1 %v10542_v42  ;;  %v2451_v12 = vsel %vm2195_vm10, %v2053_v8, %v2323_v23  ;;  %vm2198_vm15 = vcmp.gt.f32.partialorder %v1866_v43, 0.0  ;;  %v2076_v42 = vpop.f32.mrf.mxu1 }
 0x22f   : > { %v2326_v14 = vmul.f32 0.2, %v1866_v43  ;;  %vm2200_vm0 = vcmp.gt.f32.partialorder %v2059_v33, 0.0  ;;  %v2453_v20 = vsel %vm2197_vm13, %v1864_v18, %v2325_v58  ;;  %v2328_v16 = vmul.f32 0.2, %v2059_v33  ;;  %v1883_v23 = vpop.f32.mrf.mxu0 }
 0x230   : > { %v2455_v6 = vsel %vm2199_vm14, %v2057_v38, %v2327_v1  ;;  %v1870_v60 = vadd.f32 %v1869_v48, %v10012_v25  ;;  %v2450_v61 = vsel %vm2194_vm11, %v1862_v5, %v2322_v63  ;;  %v2452_v29 = vsel %vm2196_vm12, %v2055_v3, %v2324_v22 }
 0x231   : > { %v2454_v56 = vsel %vm2198_vm15, %v1866_v43, %v2326_v14  ;;  %v2063_v8 = vadd.f32 %v10529_v34, %v10016_v26  ;;  %v2456_v36 = vsel %vm2200_vm0, %v2059_v33, %v2328_v16  ;;  %v10575_v18 = vpack.c.bf16 %v2453_v20, %v2449_v15  ;;  %v10583_v3 = vpop.f32.mrf.mxu0  ;;  %v10585_v43 = vpop.f32.mrf.mxu1 }
 0x232   : > { %v10573_v24 = vpack.c.bf16 %v2454_v56, %v2450_v61  ;;  %vm2201_vm1 = vcmp.gt.f32.partialorder %v1870_v60, 0.0  ;;  %v2329_v57 = vmul.f32 0.2, %v1870_v60  ;;  %v10577_v38 = vpack.c.bf16 %v2455_v6, %v2451_v12 }
 0x233   : > { %13705 = vst [vmem:[#allocation34_spill] sm:$0xff] %v10575_v18  ;;  %v10579_v48 = vpack.c.bf16 %v2456_v36, %v2452_v29  ;;  %v1872_v5 = vadd.f32 %v10533_v19, %v10019_v30  ;;  %v2331_v34 = vmul.f32 0.2, %v2063_v8  ;;  %v2065_v56 = vadd.f32 %v10535_v51, %v10023_v28  ;;  %v10595_v19 = vpop.f32.mrf.mxu0  ;;  %v10597_v58 = vpop.f32.mrf.mxu1 }
 0x234   : > { %13704 = vst [vmem:[#allocation29_spill] sm:$0xff] %v10573_v24  ;;  %13706 = vst [vmem:[#allocation35_spill] sm:$0xff] %v10577_v38  ;;  %v1874_v33 = vadd.f32 %v1873_v53, %v10012_v25  ;;  %v2067_v15 = vadd.f32 %v2066_v31, %v10016_v26  ;;  %4269 = vmatprep.mubr.bf16.mxu0 %v10573_v24  ;;  %v2457_v63 = vsel %vm2201_vm1, %v1870_v60, %v2329_v57 }
 0x235   : > { %13707 = vst [vmem:[#allocation36_spill] sm:$0xff] %v10579_v48  ;;  %vm2203_vm2 = vcmp.gt.f32.partialorder %v2063_v8, 0.0  ;;  %v2330_v36 = vmul.f32 0.2, %v1872_v5  ;;  %v1876_v22 = vadd.f32 %v1875_v17, %v10019_v30  ;;  %4462 = vmatprep.mubr.bf16.mxu1 %v10579_v48  ;;  %4270 = vmatmul.mubr.bf16.gmra.mxu0 %v10575_v18  ;;  %vm2202_vm3 = vcmp.gt.f32.partialorder %v1872_v5, 0.0  ;;  %v10600_v31 = vpop.f32.mrf.mxu0  ;;  %v10602_v17 = vpop.f32.mrf.mxu1 }
 0x236   : > { %v2332_v51 = vmul.f32 0.2, %v2065_v56  ;;  %vm2205_vm4 = vcmp.gt.f32.partialorder %v1874_v33, 0.0  ;;  %v2333_v53 = vmul.f32 0.2, %v1874_v33  ;;  %4463 = vmatmul.mubr.bf16.gmra.mxu1 %v10577_v38  ;;  %vm2204_vm5 = vcmp.gt.f32.partialorder %v2065_v56, 0.0 }
 0x237   : > { %vm2207_vm6 = vcmp.gt.f32.partialorder %v2067_v15, 0.0  ;;  %v2335_v57 = vmul.f32 0.2, %v2067_v15  ;;  %vm2206_vm7 = vcmp.gt.f32.partialorder %v1876_v22, 0.0  ;;  %v2459_v1 = vsel %vm2203_vm2, %v2063_v8, %v2331_v34  ;;  %v10611_v29 = vpop.f32.mrf.mxu0  ;;  %v10613_v38 = vpop.f32.mrf.mxu1 }
 0x238   : > { %v2461_v12 = vsel %vm2205_vm4, %v1874_v33, %v2333_v53  ;;  %v2334_v14 = vmul.f32 0.2, %v1876_v22  ;;  %v2069_v20 = vadd.f32 %v10549_v45, %v10023_v28  ;;  %v2458_v6 = vsel %vm2202_vm3, %v1872_v5, %v2330_v36 }
 0x239   : > { %v2463_v16 = vsel %vm2207_vm6, %v2067_v15, %v2335_v57  ;;  %v1880_v60 = vadd.f32 %v10558_v21, %v10012_v25  ;;  %v2073_v61 = vadd.f32 %v10560_v32, %v10016_v26  ;;  %v2460_v18 = vsel %vm2204_vm5, %v2065_v56, %v2332_v51  ;;  %v10620_v15 = vpop.f32.mrf.mxu0  ;;  %v10622_v21 = vpop.f32.mrf.mxu1 }
 0x23a   : > { %v2462_v8 = vsel %vm2206_vm7, %v1876_v22, %v2334_v14  ;;  %vm2208_vm8 = vcmp.gt.f32.partialorder %v2069_v20, 0.0  ;;  %v2336_v34 = vmul.f32 0.2, %v2069_v20  ;;  %v10616_v33 = vpack.c.bf16 %v2461_v12, %v2457_v63 }
 0x23b   : > { %v10618_v45 = vpack.c.bf16 %v2462_v8, %v2458_v6  ;;  %vm2209_vm9 = vcmp.gt.f32.partialorder %v1880_v60, 0.0  ;;  %v2337_v5 = vmul.f32 0.2, %v1880_v60  ;;  %v10624_v32 = vpack.c.bf16 %v2463_v16, %v2459_v1  ;;  %v10635_v12 = vpop.f32.mrf.mxu0  ;;  %v10637_v1 = vpop.f32.mrf.mxu1 }
 0x23c   : > { %13708 = vst [vmem:[#allocation37_spill] sm:$0xff] %v10616_v33  ;;  %v2464_v36 = vsel %vm2208_vm8, %v2069_v20, %v2336_v34  ;;  %v1882_v53 = vadd.f32 %v10564_v37, %v10019_v30  ;;  %v2075_v56 = vadd.f32 %v10566_v13, %v10023_v28  ;;  %v2339_v63 = vmul.f32 0.2, %v2073_v61 }
 0x23d   : > { %13709 = vst [vmem:[#allocation38_spill] sm:$0xff] %v10618_v45  ;;  %13710 = vst [vmem:[#allocation39_spill] sm:$0xff] %v10624_v32  ;;  %v10630_v22 = vpack.c.bf16 %v2464_v36, %v2460_v18  ;;  %v1884_v51 = vadd.f32 %v1883_v23, %v10012_v25  ;;  %v2077_v57 = vadd.f32 %v2076_v42, %v10016_v26  ;;  %4279 = vmatprep.mubr.bf16.mxu0 %v10618_v45  ;;  %v10641_v23 = vpop.f32.mrf.mxu0  ;;  %v10643_v42 = vpop.f32.mrf.mxu1 }
 0x23e   : > { %v2465_v14 = vsel %vm2209_vm9, %v1880_v60, %v2337_v5  ;;  %vm2211_vm10 = vcmp.gt.f32.partialorder %v2073_v61, 0.0  ;;  %vm2210_vm11 = vcmp.gt.f32.partialorder %v1882_v53, 0.0  ;;  %v2338_v37 = vmul.f32 0.2, %v1882_v53  ;;  %4280 = vmatmul.mubr.bf16.gmra.mxu0 %v10616_v33 }
 0x23f   : > { %13711 = vst [vmem:[#allocation40_spill] sm:$0xff] %v10630_v22  ;;  %vm2212_vm12 = vcmp.gt.f32.partialorder %v2075_v56, 0.0  ;;  %v2340_v13 = vmul.f32 0.2, %v2075_v56  ;;  %vm2213_vm13 = vcmp.gt.f32.partialorder %v1884_v51, 0.0  ;;  %4472 = vmatprep.mubr.bf16.mxu1 %v10630_v22  ;;  %vm2215_vm14 = vcmp.gt.f32.partialorder %v2077_v57, 0.0  ;;  %v10655_v36 = vpop.f32.mrf.mxu0  ;;  %v10657_v33 = vpop.f32.mrf.mxu1 }
 0x240   : > { %v2341_v18 = vmul.f32 0.2, %v1884_v51  ;;  %v2343_v20 = vmul.f32 0.2, %v2077_v57  ;;  %v1886_v6 = vadd.f32 %v10583_v3, %v10019_v30  ;;  %v2079_v16 = vadd.f32 %v10585_v43, %v10023_v28  ;;  %4473 = vmatmul.mubr.bf16.gmra.mxu1 %v10624_v32 }
 0x241   : > { %v2467_v60 = vsel %vm2211_vm10, %v2073_v61, %v2339_v63  ;;  %v1890_v34 = vadd.f32 %v10595_v19, %v10012_v25  ;;  %v2083_v5 = vadd.f32 %v10597_v58, %v10016_v26  ;;  %v2466_v3 = vsel %vm2210_vm11, %v1882_v53, %v2338_v37  ;;  %v1905_v19 = vpop.f32.mrf.mxu0 }
 0x242   : > { %v2469_v8 = vsel %vm2213_vm13, %v1884_v51, %v2341_v18  ;;  %v2468_v22 = vsel %vm2212_vm12, %v2075_v56, %v2340_v13  ;;  %vm2214_vm15 = vcmp.gt.f32.partialorder %v1886_v6, 0.0  ;;  %v2342_v43 = vmul.f32 0.2, %v1886_v6  ;;  %v2098_v51 = vpop.f32.mrf.mxu1 }
 0x243   : > { %v10661_v32 = vpack.c.bf16 %v2469_v8, %v2465_v14  ;;  %v2471_v61 = vsel %vm2215_vm14, %v2077_v57, %v2343_v20  ;;  %vm2216_vm0 = vcmp.gt.f32.partialorder %v2079_v16, 0.0  ;;  %v2344_v63 = vmul.f32 0.2, %v2079_v16  ;;  %v10670_v14 = vpop.f32.mrf.mxu0 }
 0x244   : > { %v2470_v18 = vsel %vm2214_vm15, %v1886_v6, %v2342_v43  ;;  %vm2217_vm1 = vcmp.gt.f32.partialorder %v1890_v34, 0.0  ;;  %v2345_v58 = vmul.f32 0.2, %v1890_v34  ;;  %v2347_v45 = vmul.f32 0.2, %v2083_v5  ;;  %v10678_v20 = vpop.f32.mrf.mxu1 }
 0x245   : > { %13712 = vst [vmem:[#allocation41_spill] sm:$0xff] %v10661_v32  ;;  %v10664_v48 = vpack.c.bf16 %v2470_v18, %v2466_v3  ;;  %v2472_v24 = vsel %vm2216_vm0, %v2079_v16, %v2344_v63  ;;  %v1892_v53 = vadd.f32 %v10600_v31, %v10019_v30  ;;  %v2085_v56 = vadd.f32 %v10602_v17, %v10023_v28 }
 0x246   : > { %v10672_v57 = vpack.c.bf16 %v2471_v61, %v2467_v60  ;;  %v10674_v37 = vpack.c.bf16 %v2472_v24, %v2468_v22  ;;  %vm2219_vm2 = vcmp.gt.f32.partialorder %v2083_v5, 0.0  ;;  %v1894_v13 = vadd.f32 %v10611_v29, %v10012_v25 }
 0x247   : > { %v2473_v6 = vsel %vm2217_vm1, %v1890_v34, %v2345_v58  ;;  %vm2218_vm3 = vcmp.gt.f32.partialorder %v1892_v53, 0.0  ;;  %v2346_v16 = vmul.f32 0.2, %v1892_v53  ;;  %v2348_v8 = vmul.f32 0.2, %v2085_v56  ;;  %4289 = vmatprep.mubr.bf16.mxu0 %v10664_v48  ;;  %v10692_v34 = vpop.f32.mrf.mxu0 }
 0x248   : > { %13713 = vst [vmem:[#allocation42_spill] sm:$0xff] %v10672_v57  ;;  %13714 = vst [vmem:[#allocation43_spill] sm:$0xff] %v10674_v37  ;;  %vm2221_vm4 = vcmp.gt.f32.partialorder %v1894_v13, 0.0  ;;  %v2349_v31 = vmul.f32 0.2, %v1894_v13  ;;  %v2087_v17 = vadd.f32 %v10613_v38, %v10016_v26  ;;  %v1896_v24 = vadd.f32 %v10620_v15, %v10019_v30  ;;  %4482 = vmatprep.mubr.bf16.mxu1 %v10674_v37  ;;  %v10694_v15 = vpop.f32.mrf.mxu1 }
 0x249   : > { %4290 = vmatmul.mubr.bf16.gmra.mxu0 %v10661_v32  ;;  %v2475_v29 = vsel %vm2219_vm2, %v2083_v5, %v2347_v45  ;;  %vm2220_vm5 = vcmp.gt.f32.partialorder %v2085_v56, 0.0  ;;  %v2089_v22 = vadd.f32 %v10622_v21, %v10023_v28  ;;  %4483 = vmatmul.mubr.bf16.gmra.mxu1 %v10672_v57  ;;  %v1900_v60 = vadd.f32 %v10635_v12, %v10012_v25  ;;  %v1913_v57 = vpop.f32.mrf.mxu0 }
 0x24a   : > { %v2477_v38 = vsel %vm2221_vm4, %v1894_v13, %v2349_v31  ;;  %vm2223_vm6 = vcmp.gt.f32.partialorder %v2087_v17, 0.0  ;;  %v2351_v3 = vmul.f32 0.2, %v2087_v17  ;;  %vm2222_vm7 = vcmp.gt.f32.partialorder %v1896_v24, 0.0 }
 0x24b   : > { %v2474_v43 = vsel %vm2218_vm3, %v1892_v53, %v2346_v16  ;;  %v2350_v45 = vmul.f32 0.2, %v1896_v24  ;;  %vm2224_vm8 = vcmp.gt.f32.partialorder %v2089_v22, 0.0  ;;  %v2352_v5 = vmul.f32 0.2, %v2089_v22 }
 0x24c   : > { %v2476_v61 = vsel %vm2220_vm5, %v2085_v56, %v2348_v8  ;;  %v10697_v21 = vpack.c.bf16 %v2477_v38, %v2473_v6  ;;  %v2479_v63 = vsel %vm2223_vm6, %v2087_v17, %v2351_v3  ;;  %v2093_v12 = vadd.f32 %v10637_v1, %v10016_v26  ;;  %v2106_v56 = vpop.f32.mrf.mxu1 }
 0x24d   : > { %v2478_v18 = vsel %vm2222_vm7, %v1896_v24, %v2350_v45  ;;  %v2480_v58 = vsel %vm2224_vm8, %v2089_v22, %v2352_v5  ;;  %v2353_v13 = vmul.f32 0.2, %v1900_v60  ;;  %v1902_v31 = vadd.f32 %v10641_v23, %v10019_v30 }
 0x24e   : > { %13715 = vst [vmem:[#allocation44_spill] sm:$0xff] %v10697_v21  ;;  %v10703_v32 = vpack.c.bf16 %v2479_v63, %v2475_v29  ;;  %v10705_v53 = vpack.c.bf16 %v2478_v18, %v2474_v43  ;;  %v10707_v16 = vpack.c.bf16 %v2480_v58, %v2476_v61  ;;  %vm2225_vm9 = vcmp.gt.f32.partialorder %v1900_v60, 0.0  ;;  %v2786_v61 = vld [vmem:[#allocation2 + $0x6c8] sm:$0xff] }
 0x24f   : > { %vm2227_vm10 = vcmp.gt.f32.partialorder %v2093_v12, 0.0  ;;  %v2355_v6 = vmul.f32 0.2, %v2093_v12  ;;  %v2354_v8 = vmul.f32 0.2, %v1902_v31  ;;  %v2095_v1 = vadd.f32 %v10643_v42, %v10023_v28  ;;  %v1915_v42 = vpop.f32.mrf.mxu0  ;;  %v2790_v63 = vld [vmem:[#allocation2 + $0x6e8] sm:$0xff] }
 0x250   : > { %13716 = vst [vmem:[#allocation45_spill] sm:$0xff] %v10703_v32  ;;  %13717 = vst [vmem:[#allocation46_spill] sm:$0xff] %v10705_v53  ;;  %v1904_v17 = vadd.f32 %v10655_v36, %v10012_v25  ;;  %v2097_v23 = vadd.f32 %v10657_v33, %v10016_v26  ;;  %v1906_v24 = vadd.f32 %v1905_v19, %v10019_v30  ;;  %4299 = vmatprep.mubr.bf16.mxu0 %v10705_v53  ;;  %v2108_v33 = vpop.f32.mrf.mxu1 }
 0x251   : > { %13718 = vst [vmem:[#allocation47_spill] sm:$0xff] %v10707_v16  ;;  %v2099_v29 = vadd.f32 %v2098_v51, %v10023_v28  ;;  %v2481_v22 = vsel %vm2225_vm9, %v1900_v60, %v2353_v13  ;;  %vm2226_vm11 = vcmp.gt.f32.partialorder %v1902_v31, 0.0  ;;  %vm2228_vm12 = vcmp.gt.f32.partialorder %v2095_v1, 0.0  ;;  %4492 = vmatprep.mubr.bf16.mxu1 %v10707_v16  ;;  %4300 = vmatmul.mubr.bf16.gmra.mxu0 %v10697_v21 }
 0x252   : > { %v2356_v38 = vmul.f32 0.2, %v2095_v1  ;;  %vm2229_vm13 = vcmp.gt.f32.partialorder %v1904_v17, 0.0  ;;  %v2357_v36 = vmul.f32 0.2, %v1904_v17  ;;  %vm2231_vm14 = vcmp.gt.f32.partialorder %v2097_v23, 0.0  ;;  %4493 = vmatmul.mubr.bf16.gmra.mxu1 %v10703_v32 }
 0x253   : > { %v2359_v3 = vmul.f32 0.2, %v2097_v23  ;;  %v2483_v19 = vsel %vm2227_vm10, %v2093_v12, %v2355_v6  ;;  %vm2230_vm15 = vcmp.gt.f32.partialorder %v1906_v24, 0.0  ;;  %v2358_v51 = vmul.f32 0.2, %v1906_v24  ;;  %v1919_v6 = vpop.f32.mrf.mxu0 }
 0x254   : > { %vm2232_vm0 = vcmp.gt.f32.partialorder %v2099_v29, 0.0  ;;  %v2482_v60 = vsel %vm2226_vm11, %v1902_v31, %v2354_v8  ;;  %v2484_v43 = vsel %vm2228_vm12, %v2095_v1, %v2356_v38  ;;  %v2360_v45 = vmul.f32 0.2, %v2099_v29  ;;  %v2112_v8 = vpop.f32.mrf.mxu1 }
 0x255   : > { %v1910_v5 = vadd.f32 %v10670_v14, %v10012_v25  ;;  %v2485_v18 = vsel %vm2229_vm13, %v1904_v17, %v2357_v36  ;;  %v2487_v58 = vsel %vm2231_vm14, %v2097_v23, %v2359_v3  ;;  %v2486_v13 = vsel %vm2230_vm15, %v1906_v24, %v2358_v51 }
 0x256   : > { %v2103_v12 = vadd.f32 %v10678_v20, %v10016_v26  ;;  %v10729_v32 = vpack.c.bf16 %v2486_v13, %v2482_v60  ;;  %v2488_v21 = vsel %vm2232_vm0, %v2099_v29, %v2360_v45  ;;  %v8211_v38 = vcombine.low %v2786_v61, %v2790_v63  ;;  %v2654_v60 = vld [vmem:[#allocation2 + $0x2a8] sm:$0xff] }
 0x257   : > { %vm2233_vm1 = vcmp.gt.f32.partialorder %v1910_v5, 0.0  ;;  %v2361_v31 = vmul.f32 0.2, %v1910_v5  ;;  %v10731_v1 = vpack.c.bf16 %v2488_v21, %v2484_v43  ;;  %v10733_v16 = vpack.c.bf16 %v2485_v18, %v2481_v22  ;;  %v1921_v22 = vpop.f32.mrf.mxu0  ;;  %v2778_v18 = vld [vmem:[#allocation2 + $0x688] sm:$0xff] }
 0x258   : > { %13719 = vst [vmem:[#allocation48_spill] sm:$0xff] %v10729_v32  ;;  %vm2235_vm2 = vcmp.gt.f32.partialorder %v2103_v12, 0.0  ;;  %v2363_v14 = vmul.f32 0.2, %v2103_v12  ;;  %v8212_v17 = vcombine.high %v2786_v61, %v2790_v63  ;;  %v1912_v23 = vadd.f32 %v10692_v34, %v10019_v30  ;;  %4309 = vmatprep.mubr.bf16.mxu0 %v10729_v32 }
 0x259   : > { %13720 = vst [vmem:[#allocation49_spill] sm:$0xff] %v10731_v1  ;;  %13721 = vst [vmem:[#allocation50_spill] sm:$0xff] %v10733_v16  ;;  %v2105_v20 = vadd.f32 %v10694_v15, %v10023_v28  ;;  %v10740_v24 = vpack.c.bf16 %v2487_v58, %v2483_v19  ;;  %v1914_v29 = vadd.f32 %v1913_v57, %v10012_v25  ;;  %4502 = vmatprep.mubr.bf16.mxu1 %v10731_v1  ;;  %v2650_v15 = vld [vmem:[#allocation2 + $0x288] sm:$0xff]  ;;  %v2114_v19 = vpop.f32.mrf.mxu1  ;;  %v1923_v13 = vpop.f32.mrf.mxu0 }
 0x25a   : > { %v2107_v21 = vadd.f32 %v2106_v56, %v10016_v26  ;;  %v1916_v36 = vadd.f32 %v1915_v42, %v10019_v30  ;;  %v2489_v3 = vsel %vm2233_vm1, %v1910_v5, %v2361_v31  ;;  %v2491_v51 = vsel %vm2235_vm2, %v2103_v12, %v2363_v14  ;;  %4750 = vmatprep.subr.bf16.mxu1 %v8212_v17  ;;  %v2782_v58 = vld [vmem:[#allocation2 + $0x6a8] sm:$0xff] }
 0x25b   : > { %13722 = vst [vmem:[#allocation51_spill] sm:$0xff] %v10740_v24  ;;  %vm2234_vm3 = vcmp.gt.f32.partialorder %v1912_v23, 0.0  ;;  %v2362_v34 = vmul.f32 0.2, %v1912_v23  ;;  %4310 = vmatmul.mubr.bf16.gmra.mxu0 %v10733_v16  ;;  %4751 = vmatpush2.bf16.msra.mxu1 %v8211_v38  ;;  %vm2237_vm4 = vcmp.gt.f32.partialorder %v1914_v29, 0.0  ;;  %vm2236_vm6 = vcmp.gt.f32.partialorder %v2105_v20, 0.0  ;;  %v2116_v17 = vpop.f32.mrf.mxu1 }
 0x25c   : > { %v2365_v57 = vmul.f32 0.2, %v1914_v29  ;;  %vm2239_vm5 = vcmp.gt.f32.partialorder %v2107_v21, 0.0  ;;  %v2367_v56 = vmul.f32 0.2, %v2107_v21  ;;  %vm2238_vm7 = vcmp.gt.f32.partialorder %v1916_v36, 0.0  ;;  %4503 = vmatmul.mubr.bf16.gmra.mxu1 %v10740_v24 }
 0x25d   : > { %v2364_v42 = vmul.f32 0.2, %v2105_v20  ;;  %v2366_v43 = vmul.f32 0.2, %v1916_v36  ;;  %v2490_v45 = vsel %vm2234_vm3, %v1912_v23, %v2362_v34  ;;  %v2109_v61 = vadd.f32 %v2108_v33, %v10023_v28 }
 0x25e   : > { %v2493_v5 = vsel %vm2237_vm4, %v1914_v29, %v2365_v57  ;;  %v8075_v63 = vcombine.low %v2650_v15, %v2654_v60  ;;  %v2495_v31 = vsel %vm2239_vm5, %v2107_v21, %v2367_v56  ;;  %v8076_v38 = vcombine.high %v2650_v15, %v2654_v60  ;;  %v1925_v15 = vpop.f32.mrf.mxu0  ;;  %v2642_v57 = vld [vmem:[#allocation2 + $0x248] sm:$0xff] }
 0x25f   : > { %v10751_v12 = vpack.c.bf16 %v2493_v5, %v2489_v3  ;;  %v2494_v14 = vsel %vm2238_vm7, %v1916_v36, %v2366_v43  ;;  %vm2240_vm8 = vcmp.gt.f32.partialorder %v2109_v61, 0.0  ;;  %v2368_v1 = vmul.f32 0.2, %v2109_v61  ;;  %v2646_v56 = vld [vmem:[#allocation2 + $0x268] sm:$0xff] }
 0x260   : > { %v10753_v16 = vpack.c.bf16 %v2494_v14, %v2490_v45  ;;  %v10756_v24 = vadd.f32 %v1919_v6, %v10012_v25  ;;  %4559 = vmatprep.subr.bf16.mxu0 %v8076_v38  ;;  %v10759_v33 = vadd.f32 %v2112_v8, %v10016_v26  ;;  %v8203_v23 = vcombine.low %v2778_v18, %v2782_v58  ;;  %v2118_v8 = vpop.f32.mrf.mxu1  ;;  %v2770_v5 = vld [vmem:[#allocation2 + $0x648] sm:$0xff] }
 0x261   : > { %13723 = vst [vmem:[#allocation52_spill] sm:$0xff] %v10751_v12  ;;  %v8204_v29 = vcombine.high %v2778_v18, %v2782_v58  ;;  %v1922_v3 = vadd.f32 %v1921_v22, %v10019_v30  ;;  %v2492_v21 = vsel %vm2236_vm6, %v2105_v20, %v2364_v42  ;;  %v2496_v36 = vsel %vm2240_vm8, %v2109_v61, %v2368_v1  ;;  %v2774_v61 = vld [vmem:[#allocation2 + $0x668] sm:$0xff] }
 0x262   : > { %13724 = vst [vmem:[#allocation53_spill] sm:$0xff] %v10753_v16  ;;  %4560 = vmatpush2.bf16.msra.mxu0 %v8075_v63  ;;  %v2115_v34 = vadd.f32 %v2114_v19, %v10023_v28  ;;  %4319 = vmatprep.mubr.bf16.mxu0 %v10753_v16  ;;  %v10765_v60 = vpack.c.bf16 %v2495_v31, %v2491_v51  ;;  %vm2241_vm9 = vcmp.gt.f32.partialorder %v10756_v24, 0.0  ;;  %v2369_v1 = vmul.f32 0.2, %v10756_v24  ;;  %v2634_v31 = vld [vmem:[#allocation2 + $0x208] sm:$0xff] }
 0x263   : > { %v10767_v6 = vpack.c.bf16 %v2496_v36, %v2492_v21  ;;  %4752 = vmatprep.subr.bf16.mxu1 %v8204_v29  ;;  %4320 = vmatmul.mubr.bf16.gmra.mxu0 %v10751_v12  ;;  %vm2243_vm10 = vcmp.gt.f32.partialorder %v10759_v33, 0.0  ;;  %v2370_v20 = vmul.f32 0.2, %v1922_v3  ;;  %v1924_v51 = vadd.f32 %v1923_v13, %v10012_v25  ;;  %v2638_v14 = vld [vmem:[#allocation2 + $0x228] sm:$0xff] }
 0x264   : > { %13725 = vst [vmem:[#allocation54_spill] sm:$0xff] %v10765_v60  ;;  %4753 = vmatpush2.bf16.msra.mxu1 %v8203_v23  ;;  %v2372_v22 = vmul.f32 0.2, %v2115_v34  ;;  %v2117_v19 = vadd.f32 %v2116_v17, %v10016_v26  ;;  %v1926_v42 = vadd.f32 %v1925_v15, %v10019_v30  ;;  %vm2242_vm11 = vcmp.gt.f32.partialorder %v1922_v3, 0.0  ;;  %v2762_v21 = vld [vmem:[#allocation2 + $0x608] sm:$0xff] }
 0x265   : > { %13726 = vst [vmem:[#allocation55_spill] sm:$0xff] %v10767_v6  ;;  %4512 = vmatprep.mubr.bf16.mxu1 %v10767_v6  ;;  %vm2244_vm12 = vcmp.gt.f32.partialorder %v2115_v34, 0.0  ;;  %v2119_v43 = vadd.f32 %v2118_v8, %v10023_v28  ;;  %v8067_v45 = vcombine.low %v2642_v57, %v2646_v56  ;;  %vm2245_vm13 = vcmp.gt.f32.partialorder %v1924_v51, 0.0  ;;  %v2766_v36 = vld [vmem:[#allocation2 + $0x628] sm:$0xff] }
 0x266   : > { %4513 = vmatmul.mubr.bf16.gmra.mxu1 %v10765_v60  ;;  %v2373_v63 = vmul.f32 0.2, %v1924_v51  ;;  %vm2247_vm14 = vcmp.gt.f32.partialorder %v2117_v19, 0.0  ;;  %v2375_v18 = vmul.f32 0.2, %v2117_v19  ;;  %vm2246_vm15 = vcmp.gt.f32.partialorder %v1926_v42, 0.0 }
 0x267   : > { %v2374_v25 = vmul.f32 0.2, %v1926_v42  ;;  %vm2248_vm0 = vcmp.gt.f32.partialorder %v2119_v43, 0.0  ;;  %v2376_v26 = vmul.f32 0.2, %v2119_v43  ;;  %v2498_v58 = vsel %vm2242_vm11, %v1922_v3, %v2370_v20  ;;  %v2627_v3 = vld [vmem:[#allocation2 + $0x1d0] sm:$0xff] }
 0x268   : > { %v2371_v30 = vmul.f32 0.2, %v10759_v33  ;;  %v2500_v13 = vsel %vm2244_vm12, %v2115_v34, %v2372_v22  ;;  %v8068_v28 = vcombine.high %v2642_v57, %v2646_v56  ;;  %v2501_v38 = vsel %vm2245_vm13, %v1924_v51, %v2373_v63  ;;  %v2631_v20 = vld [vmem:[#allocation2 + $0x1f0] sm:$0xff] }
 0x269   : > { %v2502_v17 = vsel %vm2246_vm15, %v1926_v42, %v2374_v25  ;;  %v2504_v23 = vsel %vm2248_vm0, %v2119_v43, %v2376_v26  ;;  %v8195_v29 = vcombine.low %v2770_v5, %v2774_v61  ;;  %v2503_v15 = vsel %vm2247_vm14, %v2117_v19, %v2375_v18  ;;  %v2755_v22 = vld [vmem:[#allocation2 + $0x5d0] sm:$0xff] }
 0x26a   : > { %v10783_v8 = vpack.c.bf16 %v2502_v17, %v2498_v58  ;;  %v10785_v60 = vpack.c.bf16 %v2504_v23, %v2500_v13  ;;  %4561 = vmatprep.subr.bf16.mxu0 %v8068_v28  ;;  %v8196_v12 = vcombine.high %v2770_v5, %v2774_v61  ;;  %v2497_v34 = vsel %vm2241_vm9, %v10756_v24, %v2369_v1  ;;  %v2759_v51 = vld [vmem:[#allocation2 + $0x5f0] sm:$0xff] }
 0x26b   : > { %4562 = vmatpush2.bf16.msra.mxu0 %v8067_v45  ;;  %v8059_v57 = vcombine.low %v2634_v31, %v2638_v14  ;;  %v8060_v56 = vcombine.high %v2634_v31, %v2638_v14  ;;  %v2499_v19 = vsel %vm2243_vm10, %v10759_v33, %v2371_v30  ;;  %v10793_v42 = vpack.c.bf16 %v2501_v38, %v2497_v34  ;;  %v2623_v33 = vld [vmem:[#allocation2 + $0x1b0] sm:$0xff] }
 0x26c   : > { %13727 = vst [vmem:[#allocation56_spill] sm:$0xff] %v10783_v8  ;;  %13728 = vst [vmem:[#allocation57_spill] sm:$0xff] %v10785_v60  ;;  %4754 = vmatprep.subr.bf16.mxu1 %v8196_v12  ;;  %4329 = vmatprep.mubr.bf16.mxu0 %v10783_v8  ;;  %v8188_v43 = vcombine.high %v2762_v21, %v2766_v36  ;;  %v10796_v5 = vpack.c.bf16 %v2503_v15, %v2499_v19  ;;  %v2619_v12 = vld [vmem:[#allocation2 + $0x190] sm:$0xff] }
 0x26d   : > { %13729 = vst [vmem:[#allocation58_spill] sm:$0xff] %v10793_v42  ;;  %4755 = vmatpush2.bf16.msra.mxu1 %v8195_v29  ;;  %4522 = vmatprep.mubr.bf16.mxu1 %v10785_v60  ;;  %v8187_v24 = vcombine.low %v2762_v21, %v2766_v36  ;;  %v8054_v1 = vcombine.high %v2627_v3, %v2631_v20  ;;  %v2747_v63 = vld [vmem:[#allocation2 + $0x590] sm:$0xff] }
 0x26e   : > { %13730 = vst [vmem:[#allocation59_spill] sm:$0xff] %v10796_v5  ;;  %4563 = vmatprep.subr.bf16.mxu0 %v8060_v56  ;;  %4330 = vmatmul.mubr.bf16.gmra.mxu0 %v10793_v42  ;;  %v8182_v45 = vcombine.high %v2755_v22, %v2759_v51  ;;  %v8053_v61 = vcombine.low %v2627_v3, %v2631_v20  ;;  %v2751_v18 = vld [vmem:[#allocation2 + $0x5b0] sm:$0xff]  ;;  %v10807_v3 = vld [vmem:[#allocation2 + $0x1d8] sm:$0xff] }
 0x26f   : > { %4523 = vmatmul.mubr.bf16.gmra.mxu1 %v10796_v5  ;;  %4564 = vmatpush2.bf16.msra.mxu0 %v8059_v57  ;;  %v8181_v25 = vcombine.low %v2755_v22, %v2759_v51  ;;  %v8046_v26 = vcombine.high %v2619_v12, %v2623_v33  ;;  %v2611_v30 = vld [vmem:[#allocation2 + $0x150] sm:$0xff]  ;;  %v8174_v13 = vcombine.high %v2747_v63, %v2751_v18  ;;  %v10809_v57 = vld [vmem:[#allocation2 + $0x1f8] sm:$0xff] }
 0x270   : > { %4565 = vmatprep.mubr.bf16.mxu0 %v10195_v46  ;;  %4756 = vmatprep.subr.bf16.mxu1 %v8188_v43  ;;  %v2615_v58 = vld [vmem:[#allocation2 + $0x170] sm:$0xff]  ;;  %v8045_v28 = vcombine.low %v2619_v12, %v2623_v33  ;;  %v8173_v17 = vcombine.low %v2747_v63, %v2751_v18  ;;  %v10811_v56 = vld [vmem:[#allocation2 + $0x5d8] sm:$0xff] }
 0x271   : > { %4758 = vmatprep.mubr.bf16.mxu1 %v10200_v7  ;;  %4757 = vmatpush2.bf16.msra.mxu1 %v8187_v24  ;;  %v2739_v31 = vld [vmem:[#allocation2 + $0x550] sm:$0xff]  ;;  %v8038_v38 = vcombine.high %v2611_v30, %v2615_v58  ;;  %v8037_v34 = vcombine.low %v2611_v30, %v2615_v58  ;;  %v10813_v20 = vld [vmem:[#allocation2 + $0x5f8] sm:$0xff] }
 0x272   : > { %4919 = vmatprep.subr.bf16.mxu0 %v8054_v1  ;;  %5112 = vmatprep.subr.bf16.mxu1 %v8182_v45  ;;  %v2743_v14 = vld [vmem:[#allocation2 + $0x570] sm:$0xff] }
 0x273   : > { %v8166_v23 = vcombine.high %v2739_v31, %v2743_v14  ;;  %v2603_v29 = vld [vmem:[#allocation2 + $0x110] sm:$0xff]  ;;  %v8165_v22 = vcombine.low %v2739_v31, %v2743_v14 }
 0x274   : > { %v2607_v21 = vld [vmem:[#allocation2 + $0x130] sm:$0xff] }
 0x275   : > { %v2731_v36 = vld [vmem:[#allocation2 + $0x510] sm:$0xff]  ;;  %v8030_v51 = vcombine.high %v2603_v29, %v2607_v21 }
 0x276   : > { %4566 = vmatmul.mubr.bf16.vlgmr.msra.gmra.mxu0 %v10193_v9  ;;  %v2735_v15 = vld [vmem:[#allocation2 + $0x530] sm:$0xff] }
 0x277   : > { %4759 = vmatmul.mubr.bf16.vlgmr.msra.gmra.mxu1 %v10198_v4  ;;  %4920 = vmatpush1.bf16.msra.mxu0 %v8053_v61  ;;  %v8158_v19 = vcombine.high %v2731_v36, %v2735_v15  ;;  %v2595_v43 = vld [vmem:[#allocation2 + $0xd0] sm:$0xff]  ;;  %v8029_v61 = vcombine.low %v2603_v29, %v2607_v21  ;;  %v8157_v63 = vcombine.low %v2731_v36, %v2735_v15 }
 0x278   : > { %4575 = vmatprep.mubr.bf16.mxu0 %v10232_v2  ;;  %4768 = vmatprep.mubr.bf16.mxu1 %v10238_v41  ;;  %v2599_v24 = vld [vmem:[#allocation2 + $0xf0] sm:$0xff] }
 0x279   : > { %5113 = vmatpush1.bf16.msra.mxu1 %v8181_v25  ;;  %4921 = vmatprep.subr.bf16.mxu0 %v8046_v26  ;;  %v2723_v1 = vld [vmem:[#allocation2 + $0x4d0] sm:$0xff]  ;;  %v8022_v18 = vcombine.high %v2595_v43, %v2599_v24 }
 0x27a   : > { %5114 = vmatprep.subr.bf16.mxu1 %v8174_v13  ;;  %v2727_v45 = vld [vmem:[#allocation2 + $0x4f0] sm:$0xff] }
 0x27b   : > { %4922 = vmatpush1.bf16.msra.mxu0 %v8045_v28  ;;  %v8150_v25 = vcombine.high %v2723_v1, %v2727_v45  ;;  %v2587_v26 = vld [vmem:[#allocation2 + $0x90] sm:$0xff]  ;;  %v8021_v28 = vcombine.low %v2595_v43, %v2599_v24  ;;  %v8149_v31 = vcombine.low %v2723_v1, %v2727_v45 }
 0x27c   : > { %4923 = vmatprep.subr.bf16.mxu0 %v8038_v38  ;;  %v2591_v30 = vld [vmem:[#allocation2 + $0xb0] sm:$0xff] }
 0x27d   : > { %5115 = vmatpush1.bf16.msra.mxu1 %v8173_v17  ;;  %v2715_v58 = vld [vmem:[#allocation2 + $0x490] sm:$0xff]  ;;  %v8014_v14 = vcombine.high %v2587_v26, %v2591_v30  ;;  %v8013_v36 = vcombine.low %v2587_v26, %v2591_v30 }
 0x27e   : > { %4576 = vmatmul.mubr.bf16.gmra.mxu0 %v10230_v0  ;;  %5116 = vmatprep.subr.bf16.mxu1 %v8166_v23  ;;  %v2719_v13 = vld [vmem:[#allocation2 + $0x4b0] sm:$0xff] }
 0x27f   : > { %4769 = vmatmul.mubr.bf16.gmra.mxu1 %v10246_v49  ;;  %4585 = vmatprep.mubr.bf16.mxu0 %v10283_v44  ;;  %v8142_v38 = vcombine.high %v2715_v58, %v2719_v13  ;;  %v2579_v17 = vld [vmem:[#allocation2 + $0x50] sm:$0xff]  ;;  %v8141_v15 = vcombine.low %v2715_v58, %v2719_v13 }
 0x280   : > { %4778 = vmatprep.mubr.bf16.mxu1 %v10302_v59  ;;  %4924 = vmatpush1.bf16.msra.mxu0 %v8037_v34  ;;  %v2583_v23 = vld [vmem:[#allocation2 + $0x70] sm:$0xff] }
 0x281   : > { %5117 = vmatpush1.bf16.msra.mxu1 %v8165_v22  ;;  %4925 = vmatprep.subr.bf16.mxu0 %v8030_v51  ;;  %v2707_v29 = vld [vmem:[#allocation2 + $0x450] sm:$0xff]  ;;  %v8006_v34 = vcombine.high %v2579_v17, %v2583_v23  ;;  %v8005_v1 = vcombine.low %v2579_v17, %v2583_v23 }
 0x282   : > { %5118 = vmatprep.subr.bf16.mxu1 %v8158_v19  ;;  %v2711_v21 = vld [vmem:[#allocation2 + $0x470] sm:$0xff] }
 0x283   : > { %v8134_v22 = vcombine.high %v2707_v29, %v2711_v21  ;;  %v2571_v51 = vld [vmem:[#allocation2 + $0x10] sm:$0xff]  ;;  %v8133_v45 = vcombine.low %v2707_v29, %v2711_v21 }
 0x284   : > { %4926 = vmatpush1.bf16.msra.mxu0 %v8029_v61  ;;  %v2575_v19 = vld [vmem:[#allocation2 + $0x30] sm:$0xff] }
 0x285   : > { %5119 = vmatpush1.bf16.msra.mxu1 %v8157_v63  ;;  %4927 = vmatprep.subr.bf16.mxu0 %v8022_v18  ;;  %v2699_v43 = vld [vmem:[#allocation2 + $0x410] sm:$0xff]  ;;  %v7998_v61 = vcombine.high %v2571_v51, %v2575_v19  ;;  %v7997_v58 = vcombine.low %v2571_v51, %v2575_v19 }
 0x286   : > { %4586 = vmatmul.mubr.bf16.gmra.mxu0 %v10280_v54  ;;  %5120 = vmatprep.subr.bf16.mxu1 %v8150_v25  ;;  %v2703_v24 = vld [vmem:[#allocation2 + $0x430] sm:$0xff] }
 0x287   : > { %4779 = vmatmul.mubr.bf16.gmra.mxu1 %v10291_v10  ;;  %4595 = vmatprep.mubr.bf16.mxu0 %v10343_v47  ;;  %v8126_v63 = vcombine.high %v2699_v43, %v2703_v24  ;;  %v2691_v18 = vld [vmem:[#allocation2 + $0x3d0] sm:$0xff]  ;;  %v8125_v13 = vcombine.low %v2699_v43, %v2703_v24 }
 0x288   : > { %4788 = vmatprep.mubr.bf16.mxu1 %v10347_v27  ;;  %4928 = vmatpush1.bf16.msra.mxu0 %v8021_v28  ;;  %v2695_v25 = vld [vmem:[#allocation2 + $0x3f0] sm:$0xff] }
 0x289   : > { %5121 = vmatpush1.bf16.msra.mxu1 %v8149_v31  ;;  %4929 = vmatprep.subr.bf16.mxu0 %v8014_v14  ;;  %v2819_v26 = vld [vmem:[#allocation2 + $0x7d0] sm:$0xff]  ;;  %v8118_v28 = vcombine.high %v2691_v18, %v2695_v25  ;;  %v8117_v29 = vcombine.low %v2691_v18, %v2695_v25 }
 0x28a   : > { %5122 = vmatprep.subr.bf16.mxu1 %v8142_v38  ;;  %v2823_v30 = vld [vmem:[#allocation2 + $0x7f0] sm:$0xff] }
 0x28b   : > { %v8246_v31 = vcombine.high %v2819_v26, %v2823_v30  ;;  %v2683_v14 = vld [vmem:[#allocation2 + $0x390] sm:$0xff]  ;;  %v8245_v21 = vcombine.low %v2819_v26, %v2823_v30 }
 0x28c   : > { %4930 = vmatpush1.bf16.msra.mxu0 %v8013_v36  ;;  %v2687_v38 = vld [vmem:[#allocation2 + $0x3b0] sm:$0xff] }
 0x28d   : > { %5123 = vmatpush1.bf16.msra.mxu1 %v8141_v15  ;;  %4931 = vmatprep.subr.bf16.mxu0 %v8006_v34  ;;  %v2811_v17 = vld [vmem:[#allocation2 + $0x790] sm:$0xff]  ;;  %v8110_v36 = vcombine.high %v2683_v14, %v2687_v38  ;;  %v8109_v43 = vcombine.low %v2683_v14, %v2687_v38 }
 0x28e   : > { %4596 = vmatmul.mubr.bf16.gmra.mxu0 %v10327_v11  ;;  %5124 = vmatprep.subr.bf16.mxu1 %v8134_v22  ;;  %v2815_v23 = vld [vmem:[#allocation2 + $0x7b0] sm:$0xff] }
 0x28f   : > { %4789 = vmatmul.mubr.bf16.gmra.mxu1 %v10335_v50  ;;  %4605 = vmatprep.mubr.bf16.mxu0 %v10386_v40  ;;  %v8238_v15 = vcombine.high %v2811_v17, %v2815_v23  ;;  %v2675_v34 = vld [vmem:[#allocation2 + $0x350] sm:$0xff]  ;;  %v8237_v24 = vcombine.low %v2811_v17, %v2815_v23  ;;  %v13733_v17 = vld [vmem:[#allocation18_spill] sm:$0xff]  ;;  %v2825_v23 = vld [vmem:[%s13288_s8] sm:$0xff] }
 0x290   : > { %4798 = vmatprep.mubr.bf16.mxu1 %v10388_v55  ;;  %4932 = vmatpush1.bf16.msra.mxu0 %v8005_v1  ;;  %v2679_v22 = vld [vmem:[#allocation2 + $0x370] sm:$0xff] }
 0x291   : > { %5125 = vmatpush1.bf16.msra.mxu1 %v8133_v45  ;;  %4933 = vmatprep.subr.bf16.mxu0 %v7998_v61  ;;  %v2803_v51 = vld [vmem:[#allocation2 + $0x750] sm:$0xff]  ;;  %v8102_v1 = vcombine.high %v2675_v34, %v2679_v22  ;;  %v8101_v26 = vcombine.low %v2675_v34, %v2679_v22 }
 0x292   : > { %5126 = vmatprep.subr.bf16.mxu1 %v8126_v63  ;;  %v2807_v19 = vld [vmem:[#allocation2 + $0x770] sm:$0xff] }
 0x293   : > { %v8230_v45 = vcombine.high %v2803_v51, %v2807_v19  ;;  %v2667_v61 = vld [vmem:[#allocation2 + $0x310] sm:$0xff]  ;;  %v8229_v30 = vcombine.low %v2803_v51, %v2807_v19  ;;  %v13735_v51 = vld [vmem:[#allocation10_spill] sm:$0xff] }
 0x294   : > { %4934 = vmatpush1.bf16.msra.mxu0 %v7997_v58  ;;  %v2671_v63 = vld [vmem:[#allocation2 + $0x330] sm:$0xff]  ;;  %v10843_v19 = vrot.slane %v2825_v23, %v13735_v51 }
 0x295   : > { %5127 = vmatpush1.bf16.msra.mxu1 %v8125_v13  ;;  %4935 = vmatprep.subr.bf16.mxu0 %v8118_v28  ;;  %v2795_v18 = vld [vmem:[#allocation2 + $0x710] sm:$0xff]  ;;  %v8094_v58 = vcombine.high %v2667_v61, %v2671_v63  ;;  %v13731_v13 = vld [vmem:[#allocation13_spill] sm:$0xff] }
 0x296   : > { %4606 = vmatmul.mubr.bf16.gmra.mxu0 %v10376_v52  ;;  %5128 = vmatprep.subr.bf16.mxu1 %v8246_v31  ;;  %v2799_v25 = vld [vmem:[#allocation2 + $0x730] sm:$0xff] }
 0x297   : > { %4799 = vmatmul.mubr.bf16.gmra.mxu1 %v10384_v39  ;;  %4615 = vmatprep.mubr.bf16.mxu0 %v10431_v62  ;;  %v8222_v28 = vcombine.high %v2795_v18, %v2799_v25  ;;  %v2659_v31 = vld [vmem:[#allocation2 + $0x2d0] sm:$0xff]  ;;  %v8221_v34 = vcombine.low %v2795_v18, %v2799_v25  ;;  %v13737_v18 = vld [vmem:[#allocation17_spill] sm:$0xff] }
 0x298   : > { %4808 = vmatprep.mubr.bf16.mxu1 %v10436_v35  ;;  %4936 = vmatpush2.bf16.msra.mxu0 %v8117_v29  ;;  %v2663_v14 = vld [vmem:[#allocation2 + $0x2f0] sm:$0xff] }
 0x299   : > { %5129 = vmatpush2.bf16.msra.mxu1 %v8245_v21  ;;  %4937 = vmatprep.subr.bf16.mxu0 %v8110_v36  ;;  %v13732_v38 = vld [vmem:[#allocation15_spill] sm:$0xff]  ;;  %v13734_v36 = vld [vmem:[#allocation20_spill] sm:$0xff]  ;;  %v8086_v22 = vcombine.high %v2659_v31, %v2663_v14 }
 0x29a   : > { %5130 = vmatprep.subr.bf16.mxu1 %v8238_v15  ;;  %v2787_v29 = vld [vmem:[#allocation2 + $0x6d0] sm:$0xff]  ;;  %v8093_v15 = vcombine.low %v2667_v61, %v2671_v63 }
 0x29b   : > { %v2791_v21 = vld [vmem:[#allocation2 + $0x6f0] sm:$0xff] }
 0x29c   : > { %4938 = vmatpush2.bf16.msra.mxu0 %v8109_v43  ;;  %v8214_v43 = vcombine.high %v2787_v29, %v2791_v21  ;;  %v2783_v33 = vld [vmem:[#allocation2 + $0x6b0] sm:$0xff]  ;;  %v8213_v61 = vcombine.low %v2787_v29, %v2791_v21 }
 0x29d   : > { %5131 = vmatpush2.bf16.msra.mxu1 %v8237_v24  ;;  %4939 = vmatprep.subr.bf16.mxu0 %v8102_v1  ;;  %v2651_v24 = vld [vmem:[#allocation2 + $0x290] sm:$0xff] }
 0x29e   : > { %4616 = vmatmul.mubr.bf16.gmra.mxu0 %v13731_v13  ;;  %5132 = vmatprep.subr.bf16.mxu1 %v8230_v45  ;;  %v2655_v1 = vld [vmem:[#allocation2 + $0x2b0] sm:$0xff] }
 0x29f   : > { %4809 = vmatmul.mubr.bf16.gmra.mxu1 %v13732_v38  ;;  %4625 = vmatprep.mubr.bf16.mxu0 %v13733_v17  ;;  %v2779_v45 = vld [vmem:[#allocation2 + $0x690] sm:$0xff]  ;;  %v8078_v63 = vcombine.high %v2651_v24, %v2655_v1 }
 0x2a0   : > { %4818 = vmatprep.mubr.bf16.mxu1 %v13734_v36  ;;  %4940 = vmatpush2.bf16.msra.mxu0 %v8101_v26  ;;  %v13736_v12 = vld [vmem:[#allocation11_spill] sm:$0xff]  ;;  %v8085_v36 = vcombine.low %v2659_v31, %v2663_v14  ;;  %v4181_v26 = vpop.f32.mrf.mxu0 }
 0x2a1   : > { %5133 = vmatpush2.bf16.msra.mxu1 %v8229_v30  ;;  %4941 = vmatprep.subr.bf16.mxu0 %v8094_v58  ;;  %v10846_v17 = vrot.slane %v2825_v23, %v13736_v12  ;;  %v4182_v25 = vadd.f32 %v4181_v26, %v10843_v19  ;;  %v4374_v30 = vpop.f32.mrf.mxu1  ;;  %v8206_v58 = vcombine.high %v2779_v45, %v2783_v33  ;;  %v2647_v51 = vld [vmem:[#allocation2 + $0x270] sm:$0xff]  ;;  %v13739_v12 = vld [vmem:[#allocation21_spill] sm:$0xff] }
 0x2a2   : > { %5134 = vmatprep.subr.bf16.mxu1 %v8222_v28  ;;  %v2643_v28 = vld [vmem:[#allocation2 + $0x250] sm:$0xff]  ;;  %v4183_v23 = vpop.f32.mrf.mxu0 }
 0x2a3   : > { %v13738_v38 = vld [vmem:[#allocation19_spill] sm:$0xff]  ;;  %v4375_v29 = vadd.f32 %v4374_v30, %v4182_v25  ;;  %v4184_v21 = vadd.f32 %v4183_v23, %v10846_v17 }
 0x2a4   : > { %4942 = vmatpush2.bf16.msra.mxu0 %v8093_v15  ;;  %v2771_v31 = vld [vmem:[#allocation2 + $0x650] sm:$0xff]  ;;  %v13740_v15 = vld [vmem:[#allocation24_spill] sm:$0xff]  ;;  %v4185_v26 = vpop.f32.mrf.mxu0 }
 0x2a5   : > { %5135 = vmatpush2.bf16.msra.mxu1 %v8221_v34  ;;  %4943 = vmatprep.subr.bf16.mxu0 %v8086_v22  ;;  %v2775_v14 = vld [vmem:[#allocation2 + $0x670] sm:$0xff]  ;;  %v4376_v34 = vpop.f32.mrf.mxu1  ;;  %v8077_v22 = vcombine.low %v2651_v24, %v2655_v1  ;;  %v5947_v23 = vmul.f32 0.2, %v4375_v29  ;;  %v8069_v24 = vcombine.low %v2643_v28, %v2647_v51  ;;  %vm5691_vm1 = vcmp.gt.f32.partialorder %v4375_v29, 0.0 }
 0x2a6   : > { %4626 = vmatmul.mubr.bf16.gmra.mxu0 %v13737_v18  ;;  %5136 = vmatprep.subr.bf16.mxu1 %v8214_v43  ;;  %v8205_v43 = vcombine.low %v2779_v45, %v2783_v33  ;;  %v8070_v18 = vcombine.high %v2643_v28, %v2647_v51  ;;  %v4377_v13 = vadd.f32 %v4376_v34, %v4184_v21  ;;  %v2635_v62 = vld [vmem:[#allocation2 + $0x210] sm:$0xff] }
 0x2a7   : > { %4819 = vmatmul.mubr.bf16.gmra.mxu1 %v13738_v38  ;;  %4635 = vmatprep.mubr.bf16.mxu0 %v13739_v12  ;;  %v4186_v38 = vadd.f32 %v4185_v26, %v10843_v19  ;;  %v4378_v12 = vpop.f32.mrf.mxu1  ;;  %v8198_v35 = vcombine.high %v2771_v31, %v2775_v14  ;;  %v2639_v39 = vld [vmem:[#allocation2 + $0x230] sm:$0xff]  ;;  %v8197_v1 = vcombine.low %v2771_v31, %v2775_v14  ;;  %v13744_v31 = vld [vmem:[#allocation28_spill] sm:$0xff] }
 0x2a8   : > { %4828 = vmatprep.mubr.bf16.mxu1 %v13740_v15  ;;  %4944 = vmatpush2.bf16.msra.mxu0 %v8085_v36  ;;  %v4187_v15 = vpop.f32.mrf.mxu0  ;;  %v2763_v25 = vld [vmem:[#allocation2 + $0x610] sm:$0xff]  ;;  %v8062_v45 = vcombine.high %v2635_v62, %v2639_v39  ;;  %v8061_v34 = vcombine.low %v2635_v62, %v2639_v39  ;;  %v5948_v28 = vmul.f32 0.2, %v4377_v13  ;;  %v10862_v14 = vsel %vm5691_vm1, %v4375_v29, %v5947_v23 }
 0x2a9   : > { %5137 = vmatpush2.bf16.msra.mxu1 %v8213_v61  ;;  %4945 = vmatprep.subr.bf16.mxu0 %v8078_v63  ;;  %v2767_v30 = vld [vmem:[#allocation2 + $0x630] sm:$0xff]  ;;  %v4379_v52 = vadd.f32 %v4378_v12, %v4186_v38  ;;  %v4380_v36 = vpop.f32.mrf.mxu1  ;;  %v4188_v33 = vadd.f32 %v4187_v15, %v10846_v17  ;;  %v13741_v61 = vld [vmem:[#allocation22_spill] sm:$0xff]  ;;  %13745 = vst [vmem:[#allocation10_spill] sm:$0xff] %v10862_v14  ;;  %vm5692_vm3 = vcmp.gt.f32.partialorder %v4377_v13, 0.0 }
 0x2aa   : > { %5138 = vmatprep.subr.bf16.mxu1 %v8206_v58  ;;  %v4191_v58 = vpop.f32.mrf.mxu0  ;;  %v8190_v26 = vcombine.high %v2763_v25, %v2767_v30  ;;  %v13742_v38 = vld [vmem:[#allocation23_spill] sm:$0xff] }
 0x2ab   : > { %vm5699_vm2 = vcmp.gt.f32.partialorder %v4379_v52, 0.0  ;;  %v5955_v63 = vmul.f32 0.2, %v4379_v52  ;;  %v4384_v21 = vpop.f32.mrf.mxu1  ;;  %v13743_v12 = vld [vmem:[#allocation27_spill] sm:$0xff]  ;;  %v4381_v51 = vadd.f32 %v4380_v36, %v4188_v33  ;;  %v4192_v15 = vadd.f32 %v4191_v58, %v10843_v19 }
 0x2ac   : > { %4946 = vmatpush2.bf16.msra.mxu0 %v8077_v22  ;;  %v4193_v39 = vpop.f32.mrf.mxu0  ;;  %v10876_v33 = vsel %vm5692_vm3, %v4377_v13, %v5948_v28 }
 0x2ad   : > { %5139 = vmatpush2.bf16.msra.mxu1 %v8205_v43  ;;  %4947 = vmatprep.subr.bf16.mxu0 %v8070_v18  ;;  %v8189_v18 = vcombine.low %v2763_v25, %v2767_v30  ;;  %v10865_v22 = vsel %vm5699_vm2, %v4379_v52, %v5955_v63  ;;  %v4386_v62 = vpop.f32.mrf.mxu1  ;;  %vm5700_vm4 = vcmp.gt.f32.partialorder %v4381_v51, 0.0  ;;  %v5956_v25 = vmul.f32 0.2, %v4381_v51  ;;  %13747 = vst [vmem:[#allocation22_spill] sm:$0xff] %v10876_v33 }
 0x2ae   : > { %4636 = vmatmul.mubr.bf16.gmra.mxu0 %v13741_v61  ;;  %5140 = vmatprep.subr.bf16.mxu1 %v8198_v35  ;;  %13746 = vst [vmem:[#allocation11_spill] sm:$0xff] %v10865_v22  ;;  %v8056_v35 = vcombine.high %v10807_v3, %v10809_v57  ;;  %v4385_v30 = vadd.f32 %v4384_v21, %v4192_v15  ;;  %v4195_v23 = vpop.f32.mrf.mxu0 }
 0x2af   : > { %4829 = vmatmul.mubr.bf16.gmra.mxu1 %v13742_v38  ;;  %4645 = vmatprep.mubr.bf16.mxu0 %v13743_v12  ;;  %v4194_v29 = vadd.f32 %v4193_v39, %v10846_v17  ;;  %v4388_v36 = vpop.f32.mrf.mxu1  ;;  %v8184_v52 = vcombine.high %v10811_v56, %v10813_v20  ;;  %v10878_v63 = vsel %vm5700_vm4, %v4381_v51, %v5956_v25  ;;  %v13749_v39 = vld [vmem:[#allocation25_spill] sm:$0xff]  ;;  %v13750_v51 = vld [vmem:[#allocation26_spill] sm:$0xff] }
 0x2b0   : > { %4838 = vmatprep.mubr.bf16.mxu1 %v13744_v31  ;;  %4948 = vmatpush2.bf16.msra.mxu0 %v8069_v24  ;;  %v4196_v24 = vadd.f32 %v4195_v23, %v10843_v19  ;;  %13748 = vst [vmem:[#allocation23_spill] sm:$0xff] %v10878_v63  ;;  %v5963_v58 = vmul.f32 0.2, %v4385_v30  ;;  %v4197_v21 = vpop.f32.mrf.mxu0  ;;  %vm5707_vm5 = vcmp.gt.f32.partialorder %v4385_v30, 0.0  ;;  %v13752_v23 = vld [vmem:[#allocation36_spill] sm:$0xff] }
 0x2b1   : > { %5141 = vmatpush2.bf16.msra.mxu1 %v8197_v1  ;;  %4949 = vmatprep.subr.bf16.mxu0 %v8062_v45  ;;  %v4387_v43 = vadd.f32 %v4386_v62, %v4194_v29  ;;  %v4390_v15 = vpop.f32.mrf.mxu1  ;;  %v13751_v62 = vld [vmem:[#allocation29_spill] sm:$0xff] }
 0x2b2   : > { %5142 = vmatprep.subr.bf16.mxu1 %v8190_v26  ;;  %v4389_v45 = vadd.f32 %v4388_v36, %v4196_v24  ;;  %v4198_v26 = vadd.f32 %v4197_v21, %v10846_v17  ;;  %v4201_v28 = vpop.f32.mrf.mxu0  ;;  %v10889_v36 = vsel %vm5707_vm5, %v4385_v30, %v5963_v58 }
 0x2b3   : > { %v5964_v13 = vmul.f32 0.2, %v4387_v43  ;;  %v4202_v29 = vadd.f32 %v4201_v28, %v10843_v19  ;;  %13753 = vst [vmem:[#allocation27_spill] sm:$0xff] %v10889_v36  ;;  %vm5708_vm7 = vcmp.gt.f32.partialorder %v4387_v43, 0.0  ;;  %v4394_v24 = vpop.f32.mrf.mxu1 }
 0x2b4   : > { %4950 = vmatpush2.bf16.msra.mxu0 %v8061_v34  ;;  %vm5715_vm6 = vcmp.gt.f32.partialorder %v4389_v45, 0.0  ;;  %v5971_v34 = vmul.f32 0.2, %v4389_v45  ;;  %v4391_v25 = vadd.f32 %v4390_v15, %v4198_v26 }
 0x2b5   : > { %5143 = vmatpush2.bf16.msra.mxu1 %v8189_v18  ;;  %5305 = vmatprep.subr.bf16.mxu0 %v8056_v35  ;;  %v4203_v18 = vpop.f32.mrf.mxu0  ;;  %v4395_v26 = vadd.f32 %v4394_v24, %v4202_v29  ;;  %v4396_v28 = vpop.f32.mrf.mxu1  ;;  %v10897_v22 = vsel %vm5708_vm7, %v4387_v43, %v5964_v13  ;;  %v13758_v24 = vld [vmem:[#allocation35_spill] sm:$0xff]  ;;  %v13760_v13 = vld [vmem:[#allocation40_spill] sm:$0xff] }
 0x2b6   : > { %4646 = vmatmul.mubr.bf16.gmra.mxu0 %v13749_v39  ;;  %5498 = vmatprep.subr.bf16.mxu1 %v8184_v52  ;;  %v10891_v35 = vsel %vm5715_vm6, %v4389_v45, %v5971_v34  ;;  %vm5716_vm8 = vcmp.gt.f32.partialorder %v4391_v25, 0.0  ;;  %v5972_v52 = vmul.f32 0.2, %v4391_v25  ;;  %v4204_v21 = vadd.f32 %v4203_v18, %v10846_v17  ;;  %13755 = vst [vmem:[#allocation25_spill] sm:$0xff] %v10897_v22 }
 0x2b7   : > { %4839 = vmatmul.mubr.bf16.gmra.mxu1 %v13750_v51  ;;  %4655 = vmatprep.mubr.bf16.mxu0 %v13751_v62  ;;  %13754 = vst [vmem:[#allocation28_spill] sm:$0xff] %v10891_v35  ;;  %v4205_v15 = vpop.f32.mrf.mxu0  ;;  %v5979_v33 = vmul.f32 0.2, %v4395_v26  ;;  %v4398_v63 = vpop.f32.mrf.mxu1  ;;  %vm5723_vm9 = vcmp.gt.f32.partialorder %v4395_v26, 0.0  ;;  %v13766_v35 = vld [vmem:[#allocation39_spill] sm:$0xff] }
 0x2b8   : > { %4848 = vmatprep.mubr.bf16.mxu1 %v13752_v23  ;;  %v4206_v14 = vadd.f32 %v4205_v15, %v10843_v19  ;;  %v10899_v30 = vsel %vm5716_vm8, %v4391_v25, %v5972_v52  ;;  %v4397_v58 = vadd.f32 %v4396_v28, %v4204_v21  ;;  %v13757_v23 = vld [vmem:[#allocation34_spill] sm:$0xff] }
 0x2b9   : > { %13756 = vst [vmem:[#allocation26_spill] sm:$0xff] %v10899_v30  ;;  %v4207_v45 = vpop.f32.mrf.mxu0  ;;  %v13759_v15 = vld [vmem:[#allocation38_spill] sm:$0xff]  ;;  %v4400_v43 = vpop.f32.mrf.mxu1  ;;  %v10908_v28 = vsel %vm5723_vm9, %v4395_v26, %v5979_v33 }
 0x2ba   : > { %v4208_v18 = vadd.f32 %v4207_v45, %v10846_v17  ;;  %v4399_v29 = vadd.f32 %v4398_v63, %v4206_v14  ;;  %13761 = vst [vmem:[#allocation29_spill] sm:$0xff] %v10908_v28  ;;  %v5980_v1 = vmul.f32 0.2, %v4397_v58  ;;  %vm5724_vm11 = vcmp.gt.f32.partialorder %v4397_v58, 0.0 }
 0x2bb   : > { %v4211_v21 = vpop.f32.mrf.mxu0  ;;  %v4404_v34 = vpop.f32.mrf.mxu1 }
 0x2bc   : > { %vm5731_vm10 = vcmp.gt.f32.partialorder %v4399_v29, 0.0  ;;  %v5987_v25 = vmul.f32 0.2, %v4399_v29  ;;  %v4401_v52 = vadd.f32 %v4400_v43, %v4208_v18  ;;  %v4212_v45 = vadd.f32 %v4211_v21, %v10843_v19 }
 0x2bd   : > { %v4213_v63 = vpop.f32.mrf.mxu0  ;;  %v4406_v18 = vpop.f32.mrf.mxu1 }
 0x2be   : > { %4656 = vmatmul.mubr.bf16.gmra.mxu0 %v13757_v23  ;;  %v10911_v36 = vsel %vm5731_vm10, %v4399_v29, %v5987_v25  ;;  %vm5732_vm12 = vcmp.gt.f32.partialorder %v4401_v52, 0.0  ;;  %v5988_v14 = vmul.f32 0.2, %v4401_v52  ;;  %v4405_v22 = vadd.f32 %v4404_v34, %v4212_v45  ;;  %v13765_v29 = vld [vmem:[#allocation37_spill] sm:$0xff] }
 0x2bf   : > { %4849 = vmatmul.mubr.bf16.gmra.mxu1 %v13758_v24  ;;  %4665 = vmatprep.mubr.bf16.mxu0 %v13759_v15  ;;  %13762 = vst [vmem:[#allocation34_spill] sm:$0xff] %v10911_v36  ;;  %v4214_v30 = vadd.f32 %v4213_v63, %v10846_v17  ;;  %v4215_v43 = vpop.f32.mrf.mxu0  ;;  %v10919_v15 = vsel %vm5724_vm11, %v4397_v58, %v5980_v1 }
 0x2c0   : > { %4858 = vmatprep.mubr.bf16.mxu1 %v13760_v13  ;;  %v10916_v33 = vsel %vm5732_vm12, %v4401_v52, %v5988_v14  ;;  %v4216_v21 = vadd.f32 %v4215_v43, %v10843_v19  ;;  %v4408_v13 = vpop.f32.mrf.mxu1  ;;  %13764 = vst [vmem:[#allocation61_spill] sm:$0xff] %v10919_v15  ;;  %v5995_v34 = vmul.f32 0.2, %v4405_v22  ;;  %vm5739_vm13 = vcmp.gt.f32.partialorder %v4405_v22, 0.0 }
 0x2c1   : > { %13763 = vst [vmem:[#allocation60_spill] sm:$0xff] %v10916_v33  ;;  %v4407_v26 = vadd.f32 %v4406_v18, %v4214_v30  ;;  %v4217_v25 = vpop.f32.mrf.mxu0 }
 0x2c2   : > { %v4409_v45 = vadd.f32 %v4408_v13, %v4216_v21  ;;  %v4410_v52 = vpop.f32.mrf.mxu1  ;;  %v4218_v30 = vadd.f32 %v4217_v25, %v10846_v17  ;;  %v10929_v43 = vsel %vm5739_vm13, %v4405_v22, %v5995_v34 }
 0x2c3   : > { %13767 = vst [vmem:[#allocation37_spill] sm:$0xff] %v10929_v43  ;;  %vm5740_vm15 = vcmp.gt.f32.partialorder %v4407_v26, 0.0  ;;  %v5996_v24 = vmul.f32 0.2, %v4407_v26 }
 0x2c4   : > { %vm5747_vm14 = vcmp.gt.f32.partialorder %v4409_v45, 0.0  ;;  %v6003_v1 = vmul.f32 0.2, %v4409_v45  ;;  %v4411_v14 = vadd.f32 %v4410_v52, %v4218_v30  ;;  %v13769_v30 = vld [vmem:[#allocation41_spill] sm:$0xff] }
 0x2c5   : > { %v4221_v58 = vpop.f32.mrf.mxu0  ;;  %v10941_v21 = vsel %vm5740_vm15, %v4407_v26, %v5996_v24 }
 0x2c6   : > { %4666 = vmatmul.mubr.bf16.gmra.mxu0 %v13765_v29  ;;  %v4222_v63 = vadd.f32 %v4221_v58, %v10843_v19  ;;  %v4414_v18 = vpop.f32.mrf.mxu1  ;;  %v10931_v28 = vsel %vm5747_vm14, %v4409_v45, %v6003_v1  ;;  %vm5748_vm0 = vcmp.gt.f32.partialorder %v4411_v14, 0.0  ;;  %v6004_v36 = vmul.f32 0.2, %v4411_v14  ;;  %v13770_v58 = vld [vmem:[#allocation42_spill] sm:$0xff]  ;;  %13771 = vst [vmem:[#allocation41_spill] sm:$0xff] %v10941_v21 }
 0x2c7   : > { %4859 = vmatmul.mubr.bf16.gmra.mxu1 %v13766_v35  ;;  %4675 = vmatprep.mubr.bf16.mxu0 %v10664_v48  ;;  %13768 = vst [vmem:[#allocation39_spill] sm:$0xff] %v10931_v28  ;;  %v4223_v13 = vpop.f32.mrf.mxu0 }
 0x2c8   : > { %4868 = vmatprep.mubr.bf16.mxu1 %v10674_v37  ;;  %v4415_v25 = vadd.f32 %v4414_v18, %v4222_v63  ;;  %v4416_v15 = vpop.f32.mrf.mxu1  ;;  %v4224_v33 = vadd.f32 %v4223_v13, %v10846_v17  ;;  %v10943_v63 = vsel %vm5748_vm0, %v4411_v14, %v6004_v36  ;;  %v13773_v18 = vld [vmem:[#allocation47_spill] sm:$0xff] }
 0x2c9   : > { %v4225_v52 = vpop.f32.mrf.mxu0  ;;  %13772 = vst [vmem:[#allocation62_spill] sm:$0xff] %v10943_v63 }
 0x2ca   : > { %v4226_v22 = vadd.f32 %v4225_v52, %v10843_v19  ;;  %v4418_v34 = vpop.f32.mrf.mxu1  ;;  %v6011_v45 = vmul.f32 0.2, %v4415_v25  ;;  %v4417_v1 = vadd.f32 %v4416_v15, %v4224_v33  ;;  %vm5755_vm1 = vcmp.gt.f32.partialorder %v4415_v25, 0.0 }
 0x2cb   : > { %v4227_v37 = vpop.f32.mrf.mxu0 }
 0x2cc   : > { %v4419_v13 = vadd.f32 %v4418_v34, %v4226_v22  ;;  %v4228_v43 = vadd.f32 %v4227_v37, %v10846_v17  ;;  %v4420_v52 = vpop.f32.mrf.mxu1  ;;  %v10950_v26 = vsel %vm5755_vm1, %v4415_v25, %v6011_v45  ;;  %vm5756_vm3 = vcmp.gt.f32.partialorder %v4417_v1, 0.0  ;;  %v13777_v45 = vld [vmem:[#allocation45_spill] sm:$0xff] }
 0x2cd   : > { %13774 = vst [vmem:[#allocation63_spill] sm:$0xff] %v10950_v26  ;;  %v6012_v36 = vmul.f32 0.2, %v4417_v1 }
 0x2ce   : > { %4676 = vmatmul.mubr.bf16.gmra.mxu0 %v13769_v30  ;;  %vm5763_vm2 = vcmp.gt.f32.partialorder %v4419_v13, 0.0  ;;  %v4421_v15 = vadd.f32 %v4420_v52, %v4228_v43  ;;  %v13776_v52 = vld [vmem:[#allocation44_spill] sm:$0xff] }
 0x2cf   : > { %4869 = vmatmul.mubr.bf16.gmra.mxu1 %v13770_v58  ;;  %4685 = vmatprep.mubr.bf16.mxu0 %v10705_v53  ;;  %v6019_v53 = vmul.f32 0.2, %v4419_v13 }
 0x2d0   : > { %4878 = vmatprep.mubr.bf16.mxu1 %v13773_v18  ;;  %v4231_v58 = vpop.f32.mrf.mxu0  ;;  %v4424_v24 = vpop.f32.mrf.mxu1  ;;  %vm5764_vm4 = vcmp.gt.f32.partialorder %v4421_v15, 0.0  ;;  %v6020_v37 = vmul.f32 0.2, %v4421_v15 }
 0x2d1   : > { %v4232_v33 = vadd.f32 %v4231_v58, %v10843_v19  ;;  %v10952_v18 = vsel %vm5763_vm2, %v4419_v13, %v6019_v53 }
 0x2d2   : > { %v4233_v14 = vpop.f32.mrf.mxu0  ;;  %13775 = vst [vmem:[#allocation64_spill] sm:$0xff] %v10952_v18  ;;  %v4426_v34 = vpop.f32.mrf.mxu1 }
 0x2d3   : > { %v4425_v22 = vadd.f32 %v4424_v24, %v4232_v33  ;;  %v4234_v21 = vadd.f32 %v4233_v14, %v10846_v17  ;;  %v10962_v33 = vsel %vm5756_vm3, %v4417_v1, %v6012_v36  ;;  %v10965_v24 = vsel %vm5764_vm4, %v4421_v15, %v6020_v37  ;;  %v13780_v14 = vld [vmem:[#allocation49_spill] sm:$0xff] }
 0x2d4   : > { %v4235_v43 = vpop.f32.mrf.mxu0  ;;  %v4428_v58 = vpop.f32.mrf.mxu1  ;;  %13778 = vst [vmem:[#allocation44_spill] sm:$0xff] %v10962_v33  ;;  %13779 = vst [vmem:[#allocation65_spill] sm:$0xff] %v10965_v24 }
 0x2d5   : > { %v4236_v25 = vadd.f32 %v4235_v43, %v10843_v19  ;;  %v6027_v53 = vmul.f32 0.2, %v4425_v22  ;;  %v4427_v13 = vadd.f32 %v4426_v34, %v4234_v21  ;;  %vm5771_vm5 = vcmp.gt.f32.partialorder %v4425_v22, 0.0 }
 0x2d6   : > { %4686 = vmatmul.mubr.bf16.gmra.mxu0 %v13776_v52  ;;  %v4237_v63 = vpop.f32.mrf.mxu0  ;;  %v4430_v26 = vpop.f32.mrf.mxu1 }
 0x2d7   : > { %4879 = vmatmul.mubr.bf16.gmra.mxu1 %v13777_v45  ;;  %4695 = vmatprep.mubr.bf16.mxu0 %v10729_v32  ;;  %v4429_v28 = vadd.f32 %v4428_v58, %v4236_v25  ;;  %v4238_v43 = vadd.f32 %v4237_v63, %v10846_v17  ;;  %v10971_v45 = vsel %vm5771_vm5, %v4425_v22, %v6027_v53  ;;  %v6028_v1 = vmul.f32 0.2, %v4427_v13 }
 0x2d8   : > { %4888 = vmatprep.mubr.bf16.mxu1 %v13780_v14  ;;  %13781 = vst [vmem:[#allocation66_spill] sm:$0xff] %v10971_v45  ;;  %vm5772_vm7 = vcmp.gt.f32.partialorder %v4427_v13, 0.0 }
 0x2d9   : > { %vm5779_vm6 = vcmp.gt.f32.partialorder %v4429_v28, 0.0  ;;  %v6035_v32 = vmul.f32 0.2, %v4429_v28  ;;  %v4431_v21 = vadd.f32 %v4430_v26, %v4238_v43  ;;  %v13783_v26 = vld [vmem:[#allocation50_spill] sm:$0xff]  ;;  %v10986_v24 = vsel %vm5772_vm7, %v4427_v13, %v6028_v1 }
 0x2da   : > { %13786 = vst [vmem:[#allocation68_spill] sm:$0xff] %v10986_v24  ;;  %v2620_v24 = vld [vmem:[#allocation2 + $0x198] sm:$0xff] }
 0x2db   : > { %v4241_v34 = vpop.f32.mrf.mxu0  ;;  %v10974_v36 = vsel %vm5779_vm6, %v4429_v28, %v6035_v32  ;;  %vm5780_vm8 = vcmp.gt.f32.partialorder %v4431_v21, 0.0  ;;  %v6036_v37 = vmul.f32 0.2, %v4431_v21  ;;  %v4434_v25 = vpop.f32.mrf.mxu1 }
 0x2dc   : > { %v4242_v15 = vadd.f32 %v4241_v34, %v10843_v19  ;;  %13782 = vst [vmem:[#allocation67_spill] sm:$0xff] %v10974_v36  ;;  %v13785_v34 = vld [vmem:[#allocation51_spill] sm:$0xff] }
 0x2dd   : > { %v4243_v63 = vpop.f32.mrf.mxu0  ;;  %v4436_v22 = vpop.f32.mrf.mxu1  ;;  %v10980_v43 = vsel %vm5780_vm8, %v4431_v21, %v6036_v37 }
 0x2de   : > { %v4435_v18 = vadd.f32 %v4434_v25, %v4242_v15  ;;  %v4244_v33 = vadd.f32 %v4243_v63, %v10846_v17  ;;  %4696 = vmatmul.mubr.bf16.gmra.mxu0 %v13783_v26  ;;  %13784 = vst [vmem:[#allocation50_spill] sm:$0xff] %v10980_v43  ;;  %v13790_v63 = vld [vmem:[#allocation54_spill] sm:$0xff] }
 0x2df   : > { %v4245_v53 = vpop.f32.mrf.mxu0  ;;  %4889 = vmatmul.mubr.bf16.gmra.mxu1 %v13785_v34  ;;  %4705 = vmatprep.mubr.bf16.mxu0 %v10753_v16  ;;  %v4438_v15 = vpop.f32.mrf.mxu1  ;;  %v13789_v34 = vld [vmem:[#allocation52_spill] sm:$0xff] }
 0x2e0   : > { %v4437_v32 = vadd.f32 %v4436_v22, %v4244_v33  ;;  %v4246_v28 = vadd.f32 %v4245_v53, %v10843_v19  ;;  %4898 = vmatprep.mubr.bf16.mxu1 %v10767_v6  ;;  %v6043_v58 = vmul.f32 0.2, %v4435_v18  ;;  %vm5787_vm9 = vcmp.gt.f32.partialorder %v4435_v18, 0.0 }
 0x2e1   : > { %v4247_v25 = vpop.f32.mrf.mxu0  ;;  %v4440_v45 = vpop.f32.mrf.mxu1 }
 0x2e2   : > { %v4439_v21 = vadd.f32 %v4438_v15, %v4246_v28  ;;  %v4248_v37 = vadd.f32 %v4247_v25, %v10846_v17  ;;  %v10992_v36 = vsel %vm5787_vm9, %v4435_v18, %v6043_v58  ;;  %v6044_v13 = vmul.f32 0.2, %v4437_v32 }
 0x2e3   : > { %13787 = vst [vmem:[#allocation69_spill] sm:$0xff] %v10992_v36  ;;  %vm5788_vm11 = vcmp.gt.f32.partialorder %v4437_v32, 0.0 }
 0x2e4   : > { %vm5795_vm10 = vcmp.gt.f32.partialorder %v4439_v21, 0.0  ;;  %v6051_v33 = vmul.f32 0.2, %v4439_v21  ;;  %v4441_v22 = vadd.f32 %v4440_v45, %v4248_v37  ;;  %v4251_v53 = vpop.f32.mrf.mxu0  ;;  %v4444_v16 = vpop.f32.mrf.mxu1  ;;  %v11008_v36 = vsel %vm5788_vm11, %v4437_v32, %v6044_v13 }
 0x2e5   : > { %v4252_v6 = vadd.f32 %v4251_v53, %v10843_v19  ;;  %13792 = vst [vmem:[#allocation71_spill] sm:$0xff] %v11008_v36 }
 0x2e6   : > { %v10994_v1 = vsel %vm5795_vm10, %v4439_v21, %v6051_v33  ;;  %4706 = vmatmul.mubr.bf16.gmra.mxu0 %v13789_v34  ;;  %vm5796_vm12 = vcmp.gt.f32.partialorder %v4441_v22, 0.0  ;;  %v6052_v15 = vmul.f32 0.2, %v4441_v22  ;;  %v4253_v25 = vpop.f32.mrf.mxu0  ;;  %v4446_v58 = vpop.f32.mrf.mxu1 }
 0x2e7   : > { %13788 = vst [vmem:[#allocation70_spill] sm:$0xff] %v10994_v1  ;;  %4899 = vmatmul.mubr.bf16.gmra.mxu1 %v13790_v63  ;;  %4715 = vmatprep.mubr.bf16.mxu0 %v10783_v8  ;;  %v4445_v18 = vadd.f32 %v4444_v16, %v4252_v6  ;;  %v4254_v45 = vadd.f32 %v4253_v25, %v10846_v17 }
 0x2e8   : > { %4908 = vmatprep.mubr.bf16.mxu1 %v10785_v60  ;;  %v4255_v21 = vpop.f32.mrf.mxu0  ;;  %v11004_v37 = vsel %vm5796_vm12, %v4441_v22, %v6052_v15  ;;  %v4448_v28 = vpop.f32.mrf.mxu1 }
 0x2e9   : > { %13791 = vst [vmem:[#allocation52_spill] sm:$0xff] %v11004_v37  ;;  %v4447_v33 = vadd.f32 %v4446_v58, %v4254_v45  ;;  %v4256_v53 = vadd.f32 %v4255_v21, %v10843_v19  ;;  %v6059_v16 = vmul.f32 0.2, %v4445_v18  ;;  %vm5803_vm13 = vcmp.gt.f32.partialorder %v4445_v18, 0.0 }
 0x2ea   : > { %v4257_v1 = vpop.f32.mrf.mxu0  ;;  %v4450_v25 = vpop.f32.mrf.mxu1 }
 0x2eb   : > { %v4449_v6 = vadd.f32 %v4448_v28, %v4256_v53  ;;  %v4258_v43 = vadd.f32 %v4257_v1, %v10846_v17  ;;  %v11015_v13 = vsel %vm5803_vm13, %v4445_v18, %v6059_v16  ;;  %v6060_v28 = vmul.f32 0.2, %v4447_v33 }
 0x2ec   : > { %13793 = vst [vmem:[#allocation72_spill] sm:$0xff] %v11015_v13  ;;  %vm5804_vm15 = vcmp.gt.f32.partialorder %v4447_v33, 0.0  ;;  %v11034_v13 = vld [vmem:[#allocation2 + $0x158] sm:$0xff] }
 0x2ed   : > { %vm5811_vm14 = vcmp.gt.f32.partialorder %v4449_v6, 0.0  ;;  %v6067_v22 = vmul.f32 0.2, %v4449_v6  ;;  %v4261_v15 = vpop.f32.mrf.mxu0  ;;  %v4451_v45 = vadd.f32 %v4450_v25, %v4258_v43  ;;  %v11031_v1 = vsel %vm5804_vm15, %v4447_v33, %v6060_v28 }
 0x2ee   : > { %4716 = vmatmul.mubr.bf16.gmra.mxu0 %v10793_v42  ;;  %v4262_v58 = vadd.f32 %v4261_v15, %v10843_v19  ;;  %v4454_v32 = vpop.f32.mrf.mxu1  ;;  %13795 = vst [vmem:[#allocation74_spill] sm:$0xff] %v11031_v1 }
 0x2ef   : > { %4909 = vmatmul.mubr.bf16.gmra.mxu1 %v10796_v5  ;;  %4951 = vmatprep.mubr.bf16.mxu0 %v10195_v46  ;;  %v11019_v21 = vsel %vm5811_vm14, %v4449_v6, %v6067_v22  ;;  %v4263_v53 = vpop.f32.mrf.mxu0  ;;  %v6068_v43 = vmul.f32 0.2, %v4451_v45  ;;  %vm5812_vm0 = vcmp.gt.f32.partialorder %v4451_v45, 0.0  ;;  %v2624_v6 = vld [vmem:[#allocation2 + $0x1b8] sm:$0xff] }
 0x2f0   : > { %13794 = vst [vmem:[#allocation73_spill] sm:$0xff] %v11019_v21  ;;  %5144 = vmatprep.mubr.bf16.mxu1 %v10200_v7  ;;  %v4455_v25 = vadd.f32 %v4454_v32, %v4262_v58  ;;  %v4456_v15 = vpop.f32.mrf.mxu1  ;;  %v4264_v18 = vadd.f32 %v4263_v53, %v10846_v17  ;;  %v11026_v22 = vld [vmem:[#allocation2 + $0x598] sm:$0xff]  ;;  %v8048_v8 = vcombine.high %v2620_v24, %v2624_v6 }
 0x2f1   : > { %v4265_v16 = vpop.f32.mrf.mxu0  ;;  %v11028_v46 = vld [vmem:[#allocation2 + $0x5b8] sm:$0xff]  ;;  %v11039_v21 = vsel %vm5812_vm0, %v4451_v45, %v6068_v43  ;;  %v13798_v43 = vcombine.low %v10807_v3, %v10809_v57 }
 0x2f2   : > { %v4266_v36 = vadd.f32 %v4265_v16, %v10843_v19  ;;  %v4458_v37 = vpop.f32.mrf.mxu1  ;;  %v6075_v7 = vmul.f32 0.2, %v4455_v25  ;;  %v4457_v5 = vadd.f32 %v4456_v15, %v4264_v18  ;;  %vm5819_vm1 = vcmp.gt.f32.partialorder %v4455_v25, 0.0  ;;  %v11036_v16 = vld [vmem:[#allocation2 + $0x178] sm:$0xff]  ;;  %13796 = vst [vmem:[#allocation75_spill] sm:$0xff] %v11039_v21 }
 0x2f3   : > { %v4267_v42 = vpop.f32.mrf.mxu0  ;;  %v8176_v15 = vcombine.high %v11026_v22, %v11028_v46  ;;  %v8047_v18 = vcombine.low %v2620_v24, %v2624_v6  ;;  %v8040_v1 = vcombine.high %v11034_v13, %v11036_v16  ;;  %v11056_v21 = vld [vmem:[#allocation2 + $0x558] sm:$0xff]  ;;  %v13800_v24 = vcombine.low %v10811_v56, %v10813_v20 }
 0x2f4   : > { %v4459_v58 = vadd.f32 %v4458_v37, %v4266_v36  ;;  %v4268_v32 = vadd.f32 %v4267_v42, %v10846_v17  ;;  %v4460_v53 = vpop.f32.mrf.mxu1  ;;  %v6076_v60 = vmul.f32 0.2, %v4457_v5  ;;  %v11048_v45 = vsel %vm5819_vm1, %v4455_v25, %v6075_v7  ;;  %v11078_v20 = vld [vmem:[#allocation2 + $0x138] sm:$0xff] }
 0x2f5   : > { %v4271_v63 = vpop.f32.mrf.mxu0  ;;  %13797 = vst [vmem:[#allocation76_spill] sm:$0xff] %v11048_v45  ;;  %vm5820_vm3 = vcmp.gt.f32.partialorder %v4457_v5, 0.0  ;;  %v8175_v6 = vcombine.low %v11026_v22, %v11028_v46 }
 0x2f6   : > { %4952 = vmatmul.mubr.bf16.vlgmr.msra.gmra.mxu0 %v10193_v9  ;;  %vm5827_vm2 = vcmp.gt.f32.partialorder %v4459_v58, 0.0  ;;  %v6083_v42 = vmul.f32 0.2, %v4459_v58  ;;  %v4461_v36 = vadd.f32 %v4460_v53, %v4268_v32  ;;  %v4272_v37 = vadd.f32 %v4271_v63, %v10843_v19  ;;  %v4464_v28 = vpop.f32.mrf.mxu1  ;;  %v11058_v32 = vld [vmem:[#allocation2 + $0x578] sm:$0xff] }
 0x2f7   : > { %5145 = vmatmul.mubr.bf16.vlgmr.msra.gmra.mxu1 %v10198_v4  ;;  %5306 = vmatpush1.bf16.msra.mxu0 %v13798_v43  ;;  %v4273_v33 = vpop.f32.mrf.mxu0  ;;  %v8168_v56 = vcombine.high %v11056_v21, %v11058_v32  ;;  %v11085_v46 = vsel %vm5820_vm3, %v4457_v5, %v6076_v60  ;;  %v11095_v60 = vld [vmem:[#allocation2 + $0xd8] sm:$0xff] }
 0x2f8   : > { %4961 = vmatprep.mubr.bf16.mxu0 %v10232_v2  ;;  %5154 = vmatprep.mubr.bf16.mxu1 %v10238_v41  ;;  %v11063_v7 = vsel %vm5827_vm2, %v4459_v58, %v6083_v42  ;;  %vm5828_vm4 = vcmp.gt.f32.partialorder %v4461_v36, 0.0  ;;  %v6084_v3 = vmul.f32 0.2, %v4461_v36  ;;  %v4465_v57 = vadd.f32 %v4464_v28, %v4272_v37  ;;  %v4466_v63 = vpop.f32.mrf.mxu1  ;;  %v11073_v58 = vld [vmem:[#allocation2 + $0x118] sm:$0xff]  ;;  %13801 = vst [vmem:[#allocation78_spill] sm:$0xff] %v11085_v46 }
 0x2f9   : > { %13799 = vst [vmem:[#allocation77_spill] sm:$0xff] %v11063_v7  ;;  %5499 = vmatpush1.bf16.msra.mxu1 %v13800_v24  ;;  %5307 = vmatprep.subr.bf16.mxu0 %v8048_v8  ;;  %v4274_v53 = vadd.f32 %v4273_v33, %v10846_v17  ;;  %v4275_v43 = vpop.f32.mrf.mxu0  ;;  %v11080_v28 = vld [vmem:[#allocation2 + $0x518] sm:$0xff]  ;;  %v8039_v41 = vcombine.low %v11034_v13, %v11036_v16 }
 0x2fa   : > { %5500 = vmatprep.subr.bf16.mxu1 %v8176_v15  ;;  %v4276_v42 = vadd.f32 %v4275_v43, %v10843_v19  ;;  %v4468_v37 = vpop.f32.mrf.mxu1  ;;  %v11082_v8 = vld [vmem:[#allocation2 + $0x538] sm:$0xff]  ;;  %v11088_v22 = vsel %vm5828_vm4, %v4461_v36, %v6084_v3  ;;  %v6091_v33 = vmul.f32 0.2, %v4465_v57  ;;  %vm5835_vm5 = vcmp.gt.f32.partialorder %v4465_v57, 0.0 }
 0x2fb   : > { %13802 = vst [vmem:[#allocation79_spill] sm:$0xff] %v11088_v22  ;;  %5308 = vmatpush1.bf16.msra.mxu0 %v8047_v18  ;;  %v4467_v15 = vadd.f32 %v4466_v63, %v4274_v53  ;;  %v4277_v24 = vpop.f32.mrf.mxu0  ;;  %v11097_v5 = vld [vmem:[#allocation2 + $0xf8] sm:$0xff]  ;;  %v8167_v36 = vcombine.low %v11056_v21, %v11058_v32  ;;  %v8031_v18 = vcombine.low %v11073_v58, %v11078_v20 }
 0x2fc   : > { %v4469_v25 = vadd.f32 %v4468_v37, %v4276_v42  ;;  %v4278_v45 = vadd.f32 %v4277_v24, %v10846_v17  ;;  %v4470_v7 = vpop.f32.mrf.mxu1  ;;  %5309 = vmatprep.subr.bf16.mxu0 %v8040_v1  ;;  %v8032_v3 = vcombine.high %v11073_v58, %v11078_v20  ;;  %v8159_v63 = vcombine.low %v11080_v28, %v11082_v8  ;;  %v11118_v42 = vld [vmem:[#allocation2 + $0x4d8] sm:$0xff] }
 0x2fd   : > { %5501 = vmatpush1.bf16.msra.mxu1 %v8175_v6  ;;  %v8160_v6 = vcombine.high %v11080_v28, %v11082_v8  ;;  %v11111_v21 = vsel %vm5835_vm5, %v4465_v57, %v6091_v33  ;;  %v6092_v32 = vmul.f32 0.2, %v4467_v15  ;;  %v8024_v58 = vcombine.high %v11095_v60, %v11097_v5 }
 0x2fe   : > { %4962 = vmatmul.mubr.bf16.gmra.mxu0 %v10230_v0  ;;  %vm5843_vm6 = vcmp.gt.f32.partialorder %v4469_v25, 0.0  ;;  %v6099_v13 = vmul.f32 0.2, %v4469_v25  ;;  %v4471_v1 = vadd.f32 %v4470_v7, %v4278_v45  ;;  %v4281_v16 = vpop.f32.mrf.mxu0  ;;  %5502 = vmatprep.subr.bf16.mxu1 %v8168_v56  ;;  %13803 = vst [vmem:[#allocation80_spill] sm:$0xff] %v11111_v21  ;;  %v11120_v45 = vld [vmem:[#allocation2 + $0x4f8] sm:$0xff]  ;;  %vm5836_vm7 = vcmp.gt.f32.partialorder %v4467_v15, 0.0 }
 0x2ff   : > { %5155 = vmatmul.mubr.bf16.gmra.mxu1 %v10246_v49  ;;  %4971 = vmatprep.mubr.bf16.mxu0 %v10283_v44  ;;  %v4282_v53 = vadd.f32 %v4281_v16, %v10843_v19  ;;  %v2592_v16 = vld [vmem:[#allocation2 + $0xb8] sm:$0xff] }
 0x300   : > { %5164 = vmatprep.mubr.bf16.mxu1 %v10302_v59  ;;  %v11124_v7 = vsel %vm5843_vm6, %v4469_v25, %v6099_v13  ;;  %vm5844_vm8 = vcmp.gt.f32.partialorder %v4471_v1, 0.0  ;;  %v6100_v57 = vmul.f32 0.2, %v4471_v1  ;;  %v4474_v37 = vpop.f32.mrf.mxu1  ;;  %5310 = vmatpush1.bf16.msra.mxu0 %v8039_v41  ;;  %v4283_v56 = vpop.f32.mrf.mxu0  ;;  %v8152_v25 = vcombine.high %v11118_v42, %v11120_v45  ;;  %v2588_v13 = vld [vmem:[#allocation2 + $0x98] sm:$0xff] }
 0x301   : > { %13804 = vst [vmem:[#allocation81_spill] sm:$0xff] %v11124_v7  ;;  %v4475_v28 = vadd.f32 %v4474_v37, %v4282_v53  ;;  %v4284_v8 = vadd.f32 %v4283_v56, %v10846_v17  ;;  %5503 = vmatpush1.bf16.msra.mxu1 %v8167_v36  ;;  %5311 = vmatprep.subr.bf16.mxu0 %v8032_v3  ;;  %v11137_v53 = vld [vmem:[#allocation2 + $0x498] sm:$0xff] }
 0x302   : > { %v4476_v33 = vpop.f32.mrf.mxu1  ;;  %v4285_v24 = vpop.f32.mrf.mxu0  ;;  %5504 = vmatprep.subr.bf16.mxu1 %v8160_v6  ;;  %v11132_v43 = vsel %vm5844_vm8, %v4471_v1, %v6100_v57  ;;  %v11139_v37 = vld [vmem:[#allocation2 + $0x4b8] sm:$0xff]  ;;  %v11142_v36 = vsel %vm5836_vm7, %v4467_v15, %v6092_v32  ;;  %v8023_v56 = vcombine.low %v11095_v60, %v11097_v5  ;;  %v8016_v15 = vcombine.high %v2588_v13, %v2592_v16 }
 0x303   : > { %13805 = vst [vmem:[#allocation82_spill] sm:$0xff] %v11132_v43  ;;  %v11134_v41 = vadd.f32 %v4476_v33, %v4284_v8  ;;  %v4286_v20 = vadd.f32 %v4285_v24, %v10843_v19  ;;  %13806 = vst [vmem:[#allocation83_spill] sm:$0xff] %v11142_v36  ;;  %v11146_v21 = vld [vmem:[#allocation2 + $0x58] sm:$0xff]  ;;  %v6107_v57 = vmul.f32 0.2, %v4475_v28  ;;  %v8151_v33 = vcombine.low %v11118_v42, %v11120_v45 }
 0x304   : > { %v4478_v3 = vpop.f32.mrf.mxu1  ;;  %v4287_v6 = vpop.f32.mrf.mxu0  ;;  %5312 = vmatpush1.bf16.msra.mxu0 %v8031_v18  ;;  %v11152_v32 = vld [vmem:[#allocation2 + $0x78] sm:$0xff]  ;;  %vm5851_vm9 = vcmp.gt.f32.partialorder %v4475_v28, 0.0  ;;  %v8015_v42 = vcombine.low %v2588_v13, %v2592_v16  ;;  %v8143_v45 = vcombine.low %v11137_v53, %v11139_v37 }
 0x305   : > { %v4479_v8 = vadd.f32 %v4478_v3, %v4286_v20  ;;  %5505 = vmatpush1.bf16.msra.mxu1 %v8159_v63  ;;  %5313 = vmatprep.subr.bf16.mxu0 %v8024_v58  ;;  %v11154_v24 = vld [vmem:[#allocation2 + $0x458] sm:$0xff]  ;;  %v4288_v60 = vadd.f32 %v4287_v6, %v10846_v17  ;;  %v8144_v63 = vcombine.high %v11137_v53, %v11139_v37  ;;  %v6108_v7 = vmul.f32 0.2, %v11134_v41 }
 0x306   : > { %v11156_v18 = vld [vmem:[#allocation2 + $0x478] sm:$0xff]  ;;  %4972 = vmatmul.mubr.bf16.gmra.mxu0 %v10280_v54  ;;  %v4480_v5 = vpop.f32.mrf.mxu1  ;;  %5506 = vmatprep.subr.bf16.mxu1 %v8152_v25  ;;  %v8008_v25 = vcombine.high %v11146_v21, %v11152_v32  ;;  %v11172_v1 = vsel %vm5851_vm9, %v4475_v28, %v6107_v57  ;;  %vm5852_vm11 = vcmp.gt.f32.partialorder %v11134_v41, 0.0  ;;  %v8007_v36 = vcombine.low %v11146_v21, %v11152_v32 }
 0x307   : > { %5165 = vmatmul.mubr.bf16.gmra.mxu1 %v10291_v10  ;;  %4981 = vmatprep.mubr.bf16.mxu0 %v10343_v47  ;;  %vm5859_vm10 = vcmp.gt.f32.partialorder %v4479_v8, 0.0  ;;  %v6115_v58 = vmul.f32 0.2, %v4479_v8  ;;  %v4481_v20 = vadd.f32 %v4480_v5, %v4288_v60  ;;  %v8136_v6 = vcombine.high %v11154_v24, %v11156_v18  ;;  %13807 = vst [vmem:[#allocation84_spill] sm:$0xff] %v11172_v1  ;;  %v11178_v37 = vld [vmem:[#allocation2 + $0x18] sm:$0xff] }
 0x308   : > { %5174 = vmatprep.mubr.bf16.mxu1 %v10347_v27  ;;  %5314 = vmatpush1.bf16.msra.mxu0 %v8023_v56  ;;  %v11180_v56 = vld [vmem:[#allocation2 + $0x38] sm:$0xff]  ;;  %v8135_v60 = vcombine.low %v11154_v24, %v11156_v18 }
 0x309   : > { %v4291_v3 = vpop.f32.mrf.mxu0  ;;  %v11175_v13 = vsel %vm5859_vm10, %v4479_v8, %v6115_v58  ;;  %v4484_v53 = vpop.f32.mrf.mxu1  ;;  %5507 = vmatpush1.bf16.msra.mxu1 %v8151_v33  ;;  %5315 = vmatprep.subr.bf16.mxu0 %v8016_v15  ;;  %vm5860_vm12 = vcmp.gt.f32.partialorder %v4481_v20, 0.0  ;;  %v6116_v28 = vmul.f32 0.2, %v4481_v20  ;;  %v11188_v33 = vld [vmem:[#allocation2 + $0x438] sm:$0xff]  ;;  %v8000_v1 = vcombine.high %v11178_v37, %v11180_v56 }
 0x30a   : > { %13808 = vst [vmem:[#allocation85_spill] sm:$0xff] %v11175_v13  ;;  %v4292_v16 = vadd.f32 %v4291_v3, %v10843_v19  ;;  %5508 = vmatprep.subr.bf16.mxu1 %v8144_v63  ;;  %v11186_v3 = vld [vmem:[#allocation2 + $0x418] sm:$0xff] }
 0x30b   : > { %v4293_v57 = vpop.f32.mrf.mxu0  ;;  %v4486_v58 = vpop.f32.mrf.mxu1  ;;  %v11196_v63 = vsel %vm5860_vm12, %v4481_v20, %v6116_v28  ;;  %v8128_v32 = vcombine.high %v11186_v3, %v11188_v33  ;;  %v11209_v24 = vld [vmem:[#allocation2 + $0x3d8] sm:$0xff] }
 0x30c   : > { %v4485_v8 = vadd.f32 %v4484_v53, %v4292_v16  ;;  %v4294_v5 = vadd.f32 %v4293_v57, %v10846_v17  ;;  %5316 = vmatpush1.bf16.msra.mxu0 %v8015_v42  ;;  %13809 = vst [vmem:[#allocation86_spill] sm:$0xff] %v11196_v63  ;;  %v11204_v42 = vsel %vm5852_vm11, %v11134_v41, %v6108_v7  ;;  %v11211_v18 = vld [vmem:[#allocation2 + $0x3f8] sm:$0xff] }
 0x30d   : > { %v4295_v15 = vpop.f32.mrf.mxu0  ;;  %v4488_v57 = vpop.f32.mrf.mxu1  ;;  %5509 = vmatpush1.bf16.msra.mxu1 %v8143_v45  ;;  %5317 = vmatprep.subr.bf16.mxu0 %v8008_v25  ;;  %13810 = vst [vmem:[#allocation87_spill] sm:$0xff] %v11204_v42  ;;  %v11217_v25 = vld [vmem:[#allocation2 + $0x7d8] sm:$0xff]  ;;  %v8120_v45 = vcombine.high %v11209_v24, %v11211_v18 }
 0x30e   : > { %v11198_v16 = vadd.f32 %v4486_v58, %v4294_v5  ;;  %v4296_v53 = vadd.f32 %v4295_v15, %v10843_v19  ;;  %4982 = vmatmul.mubr.bf16.gmra.mxu0 %v10327_v11  ;;  %5510 = vmatprep.subr.bf16.mxu1 %v8136_v6  ;;  %v6123_v20 = vmul.f32 0.2, %v4485_v8  ;;  %v11219_v6 = vld [vmem:[#allocation2 + $0x7f8] sm:$0xff]  ;;  %vm5867_vm13 = vcmp.gt.f32.partialorder %v4485_v8, 0.0 }
 0x30f   : > { %v4297_v21 = vpop.f32.mrf.mxu0  ;;  %5175 = vmatmul.mubr.bf16.gmra.mxu1 %v10335_v50  ;;  %4991 = vmatprep.mubr.bf16.mxu0 %v10386_v40  ;;  %v4490_v41 = vpop.f32.mrf.mxu1  ;;  %v7999_v5 = vcombine.low %v11178_v37, %v11180_v56  ;;  %v8127_v58 = vcombine.low %v11186_v3, %v11188_v33  ;;  %v11231_v13 = vld [vmem:[#allocation2 + $0x398] sm:$0xff]  ;;  %v8248_v3 = vcombine.high %v11217_v25, %v11219_v6 }
 0x310   : > { %v4489_v7 = vadd.f32 %v4488_v57, %v4296_v53  ;;  %5184 = vmatprep.mubr.bf16.mxu1 %v10388_v55  ;;  %v4298_v28 = vadd.f32 %v4297_v21, %v10846_v17  ;;  %5318 = vmatpush1.bf16.msra.mxu0 %v8007_v36  ;;  %v8119_v57 = vcombine.low %v11209_v24, %v11211_v18  ;;  %v6124_v36 = vmul.f32 0.2, %v11198_v16  ;;  %v11241_v33 = vld [vmem:[#allocation2 + $0x7b8] sm:$0xff] }
 0x311   : > { %v4301_v53 = vpop.f32.mrf.mxu0  ;;  %5511 = vmatpush1.bf16.msra.mxu1 %v8135_v60  ;;  %5319 = vmatprep.subr.bf16.mxu0 %v8000_v1  ;;  %v11237_v60 = vld [vmem:[#allocation2 + $0x3b8] sm:$0xff]  ;;  %v11244_v24 = vsel %vm5867_vm13, %v4485_v8, %v6123_v20  ;;  %vm5868_vm15 = vcmp.gt.f32.partialorder %v11198_v16, 0.0 }
 0x312   : > { %vm5875_vm14 = vcmp.gt.f32.partialorder %v4489_v7, 0.0  ;;  %v6131_v15 = vmul.f32 0.2, %v4489_v7  ;;  %v4491_v21 = vadd.f32 %v4490_v41, %v4298_v28  ;;  %v4302_v37 = vadd.f32 %v4301_v53, %v10843_v19  ;;  %v4494_v56 = vpop.f32.mrf.mxu1  ;;  %5512 = vmatprep.subr.bf16.mxu1 %v8128_v32  ;;  %v11239_v1 = vld [vmem:[#allocation2 + $0x798] sm:$0xff]  ;;  %13811 = vst [vmem:[#allocation88_spill] sm:$0xff] %v11244_v24 }
 0x313   : > { %v4303_v41 = vpop.f32.mrf.mxu0  ;;  %v8247_v32 = vcombine.low %v11217_v25, %v11219_v6  ;;  %v11259_v25 = vld [vmem:[#allocation2 + $0x358] sm:$0xff]  ;;  %v13813_v6 = vld [vmem:[#allocation33_spill] sm:$0xff]  ;;  %v8111_v46 = vcombine.low %v11231_v13, %v11237_v60 }
 0x314   : > { %v11248_v18 = vsel %vm5875_vm14, %v4489_v7, %v6131_v15  ;;  %vm5876_vm0 = vcmp.gt.f32.partialorder %v4491_v21, 0.0  ;;  %v6132_v53 = vmul.f32 0.2, %v4491_v21  ;;  %v4495_v42 = vadd.f32 %v4494_v56, %v4302_v37  ;;  %v4496_v63 = vpop.f32.mrf.mxu1  ;;  %5320 = vmatpush1.bf16.msra.mxu0 %v7999_v5  ;;  %v11263_v5 = vld [vmem:[#allocation2 + $0x378] sm:$0xff] }
 0x315   : > { %13812 = vst [vmem:[#allocation89_spill] sm:$0xff] %v11248_v18  ;;  %v4304_v8 = vadd.f32 %v4303_v41, %v10846_v17  ;;  %v4305_v20 = vpop.f32.mrf.mxu0  ;;  %5513 = vmatpush1.bf16.msra.mxu1 %v8127_v58  ;;  %5321 = vmatprep.subr.bf16.mxu0 %v8120_v45  ;;  %v8112_v7 = vcombine.high %v11231_v13, %v11237_v60  ;;  %v11265_v56 = vld [vmem:[#allocation2 + $0x758] sm:$0xff] }
 0x316   : > { %v8240_v15 = vcombine.high %v11239_v1, %v11241_v33  ;;  %4992 = vmatmul.mubr.bf16.gmra.mxu0 %v13813_v6  ;;  %v4306_v28 = vadd.f32 %v4305_v20, %v10843_v19  ;;  %v4498_v37 = vpop.f32.mrf.mxu1  ;;  %5514 = vmatprep.subr.bf16.mxu1 %v8248_v3  ;;  %v11267_v58 = vld [vmem:[#allocation2 + $0x778] sm:$0xff]  ;;  %v11272_v45 = vsel %vm5868_vm15, %v11198_v16, %v6124_v36  ;;  %v6139_v24 = vmul.f32 0.2, %v4495_v42  ;;  %v13817_v20 = vld [vmem:[#allocation14_spill] sm:$0xff] }
 0x317   : > { %13814 = vst [vmem:[#allocation90_spill] sm:$0xff] %v11272_v45  ;;  %v11275_v41 = vsel %vm5876_vm0, %v4491_v21, %v6132_v53  ;;  %v13816_v18 = vld [vmem:[#allocation12_spill] sm:$0xff]  ;;  %5001 = vmatprep.mubr.bf16.mxu0 %v13817_v20  ;;  %v4497_v3 = vadd.f32 %v4496_v63, %v4304_v8  ;;  %v4307_v43 = vpop.f32.mrf.mxu0  ;;  %vm5883_vm1 = vcmp.gt.f32.partialorder %v4495_v42, 0.0  ;;  %v8239_v53 = vcombine.low %v11239_v1, %v11241_v33 }
 0x318   : > { %13815 = vst [vmem:[#allocation91_spill] sm:$0xff] %v11275_v41  ;;  %5185 = vmatmul.mubr.bf16.gmra.mxu1 %v13816_v18  ;;  %v13818_v6 = vld [vmem:[#allocation16_spill] sm:$0xff]  ;;  %v4499_v16 = vadd.f32 %v4498_v37, %v4306_v28  ;;  %v4308_v36 = vadd.f32 %v4307_v43, %v10846_v17  ;;  %v4500_v21 = vpop.f32.mrf.mxu1  ;;  %5322 = vmatpush2.bf16.msra.mxu0 %v8119_v57 }
 0x319   : > { %5194 = vmatprep.mubr.bf16.mxu1 %v13818_v6  ;;  %v11287_v20 = vld [vmem:[#allocation2 + $0x318] sm:$0xff]  ;;  %5515 = vmatpush2.bf16.msra.mxu1 %v8247_v32  ;;  %v8103_v13 = vcombine.low %v11259_v25, %v11263_v5  ;;  %v8104_v60 = vcombine.high %v11259_v25, %v11263_v5  ;;  %v8231_v43 = vcombine.low %v11265_v56, %v11267_v58  ;;  %v6140_v32 = vmul.f32 0.2, %v4497_v3  ;;  %v13830_v6 = vld [vmem:[#allocation19_spill] sm:$0xff] }
 0x31a   : > { %v11289_v63 = vld [vmem:[#allocation2 + $0x338] sm:$0xff]  ;;  %5323 = vmatprep.subr.bf16.mxu0 %v8112_v7  ;;  %vm5891_vm2 = vcmp.gt.f32.partialorder %v4499_v16, 0.0  ;;  %v6147_v57 = vmul.f32 0.2, %v4499_v16  ;;  %v4501_v28 = vadd.f32 %v4500_v21, %v4308_v36  ;;  %5516 = vmatprep.subr.bf16.mxu1 %v8240_v15  ;;  %v8232_v1 = vcombine.high %v11265_v56, %v11267_v58 }
 0x31b   : > { %v4311_v8 = vpop.f32.mrf.mxu0  ;;  %v11300_v33 = vsel %vm5883_vm1, %v4495_v42, %v6139_v24  ;;  %v8096_v25 = vcombine.high %v11287_v20, %v11289_v63  ;;  %v11305_v37 = vld [vmem:[#allocation2 + $0x718] sm:$0xff]  ;;  %vm5884_vm3 = vcmp.gt.f32.partialorder %v4497_v3, 0.0 }
 0x31c   : > { %13819 = vst [vmem:[#allocation12_spill] sm:$0xff] %v11300_v33  ;;  %v4312_v7 = vadd.f32 %v4311_v8, %v10843_v19  ;;  %v11307_v5 = vld [vmem:[#allocation2 + $0x738] sm:$0xff]  ;;  %v11309_v36 = vsel %vm5891_vm2, %v4499_v16, %v6147_v57  ;;  %vm5892_vm4 = vcmp.gt.f32.partialorder %v4501_v28, 0.0  ;;  %v6148_v15 = vmul.f32 0.2, %v4501_v28  ;;  %v4504_v21 = vpop.f32.mrf.mxu1  ;;  %5324 = vmatpush2.bf16.msra.mxu0 %v8111_v46  ;;  %v13821_v8 = vld [vmem:[#allocation13_spill] sm:$0xff] }
 0x31d   : > { %13820 = vst [vmem:[#allocation92_spill] sm:$0xff] %v11309_v36  ;;  %v4313_v56 = vpop.f32.mrf.mxu0  ;;  %5517 = vmatpush2.bf16.msra.mxu1 %v8239_v53  ;;  %5325 = vmatprep.subr.bf16.mxu0 %v8104_v60  ;;  %v8224_v16 = vcombine.high %v11305_v37, %v11307_v5  ;;  %v11317_v57 = vld [vmem:[#allocation2 + $0x2d8] sm:$0xff]  ;;  %v11334_v42 = vsel %vm5884_vm3, %v4497_v3, %v6140_v32 }
 0x31e   : > { %v4505_v24 = vadd.f32 %v4504_v21, %v4312_v7  ;;  %v4314_v58 = vadd.f32 %v4313_v56, %v10846_v17  ;;  %5002 = vmatmul.mubr.bf16.gmra.mxu0 %v13821_v8  ;;  %v4506_v22 = vpop.f32.mrf.mxu1  ;;  %5518 = vmatprep.subr.bf16.mxu1 %v8232_v1  ;;  %v11319_v41 = vld [vmem:[#allocation2 + $0x2f8] sm:$0xff]  ;;  %v11322_v46 = vsel %vm5892_vm4, %v4501_v28, %v6148_v15  ;;  %v13823_v7 = vld [vmem:[#allocation15_spill] sm:$0xff]  ;;  %v13824_v21 = vld [vmem:[#allocation18_spill] sm:$0xff] }
 0x31f   : > { %v4315_v45 = vpop.f32.mrf.mxu0  ;;  %13822 = vst [vmem:[#allocation93_spill] sm:$0xff] %v11322_v46  ;;  %5011 = vmatprep.mubr.bf16.mxu0 %v13824_v21  ;;  %v11329_v56 = vld [vmem:[#allocation2 + $0x6d8] sm:$0xff]  ;;  %13825 = vst [vmem:[#allocation94_spill] sm:$0xff] %v11334_v42  ;;  %v8095_v15 = vcombine.low %v11287_v20, %v11289_v63  ;;  %v8223_v3 = vcombine.low %v11305_v37, %v11307_v5  ;;  %v8088_v32 = vcombine.high %v11317_v57, %v11319_v41 }
 0x320   : > { %5195 = vmatmul.mubr.bf16.gmra.mxu1 %v13823_v7  ;;  %v11326_v53 = vadd.f32 %v4506_v22, %v4314_v58  ;;  %v4316_v60 = vadd.f32 %v4315_v45, %v10843_v19  ;;  %v11331_v1 = vld [vmem:[#allocation2 + $0x6f8] sm:$0xff]  ;;  %v4508_v36 = vpop.f32.mrf.mxu1  ;;  %5326 = vmatpush2.bf16.msra.mxu0 %v8103_v13  ;;  %v6155_v45 = vmul.f32 0.2, %v4505_v24  ;;  %vm5899_vm5 = vcmp.gt.f32.partialorder %v4505_v24, 0.0 }
 0x321   : > { %v13826_v33 = vld [vmem:[#allocation20_spill] sm:$0xff]  ;;  %v4317_v28 = vpop.f32.mrf.mxu0  ;;  %5519 = vmatpush2.bf16.msra.mxu1 %v8231_v43  ;;  %5327 = vmatprep.subr.bf16.mxu0 %v8096_v25  ;;  %v8087_v43 = vcombine.low %v11317_v57, %v11319_v41  ;;  %v8216_v25 = vcombine.high %v11329_v56, %v11331_v1 }
 0x322   : > { %5204 = vmatprep.mubr.bf16.mxu1 %v13826_v33  ;;  %v11339_v21 = vld [vmem:[#allocation2 + $0x298] sm:$0xff]  ;;  %v4509_v58 = vadd.f32 %v4508_v36, %v4316_v60  ;;  %v4318_v63 = vadd.f32 %v4317_v28, %v10846_v17  ;;  %v4510_v22 = vpop.f32.mrf.mxu1  ;;  %5520 = vmatprep.subr.bf16.mxu1 %v8224_v16  ;;  %v8215_v36 = vcombine.low %v11329_v56, %v11331_v1  ;;  %v6156_v60 = vmul.f32 0.2, %v11326_v53 }
 0x323   : > { %v11347_v33 = vld [vmem:[#allocation2 + $0x2b8] sm:$0xff]  ;;  %v4321_v42 = vpop.f32.mrf.mxu0  ;;  %v11367_v57 = vsel %vm5899_vm5, %v4505_v24, %v6155_v45  ;;  %vm5900_vm7 = vcmp.gt.f32.partialorder %v11326_v53, 0.0 }
 0x324   : > { %v11349_v13 = vld [vmem:[#allocation2 + $0x698] sm:$0xff]  ;;  %vm5907_vm6 = vcmp.gt.f32.partialorder %v4509_v58, 0.0  ;;  %v6163_v37 = vmul.f32 0.2, %v4509_v58  ;;  %v4322_v5 = vadd.f32 %v4321_v42, %v10843_v19  ;;  %v4511_v46 = vadd.f32 %v4510_v22, %v4318_v63  ;;  %5328 = vmatpush2.bf16.msra.mxu0 %v8095_v15  ;;  %13827 = vst [vmem:[#allocation95_spill] sm:$0xff] %v11367_v57  ;;  %v13829_v63 = vld [vmem:[#allocation17_spill] sm:$0xff] }
 0x325   : > { %v11351_v20 = vld [vmem:[#allocation2 + $0x6b8] sm:$0xff]  ;;  %v4323_v28 = vpop.f32.mrf.mxu0  ;;  %v8080_v16 = vcombine.high %v11339_v21, %v11347_v33  ;;  %5521 = vmatpush2.bf16.msra.mxu1 %v8223_v3  ;;  %5329 = vmatprep.subr.bf16.mxu0 %v8088_v32  ;;  %v8079_v32 = vcombine.low %v11339_v21, %v11347_v33 }
 0x326   : > { %v8208_v41 = vcombine.high %v11349_v13, %v11351_v20  ;;  %v11370_v42 = vsel %vm5907_vm6, %v4509_v58, %v6163_v37  ;;  %v4514_v7 = vpop.f32.mrf.mxu1  ;;  %v4324_v56 = vadd.f32 %v4323_v28, %v10846_v17  ;;  %vm5908_vm8 = vcmp.gt.f32.partialorder %v4511_v46, 0.0  ;;  %5012 = vmatmul.mubr.bf16.gmra.mxu0 %v13829_v63  ;;  %5522 = vmatprep.subr.bf16.mxu1 %v8216_v25  ;;  %v2644_v24 = vld [vmem:[#allocation2 + $0x258] sm:$0xff]  ;;  %v13831_v58 = vld [vmem:[#allocation21_spill] sm:$0xff] }
 0x327   : > { %13828 = vst [vmem:[#allocation96_spill] sm:$0xff] %v11370_v42  ;;  %v6164_v15 = vmul.f32 0.2, %v4511_v46  ;;  %v4515_v22 = vadd.f32 %v4514_v7, %v4322_v5  ;;  %v4325_v8 = vpop.f32.mrf.mxu0  ;;  %v2648_v45 = vld [vmem:[#allocation2 + $0x278] sm:$0xff]  ;;  %5021 = vmatprep.mubr.bf16.mxu0 %v13831_v58  ;;  %v8207_v28 = vcombine.low %v11349_v13, %v11351_v20  ;;  %v11387_v42 = vsel %vm5900_vm7, %v11326_v53, %v6156_v60 }
 0x328   : > { %5205 = vmatmul.mubr.bf16.gmra.mxu1 %v13830_v6  ;;  %v4516_v37 = vpop.f32.mrf.mxu1  ;;  %v4326_v3 = vadd.f32 %v4325_v8, %v10843_v19  ;;  %v2772_v7 = vld [vmem:[#allocation2 + $0x658] sm:$0xff]  ;;  %5330 = vmatpush2.bf16.msra.mxu0 %v8087_v43  ;;  %13833 = vst [vmem:[#allocation17_spill] sm:$0xff] %v11387_v42  ;;  %v8072_v21 = vcombine.high %v2644_v24, %v2648_v45 }
 0x329   : > { %v2776_v5 = vld [vmem:[#allocation2 + $0x678] sm:$0xff]  ;;  %v4517_v25 = vadd.f32 %v4516_v37, %v4324_v56  ;;  %v4327_v57 = vpop.f32.mrf.mxu0  ;;  %v11390_v8 = vsel %vm5908_vm8, %v4511_v46, %v6164_v15  ;;  %5523 = vmatpush2.bf16.msra.mxu1 %v8215_v36  ;;  %5331 = vmatprep.subr.bf16.mxu0 %v8080_v16  ;;  %v6171_v56 = vmul.f32 0.2, %v4515_v22  ;;  %vm5915_vm9 = vcmp.gt.f32.partialorder %v4515_v22, 0.0 }
 0x32a   : > { %v13832_v1 = vld [vmem:[#allocation24_spill] sm:$0xff]  ;;  %13834 = vst [vmem:[#allocation97_spill] sm:$0xff] %v11390_v8  ;;  %v4518_v58 = vpop.f32.mrf.mxu1  ;;  %v4328_v33 = vadd.f32 %v4327_v57, %v10846_v17  ;;  %5524 = vmatprep.subr.bf16.mxu1 %v8208_v41  ;;  %v8200_v37 = vcombine.high %v2772_v7, %v2776_v5  ;;  %v8071_v15 = vcombine.low %v2644_v24, %v2648_v45 }
 0x32b   : > { %5214 = vmatprep.mubr.bf16.mxu1 %v13832_v1  ;;  %v2636_v13 = vld [vmem:[#allocation2 + $0x218] sm:$0xff]  ;;  %v4519_v43 = vadd.f32 %v4518_v58, %v4326_v3  ;;  %v6172_v6 = vmul.f32 0.2, %v4517_v25  ;;  %vm5916_vm11 = vcmp.gt.f32.partialorder %v4517_v25, 0.0  ;;  %v8199_v16 = vcombine.low %v2772_v7, %v2776_v5 }
 0x32c   : > { %v2640_v1 = vld [vmem:[#allocation2 + $0x238] sm:$0xff]  ;;  %v4520_v46 = vpop.f32.mrf.mxu1  ;;  %5332 = vmatpush2.bf16.msra.mxu0 %v8079_v32  ;;  %v11395_v58 = vsel %vm5915_vm9, %v4515_v22, %v6171_v56 }
 0x32d   : > { %v2764_v53 = vld [vmem:[#allocation2 + $0x618] sm:$0xff]  ;;  %vm5923_vm10 = vcmp.gt.f32.partialorder %v4519_v43, 0.0  ;;  %v6179_v57 = vmul.f32 0.2, %v4519_v43  ;;  %v4521_v36 = vadd.f32 %v4520_v46, %v4328_v33  ;;  %5525 = vmatpush2.bf16.msra.mxu1 %v8207_v28  ;;  %5333 = vmatprep.subr.bf16.mxu0 %v8072_v21  ;;  %v8064_v20 = vcombine.high %v2636_v13, %v2640_v1  ;;  %13835 = vst [vmem:[#allocation98_spill] sm:$0xff] %v11395_v58 }
 0x32e   : > { %v2768_v60 = vld [vmem:[#allocation2 + $0x638] sm:$0xff]  ;;  %v4331_v8 = vpop.f32.mrf.mxu0  ;;  %5022 = vmatmul.mubr.bf16.gmra.mxu0 %v13741_v61  ;;  %5526 = vmatprep.subr.bf16.mxu1 %v8200_v37  ;;  %v8063_v22 = vcombine.low %v2636_v13, %v2640_v1  ;;  %v11407_v5 = vsel %vm5916_vm11, %v4517_v25, %v6172_v6 }
 0x32f   : > { %v8192_v42 = vcombine.high %v2764_v53, %v2768_v60  ;;  %v11397_v41 = vsel %vm5923_vm10, %v4519_v43, %v6179_v57  ;;  %vm5924_vm12 = vcmp.gt.f32.partialorder %v4521_v36, 0.0  ;;  %v6180_v3 = vmul.f32 0.2, %v4521_v36  ;;  %v4524_v32 = vpop.f32.mrf.mxu1  ;;  %5031 = vmatprep.mubr.bf16.mxu0 %v13743_v12  ;;  %13837 = vst [vmem:[#allocation100_spill] sm:$0xff] %v11407_v5  ;;  %v8925_v1 = vld [vmem:[%s13289_s9 + $0x78] sm:$0xff]  }
 0x330   : > { %13836 = vst [vmem:[#allocation99_spill] sm:$0xff] %v11397_v41  ;;  %v4332_v45 = vadd.f32 %v4331_v8, %v10843_v19  ;;  %5215 = vmatmul.mubr.bf16.gmra.mxu1 %v13742_v38  ;;  %v4333_v28 = vpop.f32.mrf.mxu0  ;;  %5334 = vmatpush2.bf16.msra.mxu0 %v8071_v15  ;;  %v8191_v7 = vcombine.low %v2764_v53, %v2768_v60  ;;  %v8927_v6 = vld [vmem:[%s13289_s9 + $0xf8] sm:$0xff]   ;;  %v13839_v60 = vld [vmem:[#allocation9_spill] sm:$0xff] }
 0x331   : > { %5224 = vmatprep.mubr.bf16.mxu1 %v13744_v31  ;;  %v11410_v33 = vsel %vm5924_vm12, %v4521_v36, %v6180_v3  ;;  %v4334_v8 = vadd.f32 %v4333_v28, %v10846_v17  ;;  %v4526_v56 = vpop.f32.mrf.mxu1  ;;  %5527 = vmatpush2.bf16.msra.mxu1 %v8199_v16  ;;  %v13840_v46 = vsub.s32 2, %v13839_v60  ;;  %v13841_v3 = vsub.s32 3, %v13839_v60 }
 0x332   : > { %13838 = vst [vmem:[#allocation101_spill] sm:$0xff] %v11410_v33  ;;  %v4525_v21 = vadd.f32 %v4524_v32, %v4332_v45  ;;  %5335 = vmatprep.subr.bf16.mxu0 %v8064_v20  ;;  %v4335_v43 = vpop.f32.mrf.mxu0  ;;  %5528 = vmatprep.subr.bf16.mxu1 %v8192_v42  ;;  %v8989_v20 = vld [vmem:[%s13288_s8] sm:$0xff] }
 0x333   : > { %v4527_v25 = vadd.f32 %v4526_v56, %v4334_v8  ;;  %v4336_v37 = vadd.f32 %v4335_v43, %v10843_v19  ;;  %v4528_v53 = vpop.f32.mrf.mxu1  ;;  %v11427_v15 = vrot.slane %v8989_v20, %v13840_v46  ;;  %v11431_v45 = vrot.slane %v8989_v20, %v13841_v3 }
 0x334   : > { %v6187_v57 = vmul.f32 0.2, %v4525_v21  ;;  %v4337_v36 = vpop.f32.mrf.mxu0  ;;  %5336 = vmatpush2.bf16.msra.mxu0 %v8063_v22  ;;  %vm5931_vm13 = vcmp.gt.f32.partialorder %v4525_v21, 0.0 }
 0x335   : > { %v4529_v42 = vadd.f32 %v4528_v53, %v4336_v37  ;;  %v4530_v16 = vpop.f32.mrf.mxu1  ;;  %5529 = vmatpush2.bf16.msra.mxu1 %v8191_v7  ;;  %8320 = vmatprep.subr.bf16.mxu0 %v8925_v1  ;;  %v4338_v19 = vadd.f32 %v4337_v36, %v10846_v17  ;;  %v13843_v1 = vld [vmem:[#allocation36_spill] sm:$0xff]  ;;  %v6188_v43 = vmul.f32 0.2, %v4527_v25  ;;  %vm5932_vm15 = vcmp.gt.f32.partialorder %v4527_v25, 0.0 }
 0x336   : > { %v4567_v32 = vpop.f32.mrf.mxu0  ;;  %5032 = vmatmul.mubr.bf16.gmra.mxu0 %v13749_v39  ;;  %8432 = vmatprep.subr.bf16.mxu1 %v8927_v6  ;;  %v11439_v56 = vsel %vm5931_vm13, %v4525_v21, %v6187_v57 }
 0x337   : > { %vm5939_vm14 = vcmp.gt.f32.partialorder %v4529_v42, 0.0  ;;  %v6195_v28 = vmul.f32 0.2, %v4529_v42  ;;  %v4568_v8 = vadd.f32 %v4567_v32, %v11427_v15  ;;  %v4760_v22 = vpop.f32.mrf.mxu1  ;;  %5041 = vmatprep.mubr.bf16.mxu0 %v13751_v62  ;;  %13842 = vst [vmem:[#allocation9_spill] sm:$0xff] %v11439_v56  ;;  %v4531_v7 = vadd.f32 %v4530_v16, %v4338_v19 }
 0x338   : > { %5225 = vmatmul.mubr.bf16.gmra.mxu1 %v13750_v51  ;;  %v4569_v17 = vpop.f32.mrf.mxu0 }
 0x339   : > { %5234 = vmatprep.mubr.bf16.mxu1 %v13843_v1  ;;  %v11442_v37 = vsel %vm5939_vm14, %v4529_v42, %v6195_v28  ;;  %v4761_v6 = vadd.f32 %v4760_v22, %v4568_v8  ;;  %v4570_v53 = vadd.f32 %v4569_v17, %v11431_v45  ;;  %v4762_v20 = vpop.f32.mrf.mxu1  ;;  %vm5940_vm0 = vcmp.gt.f32.partialorder %v4531_v7, 0.0 }
 0x33a   : > { %13844 = vst [vmem:[#allocation36_spill] sm:$0xff] %v11442_v37  ;;  %v6196_v36 = vmul.f32 0.2, %v4531_v7  ;;  %v4571_v3 = vpop.f32.mrf.mxu0  ;;  %v11450_v8 = vsel %vm5932_vm15, %v4527_v25, %v6188_v43  ;;  %v13850_v43 = vld [vmem:[#allocation40_spill] sm:$0xff] }
 0x33b   : > { %v4763_v21 = vadd.f32 %v4762_v20, %v4570_v53  ;;  %v4572_v57 = vadd.f32 %v4571_v3, %v11427_v15  ;;  %v4764_v16 = vpop.f32.mrf.mxu1  ;;  %v5949_v19 = vmul.f32 0.2, %v4761_v6  ;;  %vm5693_vm1 = vcmp.gt.f32.partialorder %v4761_v6, 0.0  ;;  %13846 = vst [vmem:[#allocation103_spill] sm:$0xff] %v11450_v8 }
 0x33c   : > { %v4573_v32 = vpop.f32.mrf.mxu0  ;;  %v11448_v24 = vsel %vm5940_vm0, %v4531_v7, %v6196_v36  ;;  %v13847_v7 = vld [vmem:[#allocation35_spill] sm:$0xff]  ;;  %v13848_v36 = vld [vmem:[#allocation38_spill] sm:$0xff] }
 0x33d   : > { %13845 = vst [vmem:[#allocation102_spill] sm:$0xff] %v11448_v24  ;;  %v4765_v42 = vadd.f32 %v4764_v16, %v4572_v57  ;;  %v4766_v28 = vpop.f32.mrf.mxu1  ;;  %v4574_v22 = vadd.f32 %v4573_v32, %v11431_v45  ;;  %v11459_v57 = vsel %vm5693_vm1, %v4761_v6, %v5949_v19  ;;  %v5950_v32 = vmul.f32 0.2, %v4763_v21 }
 0x33e   : > { %v4577_v17 = vpop.f32.mrf.mxu0  ;;  %5042 = vmatmul.mubr.bf16.gmra.mxu0 %v13757_v23  ;;  %13849 = vst [vmem:[#allocation35_spill] sm:$0xff] %v11459_v57  ;;  %vm5694_vm3 = vcmp.gt.f32.partialorder %v4763_v21, 0.0 }
 0x33f   : > { %vm5701_vm2 = vcmp.gt.f32.partialorder %v4765_v42, 0.0  ;;  %v5957_v20 = vmul.f32 0.2, %v4765_v42  ;;  %v4578_v3 = vadd.f32 %v4577_v17, %v11427_v15  ;;  %v4770_v46 = vpop.f32.mrf.mxu1  ;;  %5051 = vmatprep.mubr.bf16.mxu0 %v13848_v36  ;;  %v4767_v25 = vadd.f32 %v4766_v28, %v4574_v22 }
 0x340   : > { %5235 = vmatmul.mubr.bf16.gmra.mxu1 %v13847_v7  ;;  %v4579_v16 = vpop.f32.mrf.mxu0 }
 0x341   : > { %5244 = vmatprep.mubr.bf16.mxu1 %v13850_v43  ;;  %v11462_v13 = vsel %vm5701_vm2, %v4765_v42, %v5957_v20  ;;  %v4771_v56 = vadd.f32 %v4770_v46, %v4578_v3  ;;  %v4580_v53 = vadd.f32 %v4579_v16, %v11431_v45  ;;  %v4772_v37 = vpop.f32.mrf.mxu1  ;;  %vm5702_vm4 = vcmp.gt.f32.partialorder %v4767_v25, 0.0 }
 0x342   : > { %13851 = vst [vmem:[#allocation38_spill] sm:$0xff] %v11462_v13  ;;  %v5958_v8 = vmul.f32 0.2, %v4767_v25  ;;  %v4581_v24 = vpop.f32.mrf.mxu0  ;;  %v11470_v20 = vsel %vm5694_vm3, %v4763_v21, %v5950_v32 }
 0x343   : > { %v4773_v6 = vadd.f32 %v4772_v37, %v4580_v53  ;;  %v4582_v19 = vadd.f32 %v4581_v24, %v11427_v15  ;;  %v4774_v28 = vpop.f32.mrf.mxu1  ;;  %v5965_v22 = vmul.f32 0.2, %v4771_v56  ;;  %vm5709_vm5 = vcmp.gt.f32.partialorder %v4771_v56, 0.0  ;;  %13853 = vst [vmem:[#allocation104_spill] sm:$0xff] %v11470_v20 }
 0x344   : > { %v4583_v58 = vpop.f32.mrf.mxu0  ;;  %v11468_v41 = vsel %vm5702_vm4, %v4767_v25, %v5958_v8  ;;  %v13855_v25 = vld [vmem:[#allocation43_spill] sm:$0xff] }
 0x345   : > { %13852 = vst [vmem:[#allocation40_spill] sm:$0xff] %v11468_v41  ;;  %v4775_v46 = vadd.f32 %v4774_v28, %v4582_v19  ;;  %v4776_v42 = vpop.f32.mrf.mxu1  ;;  %v4584_v3 = vadd.f32 %v4583_v58, %v11431_v45  ;;  %v11479_v8 = vsel %vm5709_vm5, %v4771_v56, %v5965_v22  ;;  %v5966_v32 = vmul.f32 0.2, %v4773_v6 }
 0x346   : > { %v4587_v16 = vpop.f32.mrf.mxu0  ;;  %5052 = vmatmul.mubr.bf16.gmra.mxu0 %v13765_v29  ;;  %13854 = vst [vmem:[#allocation105_spill] sm:$0xff] %v11479_v8  ;;  %vm5710_vm7 = vcmp.gt.f32.partialorder %v4773_v6, 0.0 }
 0x347   : > { %vm5717_vm6 = vcmp.gt.f32.partialorder %v4775_v46, 0.0  ;;  %v5973_v24 = vmul.f32 0.2, %v4775_v46  ;;  %v4588_v53 = vadd.f32 %v4587_v16, %v11427_v15  ;;  %v4780_v17 = vpop.f32.mrf.mxu1  ;;  %5061 = vmatprep.mubr.bf16.mxu0 %v10664_v48  ;;  %v4777_v21 = vadd.f32 %v4776_v42, %v4584_v3 }
 0x348   : > { %5245 = vmatmul.mubr.bf16.gmra.mxu1 %v13766_v35  ;;  %v4589_v58 = vpop.f32.mrf.mxu0 }
 0x349   : > { %5254 = vmatprep.mubr.bf16.mxu1 %v13855_v25  ;;  %v11482_v19 = vsel %vm5717_vm6, %v4775_v46, %v5973_v24  ;;  %v4781_v28 = vadd.f32 %v4780_v17, %v4588_v53  ;;  %v4590_v37 = vadd.f32 %v4589_v58, %v11431_v45  ;;  %v4782_v5 = vpop.f32.mrf.mxu1  ;;  %vm5718_vm8 = vcmp.gt.f32.partialorder %v4777_v21, 0.0 }
 0x34a   : > { %13856 = vst [vmem:[#allocation43_spill] sm:$0xff] %v11482_v19  ;;  %v5974_v33 = vmul.f32 0.2, %v4777_v21  ;;  %v4591_v57 = vpop.f32.mrf.mxu0  ;;  %v11490_v24 = vsel %vm5710_vm7, %v4773_v6, %v5966_v32  ;;  %v13862_v32 = vld [vmem:[#allocation47_spill] sm:$0xff] }
 0x34b   : > { %v4783_v56 = vadd.f32 %v4782_v5, %v4590_v37  ;;  %v4592_v22 = vadd.f32 %v4591_v57, %v11427_v15  ;;  %v4784_v42 = vpop.f32.mrf.mxu1  ;;  %v5981_v3 = vmul.f32 0.2, %v4781_v28  ;;  %vm5725_vm9 = vcmp.gt.f32.partialorder %v4781_v28, 0.0  ;;  %13858 = vst [vmem:[#allocation107_spill] sm:$0xff] %v11490_v24 }
 0x34c   : > { %v4593_v13 = vpop.f32.mrf.mxu0  ;;  %v11488_v20 = vsel %vm5718_vm8, %v4777_v21, %v5974_v33  ;;  %v13859_v33 = vld [vmem:[#allocation42_spill] sm:$0xff] }
 0x34d   : > { %13857 = vst [vmem:[#allocation106_spill] sm:$0xff] %v11488_v20  ;;  %v4785_v17 = vadd.f32 %v4784_v42, %v4592_v22  ;;  %v4786_v46 = vpop.f32.mrf.mxu1  ;;  %v4594_v53 = vadd.f32 %v4593_v13, %v11431_v45  ;;  %v13860_v21 = vld [vmem:[#allocation46_spill] sm:$0xff]  ;;  %v11499_v22 = vsel %vm5725_vm9, %v4781_v28, %v5981_v3  ;;  %v5982_v42 = vmul.f32 0.2, %v4783_v56 }
 0x34e   : > { %v4597_v58 = vpop.f32.mrf.mxu0  ;;  %5062 = vmatmul.mubr.bf16.gmra.mxu0 %v13769_v30  ;;  %13861 = vst [vmem:[#allocation42_spill] sm:$0xff] %v11499_v22  ;;  %vm5726_vm11 = vcmp.gt.f32.partialorder %v4783_v56, 0.0 }
 0x34f   : > { %vm5733_vm10 = vcmp.gt.f32.partialorder %v4785_v17, 0.0  ;;  %v5989_v57 = vmul.f32 0.2, %v4785_v17  ;;  %v4598_v37 = vadd.f32 %v4597_v58, %v11427_v15  ;;  %v4790_v16 = vpop.f32.mrf.mxu1  ;;  %5071 = vmatprep.mubr.bf16.mxu0 %v13860_v21  ;;  %v4787_v6 = vadd.f32 %v4786_v46, %v4594_v53 }
 0x350   : > { %5255 = vmatmul.mubr.bf16.gmra.mxu1 %v13859_v33  ;;  %v4599_v13 = vpop.f32.mrf.mxu0 }
 0x351   : > { %5264 = vmatprep.mubr.bf16.mxu1 %v13862_v32  ;;  %v11502_v8 = vsel %vm5733_vm10, %v4785_v17, %v5989_v57  ;;  %v4791_v19 = vadd.f32 %v4790_v16, %v4598_v37  ;;  %v4600_v5 = vadd.f32 %v4599_v13, %v11431_v45  ;;  %v4792_v24 = vpop.f32.mrf.mxu1  ;;  %vm5734_vm12 = vcmp.gt.f32.partialorder %v4787_v6, 0.0 }
 0x352   : > { %13863 = vst [vmem:[#allocation108_spill] sm:$0xff] %v11502_v8  ;;  %v5990_v20 = vmul.f32 0.2, %v4787_v6  ;;  %v4601_v41 = vpop.f32.mrf.mxu0  ;;  %v11510_v57 = vsel %vm5726_vm11, %v4783_v56, %v5982_v42 }
 0x353   : > { %v4793_v28 = vadd.f32 %v4792_v24, %v4600_v5  ;;  %v4602_v3 = vadd.f32 %v4601_v41, %v11427_v15  ;;  %v4794_v46 = vpop.f32.mrf.mxu1  ;;  %v5997_v53 = vmul.f32 0.2, %v4791_v19  ;;  %vm5741_vm13 = vcmp.gt.f32.partialorder %v4791_v19, 0.0  ;;  %13865 = vst [vmem:[#allocation110_spill] sm:$0xff] %v11510_v57 }
 0x354   : > { %v4603_v32 = vpop.f32.mrf.mxu0  ;;  %v11508_v21 = vsel %vm5734_vm12, %v4787_v6, %v5990_v20  ;;  %v13866_v20 = vld [vmem:[#allocation45_spill] sm:$0xff]  ;;  %v13867_v6 = vld [vmem:[#allocation48_spill] sm:$0xff] }
 0x355   : > { %13864 = vst [vmem:[#allocation109_spill] sm:$0xff] %v11508_v21  ;;  %v4795_v16 = vadd.f32 %v4794_v46, %v4602_v3  ;;  %v4796_v17 = vpop.f32.mrf.mxu1  ;;  %v4604_v37 = vadd.f32 %v4603_v32, %v11431_v45  ;;  %v11519_v3 = vsel %vm5741_vm13, %v4791_v19, %v5997_v53  ;;  %v5998_v42 = vmul.f32 0.2, %v4793_v28 }
 0x356   : > { %v4607_v13 = vpop.f32.mrf.mxu0  ;;  %5072 = vmatmul.mubr.bf16.gmra.mxu0 %v13776_v52  ;;  %13868 = vst [vmem:[#allocation45_spill] sm:$0xff] %v11519_v3  ;;  %vm5742_vm15 = vcmp.gt.f32.partialorder %v4793_v28, 0.0 }
 0x357   : > { %vm5749_vm14 = vcmp.gt.f32.partialorder %v4795_v16, 0.0  ;;  %v6005_v41 = vmul.f32 0.2, %v4795_v16  ;;  %v4608_v5 = vadd.f32 %v4607_v13, %v11427_v15  ;;  %v4800_v58 = vpop.f32.mrf.mxu1  ;;  %5081 = vmatprep.mubr.bf16.mxu0 %v13867_v6  ;;  %v4797_v56 = vadd.f32 %v4796_v17, %v4604_v37 }
 0x358   : > { %5265 = vmatmul.mubr.bf16.gmra.mxu1 %v13866_v20  ;;  %v4609_v32 = vpop.f32.mrf.mxu0 }
 0x359   : > { %5274 = vmatprep.mubr.bf16.mxu1 %v13780_v14  ;;  %v11522_v46 = vsel %vm5749_vm14, %v4795_v16, %v6005_v41  ;;  %v4801_v22 = vadd.f32 %v4800_v58, %v4608_v5  ;;  %v4610_v24 = vadd.f32 %v4609_v32, %v11431_v45  ;;  %v4802_v8 = vpop.f32.mrf.mxu1  ;;  %vm5750_vm0 = vcmp.gt.f32.partialorder %v4797_v56, 0.0 }
 0x35a   : > { %13869 = vst [vmem:[#allocation111_spill] sm:$0xff] %v11522_v46  ;;  %v6006_v57 = vmul.f32 0.2, %v4797_v56  ;;  %v4611_v21 = vpop.f32.mrf.mxu0  ;;  %v11530_v41 = vsel %vm5742_vm15, %v4793_v28, %v5998_v42  ;;  %v13875_v42 = vld [vmem:[#allocation55_spill] sm:$0xff] }
 0x35b   : > { %v4803_v19 = vadd.f32 %v4802_v8, %v4610_v24  ;;  %v4612_v53 = vadd.f32 %v4611_v21, %v11427_v15  ;;  %v4804_v17 = vpop.f32.mrf.mxu1  ;;  %v6013_v37 = vmul.f32 0.2, %v4801_v22  ;;  %vm5757_vm1 = vcmp.gt.f32.partialorder %v4801_v22, 0.0  ;;  %13871 = vst [vmem:[#allocation113_spill] sm:$0xff] %v11530_v41 }
 0x35c   : > { %v4613_v14 = vpop.f32.mrf.mxu0  ;;  %v11528_v6 = vsel %vm5750_vm0, %v4797_v56, %v6006_v57  ;;  %v13872_v57 = vld [vmem:[#allocation51_spill] sm:$0xff]  ;;  %v13873_v56 = vld [vmem:[#allocation53_spill] sm:$0xff] }
 0x35d   : > { %13870 = vst [vmem:[#allocation112_spill] sm:$0xff] %v11528_v6  ;;  %v4805_v58 = vadd.f32 %v4804_v17, %v4612_v53  ;;  %v4806_v16 = vpop.f32.mrf.mxu1  ;;  %v4614_v5 = vadd.f32 %v4613_v14, %v11431_v45  ;;  %v11539_v53 = vsel %vm5757_vm1, %v4801_v22, %v6013_v37  ;;  %v6014_v17 = vmul.f32 0.2, %v4803_v19 }
 0x35e   : > { %v4617_v32 = vpop.f32.mrf.mxu0  ;;  %5082 = vmatmul.mubr.bf16.gmra.mxu0 %v13783_v26  ;;  %13874 = vst [vmem:[#allocation114_spill] sm:$0xff] %v11539_v53  ;;  %vm5758_vm3 = vcmp.gt.f32.partialorder %v4803_v19, 0.0 }
 0x35f   : > { %vm5765_vm2 = vcmp.gt.f32.partialorder %v4805_v58, 0.0  ;;  %v6021_v21 = vmul.f32 0.2, %v4805_v58  ;;  %v4618_v24 = vadd.f32 %v4617_v32, %v11427_v15  ;;  %v4810_v13 = vpop.f32.mrf.mxu1  ;;  %5091 = vmatprep.mubr.bf16.mxu0 %v13873_v56  ;;  %v4807_v28 = vadd.f32 %v4806_v16, %v4614_v5 }
 0x360   : > { %5275 = vmatmul.mubr.bf16.gmra.mxu1 %v13872_v57  ;;  %v4619_v14 = vpop.f32.mrf.mxu0 }
 0x361   : > { %5284 = vmatprep.mubr.bf16.mxu1 %v13875_v42  ;;  %v11542_v3 = vsel %vm5765_vm2, %v4805_v58, %v6021_v21  ;;  %v4811_v46 = vadd.f32 %v4810_v13, %v4618_v24  ;;  %v4620_v8 = vadd.f32 %v4619_v14, %v11431_v45  ;;  %v4812_v41 = vpop.f32.mrf.mxu1  ;;  %vm5766_vm4 = vcmp.gt.f32.partialorder %v4807_v28, 0.0 }
 0x362   : > { %13876 = vst [vmem:[#allocation115_spill] sm:$0xff] %v11542_v3  ;;  %v6022_v6 = vmul.f32 0.2, %v4807_v28  ;;  %v4621_v56 = vpop.f32.mrf.mxu0  ;;  %v11550_v21 = vsel %vm5758_vm3, %v4803_v19, %v6014_v17  ;;  %v13882_v17 = vld [vmem:[#allocation57_spill] sm:$0xff] }
 0x363   : > { %v4813_v22 = vadd.f32 %v4812_v41, %v4620_v8  ;;  %v4622_v37 = vadd.f32 %v4621_v56, %v11427_v15  ;;  %v4814_v16 = vpop.f32.mrf.mxu1  ;;  %v6029_v5 = vmul.f32 0.2, %v4811_v46  ;;  %vm5773_vm5 = vcmp.gt.f32.partialorder %v4811_v46, 0.0  ;;  %13878 = vst [vmem:[#allocation117_spill] sm:$0xff] %v11550_v21 }
 0x364   : > { %v4623_v42 = vpop.f32.mrf.mxu0  ;;  %v11548_v57 = vsel %vm5766_vm4, %v4807_v28, %v6022_v6  ;;  %v13879_v6 = vld [vmem:[#allocation54_spill] sm:$0xff]  ;;  %v13880_v28 = vld [vmem:[#allocation56_spill] sm:$0xff] }
 0x365   : > { %13877 = vst [vmem:[#allocation116_spill] sm:$0xff] %v11548_v57  ;;  %v4815_v13 = vadd.f32 %v4814_v16, %v4622_v37  ;;  %v4816_v58 = vpop.f32.mrf.mxu1  ;;  %v4624_v24 = vadd.f32 %v4623_v42, %v11431_v45  ;;  %v11559_v37 = vsel %vm5773_vm5, %v4811_v46, %v6029_v5  ;;  %v6030_v16 = vmul.f32 0.2, %v4813_v22 }
 0x366   : > { %v4627_v14 = vpop.f32.mrf.mxu0  ;;  %5092 = vmatmul.mubr.bf16.gmra.mxu0 %v13789_v34  ;;  %13881 = vst [vmem:[#allocation118_spill] sm:$0xff] %v11559_v37  ;;  %vm5774_vm7 = vcmp.gt.f32.partialorder %v4813_v22, 0.0 }
 0x367   : > { %vm5781_vm6 = vcmp.gt.f32.partialorder %v4815_v13, 0.0  ;;  %v6037_v8 = vmul.f32 0.2, %v4815_v13  ;;  %v4628_v56 = vadd.f32 %v4627_v14, %v11427_v15  ;;  %v4820_v32 = vpop.f32.mrf.mxu1  ;;  %5101 = vmatprep.mubr.bf16.mxu0 %v13880_v28  ;;  %v4817_v19 = vadd.f32 %v4816_v58, %v4624_v24  ;;  %v13886_v14 = vld [vmem:[#allocation58_spill] sm:$0xff] }
 0x368   : > { %5285 = vmatmul.mubr.bf16.gmra.mxu1 %v13879_v6  ;;  %v4629_v42 = vpop.f32.mrf.mxu0 }
 0x369   : > { %5294 = vmatprep.mubr.bf16.mxu1 %v13882_v17  ;;  %v11562_v53 = vsel %vm5781_vm6, %v4815_v13, %v6037_v8  ;;  %v4821_v3 = vadd.f32 %v4820_v32, %v4628_v56  ;;  %v4630_v41 = vadd.f32 %v4629_v42, %v11431_v45  ;;  %v4822_v21 = vpop.f32.mrf.mxu1  ;;  %vm5782_vm8 = vcmp.gt.f32.partialorder %v4817_v19, 0.0 }
 0x36a   : > { %13883 = vst [vmem:[#allocation119_spill] sm:$0xff] %v11562_v53  ;;  %v6038_v57 = vmul.f32 0.2, %v4817_v19  ;;  %v4631_v28 = vpop.f32.mrf.mxu0  ;;  %v11570_v8 = vsel %vm5774_vm7, %v4813_v22, %v6030_v16  ;;  %v13890_v16 = vld [vmem:[#allocation31_spill] sm:$0xff] }
 0x36b   : > { %v4823_v46 = vadd.f32 %v4822_v21, %v4630_v41  ;;  %v4632_v5 = vadd.f32 %v4631_v28, %v11427_v15  ;;  %v4824_v58 = vpop.f32.mrf.mxu1  ;;  %v6045_v24 = vmul.f32 0.2, %v4821_v3  ;;  %vm5789_vm9 = vcmp.gt.f32.partialorder %v4821_v3, 0.0  ;;  %13885 = vst [vmem:[#allocation121_spill] sm:$0xff] %v11570_v8 }
 0x36c   : > { %v4633_v17 = vpop.f32.mrf.mxu0  ;;  %v11568_v6 = vsel %vm5782_vm8, %v4817_v19, %v6038_v57  ;;  %v13887_v57 = vld [vmem:[#allocation59_spill] sm:$0xff]  ;;  %v13888_v19 = vld [vmem:[#allocation30_spill] sm:$0xff] }
 0x36d   : > { %13884 = vst [vmem:[#allocation120_spill] sm:$0xff] %v11568_v6  ;;  %v4825_v32 = vadd.f32 %v4824_v58, %v4632_v5  ;;  %v4826_v13 = vpop.f32.mrf.mxu1  ;;  %v4634_v56 = vadd.f32 %v4633_v17, %v11431_v45  ;;  %v11579_v5 = vsel %vm5789_vm9, %v4821_v3, %v6045_v24  ;;  %v6046_v58 = vmul.f32 0.2, %v4823_v46 }
 0x36e   : > { %v4637_v42 = vpop.f32.mrf.mxu0  ;;  %5102 = vmatmul.mubr.bf16.gmra.mxu0 %v13886_v14  ;;  %13889 = vst [vmem:[#allocation59_spill] sm:$0xff] %v11579_v5  ;;  %vm5790_vm11 = vcmp.gt.f32.partialorder %v4823_v46, 0.0 }
 0x36f   : > { %vm5797_vm10 = vcmp.gt.f32.partialorder %v4825_v32, 0.0  ;;  %v6053_v41 = vmul.f32 0.2, %v4825_v32  ;;  %v4638_v28 = vadd.f32 %v4637_v42, %v11427_v15  ;;  %v4830_v37 = vpop.f32.mrf.mxu1  ;;  %5337 = vmatprep.mubr.bf16.mxu0 %v13888_v19  ;;  %v4827_v22 = vadd.f32 %v4826_v13, %v4634_v56 }
 0x370   : > { %5295 = vmatmul.mubr.bf16.gmra.mxu1 %v13887_v57  ;;  %v4639_v17 = vpop.f32.mrf.mxu0 }
 0x371   : > { %5530 = vmatprep.mubr.bf16.mxu1 %v13890_v16  ;;  %v11582_v53 = vsel %vm5797_vm10, %v4825_v32, %v6053_v41  ;;  %v4831_v14 = vadd.f32 %v4830_v37, %v4638_v28  ;;  %v4640_v21 = vadd.f32 %v4639_v17, %v11431_v45  ;;  %v4832_v8 = vpop.f32.mrf.mxu1  ;;  %vm5798_vm12 = vcmp.gt.f32.partialorder %v4827_v22, 0.0  ;;  %v8926_v32 = vld [vmem:[%s13289_s9 + $0x38] sm:$0xff]  }
 0x372   : > { %13891 = vst [vmem:[#allocation30_spill] sm:$0xff] %v11582_v53  ;;  %v6054_v6 = vmul.f32 0.2, %v4827_v22  ;;  %v4641_v19 = vpop.f32.mrf.mxu0  ;;  %v8928_v17 = vld [vmem:[%s13289_s9 + $0xb8] sm:$0xff]  }
 0x373   : > { %v4833_v3 = vadd.f32 %v4832_v8, %v4640_v21  ;;  %v4642_v24 = vadd.f32 %v4641_v19, %v11427_v15  ;;  %v4834_v13 = vpop.f32.mrf.mxu1  ;;  %v6061_v56 = vmul.f32 0.2, %v4831_v14  ;;  %vm5805_vm13 = vcmp.gt.f32.partialorder %v4831_v14, 0.0  ;;  %v8929_v8 = vld [vmem:[%s13289_s9 + $0x70] sm:$0xff]  }
 0x374   : > { %v4643_v37 = vpop.f32.mrf.mxu0  ;;  %v11591_v41 = vsel %vm5798_vm12, %v4827_v22, %v6054_v6  ;;  %v11600_v21 = vsel %vm5790_vm11, %v4823_v46, %v6046_v58  ;;  %v8931_v6 = vld [vmem:[%s13289_s9 + $0xf0] sm:$0xff]  }
 0x375   : > { %13892 = vst [vmem:[#allocation31_spill] sm:$0xff] %v11591_v41  ;;  %v4835_v28 = vadd.f32 %v4834_v13, %v4642_v24  ;;  %v4836_v16 = vpop.f32.mrf.mxu1  ;;  %13893 = vst [vmem:[#allocation122_spill] sm:$0xff] %v11600_v21  ;;  %v4644_v19 = vadd.f32 %v4643_v37, %v11431_v45  ;;  %v8930_v46 = vld [vmem:[%s13289_s9 + $0x30] sm:$0xff]   ;;  %v13894_v37 = vld [vmem:[#allocation32_spill] sm:$0xff]  ;;  %v6062_v53 = vmul.f32 0.2, %v4833_v3 }
 0x376   : > { %v4647_v42 = vpop.f32.mrf.mxu0  ;;  %5338 = vmatmul.mubr.bf16.vlgmr.msra.gmra.mxu0 %v10193_v9  ;;  %v11615_v9 = vsel %vm5805_vm13, %v4831_v14, %v6061_v56  ;;  %vm5806_vm15 = vcmp.gt.f32.partialorder %v4833_v3, 0.0 }
 0x377   : > { %vm5813_vm14 = vcmp.gt.f32.partialorder %v4835_v28, 0.0  ;;  %v6069_v24 = vmul.f32 0.2, %v4835_v28  ;;  %v4648_v13 = vadd.f32 %v4647_v42, %v11427_v15  ;;  %v4840_v5 = vpop.f32.mrf.mxu1  ;;  %8321 = vmatpush3.bf16.msra.mxu0 %v8926_v32  ;;  %v4837_v58 = vadd.f32 %v4836_v16, %v4644_v19  ;;  %5347 = vmatprep.mubr.bf16.mxu0 %v10232_v2  ;;  %v8933_v42 = vld [vmem:[%s13289_s9 + $0x68] sm:$0xff]   ;;  %v8932_v2 = vld [vmem:[%s13289_s9 + $0xb0] sm:$0xff]  }
 0x378   : > { %5531 = vmatmul.mubr.bf16.vlgmr.msra.gmra.mxu1 %v10198_v4  ;;  %v4649_v22 = vpop.f32.mrf.mxu0  ;;  %8322 = vmatprep.subr.bf16.mxu0 %v8929_v8 }
 0x379   : > { %5540 = vmatprep.mubr.bf16.mxu1 %v13894_v37  ;;  %v11622_v4 = vsel %vm5813_vm14, %v4835_v28, %v6069_v24  ;;  %v4841_v32 = vadd.f32 %v4840_v5, %v4648_v13  ;;  %v4650_v21 = vadd.f32 %v4649_v22, %v11431_v45  ;;  %v4842_v41 = vpop.f32.mrf.mxu1  ;;  %8433 = vmatpush3.bf16.msra.mxu1 %v8928_v17  ;;  %vm5814_vm0 = vcmp.gt.f32.partialorder %v4837_v58, 0.0  ;;  %v8935_v5 = vld [vmem:[%s13289_s9 + $0xe8] sm:$0xff]  }
 0x37a   : > { %v6070_v56 = vmul.f32 0.2, %v4837_v58  ;;  %v4651_v16 = vpop.f32.mrf.mxu0  ;;  %8434 = vmatprep.subr.bf16.mxu1 %v8931_v6  ;;  %v8934_v24 = vld [vmem:[%s13289_s9 + $0x28] sm:$0xff]  }
 0x37b   : > { %v11633_v28 = vadd.f32 %v4842_v41, %v4650_v21  ;;  %v4652_v17 = vadd.f32 %v4651_v16, %v11427_v15  ;;  %v4844_v8 = vpop.f32.mrf.mxu1  ;;  %8323 = vmatpush3.bf16.msra.mxu0 %v8930_v46  ;;  %v6077_v19 = vmul.f32 0.2, %v4841_v32  ;;  %vm5821_vm1 = vcmp.gt.f32.partialorder %v4841_v32, 0.0  ;;  %v8936_v41 = vld [vmem:[%s13289_s9 + $0xa8] sm:$0xff]   ;;  %v8937_v21 = vld [vmem:[%s13289_s9 + $0x60] sm:$0xff]  }
 0x37c   : > { %v4653_v22 = vpop.f32.mrf.mxu0  ;;  %8324 = vmatprep.subr.bf16.mxu0 %v8933_v42  ;;  %v11639_v13 = vsel %vm5814_vm0, %v4837_v58, %v6070_v56  ;;  %v11648_v46 = vsel %vm5806_vm15, %v4833_v3, %v6062_v53  ;;  %v8939_v58 = vld [vmem:[%s13289_s9 + $0xe0] sm:$0xff]  }
 0x37d   : > { %v4845_v6 = vadd.f32 %v4844_v8, %v4652_v17  ;;  %v4846_v37 = vpop.f32.mrf.mxu1  ;;  %8435 = vmatpush3.bf16.msra.mxu1 %v8932_v2  ;;  %v4654_v42 = vadd.f32 %v4653_v22, %v11431_v45  ;;  %v11661_v53 = vsel %vm5821_vm1, %v4841_v32, %v6077_v19  ;;  %v6078_v22 = vmul.f32 0.2, %v11633_v28  ;;  %v8941_v32 = vld [vmem:[%s13289_s9 + $0x58] sm:$0xff]  }
 0x37e   : > { %v4657_v16 = vpop.f32.mrf.mxu0  ;;  %5348 = vmatmul.mubr.bf16.gmra.mxu0 %v10230_v0  ;;  %8436 = vmatprep.subr.bf16.mxu1 %v8935_v5  ;;  %v8938_v5 = vld [vmem:[%s13289_s9 + $0x20] sm:$0xff]   ;;  %vm5822_vm3 = vcmp.gt.f32.partialorder %v11633_v28, 0.0 }
 0x37f   : > { %vm5829_vm2 = vcmp.gt.f32.partialorder %v4845_v6, 0.0  ;;  %v6085_v56 = vmul.f32 0.2, %v4845_v6  ;;  %v4658_v17 = vadd.f32 %v4657_v16, %v11427_v15  ;;  %v4850_v8 = vpop.f32.mrf.mxu1  ;;  %5357 = vmatprep.mubr.bf16.mxu0 %v10283_v44  ;;  %v4847_v0 = vadd.f32 %v4846_v37, %v4654_v42  ;;  %8325 = vmatpush3.bf16.msra.mxu0 %v8934_v24  ;;  %v8943_v37 = vld [vmem:[%s13289_s9 + $0xd8] sm:$0xff]  }
 0x380   : > { %5541 = vmatmul.mubr.bf16.gmra.mxu1 %v10246_v49  ;;  %v4659_v3 = vpop.f32.mrf.mxu0  ;;  %8326 = vmatprep.subr.bf16.mxu0 %v8937_v21 }
 0x381   : > { %5550 = vmatprep.mubr.bf16.mxu1 %v10302_v59  ;;  %v11668_v16 = vsel %vm5829_vm2, %v4845_v6, %v6085_v56  ;;  %v4851_v14 = vadd.f32 %v4850_v8, %v4658_v17  ;;  %v4660_v49 = vadd.f32 %v4659_v3, %v11431_v45  ;;  %v4852_v44 = vpop.f32.mrf.mxu1  ;;  %8437 = vmatpush3.bf16.msra.mxu1 %v8936_v41  ;;  %v8940_v59 = vld [vmem:[%s13289_s9 + $0xa0] sm:$0xff]   ;;  %vm5830_vm4 = vcmp.gt.f32.partialorder %v4847_v0, 0.0  ;;  %v8942_v8 = vld [vmem:[%s13289_s9 + $0x18] sm:$0xff]  }
 0x382   : > { %v6086_v24 = vmul.f32 0.2, %v4847_v0  ;;  %v4661_v6 = vpop.f32.mrf.mxu0  ;;  %8438 = vmatprep.subr.bf16.mxu1 %v8939_v58 }
 0x383   : > { %v11683_v41 = vadd.f32 %v4852_v44, %v4660_v49  ;;  %v4662_v21 = vadd.f32 %v4661_v6, %v11427_v15  ;;  %v4854_v42 = vpop.f32.mrf.mxu1  ;;  %v6093_v56 = vmul.f32 0.2, %v4851_v14  ;;  %8327 = vmatpush3.bf16.msra.mxu0 %v8938_v5  ;;  %vm5837_vm5 = vcmp.gt.f32.partialorder %v4851_v14, 0.0  ;;  %v8944_v49 = vld [vmem:[%s13289_s9 + $0x98] sm:$0xff]   ;;  %v8945_v44 = vld [vmem:[%s13289_s9 + $0x50] sm:$0xff]  }
 0x384   : > { %v4663_v17 = vpop.f32.mrf.mxu0  ;;  %v11689_v3 = vsel %vm5830_vm4, %v4847_v0, %v6086_v24  ;;  %8328 = vmatprep.subr.bf16.mxu0 %v8941_v32  ;;  %v11700_v5 = vsel %vm5822_vm3, %v11633_v28, %v6078_v22 }
 0x385   : > { %v4855_v58 = vadd.f32 %v4854_v42, %v4662_v21  ;;  %v4856_v19 = vpop.f32.mrf.mxu1  ;;  %8439 = vmatpush3.bf16.msra.mxu1 %v8940_v59  ;;  %v4664_v0 = vadd.f32 %v4663_v17, %v11431_v45  ;;  %v8947_v59 = vld [vmem:[%s13289_s9 + $0xd0] sm:$0xff]   ;;  %v11713_v28 = vsel %vm5837_vm5, %v4851_v14, %v6093_v56  ;;  %v6094_v17 = vmul.f32 0.2, %v11683_v41  ;;  %v8949_v14 = vld [vmem:[%s13289_s9 + $0x48] sm:$0xff]  }
 0x386   : > { %v4667_v24 = vpop.f32.mrf.mxu0  ;;  %5358 = vmatmul.mubr.bf16.gmra.mxu0 %v10280_v54  ;;  %8440 = vmatprep.subr.bf16.mxu1 %v8943_v37  ;;  %v8946_v37 = vld [vmem:[%s13289_s9 + $0x10] sm:$0xff]   ;;  %vm5838_vm7 = vcmp.gt.f32.partialorder %v11683_v41, 0.0 }
 0x387   : > { %vm5845_vm6 = vcmp.gt.f32.partialorder %v4855_v58, 0.0  ;;  %v6101_v6 = vmul.f32 0.2, %v4855_v58  ;;  %v4668_v21 = vadd.f32 %v4667_v24, %v11427_v15  ;;  %v4860_v42 = vpop.f32.mrf.mxu1  ;;  %5367 = vmatprep.mubr.bf16.mxu0 %v10343_v47  ;;  %v4857_v54 = vadd.f32 %v4856_v19, %v4664_v0  ;;  %8329 = vmatpush3.bf16.msra.mxu0 %v8942_v8 }
 0x388   : > { %5551 = vmatmul.mubr.bf16.gmra.mxu1 %v10291_v10  ;;  %v4669_v22 = vpop.f32.mrf.mxu0  ;;  %8330 = vmatprep.subr.bf16.mxu0 %v8945_v44 }
 0x389   : > { %5560 = vmatprep.mubr.bf16.mxu1 %v10347_v27  ;;  %v11720_v24 = vsel %vm5845_vm6, %v4855_v58, %v6101_v6  ;;  %v4861_v32 = vadd.f32 %v4860_v42, %v4668_v21  ;;  %v4670_v10 = vadd.f32 %v4669_v22, %v11431_v45  ;;  %v4862_v47 = vpop.f32.mrf.mxu1  ;;  %8441 = vmatpush3.bf16.msra.mxu1 %v8944_v49  ;;  %v8948_v27 = vld [vmem:[%s13289_s9 + $0x90] sm:$0xff]   ;;  %vm5846_vm8 = vcmp.gt.f32.partialorder %v4857_v54, 0.0  ;;  %v8951_v58 = vld [vmem:[%s13289_s9 + $0xc8] sm:$0xff]  }
 0x38a   : > { %v6102_v56 = vmul.f32 0.2, %v4857_v54  ;;  %v4671_v8 = vpop.f32.mrf.mxu0  ;;  %8442 = vmatprep.subr.bf16.mxu1 %v8947_v59  ;;  %v8950_v42 = vld [vmem:[%s13289_s9 + $0x8] sm:$0xff]  }
 0x38b   : > { %v11735_v49 = vadd.f32 %v4862_v47, %v4670_v10  ;;  %v4672_v44 = vadd.f32 %v4671_v8, %v11427_v15  ;;  %v4864_v0 = vpop.f32.mrf.mxu1  ;;  %v6109_v6 = vmul.f32 0.2, %v4861_v32  ;;  %8331 = vmatpush3.bf16.msra.mxu0 %v8946_v37  ;;  %vm5853_vm9 = vcmp.gt.f32.partialorder %v4861_v32, 0.0  ;;  %v8952_v10 = vld [vmem:[%s13289_s9 + $0x88] sm:$0xff]   ;;  %v8953_v47 = vld [vmem:[%s13289_s9 + $0x40] sm:$0xff]  }
 0x38c   : > { %v4673_v21 = vpop.f32.mrf.mxu0  ;;  %v11741_v22 = vsel %vm5846_vm8, %v4857_v54, %v6102_v56  ;;  %8332 = vmatprep.subr.bf16.mxu0 %v8949_v14  ;;  %v11752_v37 = vsel %vm5838_vm7, %v11683_v41, %v6094_v17 }
 0x38d   : > { %v4865_v59 = vadd.f32 %v4864_v0, %v4672_v44  ;;  %v4866_v19 = vpop.f32.mrf.mxu1  ;;  %8443 = vmatpush3.bf16.msra.mxu1 %v8948_v27  ;;  %v4674_v54 = vadd.f32 %v4673_v21, %v11431_v45  ;;  %v8955_v27 = vld [vmem:[%s13289_s9 + $0xc0] sm:$0xff]   ;;  %v11765_v41 = vsel %vm5853_vm9, %v4861_v32, %v6109_v6  ;;  %v6110_v21 = vmul.f32 0.2, %v11735_v49  ;;  %v8957_v32 = vld [vmem:[%s13289_s9 + $0x178] sm:$0xff]  }
 0x38e   : > { %v4677_v56 = vpop.f32.mrf.mxu0  ;;  %5368 = vmatmul.mubr.bf16.gmra.mxu0 %v10327_v11  ;;  %8444 = vmatprep.subr.bf16.mxu1 %v8951_v58  ;;  %13895 = vst [vmem:[#allocation32_spill] sm:$0xff] %v11765_v41  ;;  %v8954_v58 = vld [vmem:[%s13289_s9] sm:$0xff]   ;;  %vm5854_vm11 = vcmp.gt.f32.partialorder %v11735_v49, 0.0 }
 0x38f   : > { %vm5861_vm10 = vcmp.gt.f32.partialorder %v4865_v59, 0.0  ;;  %v6117_v8 = vmul.f32 0.2, %v4865_v59  ;;  %v4678_v44 = vadd.f32 %v4677_v56, %v11427_v15  ;;  %v4870_v0 = vpop.f32.mrf.mxu1  ;;  %5377 = vmatprep.mubr.bf16.mxu0 %v10386_v40  ;;  %v4867_v11 = vadd.f32 %v4866_v19, %v4674_v54  ;;  %8333 = vmatpush3.bf16.msra.mxu0 %v8950_v42 }
 0x390   : > { %5561 = vmatmul.mubr.bf16.gmra.mxu1 %v10335_v50  ;;  %v4679_v17 = vpop.f32.mrf.mxu0  ;;  %8334 = vmatprep.subr.bf16.mxu0 %v8953_v47 }
 0x391   : > { %5570 = vmatprep.mubr.bf16.mxu1 %v10388_v55  ;;  %v11772_v56 = vsel %vm5861_vm10, %v4865_v59, %v6117_v8  ;;  %v4871_v14 = vadd.f32 %v4870_v0, %v4678_v44  ;;  %v4680_v50 = vadd.f32 %v4679_v17, %v11431_v45  ;;  %v4872_v40 = vpop.f32.mrf.mxu1  ;;  %8445 = vmatpush3.bf16.msra.mxu1 %v8952_v10  ;;  %v8956_v55 = vld [vmem:[%s13289_s9 + $0x80] sm:$0xff]   ;;  %vm5862_vm12 = vcmp.gt.f32.partialorder %v4867_v11, 0.0  ;;  %v8959_v59 = vld [vmem:[%s13289_s9 + $0x1f8] sm:$0xff]  }
 0x392   : > { %v6118_v6 = vmul.f32 0.2, %v4867_v11  ;;  %v4681_v42 = vpop.f32.mrf.mxu0  ;;  %8446 = vmatprep.subr.bf16.mxu1 %v8955_v27  ;;  %v11793_v27 = vsel %vm5854_vm11, %v11735_v49, %v6110_v21 }
 0x393   : > { %v4873_v10 = vadd.f32 %v4872_v40, %v4680_v50  ;;  %v4682_v47 = vadd.f32 %v4681_v42, %v11427_v15  ;;  %v4874_v54 = vpop.f32.mrf.mxu1  ;;  %v6125_v8 = vmul.f32 0.2, %v4871_v14  ;;  %8335 = vmatpush3.bf16.msra.mxu0 %v8954_v58  ;;  %vm5869_vm13 = vcmp.gt.f32.partialorder %v4871_v14, 0.0  ;;  %v13896_v42 = vld [vmem:[#allocation33_spill] sm:$0xff] }
 0x394   : > { %v4683_v44 = vpop.f32.mrf.mxu0  ;;  %v11788_v0 = vsel %vm5862_vm12, %v4867_v11, %v6118_v6  ;;  %8544 = vmatprep.subr.bf16.mxu0 %v8957_v32  ;;  %v13897_v32 = vld [vmem:[#allocation14_spill] sm:$0xff] }
 0x395   : > { %v4875_v17 = vadd.f32 %v4874_v54, %v4682_v47  ;;  %v4876_v19 = vpop.f32.mrf.mxu1  ;;  %8447 = vmatpush3.bf16.msra.mxu1 %v8956_v55  ;;  %v4684_v50 = vadd.f32 %v4683_v44, %v11431_v45  ;;  %v11803_v49 = vsel %vm5869_vm13, %v4871_v14, %v6125_v8  ;;  %v13899_v47 = vld [vmem:[#allocation16_spill] sm:$0xff]  ;;  %vm5870_vm15 = vcmp.gt.f32.partialorder %v4873_v10, 0.0 }
 0x396   : > { %v4687_v40 = vpop.f32.mrf.mxu0  ;;  %5378 = vmatmul.mubr.bf16.gmra.mxu0 %v13896_v42  ;;  %8656 = vmatprep.subr.bf16.mxu1 %v8959_v59  ;;  %13898 = vst [vmem:[#allocation33_spill] sm:$0xff] %v11803_v49  ;;  %v6126_v59 = vmul.f32 0.2, %v4873_v10 }
 0x397   : > { %vm5877_vm14 = vcmp.gt.f32.partialorder %v4875_v17, 0.0  ;;  %v6133_v58 = vmul.f32 0.2, %v4875_v17  ;;  %v4688_v6 = vadd.f32 %v4687_v40, %v11427_v15  ;;  %v4880_v55 = vpop.f32.mrf.mxu1  ;;  %5387 = vmatprep.mubr.bf16.mxu0 %v13897_v32  ;;  %v4877_v21 = vadd.f32 %v4876_v19, %v4684_v50 }
 0x398   : > { %5571 = vmatmul.mubr.bf16.gmra.mxu1 %v13816_v18  ;;  %v4689_v54 = vpop.f32.mrf.mxu0  ;;  %v13903_v18 = vld [vmem:[#allocation13_spill] sm:$0xff] }
 0x399   : > { %5580 = vmatprep.mubr.bf16.mxu1 %v13899_v47  ;;  %v11806_v44 = vsel %vm5877_vm14, %v4875_v17, %v6133_v58  ;;  %v4881_v42 = vadd.f32 %v4880_v55, %v4688_v6  ;;  %v4690_v11 = vadd.f32 %v4689_v54, %v11431_v45  ;;  %v4882_v2 = vpop.f32.mrf.mxu1  ;;  %vm5878_vm0 = vcmp.gt.f32.partialorder %v4877_v21, 0.0 }
 0x39a   : > { %13900 = vst [vmem:[#allocation14_spill] sm:$0xff] %v11806_v44  ;;  %v6134_v40 = vmul.f32 0.2, %v4877_v21  ;;  %v4691_v32 = vpop.f32.mrf.mxu0  ;;  %v11814_v6 = vsel %vm5870_vm15, %v4873_v10, %v6126_v59  ;;  %v13907_v59 = vld [vmem:[#allocation20_spill] sm:$0xff] }
 0x39b   : > { %v4883_v14 = vadd.f32 %v4882_v2, %v4690_v11  ;;  %v4692_v19 = vadd.f32 %v4691_v32, %v11427_v15  ;;  %v4884_v8 = vpop.f32.mrf.mxu1  ;;  %v6141_v50 = vmul.f32 0.2, %v4881_v42  ;;  %vm5885_vm1 = vcmp.gt.f32.partialorder %v4881_v42, 0.0  ;;  %13902 = vst [vmem:[#allocation123_spill] sm:$0xff] %v11814_v6 }
 0x39c   : > { %v4693_v47 = vpop.f32.mrf.mxu0  ;;  %v11812_v41 = vsel %vm5878_vm0, %v4877_v21, %v6134_v40  ;;  %v13904_v21 = vld [vmem:[#allocation15_spill] sm:$0xff]  ;;  %v13905_v40 = vld [vmem:[#allocation18_spill] sm:$0xff] }
 0x39d   : > { %13901 = vst [vmem:[#allocation16_spill] sm:$0xff] %v11812_v41  ;;  %v4885_v17 = vadd.f32 %v4884_v8, %v4692_v19  ;;  %v4886_v58 = vpop.f32.mrf.mxu1  ;;  %v4694_v55 = vadd.f32 %v4693_v47, %v11431_v45  ;;  %v11823_v19 = vsel %vm5885_vm1, %v4881_v42, %v6141_v50  ;;  %v6142_v47 = vmul.f32 0.2, %v4883_v14 }
 0x39e   : > { %v4697_v54 = vpop.f32.mrf.mxu0  ;;  %5388 = vmatmul.mubr.bf16.gmra.mxu0 %v13903_v18  ;;  %13906 = vst [vmem:[#allocation13_spill] sm:$0xff] %v11823_v19  ;;  %vm5886_vm3 = vcmp.gt.f32.partialorder %v4883_v14, 0.0 }
 0x39f   : > { %vm5893_vm2 = vcmp.gt.f32.partialorder %v4885_v17, 0.0  ;;  %v6149_v11 = vmul.f32 0.2, %v4885_v17  ;;  %v4698_v32 = vadd.f32 %v4697_v54, %v11427_v15  ;;  %v4890_v49 = vpop.f32.mrf.mxu1  ;;  %5397 = vmatprep.mubr.bf16.mxu0 %v13905_v40  ;;  %v4887_v10 = vadd.f32 %v4886_v58, %v4694_v55 }
 0x3a0   : > { %5581 = vmatmul.mubr.bf16.gmra.mxu1 %v13904_v21  ;;  %v4699_v8 = vpop.f32.mrf.mxu0 }
 0x3a1   : > { %5590 = vmatprep.mubr.bf16.mxu1 %v13907_v59  ;;  %v11826_v18 = vsel %vm5893_vm2, %v4885_v17, %v6149_v11  ;;  %v4891_v44 = vadd.f32 %v4890_v49, %v4698_v32  ;;  %v4700_v2 = vadd.f32 %v4699_v8, %v11431_v45  ;;  %v4892_v6 = vpop.f32.mrf.mxu1  ;;  %vm5894_vm4 = vcmp.gt.f32.partialorder %v4887_v10, 0.0 }
 0x3a2   : > { %13908 = vst [vmem:[#allocation15_spill] sm:$0xff] %v11826_v18  ;;  %v6150_v21 = vmul.f32 0.2, %v4887_v10  ;;  %v4701_v40 = vpop.f32.mrf.mxu0  ;;  %v11834_v11 = vsel %vm5886_vm3, %v4883_v14, %v6142_v47  ;;  %v13912_v47 = vld [vmem:[#allocation24_spill] sm:$0xff] }
 0x3a3   : > { %v4893_v42 = vadd.f32 %v4892_v6, %v4700_v2  ;;  %v4702_v50 = vadd.f32 %v4701_v40, %v11427_v15  ;;  %v4894_v58 = vpop.f32.mrf.mxu1  ;;  %v6157_v55 = vmul.f32 0.2, %v4891_v44  ;;  %vm5901_vm5 = vcmp.gt.f32.partialorder %v4891_v44, 0.0  ;;  %13909 = vst [vmem:[#allocation18_spill] sm:$0xff] %v11834_v11 }
 0x3a4   : > { %v4703_v59 = vpop.f32.mrf.mxu0  ;;  %v11832_v41 = vsel %vm5894_vm4, %v4887_v10, %v6150_v21  ;;  %v13910_v10 = vld [vmem:[#allocation19_spill] sm:$0xff]  ;;  %v13911_v21 = vld [vmem:[#allocation21_spill] sm:$0xff] }
 0x3a5   : > { %v4895_v49 = vadd.f32 %v4894_v58, %v4702_v50  ;;  %v4896_v17 = vpop.f32.mrf.mxu1  ;;  %v4704_v32 = vadd.f32 %v4703_v59, %v11431_v45  ;;  %v11843_v50 = vsel %vm5901_vm5, %v4891_v44, %v6157_v55  ;;  %v6158_v59 = vmul.f32 0.2, %v4893_v42 }
 0x3a6   : > { %v4707_v8 = vpop.f32.mrf.mxu0  ;;  %5398 = vmatmul.mubr.bf16.gmra.mxu0 %v13829_v63  ;;  %vm5902_vm7 = vcmp.gt.f32.partialorder %v4893_v42, 0.0 }
 0x3a7   : > { %vm5909_vm6 = vcmp.gt.f32.partialorder %v4895_v49, 0.0  ;;  %v6165_v2 = vmul.f32 0.2, %v4895_v49  ;;  %v4708_v40 = vadd.f32 %v4707_v8, %v11427_v15  ;;  %v4900_v54 = vpop.f32.mrf.mxu1  ;;  %5407 = vmatprep.mubr.bf16.mxu0 %v13911_v21  ;;  %v4897_v14 = vadd.f32 %v4896_v17, %v4704_v32 }
 0x3a8   : > { %5591 = vmatmul.mubr.bf16.gmra.mxu1 %v13910_v10  ;;  %v4709_v58 = vpop.f32.mrf.mxu0 }
 0x3a9   : > { %5600 = vmatprep.mubr.bf16.mxu1 %v13912_v47  ;;  %v11846_v63 = vsel %vm5909_vm6, %v4895_v49, %v6165_v2  ;;  %v4901_v19 = vadd.f32 %v4900_v54, %v4708_v40  ;;  %v4710_v6 = vadd.f32 %v4709_v58, %v11431_v45  ;;  %v4902_v18 = vpop.f32.mrf.mxu1  ;;  %vm5910_vm8 = vcmp.gt.f32.partialorder %v4897_v14, 0.0 }
 0x3aa   : > { %v6166_v10 = vmul.f32 0.2, %v4897_v14  ;;  %v4711_v21 = vpop.f32.mrf.mxu0  ;;  %v11854_v2 = vsel %vm5902_vm7, %v4893_v42, %v6158_v59  ;;  %v2845_v42 = vsub.s32 4, %v13839_v60 }
 0x3ab   : > { %v4903_v44 = vadd.f32 %v4902_v18, %v4710_v6  ;;  %v4712_v55 = vadd.f32 %v4711_v21, %v11427_v15  ;;  %v4904_v17 = vpop.f32.mrf.mxu1  ;;  %v6173_v32 = vmul.f32 0.2, %v4901_v19  ;;  %vm5917_vm9 = vcmp.gt.f32.partialorder %v4901_v19, 0.0 }
 0x3ac   : > { %v4713_v47 = vpop.f32.mrf.mxu0  ;;  %v11852_v11 = vsel %vm5910_vm8, %v4897_v14, %v6166_v10  ;;  %v2849_v10 = vsub.s32 5, %v13839_v60 }
 0x3ad   : > { %v4905_v54 = vadd.f32 %v4904_v17, %v4712_v55  ;;  %v4906_v49 = vpop.f32.mrf.mxu1  ;;  %v4714_v40 = vadd.f32 %v4713_v47, %v11431_v45  ;;  %v11864_v14 = vsel %vm5917_vm9, %v4901_v19, %v6173_v32  ;;  %v6174_v55 = vmul.f32 0.2, %v4903_v44 }
 0x3ae   : > { %v4717_v58 = vpop.f32.mrf.mxu0  ;;  %5408 = vmatmul.mubr.bf16.gmra.mxu0 %v13741_v61  ;;  %13913 = vst [vmem:[#allocation20_spill] sm:$0xff] %v11864_v14  ;;  %vm5918_vm11 = vcmp.gt.f32.partialorder %v4903_v44, 0.0 }
 0x3af   : > { %vm5925_vm10 = vcmp.gt.f32.partialorder %v4905_v54, 0.0  ;;  %v6181_v6 = vmul.f32 0.2, %v4905_v54  ;;  %v4718_v21 = vadd.f32 %v4717_v58, %v11427_v15  ;;  %v4910_v8 = vpop.f32.mrf.mxu1  ;;  %5417 = vmatprep.mubr.bf16.mxu0 %v13743_v12  ;;  %v4907_v59 = vadd.f32 %v4906_v49, %v4714_v40 }
 0x3b0   : > { %5601 = vmatmul.mubr.bf16.gmra.mxu1 %v13742_v38  ;;  %v4719_v61 = vpop.f32.mrf.mxu0 }
 0x3b1   : > { %5610 = vmatprep.mubr.bf16.mxu1 %v13744_v31  ;;  %v11868_v17 = vsel %vm5925_vm10, %v4905_v54, %v6181_v6  ;;  %v4911_v47 = vadd.f32 %v4910_v8, %v4718_v21  ;;  %v4720_v58 = vadd.f32 %v4719_v61, %v11431_v45  ;;  %v4912_v18 = vpop.f32.mrf.mxu1  ;;  %vm5926_vm12 = vcmp.gt.f32.partialorder %v4907_v59, 0.0  ;;  %v8990_v54 = vld [vmem:[%s13288_s8] sm:$0xff] }
 0x3b2   : > { %v6182_v12 = vmul.f32 0.2, %v4907_v59  ;;  %v4721_v19 = vpop.f32.mrf.mxu0  ;;  %v11877_v40 = vrot.slane %v8990_v54, %v2845_v42  ;;  %v11881_v14 = vrot.slane %v8990_v54, %v2849_v10 }
 0x3b3   : > { %v4913_v32 = vadd.f32 %v4912_v18, %v4720_v58  ;;  %v4722_v31 = vadd.f32 %v4721_v19, %v11427_v15  ;;  %v4914_v49 = vpop.f32.mrf.mxu1  ;;  %v6189_v8 = vmul.f32 0.2, %v4911_v47  ;;  %vm5933_vm13 = vcmp.gt.f32.partialorder %v4911_v47, 0.0 }
 0x3b4   : > { %v4723_v6 = vpop.f32.mrf.mxu0  ;;  %v11879_v21 = vsel %vm5926_vm12, %v4907_v59, %v6182_v12  ;;  %v11884_v18 = vsel %vm5918_vm11, %v4903_v44, %v6174_v55 }
 0x3b5   : > { %v4915_v61 = vadd.f32 %v4914_v49, %v4722_v31  ;;  %v4916_v38 = vpop.f32.mrf.mxu1  ;;  %v4724_v15 = vadd.f32 %v4723_v6, %v11431_v45  ;;  %v11893_v10 = vsel %vm5933_vm13, %v4911_v47, %v6189_v8  ;;  %v6190_v55 = vmul.f32 0.2, %v4913_v32 }
 0x3b6   : > { %v4953_v58 = vpop.f32.mrf.mxu0  ;;  %5418 = vmatmul.mubr.bf16.gmra.mxu0 %v13749_v39  ;;  %vm5934_vm15 = vcmp.gt.f32.partialorder %v4913_v32, 0.0 }
 0x3b7   : > { %vm5941_vm14 = vcmp.gt.f32.partialorder %v4915_v61, 0.0  ;;  %v6197_v19 = vmul.f32 0.2, %v4915_v61  ;;  %v4954_v59 = vadd.f32 %v4953_v58, %v11877_v40  ;;  %v5146_v12 = vpop.f32.mrf.mxu1  ;;  %5427 = vmatprep.mubr.bf16.mxu0 %v13751_v62  ;;  %v4917_v44 = vadd.f32 %v4916_v38, %v4724_v15 }
 0x3b8   : > { %5611 = vmatmul.mubr.bf16.gmra.mxu1 %v13750_v51  ;;  %v4955_v45 = vpop.f32.mrf.mxu0 }
 0x3b9   : > { %5620 = vmatprep.mubr.bf16.mxu1 %v13843_v1  ;;  %v11896_v39 = vsel %vm5941_vm14, %v4915_v61, %v6197_v19  ;;  %v5147_v31 = vadd.f32 %v5146_v12, %v4954_v59  ;;  %v4956_v49 = vadd.f32 %v4955_v45, %v11881_v14  ;;  %v5148_v54 = vpop.f32.mrf.mxu1  ;;  %vm5942_vm0 = vcmp.gt.f32.partialorder %v4917_v44, 0.0 }
 0x3ba   : > { %v6198_v51 = vmul.f32 0.2, %v4917_v44  ;;  %v4957_v62 = vpop.f32.mrf.mxu0  ;;  %v11904_v59 = vsel %vm5934_vm15, %v4913_v32, %v6190_v55 }
 0x3bb   : > { %v5149_v47 = vadd.f32 %v5148_v54, %v4956_v49  ;;  %v4958_v38 = vadd.f32 %v4957_v62, %v11877_v40  ;;  %v5150_v8 = vpop.f32.mrf.mxu1  ;;  %v5951_v1 = vmul.f32 0.2, %v5147_v31  ;;  %vm5695_vm1 = vcmp.gt.f32.partialorder %v5147_v31, 0.0 }
 0x3bc   : > { %v4959_v15 = vpop.f32.mrf.mxu0  ;;  %v11902_v58 = vsel %vm5942_vm0, %v4917_v44, %v6198_v51 }
 0x3bd   : > { %v5151_v61 = vadd.f32 %v5150_v8, %v4958_v38  ;;  %v5152_v19 = vpop.f32.mrf.mxu1  ;;  %v4960_v12 = vadd.f32 %v4959_v15, %v11881_v14  ;;  %v11913_v44 = vsel %vm5695_vm1, %v5147_v31, %v5951_v1  ;;  %v5952_v51 = vmul.f32 0.2, %v5149_v47 }
 0x3be   : > { %v4963_v45 = vpop.f32.mrf.mxu0  ;;  %5428 = vmatmul.mubr.bf16.gmra.mxu0 %v13757_v23  ;;  %vm5696_vm3 = vcmp.gt.f32.partialorder %v5149_v47, 0.0 }
 0x3bf   : > { %vm5703_vm2 = vcmp.gt.f32.partialorder %v5151_v61, 0.0  ;;  %v5959_v54 = vmul.f32 0.2, %v5151_v61  ;;  %v4964_v62 = vadd.f32 %v4963_v45, %v11877_v40  ;;  %v5156_v6 = vpop.f32.mrf.mxu1  ;;  %5437 = vmatprep.mubr.bf16.mxu0 %v13848_v36  ;;  %v5153_v32 = vadd.f32 %v5152_v19, %v4960_v12 }
 0x3c0   : > { %5621 = vmatmul.mubr.bf16.gmra.mxu1 %v13847_v7  ;;  %v4965_v55 = vpop.f32.mrf.mxu0 }
 0x3c1   : > { %5630 = vmatprep.mubr.bf16.mxu1 %v13850_v43  ;;  %v11916_v23 = vsel %vm5703_vm2, %v5151_v61, %v5959_v54  ;;  %v5157_v38 = vadd.f32 %v5156_v6, %v4964_v62  ;;  %v4966_v8 = vadd.f32 %v4965_v55, %v11881_v14  ;;  %v5158_v15 = vpop.f32.mrf.mxu1  ;;  %vm5704_vm4 = vcmp.gt.f32.partialorder %v5153_v32, 0.0 }
 0x3c2   : > { %v5960_v7 = vmul.f32 0.2, %v5153_v32  ;;  %v4967_v36 = vpop.f32.mrf.mxu0  ;;  %v11924_v54 = vsel %vm5696_vm3, %v5149_v47, %v5952_v51 }
 0x3c3   : > { %v5159_v31 = vadd.f32 %v5158_v15, %v4966_v8  ;;  %v4968_v1 = vadd.f32 %v4967_v36, %v11877_v40  ;;  %v5160_v19 = vpop.f32.mrf.mxu1  ;;  %v5967_v43 = vmul.f32 0.2, %v5157_v38  ;;  %vm5711_vm5 = vcmp.gt.f32.partialorder %v5157_v38, 0.0 }
 0x3c4   : > { %v4969_v12 = vpop.f32.mrf.mxu0  ;;  %v11922_v49 = vsel %vm5704_vm4, %v5153_v32, %v5960_v7 }
 0x3c5   : > { %v5161_v6 = vadd.f32 %v5160_v19, %v4968_v1  ;;  %v5162_v61 = vpop.f32.mrf.mxu1  ;;  %v4970_v62 = vadd.f32 %v4969_v12, %v11881_v14  ;;  %v11933_v32 = vsel %vm5711_vm5, %v5157_v38, %v5967_v43  ;;  %v5968_v7 = vmul.f32 0.2, %v5159_v31 }
 0x3c6   : > { %v4973_v55 = vpop.f32.mrf.mxu0  ;;  %5438 = vmatmul.mubr.bf16.gmra.mxu0 %v13765_v29  ;;  %13914 = vst [vmem:[#allocation19_spill] sm:$0xff] %v11933_v32  ;;  %vm5712_vm7 = vcmp.gt.f32.partialorder %v5159_v31, 0.0 }
 0x3c7   : > { %vm5719_vm6 = vcmp.gt.f32.partialorder %v5161_v6, 0.0  ;;  %v5975_v15 = vmul.f32 0.2, %v5161_v6  ;;  %v4974_v36 = vadd.f32 %v4973_v55, %v11877_v40  ;;  %v5166_v45 = vpop.f32.mrf.mxu1  ;;  %5447 = vmatprep.mubr.bf16.mxu0 %v10664_v48  ;;  %v5163_v47 = vadd.f32 %v5162_v61, %v4970_v62 }
 0x3c8   : > { %5631 = vmatmul.mubr.bf16.gmra.mxu1 %v13766_v35  ;;  %v4975_v51 = vpop.f32.mrf.mxu0 }
 0x3c9   : > { %5640 = vmatprep.mubr.bf16.mxu1 %v13855_v25  ;;  %v11936_v29 = vsel %vm5719_vm6, %v5161_v6, %v5975_v15  ;;  %v5167_v1 = vadd.f32 %v5166_v45, %v4974_v36  ;;  %v4976_v19 = vadd.f32 %v4975_v51, %v11881_v14  ;;  %v5168_v12 = vpop.f32.mrf.mxu1  ;;  %vm5720_vm8 = vcmp.gt.f32.partialorder %v5163_v47, 0.0 }
 0x3ca   : > { %v5976_v35 = vmul.f32 0.2, %v5163_v47  ;;  %v4977_v48 = vpop.f32.mrf.mxu0  ;;  %v11944_v15 = vsel %vm5712_vm7, %v5159_v31, %v5968_v7  ;;  %v13917_v7 = vld [vmem:[#allocation47_spill] sm:$0xff] }
 0x3cb   : > { %v5169_v38 = vadd.f32 %v5168_v12, %v4976_v19  ;;  %v4978_v43 = vadd.f32 %v4977_v48, %v11877_v40  ;;  %v5170_v61 = vpop.f32.mrf.mxu1  ;;  %v5983_v25 = vmul.f32 0.2, %v5167_v1  ;;  %vm5727_vm9 = vcmp.gt.f32.partialorder %v5167_v1, 0.0 }
 0x3cc   : > { %v4979_v62 = vpop.f32.mrf.mxu0  ;;  %v11942_v8 = vsel %vm5720_vm8, %v5163_v47, %v5976_v35  ;;  %v13915_v47 = vld [vmem:[#allocation46_spill] sm:$0xff] }
 0x3cd   : > { %v5171_v45 = vadd.f32 %v5170_v61, %v4978_v43  ;;  %v5172_v6 = vpop.f32.mrf.mxu1  ;;  %v4980_v36 = vadd.f32 %v4979_v62, %v11881_v14  ;;  %v11953_v35 = vsel %vm5727_vm9, %v5167_v1, %v5983_v25  ;;  %v5984_v61 = vmul.f32 0.2, %v5169_v38 }
 0x3ce   : > { %v4983_v51 = vpop.f32.mrf.mxu0  ;;  %5448 = vmatmul.mubr.bf16.gmra.mxu0 %v13769_v30  ;;  %13916 = vst [vmem:[#allocation21_spill] sm:$0xff] %v11953_v35  ;;  %vm5728_vm11 = vcmp.gt.f32.partialorder %v5169_v38, 0.0 }
 0x3cf   : > { %vm5735_vm10 = vcmp.gt.f32.partialorder %v5171_v45, 0.0  ;;  %v5991_v12 = vmul.f32 0.2, %v5171_v45  ;;  %v4984_v48 = vadd.f32 %v4983_v51, %v11877_v40  ;;  %v5176_v55 = vpop.f32.mrf.mxu1  ;;  %5457 = vmatprep.mubr.bf16.mxu0 %v13915_v47  ;;  %v5173_v31 = vadd.f32 %v5172_v6, %v4980_v36 }
 0x3d0   : > { %5641 = vmatmul.mubr.bf16.gmra.mxu1 %v13859_v33  ;;  %v4985_v43 = vpop.f32.mrf.mxu0 }
 0x3d1   : > { %5650 = vmatprep.mubr.bf16.mxu1 %v13917_v7  ;;  %v11956_v30 = vsel %vm5735_vm10, %v5171_v45, %v5991_v12  ;;  %v5177_v62 = vadd.f32 %v5176_v55, %v4984_v48  ;;  %v4986_v19 = vadd.f32 %v4985_v43, %v11881_v14  ;;  %v5178_v42 = vpop.f32.mrf.mxu1  ;;  %vm5736_vm12 = vcmp.gt.f32.partialorder %v5173_v31, 0.0 }
 0x3d2   : > { %13918 = vst [vmem:[#allocation24_spill] sm:$0xff] %v11956_v30  ;;  %v5992_v33 = vmul.f32 0.2, %v5173_v31  ;;  %v4987_v47 = vpop.f32.mrf.mxu0  ;;  %v11964_v12 = vsel %vm5728_vm11, %v5169_v38, %v5984_v61  ;;  %v13923_v61 = vld [vmem:[#allocation49_spill] sm:$0xff] }
 0x3d3   : > { %v5179_v1 = vadd.f32 %v5178_v42, %v4986_v19  ;;  %v4988_v25 = vadd.f32 %v4987_v47, %v11877_v40  ;;  %v5180_v6 = vpop.f32.mrf.mxu1  ;;  %v5999_v36 = vmul.f32 0.2, %v5177_v62  ;;  %vm5743_vm13 = vcmp.gt.f32.partialorder %v5177_v62, 0.0  ;;  %13920 = vst [vmem:[#allocation47_spill] sm:$0xff] %v11964_v12 }
 0x3d4   : > { %v4989_v7 = vpop.f32.mrf.mxu0  ;;  %v11962_v32 = vsel %vm5736_vm12, %v5173_v31, %v5992_v33  ;;  %v13921_v31 = vld [vmem:[#allocation48_spill] sm:$0xff] }
 0x3d5   : > { %13919 = vst [vmem:[#allocation46_spill] sm:$0xff] %v11962_v32  ;;  %v5181_v55 = vadd.f32 %v5180_v6, %v4988_v25  ;;  %v5182_v45 = vpop.f32.mrf.mxu1  ;;  %v4990_v48 = vadd.f32 %v4989_v7, %v11881_v14  ;;  %v11973_v33 = vsel %vm5743_vm13, %v5177_v62, %v5999_v36  ;;  %v6000_v6 = vmul.f32 0.2, %v5179_v1  ;;  %v13979_v32 = vld [vmem:[#allocation110_spill] sm:$0xff] }
 0x3d6   : > { %v4993_v43 = vpop.f32.mrf.mxu0  ;;  %5458 = vmatmul.mubr.bf16.gmra.mxu0 %v13776_v52  ;;  %13922 = vst [vmem:[#allocation48_spill] sm:$0xff] %v11973_v33  ;;  %vm5744_vm15 = vcmp.gt.f32.partialorder %v5179_v1, 0.0 }
 0x3d7   : > { %vm5751_vm14 = vcmp.gt.f32.partialorder %v5181_v55, 0.0  ;;  %v6007_v19 = vmul.f32 0.2, %v5181_v55  ;;  %v4994_v47 = vadd.f32 %v4993_v43, %v11877_v40  ;;  %5467 = vmatprep.mubr.bf16.mxu0 %v13921_v31  ;;  %v5183_v38 = vadd.f32 %v5182_v45, %v4990_v48 }
 0x3d8   : > { %v5186_v51 = vpop.f32.mrf.mxu1  ;;  %5651 = vmatmul.mubr.bf16.gmra.mxu1 %v13866_v20  ;;  %v4995_v25 = vpop.f32.mrf.mxu0 }
 0x3d9   : > { %5660 = vmatprep.mubr.bf16.mxu1 %v13923_v61  ;;  %v11976_v52 = vsel %vm5751_vm14, %v5181_v55, %v6007_v19  ;;  %v5187_v7 = vadd.f32 %v5186_v51, %v4994_v47  ;;  %v4996_v42 = vadd.f32 %v4995_v25, %v11881_v14  ;;  %vm5752_vm0 = vcmp.gt.f32.partialorder %v5183_v38, 0.0 }
 0x3da   : > { %13924 = vst [vmem:[#allocation49_spill] sm:$0xff] %v11976_v52  ;;  %v5188_v35 = vpop.f32.mrf.mxu1  ;;  %v6008_v20 = vmul.f32 0.2, %v5183_v38  ;;  %v4997_v31 = vpop.f32.mrf.mxu0  ;;  %v11984_v19 = vsel %vm5744_vm15, %v5179_v1, %v6000_v6  ;;  %v13930_v6 = vld [vmem:[#allocation55_spill] sm:$0xff] }
 0x3db   : > { %v5189_v62 = vadd.f32 %v5188_v35, %v4996_v42  ;;  %v4998_v36 = vadd.f32 %v4997_v31, %v11877_v40  ;;  %v6015_v48 = vmul.f32 0.2, %v5187_v7  ;;  %vm5759_vm1 = vcmp.gt.f32.partialorder %v5187_v7, 0.0  ;;  %13926 = vst [vmem:[#allocation125_spill] sm:$0xff] %v11984_v19 }
 0x3dc   : > { %v5190_v45 = vpop.f32.mrf.mxu1  ;;  %v4999_v61 = vpop.f32.mrf.mxu0  ;;  %v11982_v30 = vsel %vm5752_vm0, %v5183_v38, %v6008_v20  ;;  %v13927_v38 = vld [vmem:[#allocation51_spill] sm:$0xff]  ;;  %v13928_v20 = vld [vmem:[#allocation53_spill] sm:$0xff] }
 0x3dd   : > { %13925 = vst [vmem:[#allocation124_spill] sm:$0xff] %v11982_v30  ;;  %v5191_v51 = vadd.f32 %v5190_v45, %v4998_v36  ;;  %v5000_v47 = vadd.f32 %v4999_v61, %v11881_v14  ;;  %v11993_v36 = vsel %vm5759_vm1, %v5187_v7, %v6015_v48  ;;  %v6016_v61 = vmul.f32 0.2, %v5189_v62 }
 0x3de   : > { %v5192_v55 = vpop.f32.mrf.mxu1  ;;  %v5003_v25 = vpop.f32.mrf.mxu0  ;;  %5468 = vmatmul.mubr.bf16.gmra.mxu0 %v13783_v26  ;;  %13929 = vst [vmem:[#allocation51_spill] sm:$0xff] %v11993_v36  ;;  %vm5760_vm3 = vcmp.gt.f32.partialorder %v5189_v62, 0.0 }
 0x3df   : > { %vm5767_vm2 = vcmp.gt.f32.partialorder %v5191_v51, 0.0  ;;  %v6023_v42 = vmul.f32 0.2, %v5191_v51  ;;  %v5004_v31 = vadd.f32 %v5003_v25, %v11877_v40  ;;  %5477 = vmatprep.mubr.bf16.mxu0 %v13928_v20  ;;  %v5193_v1 = vadd.f32 %v5192_v55, %v5000_v47 }
 0x3e0   : > { %v5196_v43 = vpop.f32.mrf.mxu1  ;;  %5661 = vmatmul.mubr.bf16.gmra.mxu1 %v13927_v38  ;;  %v5005_v45 = vpop.f32.mrf.mxu0 }
 0x3e1   : > { %5670 = vmatprep.mubr.bf16.mxu1 %v13930_v6  ;;  %v11996_v26 = vsel %vm5767_vm2, %v5191_v51, %v6023_v42  ;;  %v5197_v33 = vadd.f32 %v5196_v43, %v5004_v31  ;;  %v5006_v35 = vadd.f32 %v5005_v45, %v11881_v14  ;;  %vm5768_vm4 = vcmp.gt.f32.partialorder %v5193_v1, 0.0 }
 0x3e2   : > { %13931 = vst [vmem:[#allocation53_spill] sm:$0xff] %v11996_v26  ;;  %v5198_v52 = vpop.f32.mrf.mxu1  ;;  %v6024_v38 = vmul.f32 0.2, %v5193_v1  ;;  %v5007_v20 = vpop.f32.mrf.mxu0  ;;  %v12004_v42 = vsel %vm5760_vm3, %v5189_v62, %v6016_v61  ;;  %v13937_v61 = vld [vmem:[#allocation57_spill] sm:$0xff] }
 0x3e3   : > { %v5199_v7 = vadd.f32 %v5198_v52, %v5006_v35  ;;  %v5008_v48 = vadd.f32 %v5007_v20, %v11877_v40  ;;  %v6031_v47 = vmul.f32 0.2, %v5197_v33  ;;  %vm5775_vm5 = vcmp.gt.f32.partialorder %v5197_v33, 0.0  ;;  %13933 = vst [vmem:[#allocation126_spill] sm:$0xff] %v12004_v42 }
 0x3e4   : > { %v5200_v55 = vpop.f32.mrf.mxu1  ;;  %v5009_v6 = vpop.f32.mrf.mxu0  ;;  %v12002_v19 = vsel %vm5768_vm4, %v5193_v1, %v6024_v38  ;;  %v13934_v1 = vld [vmem:[#allocation54_spill] sm:$0xff]  ;;  %v13935_v38 = vld [vmem:[#allocation56_spill] sm:$0xff] }
 0x3e5   : > { %13932 = vst [vmem:[#allocation55_spill] sm:$0xff] %v12002_v19  ;;  %v5201_v43 = vadd.f32 %v5200_v55, %v5008_v48  ;;  %v5010_v31 = vadd.f32 %v5009_v6, %v11881_v14  ;;  %v12013_v48 = vsel %vm5775_vm5, %v5197_v33, %v6031_v47  ;;  %v6032_v6 = vmul.f32 0.2, %v5199_v7 }
 0x3e6   : > { %v5202_v51 = vpop.f32.mrf.mxu1  ;;  %v5013_v45 = vpop.f32.mrf.mxu0  ;;  %5478 = vmatmul.mubr.bf16.gmra.mxu0 %v13789_v34  ;;  %13936 = vst [vmem:[#allocation54_spill] sm:$0xff] %v12013_v48  ;;  %vm5776_vm7 = vcmp.gt.f32.partialorder %v5199_v7, 0.0 }
 0x3e7   : > { %vm5783_vm6 = vcmp.gt.f32.partialorder %v5201_v43, 0.0  ;;  %v6039_v35 = vmul.f32 0.2, %v5201_v43  ;;  %v5014_v20 = vadd.f32 %v5013_v45, %v11877_v40  ;;  %5487 = vmatprep.mubr.bf16.mxu0 %v13935_v38  ;;  %v5203_v62 = vadd.f32 %v5202_v51, %v5010_v31  ;;  %v13941_v45 = vld [vmem:[#allocation58_spill] sm:$0xff] }
 0x3e8   : > { %v5206_v25 = vpop.f32.mrf.mxu1  ;;  %5671 = vmatmul.mubr.bf16.gmra.mxu1 %v13934_v1  ;;  %v5015_v55 = vpop.f32.mrf.mxu0 }
 0x3e9   : > { %5680 = vmatprep.mubr.bf16.mxu1 %v13937_v61  ;;  %v12016_v34 = vsel %vm5783_vm6, %v5201_v43, %v6039_v35  ;;  %v5207_v36 = vadd.f32 %v5206_v25, %v5014_v20  ;;  %v5016_v52 = vadd.f32 %v5015_v55, %v11881_v14  ;;  %vm5784_vm8 = vcmp.gt.f32.partialorder %v5203_v62, 0.0 }
 0x3ea   : > { %13938 = vst [vmem:[#allocation56_spill] sm:$0xff] %v12016_v34  ;;  %v5208_v26 = vpop.f32.mrf.mxu1  ;;  %v6040_v1 = vmul.f32 0.2, %v5203_v62  ;;  %v5017_v38 = vpop.f32.mrf.mxu0  ;;  %v12024_v35 = vsel %vm5776_vm7, %v5199_v7, %v6032_v6 }
 0x3eb   : > { %v5209_v33 = vadd.f32 %v5208_v26, %v5016_v52  ;;  %v5018_v47 = vadd.f32 %v5017_v38, %v11877_v40  ;;  %v6047_v31 = vmul.f32 0.2, %v5207_v36  ;;  %vm5791_vm9 = vcmp.gt.f32.partialorder %v5207_v36, 0.0  ;;  %13940 = vst [vmem:[#allocation127_spill] sm:$0xff] %v12024_v35 }
 0x3ec   : > { %v5210_v51 = vpop.f32.mrf.mxu1  ;;  %v5019_v61 = vpop.f32.mrf.mxu0  ;;  %v12022_v42 = vsel %vm5784_vm8, %v5203_v62, %v6040_v1  ;;  %v13942_v62 = vld [vmem:[#allocation23_spill] sm:$0xff]  ;;  %v13943_v1 = vld [vmem:[#allocation22_spill] sm:$0xff] }
 0x3ed   : > { %13939 = vst [vmem:[#allocation57_spill] sm:$0xff] %v12022_v42  ;;  %v5211_v25 = vadd.f32 %v5210_v51, %v5018_v47  ;;  %v5020_v20 = vadd.f32 %v5019_v61, %v11881_v14  ;;  %v13944_v47 = vpack.c.bf16 %v13942_v62, %v13943_v1  ;;  %v12035_v7 = vsel %vm5791_vm9, %v5207_v36, %v6047_v31  ;;  %v13946_v51 = vld [vmem:[#allocation40_spill] sm:$0xff] }
 0x3ee   : > { %v5212_v43 = vpop.f32.mrf.mxu1  ;;  %v5023_v55 = vpop.f32.mrf.mxu0  ;;  %5488 = vmatmul.mubr.bf16.gmra.mxu0 %v13941_v45  ;;  %13945 = vst [vmem:[#allocation58_spill] sm:$0xff] %v12035_v7  ;;  %v13947_v61 = vld [vmem:[#allocation104_spill] sm:$0xff]  ;;  %v6048_v26 = vmul.f32 0.2, %v5209_v33  ;;  %vm5792_vm11 = vcmp.gt.f32.partialorder %v5209_v33, 0.0  ;;  %v13956_v7 = vld [vmem:[#allocation35_spill] sm:$0xff] }
 0x3ef   : > { %vm5799_vm10 = vcmp.gt.f32.partialorder %v5211_v25, 0.0  ;;  %v6055_v52 = vmul.f32 0.2, %v5211_v25  ;;  %v5024_v38 = vadd.f32 %v5023_v55, %v11877_v40  ;;  %7138 = vmatprep.mubr.bf16.mxu0 %v13944_v47  ;;  %v5213_v6 = vadd.f32 %v5212_v43, %v5020_v20  ;;  %v8960_v47 = vld [vmem:[%s13289_s9 + $0x1b8] sm:$0xff]  }
 0x3f0   : > { %v5216_v48 = vpop.f32.mrf.mxu1  ;;  %5681 = vmatmul.mubr.bf16.gmra.mxu1 %v13887_v57  ;;  %v13948_v45 = vpack.c.bf16 %v13946_v51, %v13947_v61  ;;  %v5025_v34 = vpop.f32.mrf.mxu0  ;;  %v12058_v51 = vsel %vm5792_vm11, %v5209_v33, %v6048_v26  ;;  %v13955_v26 = vld [vmem:[#allocation38_spill] sm:$0xff] }
 0x3f1   : > { %v12040_v35 = vsel %vm5799_vm10, %v5211_v25, %v6055_v52  ;;  %v5217_v42 = vadd.f32 %v5216_v48, %v5024_v38  ;;  %v5026_v55 = vadd.f32 %v5025_v34, %v11881_v14  ;;  %vm5800_vm12 = vcmp.gt.f32.partialorder %v5213_v6, 0.0  ;;  %v8958_v25 = vld [vmem:[%s13289_s9 + $0x138] sm:$0xff]   ;;  %13951 = vst [vmem:[#allocation40_spill] sm:$0xff] %v12058_v51 }
 0x3f2   : > { %7299 = vmatprep.mubr.bf16.mxu1 %v13948_v45  ;;  %13949 = vst [vmem:[#allocation23_spill] sm:$0xff] %v12040_v35  ;;  %v5218_v19 = vpop.f32.mrf.mxu1  ;;  %v6056_v36 = vmul.f32 0.2, %v5213_v6  ;;  %v5027_v31 = vpop.f32.mrf.mxu0  ;;  %v13959_v35 = vld [vmem:[#allocation26_spill] sm:$0xff] }
 0x3f3   : > { %v5219_v43 = vadd.f32 %v5218_v19, %v5026_v55  ;;  %v5028_v20 = vadd.f32 %v5027_v31, %v11877_v40  ;;  %v6063_v52 = vmul.f32 0.2, %v5217_v42  ;;  %vm5807_vm13 = vcmp.gt.f32.partialorder %v5217_v42, 0.0  ;;  %v8961_v19 = vld [vmem:[%s13289_s9 + $0x170] sm:$0xff]  }
 0x3f4   : > { %v5220_v62 = vpop.f32.mrf.mxu1  ;;  %v5029_v48 = vpop.f32.mrf.mxu0  ;;  %v12049_v38 = vsel %vm5800_vm12, %v5213_v6, %v6056_v36  ;;  %v13952_v55 = vld [vmem:[#allocation11_spill] sm:$0xff]  ;;  %v13953_v6 = vld [vmem:[#allocation10_spill] sm:$0xff] }
 0x3f5   : > { %13950 = vst [vmem:[#allocation22_spill] sm:$0xff] %v12049_v38  ;;  %v5221_v34 = vadd.f32 %v5220_v62, %v5028_v20  ;;  %v5030_v61 = vadd.f32 %v5029_v48, %v11881_v14  ;;  %v13954_v36 = vpack.c.bf16 %v13952_v55, %v13953_v6  ;;  %v8963_v31 = vld [vmem:[%s13289_s9 + $0x1f0] sm:$0xff]   ;;  %v13957_v48 = vpack.c.bf16 %v13955_v26, %v13956_v7  ;;  %v13960_v20 = vld [vmem:[#allocation25_spill] sm:$0xff]  ;;  %v13962_v38 = vld [vmem:[#allocation106_spill] sm:$0xff] }
 0x3f6   : > { %v5222_v1 = vpop.f32.mrf.mxu1  ;;  %v5033_v45 = vpop.f32.mrf.mxu0  ;;  %v8962_v55 = vld [vmem:[%s13289_s9 + $0x130] sm:$0xff]   ;;  %v12077_v6 = vsel %vm5807_vm13, %v5217_v42, %v6063_v52  ;;  %v13961_v51 = vpack.c.bf16 %v13959_v35, %v13960_v20  ;;  %v8965_v7 = vld [vmem:[%s13289_s9 + $0x168] sm:$0xff]   ;;  %vm5808_vm15 = vcmp.gt.f32.partialorder %v5219_v43, 0.0 }
 0x3f7   : > { %7139 = vmatmul.mubr.bf16.vlgmr.msra.gmra.mxu0 %v13954_v36  ;;  %vm5815_vm14 = vcmp.gt.f32.partialorder %v5221_v34, 0.0  ;;  %v6071_v62 = vmul.f32 0.2, %v5221_v34  ;;  %v5034_v57 = vadd.f32 %v5033_v45, %v11877_v40  ;;  %13958 = vst [vmem:[#allocation104_spill] sm:$0xff] %v12077_v6  ;;  %v5223_v36 = vadd.f32 %v5222_v1, %v5030_v61  ;;  %v13963_v45 = vld [vmem:[#allocation107_spill] sm:$0xff]  ;;  %v8966_v61 = vld [vmem:[%s13289_s9 + $0x128] sm:$0xff]  }
 0x3f8   : > { %v5226_v33 = vpop.f32.mrf.mxu1  ;;  %7300 = vmatmul.mubr.bf16.vlgmr.msra.gmra.mxu1 %v13957_v48  ;;  %8545 = vmatpush3.bf16.msra.mxu0 %v8958_v25  ;;  %v13964_v30 = vpack.c.bf16 %v13962_v38, %v13963_v45  ;;  %v5035_v12 = vpop.f32.mrf.mxu0  ;;  %v6064_v25 = vmul.f32 0.2, %v5219_v43  ;;  %v8964_v35 = vld [vmem:[%s13289_s9 + $0x1b0] sm:$0xff]   ;;  %v13974_v6 = vld [vmem:[#allocation60_spill] sm:$0xff] }
 0x3f9   : > { %7146 = vmatprep.mubr.bf16.mxu0 %v13961_v51  ;;  %v12088_v26 = vsel %vm5815_vm14, %v5221_v34, %v6071_v62  ;;  %v5227_v48 = vadd.f32 %v5226_v33, %v5034_v57  ;;  %v5036_v42 = vadd.f32 %v5035_v12, %v11881_v14  ;;  %8657 = vmatpush3.bf16.msra.mxu1 %v8960_v47  ;;  %vm5816_vm0 = vcmp.gt.f32.partialorder %v5223_v36, 0.0  ;;  %v8967_v57 = vld [vmem:[%s13289_s9 + $0x1e8] sm:$0xff]  }
 0x3fa   : > { %7307 = vmatprep.mubr.bf16.mxu1 %v13964_v30  ;;  %13965 = vst [vmem:[#allocation11_spill] sm:$0xff] %v12088_v26  ;;  %v5228_v52 = vpop.f32.mrf.mxu1  ;;  %8546 = vmatprep.subr.bf16.mxu0 %v8961_v19  ;;  %v6072_v38 = vmul.f32 0.2, %v5223_v36  ;;  %v5037_v1 = vpop.f32.mrf.mxu0  ;;  %v8968_v33 = vld [vmem:[%s13289_s9 + $0x1a8] sm:$0xff]   ;;  %v12114_v45 = vsel %vm5808_vm15, %v5219_v43, %v6064_v25  ;;  %v13978_v26 = vld [vmem:[#allocation109_spill] sm:$0xff] }
 0x3fb   : > { %8658 = vmatprep.subr.bf16.mxu1 %v8963_v31  ;;  %v12099_v12 = vadd.f32 %v5228_v52, %v5036_v42  ;;  %v5038_v34 = vadd.f32 %v5037_v1, %v11877_v40  ;;  %v6079_v19 = vmul.f32 0.2, %v5227_v48  ;;  %vm5823_vm1 = vcmp.gt.f32.partialorder %v5227_v48, 0.0  ;;  %13967 = vst [vmem:[#allocation38_spill] sm:$0xff] %v12114_v45  ;;  %v13969_v52 = vld [vmem:[#allocation27_spill] sm:$0xff] }
 0x3fc   : > { %v5230_v47 = vpop.f32.mrf.mxu1  ;;  %8547 = vmatpush3.bf16.msra.mxu0 %v8962_v55  ;;  %v5039_v51 = vpop.f32.mrf.mxu0  ;;  %v12105_v20 = vsel %vm5816_vm0, %v5223_v36, %v6072_v38  ;;  %v8969_v55 = vld [vmem:[%s13289_s9 + $0x160] sm:$0xff]   ;;  %v13968_v36 = vld [vmem:[#allocation28_spill] sm:$0xff]  ;;  %v13980_v1 = vpack.c.bf16 %v13978_v26, %v13979_v32 }
 0x3fd   : > { %8548 = vmatprep.subr.bf16.mxu0 %v8965_v7  ;;  %13966 = vst [vmem:[#allocation10_spill] sm:$0xff] %v12105_v20  ;;  %v5231_v31 = vadd.f32 %v5230_v47, %v5038_v34  ;;  %8659 = vmatpush3.bf16.msra.mxu1 %v8964_v35  ;;  %v5040_v7 = vadd.f32 %v5039_v51, %v11881_v14  ;;  %v8971_v35 = vld [vmem:[%s13289_s9 + $0x1e0] sm:$0xff]   ;;  %v13971_v47 = vld [vmem:[#allocation43_spill] sm:$0xff]  ;;  %v8973_v26 = vld [vmem:[%s13289_s9 + $0x158] sm:$0xff]   ;;  %vm5824_vm3 = vcmp.gt.f32.partialorder %v12099_v12, 0.0 }
 0x3fe   : > { %v5232_v62 = vpop.f32.mrf.mxu1  ;;  %v5043_v42 = vpop.f32.mrf.mxu0  ;;  %v13970_v38 = vpack.c.bf16 %v13968_v36, %v13969_v52  ;;  %8660 = vmatprep.subr.bf16.mxu1 %v8967_v57  ;;  %v13972_v51 = vld [vmem:[#allocation105_spill] sm:$0xff]  ;;  %v12133_v57 = vsel %vm5823_vm1, %v5227_v48, %v6079_v19 }
 0x3ff   : > { %vm5831_vm2 = vcmp.gt.f32.partialorder %v5231_v31, 0.0  ;;  %v6087_v34 = vmul.f32 0.2, %v5231_v31  ;;  %v5044_v43 = vadd.f32 %v5043_v42, %v11877_v40  ;;  %v13973_v30 = vpack.c.bf16 %v13971_v47, %v13972_v51  ;;  %v13975_v36 = vld [vmem:[#allocation61_spill] sm:$0xff]  ;;  %13977 = vst [vmem:[#allocation35_spill] sm:$0xff] %v12133_v57  ;;  %v13990_v57 = vld [vmem:[#allocation62_spill] sm:$0xff] }
 0x400   : > { %7147 = vmatmul.mubr.bf16.gmra.mxu0 %v13970_v38  ;;  %v5236_v25 = vpop.f32.mrf.mxu1  ;;  %v13976_v52 = vpack.c.bf16 %v13974_v6, %v13975_v36  ;;  %v5233_v38 = vadd.f32 %v5232_v62, %v5040_v7  ;;  %v5045_v45 = vpop.f32.mrf.mxu0  ;;  %v8970_v42 = vld [vmem:[%s13289_s9 + $0x120] sm:$0xff]   ;;  %v8975_v62 = vld [vmem:[%s13289_s9 + $0x1d8] sm:$0xff]  }
 0x401   : > { %7308 = vmatmul.mubr.bf16.gmra.mxu1 %v13973_v30  ;;  %8549 = vmatpush3.bf16.msra.mxu0 %v8966_v61  ;;  %v6080_v30 = vmul.f32 0.2, %v12099_v12  ;;  %v12142_v47 = vsel %vm5831_vm2, %v5231_v31, %v6087_v34  ;;  %v5237_v6 = vadd.f32 %v5236_v25, %v5044_v43  ;;  %v5046_v51 = vadd.f32 %v5045_v45, %v11881_v14  ;;  %v8972_v32 = vld [vmem:[%s13289_s9 + $0x1a0] sm:$0xff]   ;;  %v8974_v34 = vld [vmem:[%s13289_s9 + $0x118] sm:$0xff]  }
 0x402   : > { %7154 = vmatprep.mubr.bf16.mxu0 %v13976_v52  ;;  %7315 = vmatprep.mubr.bf16.mxu1 %v13980_v1  ;;  %13981 = vst [vmem:[#allocation26_spill] sm:$0xff] %v12142_v47  ;;  %v5238_v48 = vpop.f32.mrf.mxu1  ;;  %vm5832_vm4 = vcmp.gt.f32.partialorder %v5233_v38, 0.0  ;;  %v6088_v61 = vmul.f32 0.2, %v5233_v38  ;;  %v5047_v31 = vpop.f32.mrf.mxu0  ;;  %v8976_v36 = vld [vmem:[%s13289_s9 + $0x198] sm:$0xff]   ;;  %v8977_v52 = vld [vmem:[%s13289_s9 + $0x150] sm:$0xff]  }
 0x403   : > { %8661 = vmatpush3.bf16.msra.mxu1 %v8968_v33  ;;  %8550 = vmatprep.subr.bf16.mxu0 %v8969_v55  ;;  %v12157_v33 = vadd.f32 %v5238_v48, %v5046_v51  ;;  %v5048_v55 = vadd.f32 %v5047_v31, %v11877_v40  ;;  %v6095_v7 = vmul.f32 0.2, %v5237_v6  ;;  %vm5839_vm5 = vcmp.gt.f32.partialorder %v5237_v6, 0.0  ;;  %v13984_v48 = vld [vmem:[#allocation34_spill] sm:$0xff]  ;;  %v13994_v47 = vld [vmem:[#allocation112_spill] sm:$0xff]  ;;  %v13995_v20 = vld [vmem:[#allocation113_spill] sm:$0xff] }
 0x404   : > { %8662 = vmatprep.subr.bf16.mxu1 %v8971_v35  ;;  %v5240_v45 = vpop.f32.mrf.mxu1  ;;  %v5049_v1 = vpop.f32.mrf.mxu0  ;;  %v12163_v43 = vsel %vm5832_vm4, %v5233_v38, %v6088_v61  ;;  %v13985_v61 = vld [vmem:[#allocation29_spill] sm:$0xff]  ;;  %v13996_v31 = vpack.c.bf16 %v13994_v47, %v13995_v20  ;;  %v8980_v20 = vld [vmem:[%s13289_s9 + $0x190] sm:$0xff]   ;;  %v8981_v47 = vld [vmem:[%s13289_s9 + $0x148] sm:$0xff]  }
 0x405   : > { %8551 = vmatpush3.bf16.msra.mxu0 %v8970_v42  ;;  %13982 = vst [vmem:[#allocation25_spill] sm:$0xff] %v12163_v43  ;;  %v5241_v35 = vadd.f32 %v5240_v45, %v5048_v55  ;;  %v12174_v42 = vsel %vm5824_vm3, %v12099_v12, %v6080_v30  ;;  %v5050_v38 = vadd.f32 %v5049_v1, %v11881_v14  ;;  %v13987_v45 = vld [vmem:[#allocation108_spill] sm:$0xff]  ;;  %v13988_v1 = vld [vmem:[#allocation42_spill] sm:$0xff]  ;;  %vm5840_vm7 = vcmp.gt.f32.partialorder %v12157_v33, 0.0  ;;  %v14011_v43 = vld [vmem:[#allocation117_spill] sm:$0xff] }
 0x406   : > { %v5242_v25 = vpop.f32.mrf.mxu1  ;;  %8552 = vmatprep.subr.bf16.mxu0 %v8973_v26  ;;  %13983 = vst [vmem:[#allocation106_spill] sm:$0xff] %v12174_v42  ;;  %v5053_v51 = vpop.f32.mrf.mxu0  ;;  %v8979_v26 = vld [vmem:[%s13289_s9 + $0x1d0] sm:$0xff]   ;;  %v13989_v19 = vpack.c.bf16 %v13987_v45, %v13988_v1 }
 0x407   : > { %8663 = vmatpush3.bf16.msra.mxu1 %v8972_v32  ;;  %v13986_v32 = vpack.c.bf16 %v13984_v48, %v13985_v61  ;;  %vm5847_vm6 = vcmp.gt.f32.partialorder %v5241_v35, 0.0  ;;  %v6103_v55 = vmul.f32 0.2, %v5241_v35  ;;  %v5054_v12 = vadd.f32 %v5053_v51, %v11877_v40  ;;  %v13991_v48 = vld [vmem:[#allocation41_spill] sm:$0xff]  ;;  %v8978_v51 = vld [vmem:[%s13289_s9 + $0x110] sm:$0xff]  }
 0x408   : > { %8664 = vmatprep.subr.bf16.mxu1 %v8975_v62  ;;  %v5246_v30 = vpop.f32.mrf.mxu1  ;;  %v13992_v61 = vpack.c.bf16 %v13990_v57, %v13991_v48  ;;  %v12193_v62 = vsel %vm5839_vm5, %v5237_v6, %v6095_v7  ;;  %v5055_v42 = vpop.f32.mrf.mxu0  ;;  %v8984_v48 = vld [vmem:[%s13289_s9 + $0x188] sm:$0xff]  }
 0x409   : > { %7155 = vmatmul.mubr.bf16.gmra.mxu0 %v13986_v32  ;;  %7316 = vmatmul.mubr.bf16.gmra.mxu1 %v13989_v19  ;;  %13993 = vst [vmem:[#allocation107_spill] sm:$0xff] %v12193_v62  ;;  %v5243_v32 = vadd.f32 %v5242_v25, %v5050_v38  ;;  %v6096_v19 = vmul.f32 0.2, %v12157_v33  ;;  %v12202_v45 = vsel %vm5847_vm6, %v5241_v35, %v6103_v55  ;;  %v8983_v25 = vld [vmem:[%s13289_s9 + $0x1c8] sm:$0xff]   ;;  %v14006_v62 = vld [vmem:[#allocation65_spill] sm:$0xff] }
 0x40a   : > { %7162 = vmatprep.mubr.bf16.mxu0 %v13992_v61  ;;  %7323 = vmatprep.mubr.bf16.mxu1 %v13996_v31  ;;  %13997 = vst [vmem:[#allocation28_spill] sm:$0xff] %v12202_v45  ;;  %v5247_v57 = vadd.f32 %v5246_v30, %v5054_v12  ;;  %v5056_v1 = vadd.f32 %v5055_v42, %v11881_v14  ;;  %v5248_v6 = vpop.f32.mrf.mxu1  ;;  %v5057_v35 = vpop.f32.mrf.mxu0  ;;  %v8982_v55 = vld [vmem:[%s13289_s9 + $0x108] sm:$0xff]   ;;  %v8985_v61 = vld [vmem:[%s13289_s9 + $0x140] sm:$0xff]   ;;  %v14010_v45 = vld [vmem:[#allocation116_spill] sm:$0xff] }
 0x40b   : > { %8553 = vmatpush3.bf16.msra.mxu0 %v8974_v34  ;;  %8665 = vmatpush3.bf16.msra.mxu1 %v8976_v36  ;;  %vm5848_vm8 = vcmp.gt.f32.partialorder %v5243_v32, 0.0  ;;  %v6104_v34 = vmul.f32 0.2, %v5243_v32 }
 0x40c   : > { %8554 = vmatprep.subr.bf16.mxu0 %v8977_v52  ;;  %8666 = vmatprep.subr.bf16.mxu1 %v8979_v26  ;;  %v5249_v36 = vadd.f32 %v5248_v6, %v5056_v1  ;;  %v5058_v52 = vadd.f32 %v5057_v35, %v11877_v40  ;;  %v5250_v42 = vpop.f32.mrf.mxu1  ;;  %v6111_v38 = vmul.f32 0.2, %v5247_v57  ;;  %v5059_v31 = vpop.f32.mrf.mxu0  ;;  %vm5855_vm9 = vcmp.gt.f32.partialorder %v5247_v57, 0.0  ;;  %v14000_v6 = vld [vmem:[#allocation39_spill] sm:$0xff] }
 0x40d   : > { %v12221_v12 = vsel %vm5848_vm8, %v5243_v32, %v6104_v34  ;;  %v5060_v32 = vadd.f32 %v5059_v31, %v11881_v14  ;;  %v14001_v34 = vld [vmem:[#allocation37_spill] sm:$0xff]  ;;  %v14012_v35 = vpack.c.bf16 %v14010_v45, %v14011_v43 }
 0x40e   : > { %13998 = vst [vmem:[#allocation27_spill] sm:$0xff] %v12221_v12  ;;  %v5251_v30 = vadd.f32 %v5250_v42, %v5058_v52  ;;  %v5252_v26 = vpop.f32.mrf.mxu1  ;;  %v5063_v1 = vpop.f32.mrf.mxu0  ;;  %v14003_v42 = vld [vmem:[#allocation111_spill] sm:$0xff]  ;;  %v14004_v31 = vld [vmem:[#allocation45_spill] sm:$0xff]  ;;  %vm5856_vm11 = vcmp.gt.f32.partialorder %v5249_v36, 0.0 }
 0x40f   : > { %8555 = vmatpush3.bf16.msra.mxu0 %v8978_v51  ;;  %8667 = vmatpush3.bf16.msra.mxu1 %v8980_v20  ;;  %v12232_v51 = vsel %vm5840_vm7, %v12157_v33, %v6096_v19  ;;  %v14002_v20 = vpack.c.bf16 %v14000_v6, %v14001_v34  ;;  %v5064_v33 = vadd.f32 %v5063_v1, %v11877_v40  ;;  %v14007_v6 = vld [vmem:[#allocation44_spill] sm:$0xff]  ;;  %v8986_v1 = vld [vmem:[%s13289_s9 + $0x100] sm:$0xff]  }
 0x410   : > { %8556 = vmatprep.subr.bf16.mxu0 %v8981_v47  ;;  %13999 = vst [vmem:[#allocation43_spill] sm:$0xff] %v12232_v51  ;;  %8668 = vmatprep.subr.bf16.mxu1 %v8983_v25  ;;  %v8987_v47 = vld [vmem:[%s13289_s9 + $0x1c0] sm:$0xff]   ;;  %vm5863_vm10 = vcmp.gt.f32.partialorder %v5251_v30, 0.0  ;;  %v6119_v52 = vmul.f32 0.2, %v5251_v30  ;;  %v5256_v19 = vpop.f32.mrf.mxu1  ;;  %v14005_v7 = vpack.c.bf16 %v14003_v42, %v14004_v31  ;;  %v14008_v34 = vpack.c.bf16 %v14006_v62, %v14007_v6  ;;  %v5065_v51 = vpop.f32.mrf.mxu0 }
 0x411   : > { %7163 = vmatmul.mubr.bf16.gmra.mxu0 %v14002_v20  ;;  %v12251_v25 = vsel %vm5855_vm9, %v5247_v57, %v6111_v38  ;;  %v5253_v20 = vadd.f32 %v5252_v26, %v5060_v32  ;;  %v6112_v42 = vmul.f32 0.2, %v5249_v36  ;;  %v5257_v31 = vadd.f32 %v5256_v19, %v5064_v33  ;;  %v8988_v43 = vld [vmem:[%s13289_s9 + $0x180] sm:$0xff]  }
 0x412   : > { %7324 = vmatmul.mubr.bf16.gmra.mxu1 %v14005_v7  ;;  %7170 = vmatprep.mubr.bf16.mxu0 %v14008_v34  ;;  %14009 = vst [vmem:[#allocation105_spill] sm:$0xff] %v12251_v25  ;;  %v12259_v7 = vsel %vm5863_vm10, %v5251_v30, %v6119_v52  ;;  %v5066_v62 = vadd.f32 %v5065_v51, %v11881_v14  ;;  %v5258_v6 = vpop.f32.mrf.mxu1  ;;  %v5067_v38 = vpop.f32.mrf.mxu0  ;;  %v14017_v34 = vld [vmem:[#allocation63_spill] sm:$0xff] }
 0x413   : > { %7331 = vmatprep.mubr.bf16.mxu1 %v14012_v35  ;;  %8557 = vmatpush3.bf16.msra.mxu0 %v8982_v55  ;;  %14013 = vst [vmem:[#allocation60_spill] sm:$0xff] %v12259_v7  ;;  %vm5864_vm12 = vcmp.gt.f32.partialorder %v5253_v20, 0.0  ;;  %v6120_v57 = vmul.f32 0.2, %v5253_v20  ;;  %v5068_v30 = vadd.f32 %v5067_v38, %v11877_v40  ;;  %v6127_v51 = vmul.f32 0.2, %v5257_v31 }
 0x414   : > { %8669 = vmatpush3.bf16.msra.mxu1 %v8984_v48  ;;  %8558 = vmatprep.subr.bf16.mxu0 %v8985_v61  ;;  %v5259_v55 = vadd.f32 %v5258_v6, %v5066_v62  ;;  %v5260_v26 = vpop.f32.mrf.mxu1  ;;  %v5069_v32 = vpop.f32.mrf.mxu0  ;;  %vm5871_vm13 = vcmp.gt.f32.partialorder %v5257_v31, 0.0  ;;  %v12271_v52 = vsel %vm5856_vm11, %v5249_v36, %v6112_v42  ;;  %v14019_v38 = vld [vmem:[#allocation115_spill] sm:$0xff]  ;;  %v14022_v36 = vld [vmem:[#allocation50_spill] sm:$0xff]  ;;  %v14023_v42 = vld [vmem:[#allocation68_spill] sm:$0xff] }
 0x415   : > { %8670 = vmatprep.subr.bf16.mxu1 %v8987_v47  ;;  %v12268_v48 = vsel %vm5864_vm12, %v5253_v20, %v6120_v57  ;;  %v5261_v61 = vadd.f32 %v5260_v26, %v5068_v30  ;;  %14015 = vst [vmem:[#allocation109_spill] sm:$0xff] %v12271_v52  ;;  %v5070_v33 = vadd.f32 %v5069_v32, %v11881_v14  ;;  %v14016_v47 = vld [vmem:[#allocation64_spill] sm:$0xff] }
 0x416   : > { %14014 = vst [vmem:[#allocation61_spill] sm:$0xff] %v12268_v48  ;;  %v5262_v35 = vpop.f32.mrf.mxu1  ;;  %v5073_v19 = vpop.f32.mrf.mxu0  ;;  %v14018_v62 = vpack.c.bf16 %v14016_v47, %v14017_v34  ;;  %v14024_v26 = vpack.c.bf16 %v14022_v36, %v14023_v42  ;;  %v12286_v32 = vsel %vm5871_vm13, %v5257_v31, %v6127_v51  ;;  %v14026_v34 = vld [vmem:[#allocation120_spill] sm:$0xff]  ;;  %v6128_v25 = vmul.f32 0.2, %v5259_v55 }
 0x417   : > { %8559 = vmatpush3.bf16.msra.mxu0 %v8986_v1  ;;  %vm5879_vm14 = vcmp.gt.f32.partialorder %v5261_v61, 0.0  ;;  %v6135_v20 = vmul.f32 0.2, %v5261_v61  ;;  %v5074_v1 = vadd.f32 %v5073_v19, %v11877_v40  ;;  %14025 = vst [vmem:[#allocation110_spill] sm:$0xff] %v12286_v32  ;;  %v5263_v47 = vadd.f32 %v5262_v35, %v5070_v33 }
 0x418   : > { %8671 = vmatpush3.bf16.msra.mxu1 %v8988_v43  ;;  %v5266_v57 = vpop.f32.mrf.mxu1  ;;  %v14020_v43 = vld [vmem:[#allocation114_spill] sm:$0xff]  ;;  %v5075_v6 = vpop.f32.mrf.mxu0  ;;  %vm5872_vm15 = vcmp.gt.f32.partialorder %v5259_v55, 0.0  ;;  %v14128_v48 = vpack.c.bf16 %v11852_v11, %v11854_v2 }
 0x419   : > { %7171 = vmatmul.mubr.bf16.gmra.mxu0 %v14018_v62  ;;  %v14021_v30 = vpack.c.bf16 %v14019_v38, %v14020_v43  ;;  %v14027_v62 = vld [vmem:[#allocation121_spill] sm:$0xff]  ;;  %v12291_v7 = vsel %vm5879_vm14, %v5261_v61, %v6135_v20  ;;  %v5267_v19 = vadd.f32 %v5266_v57, %v5074_v1  ;;  %v5076_v52 = vadd.f32 %v5075_v6, %v11881_v14 }
 0x41a   : > { %7178 = vmatprep.mubr.bf16.mxu0 %v14024_v26  ;;  %v14028_v45 = vpack.c.bf16 %v14026_v34, %v14027_v62  ;;  %14029 = vst [vmem:[#allocation34_spill] sm:$0xff] %v12291_v7  ;;  %v5268_v38 = vpop.f32.mrf.mxu1  ;;  %vm5880_vm0 = vcmp.gt.f32.partialorder %v5263_v47, 0.0  ;;  %v6136_v31 = vmul.f32 0.2, %v5263_v47  ;;  %v5077_v51 = vpop.f32.mrf.mxu0  ;;  %v12299_v6 = vsel %vm5872_vm15, %v5259_v55, %v6128_v25  ;;  %v14032_v26 = vld [vmem:[#allocation67_spill] sm:$0xff]  ;;  %v14033_v34 = vld [vmem:[#allocation66_spill] sm:$0xff] }
 0x41b   : > { %7332 = vmatmul.mubr.bf16.gmra.mxu1 %v14021_v30  ;;  %v5269_v35 = vadd.f32 %v5268_v38, %v5076_v52  ;;  %v5078_v33 = vadd.f32 %v5077_v51, %v11877_v40  ;;  %vm5887_vm1 = vcmp.gt.f32.partialorder %v5267_v19, 0.0  ;;  %14031 = vst [vmem:[#allocation108_spill] sm:$0xff] %v12299_v6  ;;  %v14034_v62 = vpack.c.bf16 %v14032_v26, %v14033_v34  ;;  %v14035_v51 = vld [vmem:[#allocation119_spill] sm:$0xff]  ;;  %v14038_v25 = vld [vmem:[#allocation52_spill] sm:$0xff] }
 0x41c   : > { %7339 = vmatprep.mubr.bf16.mxu1 %v14028_v45  ;;  %v5270_v30 = vpop.f32.mrf.mxu1  ;;  %v6143_v45 = vmul.f32 0.2, %v5267_v19  ;;  %v5079_v36 = vpop.f32.mrf.mxu0  ;;  %v12297_v42 = vsel %vm5880_vm0, %v5263_v47, %v6136_v31  ;;  %v14039_v55 = vld [vmem:[#allocation71_spill] sm:$0xff] }
 0x41d   : > { %14030 = vst [vmem:[#allocation29_spill] sm:$0xff] %v12297_v42  ;;  %v5271_v61 = vadd.f32 %v5270_v30, %v5078_v33  ;;  %v5080_v1 = vadd.f32 %v5079_v36, %v11881_v14  ;;  %v14036_v33 = vld [vmem:[#allocation118_spill] sm:$0xff]  ;;  %v14040_v36 = vpack.c.bf16 %v14038_v25, %v14039_v55  ;;  %v14042_v34 = vld [vmem:[#allocation31_spill] sm:$0xff]  ;;  %v6144_v7 = vmul.f32 0.2, %v5269_v35 }
 0x41e   : > { %v5272_v20 = vpop.f32.mrf.mxu1  ;;  %v5083_v57 = vpop.f32.mrf.mxu0  ;;  %v14037_v30 = vpack.c.bf16 %v14035_v51, %v14036_v33  ;;  %v12314_v43 = vsel %vm5887_vm1, %v5267_v19, %v6143_v45  ;;  %vm5888_vm3 = vcmp.gt.f32.partialorder %v5269_v35, 0.0 }
 0x41f   : > { %vm5895_vm2 = vcmp.gt.f32.partialorder %v5271_v61, 0.0  ;;  %v6151_v38 = vmul.f32 0.2, %v5271_v61  ;;  %v5084_v47 = vadd.f32 %v5083_v57, %v11877_v40  ;;  %14041 = vst [vmem:[#allocation42_spill] sm:$0xff] %v12314_v43  ;;  %v5273_v26 = vadd.f32 %v5272_v20, %v5080_v1 }
 0x420   : > { %v5276_v31 = vpop.f32.mrf.mxu1  ;;  %v5085_v52 = vpop.f32.mrf.mxu0 }
 0x421   : > { %7179 = vmatmul.mubr.bf16.gmra.mxu0 %v14034_v62  ;;  %v14043_v62 = vld [vmem:[#allocation122_spill] sm:$0xff]  ;;  %v12319_v6 = vsel %vm5895_vm2, %v5271_v61, %v6151_v38  ;;  %v5277_v57 = vadd.f32 %v5276_v31, %v5084_v47  ;;  %v5086_v42 = vadd.f32 %v5085_v52, %v11881_v14  ;;  %vm5896_vm4 = vcmp.gt.f32.partialorder %v5273_v26, 0.0 }
 0x422   : > { %7186 = vmatprep.mubr.bf16.mxu0 %v14040_v36  ;;  %v14044_v32 = vpack.c.bf16 %v14042_v34, %v14043_v62  ;;  %14045 = vst [vmem:[#allocation62_spill] sm:$0xff] %v12319_v6  ;;  %v5278_v51 = vpop.f32.mrf.mxu1  ;;  %v6152_v19 = vmul.f32 0.2, %v5273_v26  ;;  %v5087_v45 = vpop.f32.mrf.mxu0  ;;  %v12327_v52 = vsel %vm5888_vm3, %v5269_v35, %v6144_v7  ;;  %v14048_v36 = vld [vmem:[#allocation70_spill] sm:$0xff]  ;;  %v14049_v34 = vld [vmem:[#allocation69_spill] sm:$0xff]  ;;  %v14054_v7 = vld [vmem:[#allocation75_spill] sm:$0xff] }
 0x423   : > { %7340 = vmatmul.mubr.bf16.gmra.mxu1 %v14037_v30  ;;  %v5279_v20 = vadd.f32 %v5278_v51, %v5086_v42  ;;  %v5088_v1 = vadd.f32 %v5087_v45, %v11877_v40  ;;  %vm5903_vm5 = vcmp.gt.f32.partialorder %v5277_v57, 0.0  ;;  %14047 = vst [vmem:[#allocation112_spill] sm:$0xff] %v12327_v52  ;;  %v14050_v62 = vpack.c.bf16 %v14048_v36, %v14049_v34  ;;  %v14051_v45 = vld [vmem:[#allocation30_spill] sm:$0xff]  ;;  %v14126_v52 = vld [vmem:[#allocation17_spill] sm:$0xff] }
 0x424   : > { %7347 = vmatprep.mubr.bf16.mxu1 %v14044_v32  ;;  %v5280_v30 = vpop.f32.mrf.mxu1  ;;  %v6159_v32 = vmul.f32 0.2, %v5277_v57  ;;  %v5089_v25 = vpop.f32.mrf.mxu0  ;;  %v12325_v55 = vsel %vm5896_vm4, %v5273_v26, %v6152_v19  ;;  %v14055_v35 = vld [vmem:[#allocation74_spill] sm:$0xff]  ;;  %v14058_v34 = vpack.c.bf16 %v11639_v13, %v11648_v46 }
 0x425   : > { %14046 = vst [vmem:[#allocation41_spill] sm:$0xff] %v12325_v55  ;;  %v5281_v61 = vadd.f32 %v5280_v30, %v5088_v1  ;;  %v5090_v47 = vadd.f32 %v5089_v25, %v11881_v14  ;;  %v14052_v1 = vld [vmem:[#allocation59_spill] sm:$0xff]  ;;  %v14056_v25 = vpack.c.bf16 %v14054_v7, %v14055_v35  ;;  %v6160_v42 = vmul.f32 0.2, %v5279_v20 }
 0x426   : > { %v5282_v38 = vpop.f32.mrf.mxu1  ;;  %v5093_v31 = vpop.f32.mrf.mxu0  ;;  %v14053_v30 = vpack.c.bf16 %v14051_v45, %v14052_v1  ;;  %v12342_v33 = vsel %vm5903_vm5, %v5277_v57, %v6159_v32  ;;  %vm5904_vm7 = vcmp.gt.f32.partialorder %v5279_v20, 0.0 }
 0x427   : > { %vm5911_vm6 = vcmp.gt.f32.partialorder %v5281_v61, 0.0  ;;  %v6167_v51 = vmul.f32 0.2, %v5281_v61  ;;  %v5094_v26 = vadd.f32 %v5093_v31, %v11877_v40  ;;  %14057 = vst [vmem:[#allocation113_spill] sm:$0xff] %v12342_v33  ;;  %v5283_v36 = vadd.f32 %v5282_v38, %v5090_v47 }
 0x428   : > { %v5286_v19 = vpop.f32.mrf.mxu1 }
 0x429   : > { %7187 = vmatmul.mubr.bf16.gmra.mxu0 %v14050_v62  ;;  %v5095_v62 = vpop.f32.mrf.mxu0  ;;  %v12347_v43 = vsel %vm5911_vm6, %v5281_v61, %v6167_v51  ;;  %v5287_v31 = vadd.f32 %v5286_v19, %v5094_v26  ;;  %vm5912_vm8 = vcmp.gt.f32.partialorder %v5283_v36, 0.0  ;;  %v6168_v57 = vmul.f32 0.2, %v5283_v36 }
 0x42a   : > { %7194 = vmatprep.mubr.bf16.mxu0 %v14056_v25  ;;  %14059 = vst [vmem:[#allocation39_spill] sm:$0xff] %v12347_v43  ;;  %v5096_v6 = vadd.f32 %v5095_v62, %v11881_v14  ;;  %v5288_v45 = vpop.f32.mrf.mxu1  ;;  %v12355_v26 = vsel %vm5904_vm7, %v5279_v20, %v6160_v42  ;;  %v14062_v25 = vld [vmem:[#allocation73_spill] sm:$0xff]  ;;  %v14066_v20 = vld [vmem:[#allocation79_spill] sm:$0xff]  ;;  %v14067_v42 = vld [vmem:[#allocation78_spill] sm:$0xff] }
 0x42b   : > { %7348 = vmatmul.mubr.bf16.gmra.mxu1 %v14053_v30  ;;  %v5097_v32 = vpop.f32.mrf.mxu0  ;;  %v6175_v46 = vmul.f32 0.2, %v5287_v31  ;;  %v12353_v7 = vsel %vm5912_vm8, %v5283_v36, %v6168_v57  ;;  %vm5919_vm9 = vcmp.gt.f32.partialorder %v5287_v31, 0.0  ;;  %14061 = vst [vmem:[#allocation111_spill] sm:$0xff] %v12355_v26 }
 0x42c   : > { %7355 = vmatprep.mubr.bf16.mxu1 %v14058_v34  ;;  %v5289_v38 = vadd.f32 %v5288_v45, %v5096_v6  ;;  %v5098_v47 = vadd.f32 %v5097_v32, %v11877_v40  ;;  %v5290_v13 = vpop.f32.mrf.mxu1  ;;  %14060 = vst [vmem:[#allocation37_spill] sm:$0xff] %v12353_v7  ;;  %v14063_v34 = vld [vmem:[#allocation72_spill] sm:$0xff]  ;;  %v14065_v32 = vpack.c.bf16 %v11622_v4, %v11615_v9  ;;  %v14125_v7 = vld [vmem:[#allocation97_spill] sm:$0xff] }
 0x42d   : > { %v5099_v30 = vpop.f32.mrf.mxu0  ;;  %v14064_v62 = vpack.c.bf16 %v14062_v25, %v14063_v34  ;;  %v14070_v25 = vpack.c.bf16 %v11689_v3, %v11700_v5  ;;  %v14127_v55 = vpack.c.bf16 %v14125_v7, %v14126_v52  ;;  %v14134_v7 = vld [vmem:[#allocation95_spill] sm:$0xff] }
 0x42e   : > { %v5291_v61 = vadd.f32 %v5290_v13, %v5098_v47  ;;  %v5292_v51 = vpop.f32.mrf.mxu1  ;;  %v5100_v19 = vadd.f32 %v5099_v30, %v11881_v14  ;;  %v14068_v47 = vpack.c.bf16 %v14066_v20, %v14067_v42  ;;  %v12370_v13 = vsel %vm5919_vm9, %v5287_v31, %v6175_v46 }
 0x42f   : > { %v5103_v35 = vpop.f32.mrf.mxu0  ;;  %14069 = vst [vmem:[#allocation45_spill] sm:$0xff] %v12370_v13  ;;  %vm5920_vm11 = vcmp.gt.f32.partialorder %v5289_v38, 0.0  ;;  %v14112_v13 = vld [vmem:[#allocation93_spill] sm:$0xff] }
 0x430   : > { %vm5927_vm10 = vcmp.gt.f32.partialorder %v5291_v61, 0.0  ;;  %v6183_v45 = vmul.f32 0.2, %v5291_v61  ;;  %v5104_v36 = vadd.f32 %v5103_v35, %v11877_v40  ;;  %v5296_v57 = vpop.f32.mrf.mxu1  ;;  %v5293_v30 = vadd.f32 %v5292_v51, %v5100_v19 }
 0x431   : > { %7195 = vmatmul.mubr.bf16.gmra.mxu0 %v14064_v62  ;;  %v5105_v34 = vpop.f32.mrf.mxu0  ;;  %v6176_v62 = vmul.f32 0.2, %v5289_v38 }
 0x432   : > { %7202 = vmatprep.mubr.bf16.mxu0 %v14068_v47  ;;  %v12375_v1 = vsel %vm5927_vm10, %v5291_v61, %v6183_v45  ;;  %v5297_v35 = vadd.f32 %v5296_v57, %v5104_v36  ;;  %v5106_v6 = vadd.f32 %v5105_v34, %v11881_v14  ;;  %v5298_v9 = vpop.f32.mrf.mxu1  ;;  %vm5928_vm12 = vcmp.gt.f32.partialorder %v5293_v30, 0.0  ;;  %v14074_v47 = vld [vmem:[#allocation77_spill] sm:$0xff] }
 0x433   : > { %7356 = vmatmul.mubr.bf16.gmra.mxu1 %v14065_v32  ;;  %14071 = vst [vmem:[#allocation65_spill] sm:$0xff] %v12375_v1  ;;  %v6184_v31 = vmul.f32 0.2, %v5293_v30  ;;  %v5107_v46 = vpop.f32.mrf.mxu0  ;;  %v12383_v57 = vsel %vm5920_vm11, %v5289_v38, %v6176_v62  ;;  %v14077_v38 = vpack.c.bf16 %v11668_v16, %v11661_v53  ;;  %v14078_v62 = vld [vmem:[#allocation82_spill] sm:$0xff] }
 0x434   : > { %7363 = vmatprep.mubr.bf16.mxu1 %v14070_v25  ;;  %v5299_v51 = vadd.f32 %v5298_v9, %v5106_v6  ;;  %v5108_v19 = vadd.f32 %v5107_v46, %v11877_v40  ;;  %v5300_v3 = vpop.f32.mrf.mxu1  ;;  %v6191_v61 = vmul.f32 0.2, %v5297_v35  ;;  %14073 = vst [vmem:[#allocation116_spill] sm:$0xff] %v12383_v57  ;;  %vm5935_vm13 = vcmp.gt.f32.partialorder %v5297_v35, 0.0  ;;  %v14075_v25 = vld [vmem:[#allocation76_spill] sm:$0xff]  ;;  %v14079_v9 = vld [vmem:[#allocation83_spill] sm:$0xff] }
 0x435   : > { %v5109_v5 = vpop.f32.mrf.mxu0  ;;  %v12381_v32 = vsel %vm5928_vm12, %v5293_v30, %v6184_v31  ;;  %v14076_v34 = vpack.c.bf16 %v14074_v47, %v14075_v25  ;;  %v14081_v46 = vpack.c.bf16 %v11741_v22, %v11752_v37  ;;  %v14102_v40 = vld [vmem:[#allocation16_spill] sm:$0xff]  ;;  %v14113_v1 = vld [vmem:[#allocation94_spill] sm:$0xff] }
 0x436   : > { %14072 = vst [vmem:[#allocation44_spill] sm:$0xff] %v12381_v32  ;;  %v5301_v45 = vadd.f32 %v5300_v3, %v5108_v19  ;;  %v5302_v36 = vpop.f32.mrf.mxu1  ;;  %v5110_v20 = vadd.f32 %v5109_v5, %v11881_v14  ;;  %v14080_v14 = vpack.c.bf16 %v14078_v62, %v14079_v9  ;;  %v12406_v3 = vsel %vm5935_vm13, %v5297_v35, %v6191_v61  ;;  %v14100_v62 = vld [vmem:[#allocation90_spill] sm:$0xff] }
 0x437   : > { %v12386_v42 = vpop.f32.mrf.mxu0  ;;  %14082 = vst [vmem:[#allocation117_spill] sm:$0xff] %v12406_v3  ;;  %v6192_v5 = vmul.f32 0.2, %v5299_v51  ;;  %vm5936_vm15 = vcmp.gt.f32.partialorder %v5299_v51, 0.0  ;;  %v14103_v3 = vld [vmem:[#allocation123_spill] sm:$0xff]  ;;  %v14114_v57 = vpack.c.bf16 %v14112_v13, %v14113_v1  ;;  %v14115_v32 = vld [vmem:[#allocation18_spill] sm:$0xff] }
 0x438   : > { %vm5943_vm14 = vcmp.gt.f32.partialorder %v5301_v45, 0.0  ;;  %v6199_v6 = vmul.f32 0.2, %v5301_v45  ;;  %v12393_v30 = vpop.f32.mrf.mxu1  ;;  %v5303_v31 = vadd.f32 %v5302_v36, %v5110_v20  ;;  %v14116_v33 = vpack.c.bf16 %v11832_v41, %v14115_v32  ;;  %v14118_v1 = vld [vmem:[#allocation92_spill] sm:$0xff]  ;;  %v14123_v32 = vld [vmem:[#allocation13_spill] sm:$0xff] }
 0x439   : > { %7203 = vmatmul.mubr.bf16.gmra.mxu0 %v14076_v34  ;;  %v12404_v19 = vpop.f32.mrf.mxu0  ;;  %v12422_v61 = vsel %vm5936_vm15, %v5299_v51, %v6192_v5  ;;  %v14086_v34 = vld [vmem:[#allocation81_spill] sm:$0xff]  ;;  %v14093_v51 = vpack.c.bf16 %v11788_v0, %v11793_v27  ;;  %v14097_v27 = vld [vmem:[#allocation32_spill] sm:$0xff] }
 0x43a   : > { %7210 = vmatprep.mubr.bf16.mxu0 %v14080_v14  ;;  %v12408_v47 = vsel %vm5943_vm14, %v5301_v45, %v6199_v6  ;;  %v12410_v25 = vpop.f32.mrf.mxu1  ;;  %vm5944_vm0 = vcmp.gt.f32.partialorder %v5303_v31, 0.0  ;;  %v6200_v16 = vmul.f32 0.2, %v5303_v31  ;;  %14085 = vst [vmem:[#allocation115_spill] sm:$0xff] %v12422_v61  ;;  %v14087_v6 = vld [vmem:[#allocation80_spill] sm:$0xff]  ;;  %v14089_v14 = vpack.c.bf16 %v11720_v24, %v11713_v28 }
 0x43b   : > { %7364 = vmatmul.mubr.bf16.gmra.mxu1 %v14077_v38  ;;  %14083 = vst [vmem:[#allocation64_spill] sm:$0xff] %v12408_v47  ;;  %v12414_v36 = vpop.f32.mrf.mxu0  ;;  %v14088_v38 = vpack.c.bf16 %v14086_v34, %v14087_v6  ;;  %v14104_v47 = vpack.c.bf16 %v14102_v40, %v14103_v3  ;;  %v14109_v3 = vld [vmem:[#allocation14_spill] sm:$0xff]  ;;  %v14119_v13 = vld [vmem:[#allocation12_spill] sm:$0xff] }
 0x43c   : > { %7371 = vmatprep.mubr.bf16.mxu1 %v14081_v46  ;;  %v12416_v20 = vpop.f32.mrf.mxu1  ;;  %v12418_v37 = vsel %vm5944_vm0, %v5303_v31, %v6200_v16  ;;  %v14090_v31 = vld [vmem:[#allocation86_spill] sm:$0xff]  ;;  %v14091_v46 = vld [vmem:[#allocation87_spill] sm:$0xff] }
 0x43d   : > { %v5345_v22 = vpop.f32.mrf.mxu0  ;;  %14084 = vst [vmem:[#allocation63_spill] sm:$0xff] %v12418_v37  ;;  %v14092_v16 = vpack.c.bf16 %v14090_v31, %v14091_v46  ;;  %v14095_v31 = vld [vmem:[#allocation84_spill] sm:$0xff] }
 0x43e   : > { %v12420_v35 = vpop.f32.mrf.mxu1 }
 0x43f   : > { %v12424_v45 = vpop.f32.mrf.mxu0 }
 0x440   : > { %v12431_v9 = vpop.f32.mrf.mxu1 }
 0x441   : > { %7211 = vmatmul.mubr.bf16.gmra.mxu0 %v14088_v38  ;;  %v12442_v5 = vpop.f32.mrf.mxu0 }
 0x442   : > { %7218 = vmatprep.mubr.bf16.mxu0 %v14092_v16  ;;  %v12444_v34 = vpop.f32.mrf.mxu1  ;;  %v14098_v16 = vpack.c.bf16 %v11772_v56, %v14097_v27 }
 0x443   : > { %7372 = vmatmul.mubr.bf16.gmra.mxu1 %v14089_v14  ;;  %v12446_v6 = vpop.f32.mrf.mxu0  ;;  %v14094_v14 = vld [vmem:[#allocation85_spill] sm:$0xff] }
 0x444   : > { %7379 = vmatprep.mubr.bf16.mxu1 %v14093_v51  ;;  %v12448_v38 = vpop.f32.mrf.mxu1  ;;  %v14096_v46 = vpack.c.bf16 %v14094_v14, %v14095_v31  ;;  %v14099_v51 = vld [vmem:[#allocation91_spill] sm:$0xff] }
 0x445   : > { %v12450_v53 = vpop.f32.mrf.mxu0  ;;  %v14101_v4 = vpack.c.bf16 %v14099_v51, %v14100_v62  ;;  %v14105_v62 = vld [vmem:[#allocation89_spill] sm:$0xff] }
 0x446   : > { %v12452_v28 = vpop.f32.mrf.mxu1 }
 0x447   : > { %v12454_v24 = vpop.f32.mrf.mxu0 }
 0x448   : > { %v12459_v0 = vpop.f32.mrf.mxu1 }
 0x449   : > { %7219 = vmatmul.mubr.bf16.gmra.mxu0 %v14096_v46  ;;  %v12470_v61 = vpop.f32.mrf.mxu0 }
 0x44a   : > { %7226 = vmatprep.mubr.bf16.mxu0 %v14101_v4  ;;  %v12472_v37 = vpop.f32.mrf.mxu1  ;;  %v14106_v4 = vld [vmem:[#allocation88_spill] sm:$0xff] }
 0x44b   : > { %7380 = vmatmul.mubr.bf16.gmra.mxu1 %v14098_v16  ;;  %v12474_v14 = vpop.f32.mrf.mxu0  ;;  %v14107_v16 = vpack.c.bf16 %v14105_v62, %v14106_v4 }
 0x44c   : > { %7387 = vmatprep.mubr.bf16.mxu1 %v14104_v47  ;;  %v12476_v31 = vpop.f32.mrf.mxu1  ;;  %v14110_v47 = vld [vmem:[#allocation33_spill] sm:$0xff] }
 0x44d   : > { %v12478_v46 = vpop.f32.mrf.mxu0  ;;  %v14111_v51 = vpack.c.bf16 %v14109_v3, %v14110_v47 }
 0x44e   : > { %v12480_v56 = vpop.f32.mrf.mxu1 }
 0x44f   : > { %v12482_v27 = vpop.f32.mrf.mxu0 }
 0x450   : > { %v12487_v40 = vpop.f32.mrf.mxu1 }
 0x451   : > { %7227 = vmatmul.mubr.bf16.gmra.mxu0 %v14107_v16  ;;  %14108 = vst [vmem:[#allocation114_spill] sm:$0xff] %v12487_v40  ;;  %v12498_v43 = vpop.f32.mrf.mxu0  ;;  %v2853_v40 = vsub.s32 6, %v13839_v60 }
 0x452   : > { %7234 = vmatprep.mubr.bf16.mxu0 %v14114_v57  ;;  %v12500_v26 = vpop.f32.mrf.mxu1  ;;  %v14120_v57 = vpack.c.bf16 %v14118_v1, %v14119_v13 }
 0x453   : > { %7388 = vmatmul.mubr.bf16.gmra.mxu1 %v14111_v51  ;;  %v12502_v62 = vpop.f32.mrf.mxu0 }
 0x454   : > { %7395 = vmatprep.mubr.bf16.mxu1 %v14116_v33  ;;  %v12504_v4 = vpop.f32.mrf.mxu1  ;;  %v14122_v33 = vld [vmem:[#allocation15_spill] sm:$0xff] }
 0x455   : > { %v12506_v16 = vpop.f32.mrf.mxu0  ;;  %v14124_v51 = vpack.c.bf16 %v14122_v33, %v14123_v32 }
 0x456   : > { %v12508_v3 = vpop.f32.mrf.mxu1 }
 0x457   : > { %v12510_v47 = vpop.f32.mrf.mxu0 }
 0x458   : > { %14117 = vst [vmem:[#allocation50_spill] sm:$0xff] %v12510_v47  ;;  %v12515_v41 = vpop.f32.mrf.mxu1  ;;  %v2857_v47 = vsub.s32 7, %v13839_v60 }
 0x459   : > { %7235 = vmatmul.mubr.bf16.gmra.mxu0 %v14120_v57  ;;  %14121 = vst [vmem:[#allocation68_spill] sm:$0xff] %v12515_v41  ;;  %v12526_v12 = vpop.f32.mrf.mxu0 }
 0x45a   : > { %7242 = vmatprep.mubr.bf16.mxu0 %v14127_v55  ;;  %v12529_v1 = vpop.f32.mrf.mxu1  ;;  %v8991_v55 = vld [vmem:[%s13288_s8] sm:$0xff] }
 0x45b   : > { %7396 = vmatmul.mubr.bf16.gmra.mxu1 %v14124_v51  ;;  %14129 = vst [vmem:[#allocation120_spill] sm:$0xff] %v12529_v1  ;;  %v12531_v13 = vpop.f32.mrf.mxu0  ;;  %v12540_v52 = vrot.slane %v8991_v55, %v2857_v47  ;;  %v14139_v1 = vld [vmem:[#allocation100_spill] sm:$0xff] }
 0x45c   : > { %7403 = vmatprep.mubr.bf16.mxu1 %v14128_v48  ;;  %14130 = vst [vmem:[#allocation121_spill] sm:$0xff] %v12531_v13  ;;  %v12533_v57 = vpop.f32.mrf.mxu1  ;;  %v14133_v48 = vld [vmem:[#allocation96_spill] sm:$0xff]  ;;  %v14138_v13 = vld [vmem:[#allocation101_spill] sm:$0xff] }
 0x45d   : > { %14131 = vst [vmem:[#allocation67_spill] sm:$0xff] %v12533_v57  ;;  %v12535_v33 = vpop.f32.mrf.mxu0  ;;  %v14135_v32 = vpack.c.bf16 %v14133_v48, %v14134_v7  ;;  %v5346_v51 = vadd.f32 %v5345_v22, %v12540_v52  ;;  %v14137_v57 = vpack.c.bf16 %v11846_v63, %v11843_v50  ;;  %v14140_v47 = vpack.c.bf16 %v14138_v13, %v14139_v1 }
 0x45e   : > { %v12542_v11 = vpop.f32.mrf.mxu1  ;;  %v5342_v22 = vadd.f32 %v12404_v19, %v12540_v52  ;;  %v12573_v1 = vrot.slane %v8991_v55, %v2853_v40  ;;  %v5356_v40 = vadd.f32 %v12450_v53, %v12540_v52 }
 0x45f   : > { %v12544_v2 = vpop.f32.mrf.mxu0  ;;  %v5539_v50 = vadd.f32 %v12420_v35, %v5346_v51  ;;  %v14148_v51 = vld [vmem:[#allocation20_spill] sm:$0xff] }
 0x460   : > { %14132 = vst [vmem:[#allocation66_spill] sm:$0xff] %v12544_v2  ;;  %v12550_v41 = vpop.f32.mrf.mxu1  ;;  %v14141_v2 = vpack.c.bf16 %v11879_v21, %v11884_v18  ;;  %v5535_v21 = vadd.f32 %v12410_v25, %v5342_v22  ;;  %v5344_v13 = vadd.f32 %v12414_v36, %v12573_v1  ;;  %v14149_v25 = vpack.c.bf16 %v11868_v17, %v14148_v51  ;;  %v14150_v22 = vld [vmem:[#allocation102_spill] sm:$0xff] }
 0x461   : > { %7243 = vmatmul.mubr.bf16.gmra.mxu0 %v14135_v32  ;;  %14136 = vst [vmem:[#allocation119_spill] sm:$0xff] %v12550_v41  ;;  %v12562_v48 = vpop.f32.mrf.mxu0  ;;  %v5962_v35 = vmul.f32 0.2, %v5539_v50  ;;  %v14151_v41 = vld [vmem:[#allocation103_spill] sm:$0xff]  ;;  %v5340_v36 = vadd.f32 %v12386_v42, %v12573_v1  ;;  %vm5706_vm1 = vcmp.gt.f32.partialorder %v5539_v50, 0.0  ;;  %v5549_v42 = vadd.f32 %v12452_v28, %v5356_v40  ;;  %v14155_v28 = vld [vmem:[#allocation9_spill] sm:$0xff] }
 0x462   : > { %7250 = vmatprep.mubr.bf16.mxu0 %v14140_v47  ;;  %v12566_v7 = vpop.f32.mrf.mxu1  ;;  %v5954_v53 = vmul.f32 0.2, %v5535_v21  ;;  %vm5698_vm2 = vcmp.gt.f32.partialorder %v5535_v21, 0.0 }
 0x463   : > { %7404 = vmatmul.mubr.bf16.gmra.mxu1 %v14137_v57  ;;  %v12568_v32 = vpop.f32.mrf.mxu0  ;;  %v14144_v57 = vld [vmem:[#allocation99_spill] sm:$0xff]  ;;  %vm5722_vm4 = vcmp.gt.f32.partialorder %v5549_v42, 0.0 }
 0x464   : > { %7411 = vmatprep.mubr.bf16.mxu1 %v14141_v2  ;;  %v12571_v63 = vpop.f32.mrf.mxu1  ;;  %v14145_v2 = vld [vmem:[#allocation98_spill] sm:$0xff] }
 0x465   : > { %14142 = vst [vmem:[#allocation118_spill] sm:$0xff] %v12571_v63  ;;  %v12575_v60 = vpop.f32.mrf.mxu0  ;;  %v14146_v47 = vpack.c.bf16 %v14144_v57, %v14145_v2  ;;  %v14152_v63 = vpack.c.bf16 %v14150_v22, %v14151_v41  ;;  %v14153_v57 = vpack.c.bf16 %v11902_v58, %v11904_v59  ;;  %v5537_v41 = vadd.f32 %v12416_v20, %v5344_v13 }
 0x466   : > { %v12578_v18 = vpop.f32.mrf.mxu1  ;;  %v5533_v58 = vadd.f32 %v12393_v30, %v5340_v36  ;;  %v5354_v20 = vadd.f32 %v12446_v6, %v12573_v1  ;;  %v5978_v30 = vmul.f32 0.2, %v5549_v42  ;;  %v14158_v6 = vpack.c.bf16 %v11922_v49, %v11924_v54 }
 0x467   : > { %v12582_v19 = vpop.f32.mrf.mxu0  ;;  %vm5705_vm3 = vcmp.gt.f32.partialorder %v5537_v41, 0.0 }
 0x468   : > { %14143 = vst [vmem:[#allocation52_spill] sm:$0xff] %v12582_v19  ;;  %v12589_v55 = vpop.f32.mrf.mxu1  ;;  %v14154_v19 = vld [vmem:[#allocation36_spill] sm:$0xff]  ;;  %v5953_v36 = vmul.f32 0.2, %v5533_v58  ;;  %vm5697_vm5 = vcmp.gt.f32.partialorder %v5533_v58, 0.0 }
 0x469   : > { %7251 = vmatmul.mubr.bf16.gmra.mxu0 %v14146_v47  ;;  %14147 = vst [vmem:[#allocation71_spill] sm:$0xff] %v12589_v55  ;;  %v12602_v2 = vpop.f32.mrf.mxu0  ;;  %v5352_v47 = vadd.f32 %v12442_v5, %v12540_v52  ;;  %v6210_v5 = vsel %vm5698_vm2, %v5535_v21, %v5954_v53  ;;  %v5961_v55 = vmul.f32 0.2, %v5537_v41  ;;  %v14156_v40 = vpack.c.bf16 %v14154_v19, %v14155_v28 }
 0x46a   : > { %7258 = vmatprep.mubr.bf16.mxu0 %v14152_v63  ;;  %v12606_v17 = vpop.f32.mrf.mxu1  ;;  %v14157_v21 = vpack.c.bf16 %v11896_v39, %v11893_v10  ;;  %v5350_v19 = vadd.f32 %v12424_v45, %v12573_v1  ;;  %v5547_v39 = vadd.f32 %v12448_v38, %v5354_v20  ;;  %v6209_v28 = vsel %vm5697_vm5, %v5533_v58, %v5953_v36 }
 0x46b   : > { %7412 = vmatmul.mubr.bf16.gmra.mxu1 %v14149_v25  ;;  %v12609_v63 = vpop.f32.mrf.mxu0  ;;  %v6218_v25 = vsel %vm5706_vm1, %v5539_v50, %v5962_v35  ;;  %v5545_v22 = vadd.f32 %v12444_v34, %v5352_v47  ;;  %v5366_v35 = vadd.f32 %v12478_v46, %v12540_v52  ;;  %v5362_v47 = vadd.f32 %v12470_v61, %v12540_v52 }
 0x46c   : > { %7419 = vmatprep.mubr.bf16.mxu1 %v14153_v57  ;;  %v12612_v51 = vpop.f32.mrf.mxu1  ;;  %v6466_v50 = vpack.c.bf16 %v6218_v25, %v6210_v5  ;;  %v6217_v10 = vsel %vm5705_vm3, %v5537_v41, %v5961_v55  ;;  %v6234_v5 = vsel %vm5722_vm4, %v5549_v42, %v5978_v30  ;;  %v5977_v41 = vmul.f32 0.2, %v5547_v39 }
 0x46d   : > { %v12615_v59 = vpop.f32.mrf.mxu0  ;;  %v5970_v46 = vmul.f32 0.2, %v5545_v22  ;;  %vm5714_vm6 = vcmp.gt.f32.partialorder %v5545_v22, 0.0  ;;  %v5559_v54 = vadd.f32 %v12480_v56, %v5366_v35  ;;  %v5555_v61 = vadd.f32 %v12472_v37, %v5362_v47 }
 0x46e   : > { %v12618_v57 = vpop.f32.mrf.mxu1  ;;  %v5364_v38 = vadd.f32 %v12474_v14, %v12573_v1  ;;  %v14159_v56 = vpack.c.bf16 %v11916_v23, %v11913_v44  ;;  %vm5721_vm7 = vcmp.gt.f32.partialorder %v5547_v39, 0.0  ;;  %v5376_v58 = vadd.f32 %v12506_v16, %v12540_v52 }
 0x46f   : > { %v12622_v13 = vpop.f32.mrf.mxu0  ;;  %v6226_v55 = vsel %vm5714_vm6, %v5545_v22, %v5970_v46  ;;  %v14160_v22 = vpack.c.bf16 %v11942_v8, %v11944_v15  ;;  %v5360_v30 = vadd.f32 %v12454_v24, %v12573_v1  ;;  %vm5738_vm8 = vcmp.gt.f32.partialorder %v5559_v54, 0.0 }
 0x470   : > { %v12629_v34 = vpop.f32.mrf.mxu1  ;;  %v6474_v42 = vpack.c.bf16 %v6234_v5, %v6226_v55  ;;  %v5986_v23 = vmul.f32 0.2, %v5555_v61  ;;  %v5372_v16 = vadd.f32 %v12498_v43, %v12540_v52  ;;  %v6233_v36 = vsel %vm5721_vm7, %v5547_v39, %v5977_v41 }
 0x471   : > { %7259 = vmatmul.mubr.bf16.gmra.mxu0 %v14156_v40  ;;  %v12639_v53 = vpop.f32.mrf.mxu0  ;;  %v5543_v40 = vadd.f32 %v12431_v9, %v5350_v19  ;;  %v5994_v9 = vmul.f32 0.2, %v5559_v54  ;;  %vm5730_vm10 = vcmp.gt.f32.partialorder %v5555_v61, 0.0  ;;  %v5557_v8 = vadd.f32 %v12476_v31, %v5364_v38 }
 0x472   : > { %7460 = vmatprep.mubr.bf16.mxu0 %v14158_v6  ;;  %v12643_v25 = vpop.f32.mrf.mxu1  ;;  %v5569_v19 = vadd.f32 %v12508_v3, %v5376_v58  ;;  %v5565_v43 = vadd.f32 %v12500_v26, %v5372_v16  ;;  %v6242_v39 = vsel %vm5730_vm10, %v5555_v61, %v5986_v23  ;;  %v5374_v31 = vadd.f32 %v12502_v62, %v12573_v1  ;;  %v14161_v3 = vld [vmem:[#allocation19_spill] sm:$0xff]  ;;  %v14163_v61 = vld [vmem:[#allocation46_spill] sm:$0xff] }
 0x473   : > { %7420 = vmatmul.mubr.bf16.gmra.mxu1 %v14157_v21  ;;  %v12646_v49 = vpop.f32.mrf.mxu0  ;;  %v6465_v21 = vpack.c.bf16 %v6217_v10, %v6209_v28  ;;  %v5969_v14 = vmul.f32 0.2, %v5543_v40  ;;  %vm5713_vm9 = vcmp.gt.f32.partialorder %v5543_v40, 0.0  ;;  %v6250_v46 = vsel %vm5738_vm8, %v5559_v54, %v5994_v9 }
 0x474   : > { %7621 = vmatprep.mubr.bf16.mxu1 %v6466_v50  ;;  %v12649_v45 = vpop.f32.mrf.mxu1  ;;  %v5553_v10 = vadd.f32 %v12459_v0, %v5360_v30  ;;  %v5993_v55 = vmul.f32 0.2, %v5557_v8  ;;  %v14162_v54 = vpack.c.bf16 %v11936_v29, %v14161_v3  ;;  %vm5737_vm11 = vcmp.gt.f32.partialorder %v5557_v8, 0.0 }
 0x475   : > { %v12652_v50 = vpop.f32.mrf.mxu0  ;;  %v6225_v47 = vsel %vm5713_vm9, %v5543_v40, %v5969_v14  ;;  %v6482_v40 = vpack.c.bf16 %v6250_v46, %v6242_v39  ;;  %v6010_v0 = vmul.f32 0.2, %v5569_v19  ;;  %v5386_v38 = vadd.f32 %v12535_v33, %v12540_v52 }
 0x476   : > { %v12655_v6 = vpop.f32.mrf.mxu1  ;;  %v6473_v28 = vpack.c.bf16 %v6233_v36, %v6225_v47  ;;  %v5985_v62 = vmul.f32 0.2, %v5553_v10  ;;  %v5370_v9 = vadd.f32 %v12482_v27, %v12573_v1  ;;  %vm5754_vm12 = vcmp.gt.f32.partialorder %v5569_v19, 0.0  ;;  %v14166_v47 = vld [vmem:[#allocation114_spill] sm:$0xff] }
 0x477   : > { %v12659_v20 = vpop.f32.mrf.mxu0  ;;  %vm5729_vm13 = vcmp.gt.f32.partialorder %v5553_v10, 0.0  ;;  %v6002_v58 = vmul.f32 0.2, %v5565_v43  ;;  %v5382_v33 = vadd.f32 %v12526_v12, %v12540_v52  ;;  %v6249_v14 = vsel %vm5737_vm11, %v5557_v8, %v5993_v55  ;;  %v14167_v12 = vld [vmem:[#allocation120_spill] sm:$0xff] }
 0x478   : > { %v12666_v37 = vpop.f32.mrf.mxu1  ;;  %vm5746_vm14 = vcmp.gt.f32.partialorder %v5565_v43, 0.0  ;;  %v5567_v30 = vadd.f32 %v12504_v4, %v5374_v31  ;;  %v5579_v16 = vadd.f32 %v12542_v11, %v5386_v38  ;;  %v6266_v36 = vsel %vm5754_vm12, %v5569_v19, %v6010_v0  ;;  %v14168_v4 = vld [vmem:[#allocation121_spill] sm:$0xff]  ;;  %v14169_v11 = vld [vmem:[#allocation24_spill] sm:$0xff] }
 0x479   : > { %7461 = vmatmul.mubr.bf16.vlgmr.msra.gmra.mxu0 %v14159_v56  ;;  %v12673_v44 = vpop.f32.mrf.mxu0  ;;  %v14164_v56 = vld [vmem:[#allocation47_spill] sm:$0xff]  ;;  %v6241_v46 = vsel %vm5729_vm13, %v5553_v10, %v5985_v62  ;;  %v6258_v8 = vsel %vm5746_vm14, %v5565_v43, %v6002_v58  ;;  %v5384_v31 = vadd.f32 %v14168_v4, %v12573_v1  ;;  %v14170_v38 = vld [vmem:[#allocation21_spill] sm:$0xff]  ;;  %v14173_v43 = vld [vmem:[#allocation124_spill] sm:$0xff] }
 0x47a   : > { %7468 = vmatprep.mubr.bf16.mxu0 %v14160_v22  ;;  %v12677_v35 = vpop.f32.mrf.mxu1  ;;  %v6481_v3 = vpack.c.bf16 %v6249_v14, %v6241_v46  ;;  %v6009_v55 = vmul.f32 0.2, %v5567_v30  ;;  %v14171_v19 = vpack.c.bf16 %v14169_v11, %v14170_v38  ;;  %v6490_v10 = vpack.c.bf16 %v6266_v36, %v6258_v8  ;;  %v14174_v62 = vld [vmem:[#allocation125_spill] sm:$0xff] }
 0x47b   : > { %7622 = vmatmul.mubr.bf16.vlgmr.msra.gmra.mxu1 %v6465_v21  ;;  %v12680_v15 = vpop.f32.mrf.mxu0  ;;  %vm5753_vm15 = vcmp.gt.f32.partialorder %v5567_v30, 0.0  ;;  %v6026_v0 = vmul.f32 0.2, %v5579_v16  ;;  %vm5770_vm0 = vcmp.gt.f32.partialorder %v5579_v16, 0.0 }
 0x47c   : > { %7629 = vmatprep.mubr.bf16.mxu1 %v6474_v42  ;;  %v12683_v24 = vpop.f32.mrf.mxu1  ;;  %v14165_v42 = vpack.c.bf16 %v14163_v61, %v14164_v56  ;;  %v5396_v56 = vadd.f32 %v12575_v60, %v12540_v52  ;;  %v5392_v60 = vadd.f32 %v12562_v48, %v12540_v52 }
 0x47d   : > { %v12686_v5 = vpop.f32.mrf.mxu0 }
 0x47e   : > { %v12689_v21 = vpop.f32.mrf.mxu1  ;;  %v5589_v11 = vadd.f32 %v12578_v18, %v5396_v56  ;;  %v5585_v48 = vadd.f32 %v12566_v7, %v5392_v60  ;;  %v14180_v18 = vld [vmem:[#allocation49_spill] sm:$0xff]  ;;  %v14181_v56 = vld [vmem:[#allocation48_spill] sm:$0xff]  ;;  %v14187_v60 = vld [vmem:[#allocation66_spill] sm:$0xff] }
 0x47f   : > { %v12693_v41 = vpop.f32.mrf.mxu0 }
 0x480   : > { %v12700_v26 = vpop.f32.mrf.mxu1  ;;  %vm5786_vm4 = vcmp.gt.f32.partialorder %v5589_v11, 0.0  ;;  %vm5778_vm6 = vcmp.gt.f32.partialorder %v5585_v48, 0.0 }
 0x481   : > { %7469 = vmatmul.mubr.bf16.gmra.mxu0 %v14162_v54  ;;  %v12707_v29 = vpop.f32.mrf.mxu0  ;;  %v5575_v54 = vadd.f32 %v14167_v12, %v5382_v33  ;;  %v14176_v33 = vld [vmem:[#allocation50_spill] sm:$0xff]  ;;  %v14177_v12 = vld [vmem:[#allocation67_spill] sm:$0xff] }
 0x482   : > { %7476 = vmatprep.mubr.bf16.mxu0 %v14165_v42  ;;  %v12711_v22 = vpop.f32.mrf.mxu1  ;;  %v5380_v14 = vadd.f32 %v14176_v33, %v12573_v1  ;;  %v5577_v8 = vadd.f32 %v14177_v12, %v5384_v31  ;;  %v5394_v31 = vadd.f32 %v12568_v32, %v12573_v1 }
 0x483   : > { %7630 = vmatmul.mubr.bf16.gmra.mxu1 %v6473_v28  ;;  %v12714_v23 = vpop.f32.mrf.mxu0  ;;  %v5563_v28 = vadd.f32 %v14166_v47, %v5370_v9  ;;  %v14175_v9 = vpack.c.bf16 %v14173_v43, %v14174_v62  ;;  %v6018_v36 = vmul.f32 0.2, %v5575_v54  ;;  %vm5762_vm2 = vcmp.gt.f32.partialorder %v5575_v54, 0.0  ;;  %v14178_v43 = vld [vmem:[#allocation68_spill] sm:$0xff] }
 0x484   : > { %7637 = vmatprep.mubr.bf16.mxu1 %v6482_v40  ;;  %v12717_v27 = vpop.f32.mrf.mxu1  ;;  %v5573_v62 = vadd.f32 %v14178_v43, %v5380_v14  ;;  %vm5769_vm3 = vcmp.gt.f32.partialorder %v5577_v8, 0.0  ;;  %v14185_v14 = vld [vmem:[#allocation126_spill] sm:$0xff] }
 0x485   : > { %v12720_v39 = vpop.f32.mrf.mxu0  ;;  %v6001_v58 = vmul.f32 0.2, %v5563_v28  ;;  %vm5745_vm1 = vcmp.gt.f32.partialorder %v5563_v28, 0.0 }
 0x486   : > { %v12723_v40 = vpop.f32.mrf.mxu1  ;;  %v6017_v32 = vmul.f32 0.2, %v5573_v62  ;;  %vm5761_vm5 = vcmp.gt.f32.partialorder %v5573_v62, 0.0 }
 0x487   : > { %v12727_v61 = vpop.f32.mrf.mxu0 }
 0x488   : > { %v12734_v42 = vpop.f32.mrf.mxu1 }
 0x489   : > { %7477 = vmatmul.mubr.bf16.gmra.mxu0 %v14171_v19  ;;  %14172 = vst [vmem:[#allocation31_spill] sm:$0xff] %v12734_v42  ;;  %v12741_v46 = vpop.f32.mrf.mxu0  ;;  %v6282_v19 = vsel %vm5770_vm0, %v5579_v16, %v6026_v0  ;;  %v14182_v16 = vpack.c.bf16 %v14180_v18, %v14181_v56  ;;  %v6042_v0 = vmul.f32 0.2, %v5589_v11 }
 0x48a   : > { %7484 = vmatprep.mubr.bf16.mxu0 %v14175_v9  ;;  %v12745_v47 = vpop.f32.mrf.mxu1 }
 0x48b   : > { %7638 = vmatmul.mubr.bf16.gmra.mxu1 %v6481_v3  ;;  %v6265_v3 = vsel %vm5753_vm15, %v5567_v30, %v6009_v55  ;;  %v12748_v4 = vpop.f32.mrf.mxu0  ;;  %v6274_v30 = vsel %vm5762_vm2, %v5575_v54, %v6018_v36  ;;  %v6025_v55 = vmul.f32 0.2, %v5577_v8  ;;  %v14184_v54 = vld [vmem:[#allocation55_spill] sm:$0xff] }
 0x48c   : > { %7645 = vmatprep.mubr.bf16.mxu1 %v6490_v10  ;;  %v12751_v38 = vpop.f32.mrf.mxu1  ;;  %v6257_v10 = vsel %vm5745_vm1, %v5563_v28, %v6001_v58  ;;  %v6498_v28 = vpack.c.bf16 %v6282_v19, %v6274_v30  ;;  %v5406_v58 = vadd.f32 %v12615_v59, %v12540_v52  ;;  %v14186_v36 = vpack.c.bf16 %v14184_v54, %v14185_v14  ;;  %v14189_v30 = vld [vmem:[#allocation118_spill] sm:$0xff] }
 0x48d   : > { %v12754_v9 = vpop.f32.mrf.mxu0  ;;  %v6489_v33 = vpack.c.bf16 %v6265_v3, %v6257_v10  ;;  %v5390_v3 = vadd.f32 %v14187_v60, %v12573_v1  ;;  %v6034_v19 = vmul.f32 0.2, %v5585_v48  ;;  %v5402_v59 = vadd.f32 %v12602_v2, %v12540_v52 }
 0x48e   : > { %v12757_v42 = vpop.f32.mrf.mxu1  ;;  %v5587_v18 = vadd.f32 %v14189_v30, %v5394_v31  ;;  %v6273_v14 = vsel %vm5761_vm5, %v5573_v62, %v6017_v32  ;;  %v5404_v31 = vadd.f32 %v12609_v63, %v12573_v1  ;;  %v5416_v32 = vadd.f32 %v12652_v50, %v12540_v52 }
 0x48f   : > { %v12761_v12 = vpop.f32.mrf.mxu0  ;;  %v5595_v2 = vadd.f32 %v12606_v17, %v5402_v59  ;;  %v14199_v59 = vld [vmem:[#allocation52_spill] sm:$0xff]  ;;  %v5412_v50 = vadd.f32 %v12639_v53, %v12540_v52 }
 0x490   : > { %14179 = vst [vmem:[#allocation122_spill] sm:$0xff] %v12761_v12  ;;  %v12768_v7 = vpop.f32.mrf.mxu1  ;;  %vm5785_vm7 = vcmp.gt.f32.partialorder %v5587_v18, 0.0 }
 0x491   : > { %7485 = vmatmul.mubr.bf16.gmra.mxu0 %v14182_v16  ;;  %14183 = vst [vmem:[#allocation70_spill] sm:$0xff] %v12768_v7  ;;  %v12775_v10 = vpop.f32.mrf.mxu0  ;;  %v5599_v16 = vadd.f32 %v12618_v57, %v5406_v58  ;;  %v14192_v57 = vld [vmem:[#allocation53_spill] sm:$0xff]  ;;  %v14193_v58 = vld [vmem:[#allocation51_spill] sm:$0xff]  ;;  %vm5794_vm10 = vcmp.gt.f32.partialorder %v5595_v2, 0.0  ;;  %v5605_v53 = vadd.f32 %v12643_v25, %v5412_v50  ;;  %v5410_v50 = vadd.f32 %v12622_v13, %v12573_v1 }
 0x492   : > { %7492 = vmatprep.mubr.bf16.mxu0 %v14186_v36  ;;  %v12779_v43 = vpop.f32.mrf.mxu1  ;;  %v14190_v36 = vld [vmem:[#allocation119_spill] sm:$0xff] }
 0x493   : > { %7646 = vmatmul.mubr.bf16.gmra.mxu1 %v6489_v33  ;;  %14188 = vst [vmem:[#allocation69_spill] sm:$0xff] %v12779_v43  ;;  %v6281_v33 = vsel %vm5769_vm3, %v5577_v8, %v6025_v55  ;;  %v12782_v56 = vpop.f32.mrf.mxu0  ;;  %v5583_v60 = vadd.f32 %v14190_v36, %v5390_v3  ;;  %v6290_v8 = vsel %vm5778_vm6, %v5585_v48, %v6034_v19  ;;  %v6041_v55 = vmul.f32 0.2, %v5587_v18  ;;  %v14196_v48 = vld [vmem:[#allocation57_spill] sm:$0xff]  ;;  %v14197_v3 = vld [vmem:[#allocation127_spill] sm:$0xff] }
 0x494   : > { %7653 = vmatprep.mubr.bf16.mxu1 %v6498_v28  ;;  %v12785_v54 = vpop.f32.mrf.mxu1  ;;  %v6298_v28 = vsel %vm5786_vm4, %v5589_v11, %v6042_v0  ;;  %v6497_v12 = vpack.c.bf16 %v6281_v33, %v6273_v14  ;;  %v14194_v11 = vpack.c.bf16 %v14192_v57, %v14193_v58  ;;  %v6058_v0 = vmul.f32 0.2, %v5599_v16 }
 0x495   : > { %v12788_v7 = vpop.f32.mrf.mxu0  ;;  %v6506_v62 = vpack.c.bf16 %v6298_v28, %v6290_v8  ;;  %v14198_v19 = vpack.c.bf16 %v14196_v48, %v14197_v3  ;;  %v6033_v63 = vmul.f32 0.2, %v5583_v60  ;;  %v5400_v33 = vadd.f32 %v14199_v59, %v12573_v1  ;;  %v14200_v3 = vld [vmem:[#allocation71_spill] sm:$0xff] }
 0x496   : > { %v12791_v43 = vpop.f32.mrf.mxu1  ;;  %vm5802_vm8 = vcmp.gt.f32.partialorder %v5599_v16, 0.0  ;;  %vm5777_vm9 = vcmp.gt.f32.partialorder %v5583_v60, 0.0  ;;  %v6050_v28 = vmul.f32 0.2, %v5595_v2  ;;  %v5597_v8 = vadd.f32 %v12612_v51, %v5404_v31 }
 0x497   : > { %v12795_v30 = vpop.f32.mrf.mxu0  ;;  %v5609_v58 = vadd.f32 %v12655_v6, %v5416_v32  ;;  %v6289_v48 = vsel %vm5777_vm9, %v5583_v60, %v6033_v63  ;;  %v5414_v51 = vadd.f32 %v12646_v49, %v12573_v1  ;;  %v14201_v6 = vld [vmem:[#allocation56_spill] sm:$0xff]  ;;  %v14202_v32 = vld [vmem:[#allocation54_spill] sm:$0xff]  ;;  %v5426_v63 = vadd.f32 %v12686_v5, %v12540_v52 }
 0x498   : > { %14191 = vst [vmem:[#allocation30_spill] sm:$0xff] %v12795_v30  ;;  %v12802_v17 = vpop.f32.mrf.mxu1  ;;  %vm5801_vm11 = vcmp.gt.f32.partialorder %v5597_v8, 0.0  ;;  %v5422_v5 = vadd.f32 %v12673_v44, %v12540_v52  ;;  %vm5810_vm14 = vcmp.gt.f32.partialorder %v5605_v53, 0.0 }
 0x499   : > { %7493 = vmatmul.mubr.bf16.gmra.mxu0 %v14194_v11  ;;  %14195 = vst [vmem:[#allocation59_spill] sm:$0xff] %v12802_v17  ;;  %v12809_v14 = vpop.f32.mrf.mxu0  ;;  %vm5818_vm12 = vcmp.gt.f32.partialorder %v5609_v58, 0.0 }
 0x49a   : > { %7500 = vmatprep.mubr.bf16.mxu0 %v14198_v19  ;;  %v12813_v36 = vpop.f32.mrf.mxu1  ;;  %v5593_v19 = vadd.f32 %v14200_v3, %v5400_v33  ;;  %v14205_v33 = vld [vmem:[#allocation40_spill] sm:$0xff]  ;;  %v5607_v3 = vadd.f32 %v12649_v45, %v5414_v51  ;;  %v5615_v44 = vadd.f32 %v12677_v35, %v5422_v5  ;;  %v5424_v45 = vadd.f32 %v12680_v15, %v12573_v1 }
 0x49b   : > { %7654 = vmatmul.mubr.bf16.gmra.mxu1 %v6497_v12  ;;  %v6297_v12 = vsel %vm5785_vm7, %v5587_v18, %v6041_v55  ;;  %v12816_v57 = vpop.f32.mrf.mxu0  ;;  %v6306_v18 = vsel %vm5794_vm10, %v5595_v2, %v6050_v28  ;;  %v6057_v55 = vmul.f32 0.2, %v5597_v8  ;;  %v14204_v2 = vld [vmem:[#allocation22_spill] sm:$0xff] }
 0x49c   : > { %7661 = vmatprep.mubr.bf16.mxu1 %v6506_v62  ;;  %v12819_v11 = vpop.f32.mrf.mxu1  ;;  %v6314_v62 = vsel %vm5802_vm8, %v5599_v16, %v6058_v0  ;;  %v6505_v17 = vpack.c.bf16 %v6297_v12, %v6289_v48  ;;  %v14203_v16 = vpack.c.bf16 %v14201_v6, %v14202_v32  ;;  %v6074_v0 = vmul.f32 0.2, %v5609_v58 }
 0x49d   : > { %v12822_v59 = vpop.f32.mrf.mxu0  ;;  %v6514_v60 = vpack.c.bf16 %v6314_v62, %v6306_v18  ;;  %v14206_v28 = vpack.c.bf16 %v14204_v2, %v14205_v33  ;;  %v6049_v49 = vmul.f32 0.2, %v5593_v19  ;;  %vm5793_vm13 = vcmp.gt.f32.partialorder %v5593_v19, 0.0 }
 0x49e   : > { %v12825_v30 = vpop.f32.mrf.mxu1  ;;  %v6066_v62 = vmul.f32 0.2, %v5605_v53  ;;  %v5619_v6 = vadd.f32 %v12689_v21, %v5426_v63  ;;  %v6330_v32 = vsel %vm5818_vm12, %v5609_v58, %v6074_v0  ;;  %v14207_v21 = vld [vmem:[#allocation23_spill] sm:$0xff]  ;;  %v14208_v63 = vld [vmem:[#allocation58_spill] sm:$0xff]  ;;  %vm5817_vm15 = vcmp.gt.f32.partialorder %v5607_v3, 0.0 }
 0x49f   : > { %v12829_v31 = vpop.f32.mrf.mxu0  ;;  %v14209_v58 = vpack.c.bf16 %v14207_v21, %v14208_v63  ;;  %v5436_v0 = vadd.f32 %v12720_v39, %v12540_v52  ;;  %v5432_v39 = vadd.f32 %v12707_v29, %v12540_v52  ;;  %vm5826_vm2 = vcmp.gt.f32.partialorder %v5615_v44, 0.0 }
 0x4a0   : > { %v12836_v25 = vpop.f32.mrf.mxu1  ;;  %vm5834_vm0 = vcmp.gt.f32.partialorder %v5619_v6, 0.0 }
 0x4a1   : > { %7501 = vmatmul.mubr.bf16.gmra.mxu0 %v14203_v16  ;;  %v12843_v12 = vpop.f32.mrf.mxu0  ;;  %v6305_v16 = vsel %vm5793_vm13, %v5593_v19, %v6049_v49  ;;  %v14211_v49 = vld [vmem:[#allocation38_spill] sm:$0xff]  ;;  %v5629_v21 = vadd.f32 %v12723_v40, %v5436_v0  ;;  %v5625_v29 = vadd.f32 %v12711_v22, %v5432_v39  ;;  %v14213_v40 = vld [vmem:[#allocation11_spill] sm:$0xff]  ;;  %v14214_v0 = vld [vmem:[#allocation104_spill] sm:$0xff]  ;;  %v5446_v22 = vadd.f32 %v12754_v9, %v12540_v52 }
 0x4a2   : > { %7508 = vmatprep.mubr.bf16.mxu0 %v14206_v28  ;;  %v12847_v48 = vpop.f32.mrf.mxu1 }
 0x4a3   : > { %7662 = vmatmul.mubr.bf16.gmra.mxu1 %v6505_v17  ;;  %v6313_v17 = vsel %vm5801_vm11, %v5597_v8, %v6057_v55  ;;  %v12850_v18 = vpop.f32.mrf.mxu0  ;;  %v6322_v8 = vsel %vm5810_vm14, %v5605_v53, %v6066_v62  ;;  %v6073_v55 = vmul.f32 0.2, %v5607_v3  ;;  %v14210_v53 = vld [vmem:[#allocation10_spill] sm:$0xff]  ;;  %v5420_v62 = vadd.f32 %v12659_v20, %v12573_v1 }
 0x4a4   : > { %7669 = vmatprep.mubr.bf16.mxu1 %v6514_v60  ;;  %v12853_v13 = vpop.f32.mrf.mxu1  ;;  %v5603_v60 = vadd.f32 %v12629_v34, %v5410_v50  ;;  %v6513_v33 = vpack.c.bf16 %v6313_v17, %v6305_v16  ;;  %v6522_v19 = vpack.c.bf16 %v6330_v32, %v6322_v8  ;;  %v6090_v34 = vmul.f32 0.2, %v5619_v6 }
 0x4a5   : > { %v12856_v2 = vpop.f32.mrf.mxu0  ;;  %v14212_v50 = vpack.c.bf16 %v14210_v53, %v14211_v49  ;;  %v6082_v17 = vmul.f32 0.2, %v5615_v44  ;;  %v6329_v16 = vsel %vm5817_vm15, %v5607_v3, %v6073_v55  ;;  %v5434_v3 = vadd.f32 %v12714_v23, %v12573_v1 }
 0x4a6   : > { %v12859_v28 = vpop.f32.mrf.mxu1  ;;  %v6065_v15 = vmul.f32 0.2, %v5603_v60  ;;  %vm5809_vm1 = vcmp.gt.f32.partialorder %v5603_v60, 0.0  ;;  %v6346_v63 = vsel %vm5834_vm0, %v5619_v6, %v6090_v34  ;;  %v14215_v6 = vpack.c.bf16 %v14213_v40, %v14214_v0 }
 0x4a7   : > { %v12863_v51 = vpop.f32.mrf.mxu0  ;;  %v6106_v34 = vmul.f32 0.2, %v5629_v21  ;;  %vm5850_vm4 = vcmp.gt.f32.partialorder %v5629_v21, 0.0  ;;  %vm5842_vm6 = vcmp.gt.f32.partialorder %v5625_v29, 0.0  ;;  %v5639_v40 = vadd.f32 %v12757_v42, %v5446_v22 }
 0x4a8   : > { %v12870_v35 = vpop.f32.mrf.mxu1 }
 0x4a9   : > { %7509 = vmatmul.mubr.bf16.gmra.mxu0 %v14209_v58  ;;  %v12877_v5 = vpop.f32.mrf.mxu0  ;;  %v6321_v58 = vsel %vm5809_vm1, %v5603_v60, %v6065_v15  ;;  %v14218_v15 = vld [vmem:[#allocation106_spill] sm:$0xff]  ;;  %v6122_v22 = vmul.f32 0.2, %v5639_v40  ;;  %vm5866_vm9 = vcmp.gt.f32.partialorder %v5639_v40, 0.0 }
 0x4aa   : > { %7516 = vmatprep.mubr.bf16.mxu0 %v14212_v50  ;;  %v12881_v32 = vpop.f32.mrf.mxu1  ;;  %v6521_v49 = vpack.c.bf16 %v6329_v16, %v6321_v58  ;;  %v6098_v16 = vmul.f32 0.2, %v5625_v29 }
 0x4ab   : > { %7670 = vmatmul.mubr.bf16.gmra.mxu1 %v6513_v33  ;;  %v5617_v33 = vadd.f32 %v12683_v24, %v5424_v45  ;;  %v12884_v8 = vpop.f32.mrf.mxu0  ;;  %v6338_v24 = vsel %vm5826_vm2, %v5615_v44, %v6082_v17  ;;  %v14217_v44 = vld [vmem:[#allocation25_spill] sm:$0xff] }
 0x4ac   : > { %7677 = vmatprep.mubr.bf16.mxu1 %v6522_v19  ;;  %v12887_v20 = vpop.f32.mrf.mxu1  ;;  %v5613_v19 = vadd.f32 %v12666_v37, %v5420_v62  ;;  %v6530_v60 = vpack.c.bf16 %v6346_v63, %v6338_v24  ;;  %v5430_v37 = vadd.f32 %v12693_v41, %v12573_v1  ;;  %v14219_v62 = vpack.c.bf16 %v14217_v44, %v14218_v15 }
 0x4ad   : > { %v12890_v53 = vpop.f32.mrf.mxu0  ;;  %v6089_v45 = vmul.f32 0.2, %v5617_v33  ;;  %vm5833_vm3 = vcmp.gt.f32.partialorder %v5617_v33, 0.0  ;;  %v5627_v41 = vadd.f32 %v12717_v27, %v5434_v3  ;;  %v5442_v63 = vadd.f32 %v12741_v46, %v12540_v52 }
 0x4ae   : > { %v12895_v55 = vpop.f32.mrf.mxu1  ;;  %v6081_v17 = vmul.f32 0.2, %v5613_v19  ;;  %vm5825_vm5 = vcmp.gt.f32.partialorder %v5613_v19, 0.0  ;;  %v5623_v24 = vadd.f32 %v12700_v26, %v5430_v37  ;;  %v5444_v27 = vadd.f32 %v12748_v4, %v12573_v1  ;;  %v14220_v37 = vld [vmem:[#allocation26_spill] sm:$0xff] }
 0x4af   : > { %v12897_v50 = vpop.f32.mrf.mxu0  ;;  %v6345_v58 = vsel %vm5833_vm3, %v5617_v33, %v6089_v45  ;;  %v6105_v44 = vmul.f32 0.2, %v5627_v41  ;;  %v5635_v33 = vadd.f32 %v12745_v47, %v5442_v63  ;;  %v6354_v15 = vsel %vm5842_vm6, %v5625_v29, %v6098_v16  ;;  %v14223_v47 = vld [vmem:[#allocation27_spill] sm:$0xff]  ;;  %v12946_v16 = vld [vmem:[%s13290_s10] ss:$0 sm:$0xff] }
 0x4b0   : > { %v12906_v23 = vpop.f32.mrf.mxu1  ;;  %vm5849_vm7 = vcmp.gt.f32.partialorder %v5627_v41, 0.0  ;;  %v5440_v26 = vadd.f32 %v12727_v61, %v12573_v1  ;;  %v6097_v4 = vmul.f32 0.2, %v5623_v24  ;;  %v14224_v63 = vld [vmem:[#allocation43_spill] sm:$0xff]  ;;  %vm5841_vm8 = vcmp.gt.f32.partialorder %v5623_v24, 0.0 }
 0x4b1   : > { %7517 = vmatmul.mubr.bf16.gmra.mxu0 %v14215_v6  ;;  %14216 = vst [vmem:[#allocation75_spill] sm:$0xff] %v12906_v23  ;;  %v12911_v39 = vpop.f32.mrf.mxu0  ;;  %v6362_v6 = vsel %vm5850_vm4, %v5629_v21, %v6106_v34  ;;  %v14221_v21 = vld [vmem:[#allocation35_spill] sm:$0xff]  ;;  %v14225_v29 = vpack.c.bf16 %v14223_v47, %v14224_v63  ;;  %v5637_v61 = vadd.f32 %v12751_v38, %v5444_v27  ;;  %vm5858_vm10 = vcmp.gt.f32.partialorder %v5635_v33, 0.0 }
 0x4b2   : > { %7524 = vmatprep.mubr.bf16.mxu0 %v14219_v62  ;;  %v12916_v9 = vpop.f32.mrf.mxu1  ;;  %v6538_v34 = vpack.c.bf16 %v6362_v6, %v6354_v15  ;;  %v5456_v62 = vadd.f32 %v12788_v7, %v12540_v52  ;;  %v6361_v6 = vsel %vm5849_vm7, %v5627_v41, %v6105_v44  ;;  %v6114_v7 = vmul.f32 0.2, %v5635_v33 }
 0x4b3   : > { %7678 = vmatmul.mubr.bf16.gmra.mxu1 %v6521_v49  ;;  %v12919_v49 = vpop.f32.mrf.mxu0  ;;  %vm5865_vm11 = vcmp.gt.f32.partialorder %v5637_v61, 0.0  ;;  %v6121_v44 = vmul.f32 0.2, %v5637_v61 }
 0x4b4   : > { %7685 = vmatprep.mubr.bf16.mxu1 %v6530_v60  ;;  %v12923_v0 = vpop.f32.mrf.mxu1  ;;  %v6337_v60 = vsel %vm5825_vm5, %v5613_v19, %v6081_v17  ;;  %v14222_v19 = vpack.c.bf16 %v14220_v37, %v14221_v21  ;;  %v14226_v37 = vld [vmem:[#allocation31_spill] sm:$0xff] }
 0x4b5   : > { %v12927_v3 = vpop.f32.mrf.mxu0  ;;  %v6529_v46 = vpack.c.bf16 %v6345_v58, %v6337_v60  ;;  %v5452_v60 = vadd.f32 %v12775_v10, %v12540_v52  ;;  %v5633_v21 = vadd.f32 %v14226_v37, %v5440_v26  ;;  %v5454_v10 = vadd.f32 %v12782_v56, %v12573_v1  ;;  %v14231_v56 = vld [vmem:[#allocation122_spill] sm:$0xff] }
 0x4b6   : > { %v12930_v45 = vpop.f32.mrf.mxu1 }
 0x4b7   : > { %v8336_v42 = vpop.f32.mrf.mxu0  ;;  %vm5857_vm12 = vcmp.gt.f32.partialorder %v5633_v21, 0.0 }
 0x4b8   : > { %v8448_v17 = vpop.f32.mrf.mxu1 }
 0x4b9   : > { %7525 = vmatmul.mubr.bf16.gmra.mxu0 %v14222_v19  ;;  %v8337_v58 = vpop.f32.mrf.mxu0  ;;  %v6353_v19 = vsel %vm5841_vm8, %v5623_v24, %v6097_v4  ;;  %v6113_v4 = vmul.f32 0.2, %v5633_v21 }
 0x4ba   : > { %7532 = vmatprep.mubr.bf16.mxu0 %v14225_v29  ;;  %v8449_v15 = vpop.f32.mrf.mxu1  ;;  %v6378_v29 = vsel %vm5866_vm9, %v5639_v40, %v6122_v22  ;;  %v6537_v41 = vpack.c.bf16 %v6361_v6, %v6353_v19  ;;  %v14228_v40 = vld [vmem:[#allocation28_spill] sm:$0xff]  ;;  %v14229_v22 = vld [vmem:[#allocation107_spill] sm:$0xff]  ;;  %v5450_v19 = vadd.f32 %v14231_v56, %v12573_v1 }
 0x4bb   : > { %7686 = vmatmul.mubr.bf16.gmra.mxu1 %v6529_v46  ;;  %v8338_v46 = vadd.f32 %v8337_v58, %v8336_v42  ;;  %v8450_v38 = vadd.f32 %v8449_v15, %v8448_v17  ;;  %v8339_v27 = vpop.f32.mrf.mxu0  ;;  %v14227_v58 = vld [vmem:[#allocation69_spill] sm:$0xff]  ;;  %v14230_v6 = vpack.c.bf16 %v14228_v40, %v14229_v22 }
 0x4bc   : > { %7693 = vmatprep.mubr.bf16.mxu1 %v6538_v34  ;;  %v5649_v34 = vadd.f32 %v12791_v43, %v5456_v62  ;;  %v8451_v63 = vpop.f32.mrf.mxu1  ;;  %v5645_v26 = vadd.f32 %v14227_v58, %v5452_v60  ;;  %v6370_v43 = vsel %vm5858_vm10, %v5635_v33, %v6114_v7  ;;  %v5466_v60 = vadd.f32 %v12822_v59, %v12540_v52  ;;  %v14232_v33 = vld [vmem:[#allocation61_spill] sm:$0xff] }
 0x4bd   : > { %v7141_v47 = vadd.f32 %v8338_v46, %v12946_v16  ;;  %v8340_v42 = vpop.f32.mrf.mxu0  ;;  %v6546_v15 = vpack.c.bf16 %v6378_v29, %v6370_v43  ;;  %v14233_v7 = vld [vmem:[#allocation109_spill] sm:$0xff] }
 0x4be   : > { %v8341_v17 = vadd.f32 %v8340_v42, %v8339_v27  ;;  %v8452_v24 = vpop.f32.mrf.mxu1  ;;  %v6138_v23 = vmul.f32 0.2, %v5649_v34  ;;  %v5647_v42 = vadd.f32 %v12785_v54, %v5454_v10  ;;  %vm5882_vm13 = vcmp.gt.f32.partialorder %v5649_v34, 0.0 }
 0x4bf   : > { %v12958_v37 = vadd.f32 %v8450_v38, %v7141_v47  ;;  %v8453_v62 = vadd.f32 %v8452_v24, %v8451_v63  ;;  %v14234_v47 = vpack.c.bf16 %v14232_v33, %v14233_v7  ;;  %v6377_v63 = vsel %vm5865_vm11, %v5637_v61, %v6121_v44  ;;  %v14238_v7 = vld [vmem:[#allocation105_spill] sm:$0xff] }
 0x4c0   : > { %v8342_v46 = vpop.f32.mrf.mxu0  ;;  %v7144_v38 = vadd.f32 %v8341_v17, %v12946_v16  ;;  %v6130_v58 = vmul.f32 0.2, %v5645_v26  ;;  %v5462_v24 = vadd.f32 %v12809_v14, %v12540_v52  ;;  %vm5874_vm14 = vcmp.gt.f32.partialorder %v5645_v26, 0.0 }
 0x4c1   : > { %7533 = vmatmul.mubr.bf16.gmra.mxu0 %v14230_v6  ;;  %v8454_v27 = vpop.f32.mrf.mxu1  ;;  %v14235_v6 = vld [vmem:[#allocation70_spill] sm:$0xff]  ;;  %v5659_v54 = vadd.f32 %v12825_v30, %v5466_v60  ;;  %vm5881_vm15 = vcmp.gt.f32.partialorder %v5647_v42, 0.0  ;;  %v6137_v14 = vmul.f32 0.2, %v5647_v42 }
 0x4c2   : > { %7540 = vmatprep.mubr.bf16.mxu0 %v14234_v47  ;;  %v8343_v29 = vpop.f32.mrf.mxu0  ;;  %v12976_v59 = vadd.f32 %v8453_v62, %v7144_v38  ;;  %v5643_v61 = vadd.f32 %v14235_v6, %v5450_v19  ;;  %v5464_v62 = vadd.f32 %v12816_v57, %v12573_v1  ;;  %v6386_v30 = vsel %vm5874_vm14, %v5645_v26, %v6130_v58  ;;  %v14236_v60 = vld [vmem:[#allocation30_spill] sm:$0xff]  ;;  %v14240_v26 = vld [vmem:[#allocation29_spill] sm:$0xff]  ;;  %v14241_v58 = vld [vmem:[#allocation108_spill] sm:$0xff] }
 0x4c3   : > { %7694 = vmatmul.mubr.bf16.gmra.mxu1 %v6537_v41  ;;  %v8344_v17 = vadd.f32 %v8343_v29, %v8342_v46  ;;  %v8455_v43 = vpop.f32.mrf.mxu1  ;;  %v6369_v41 = vsel %vm5857_vm12, %v5633_v21, %v6113_v4  ;;  %v5655_v21 = vadd.f32 %v12813_v36, %v5462_v24  ;;  %v6154_v29 = vmul.f32 0.2, %v5659_v54 }
 0x4c4   : > { %7701 = vmatprep.mubr.bf16.mxu1 %v6546_v15  ;;  %v8456_v40 = vadd.f32 %v8455_v43, %v8454_v27  ;;  %v8345_v22 = vpop.f32.mrf.mxu0  ;;  %v6394_v15 = vsel %vm5882_vm13, %v5649_v34, %v6138_v23  ;;  %v6545_v56 = vpack.c.bf16 %v6377_v63, %v6369_v41  ;;  %v5460_v27 = vadd.f32 %v14236_v60, %v12573_v1  ;;  %v14237_v34 = vld [vmem:[#allocation60_spill] sm:$0xff] }
 0x4c5   : > { %v7149_v44 = vadd.f32 %v8344_v17, %v12946_v16  ;;  %v8457_v10 = vpop.f32.mrf.mxu1  ;;  %v14239_v47 = vpack.c.bf16 %v14237_v34, %v14238_v7  ;;  %v6554_v63 = vpack.c.bf16 %v6394_v15, %v6386_v30  ;;  %v6129_v57 = vmul.f32 0.2, %v5643_v61 }
 0x4c6   : > { %v8346_v46 = vpop.f32.mrf.mxu0  ;;  %v5476_v36 = vadd.f32 %v12856_v2, %v12540_v52  ;;  %v14242_v43 = vpack.c.bf16 %v14240_v26, %v14241_v58  ;;  %vm5873_vm0 = vcmp.gt.f32.partialorder %v5643_v61, 0.0  ;;  %v6393_v41 = vsel %vm5881_vm15, %v5647_v42, %v6137_v14 }
 0x4c7   : > { %v12986_v4 = vadd.f32 %v8456_v40, %v7149_v44  ;;  %v8347_v38 = vadd.f32 %v8346_v46, %v8345_v22  ;;  %v8458_v19 = vpop.f32.mrf.mxu1  ;;  %v5657_v40 = vadd.f32 %v12819_v11, %v5464_v62  ;;  %vm5898_vm1 = vcmp.gt.f32.partialorder %v5659_v54, 0.0 }
 0x4c8   : > { %v8459_v33 = vadd.f32 %v8458_v19, %v8457_v10  ;;  %v6146_v6 = vmul.f32 0.2, %v5655_v21  ;;  %v5472_v2 = vadd.f32 %v12843_v12, %v12540_v52  ;;  %vm5890_vm2 = vcmp.gt.f32.partialorder %v5655_v21, 0.0 }
 0x4c9   : > { %v8348_v23 = vpop.f32.mrf.mxu0  ;;  %7541 = vmatmul.mubr.bf16.gmra.mxu0 %v14239_v47  ;;  %v7152_v24 = vadd.f32 %v8347_v38, %v12946_v16  ;;  %v8460_v17 = vpop.f32.mrf.mxu1  ;;  %v6385_v30 = vsel %vm5873_vm0, %v5643_v61, %v6129_v57  ;;  %v5669_v42 = vadd.f32 %v12859_v28, %v5476_v36  ;;  %v6410_v62 = vsel %vm5898_vm1, %v5659_v54, %v6154_v29  ;;  %v14244_v54 = vld [vmem:[#allocation34_spill] sm:$0xff] }
 0x4ca   : > { %7548 = vmatprep.mubr.bf16.mxu0 %v14242_v43  ;;  %v6553_v60 = vpack.c.bf16 %v6393_v41, %v6385_v30  ;;  %vm5897_vm3 = vcmp.gt.f32.partialorder %v5657_v40, 0.0  ;;  %v6153_v12 = vmul.f32 0.2, %v5657_v40  ;;  %v6402_v28 = vsel %vm5890_vm2, %v5655_v21, %v6146_v6  ;;  %v14245_v29 = vld [vmem:[#allocation110_spill] sm:$0xff]  ;;  %v14247_v21 = vld [vmem:[#allocation41_spill] sm:$0xff]  ;;  %v14248_v43 = vld [vmem:[#allocation112_spill] sm:$0xff] }
 0x4cb   : > { %7702 = vmatmul.mubr.bf16.gmra.mxu1 %v6545_v56  ;;  %v8349_v22 = vpop.f32.mrf.mxu0  ;;  %v13004_v44 = vadd.f32 %v8459_v33, %v7152_v24  ;;  %v8461_v15 = vpop.f32.mrf.mxu1  ;;  %v14243_v56 = vld [vmem:[#allocation59_spill] sm:$0xff]  ;;  %v5474_v33 = vadd.f32 %v12850_v18, %v12573_v1  ;;  %v14246_v36 = vpack.c.bf16 %v14244_v54, %v14245_v29  ;;  %v6562_v24 = vpack.c.bf16 %v6410_v62, %v6402_v28 }
 0x4cc   : > { %7709 = vmatprep.mubr.bf16.mxu1 %v6554_v63  ;;  %v8350_v10 = vadd.f32 %v8349_v22, %v8348_v23  ;;  %v5653_v46 = vadd.f32 %v14243_v56, %v5460_v27  ;;  %v8462_v38 = vadd.f32 %v8461_v15, %v8460_v17  ;;  %v5665_v27 = vadd.f32 %v12847_v48, %v5472_v2 }
 0x4cd   : > { %v8351_v19 = vpop.f32.mrf.mxu0  ;;  %v8463_v14 = vpop.f32.mrf.mxu1  ;;  %v5470_v18 = vadd.f32 %v12829_v31, %v12573_v1  ;;  %v6170_v17 = vmul.f32 0.2, %v5669_v42  ;;  %v5486_v48 = vadd.f32 %v12890_v53, %v12540_v52  ;;  %v14249_v41 = vpack.c.bf16 %v14247_v21, %v14248_v43 }
 0x4ce   : > { %v7157_v11 = vadd.f32 %v8350_v10, %v12946_v16  ;;  %vm5889_vm4 = vcmp.gt.f32.partialorder %v5653_v46, 0.0  ;;  %v6145_v47 = vmul.f32 0.2, %v5653_v46  ;;  %v6409_v22 = vsel %vm5897_vm3, %v5657_v40, %v6153_v12 }
 0x4cf   : > { %v8352_v23 = vpop.f32.mrf.mxu0  ;;  %v8464_v61 = vpop.f32.mrf.mxu1  ;;  %v5667_v6 = vadd.f32 %v12853_v13, %v5474_v33  ;;  %vm5914_vm5 = vcmp.gt.f32.partialorder %v5669_v42, 0.0  ;;  %v6162_v31 = vmul.f32 0.2, %v5665_v27  ;;  %v5482_v10 = vadd.f32 %v12877_v5, %v12540_v52 }
 0x4d0   : > { %v13013_v34 = vadd.f32 %v8462_v38, %v7157_v11  ;;  %v8353_v7 = vadd.f32 %v8352_v23, %v8351_v19  ;;  %v8465_v63 = vadd.f32 %v8464_v61, %v8463_v14  ;;  %v6401_v38 = vsel %vm5889_vm4, %v5653_v46, %v6145_v47  ;;  %v14250_v47 = vld [vmem:[#allocation62_spill] sm:$0xff] }
 0x4d1   : > { %v8354_v57 = vpop.f32.mrf.mxu0  ;;  %7549 = vmatmul.mubr.bf16.gmra.mxu0 %v14246_v36  ;;  %vm5906_vm6 = vcmp.gt.f32.partialorder %v5665_v27, 0.0  ;;  %v5663_v40 = vadd.f32 %v12836_v25, %v5470_v18  ;;  %v5679_v13 = vadd.f32 %v12895_v55, %v5486_v48  ;;  %v6426_v62 = vsel %vm5914_vm5, %v5669_v42, %v6170_v17  ;;  %v14254_v18 = vld [vmem:[#allocation111_spill] sm:$0xff] }
 0x4d2   : > { %v7160_v26 = vadd.f32 %v8353_v7, %v12946_v16  ;;  %v8466_v58 = vpop.f32.mrf.mxu1  ;;  %7556 = vmatprep.mubr.bf16.mxu0 %v14249_v41  ;;  %vm5913_vm7 = vcmp.gt.f32.partialorder %v5667_v6, 0.0  ;;  %v6169_v5 = vmul.f32 0.2, %v5667_v6  ;;  %v5675_v33 = vadd.f32 %v12881_v32, %v5482_v10 }
 0x4d3   : > { %7710 = vmatmul.mubr.bf16.gmra.mxu1 %v6553_v60  ;;  %v8355_v2 = vpop.f32.mrf.mxu0  ;;  %v6561_v60 = vpack.c.bf16 %v6409_v22, %v6401_v38  ;;  %v6418_v61 = vsel %vm5906_vm6, %v5665_v27, %v6162_v31  ;;  %v5484_v25 = vadd.f32 %v12884_v8, %v12573_v1  ;;  %v6161_v54 = vmul.f32 0.2, %v5663_v40  ;;  %v14253_v27 = vld [vmem:[#allocation37_spill] sm:$0xff] }
 0x4d4   : > { %7717 = vmatprep.mubr.bf16.mxu1 %v6562_v24  ;;  %v13031_v53 = vadd.f32 %v8465_v63, %v7160_v26  ;;  %v8356_v15 = vadd.f32 %v8355_v2, %v8354_v57  ;;  %v8467_v56 = vpop.f32.mrf.mxu1  ;;  %v14251_v63 = vld [vmem:[#allocation42_spill] sm:$0xff]  ;;  %v6570_v57 = vpack.c.bf16 %v6426_v62, %v6418_v61  ;;  %v6186_v29 = vmul.f32 0.2, %v5679_v13  ;;  %v14259_v61 = vld [vmem:[#allocation44_spill] sm:$0xff] }
 0x4d5   : > { %v8468_v19 = vadd.f32 %v8467_v56, %v8466_v58  ;;  %v8357_v30 = vpop.f32.mrf.mxu0  ;;  %v14252_v42 = vpack.c.bf16 %v14250_v47, %v14251_v63  ;;  %v5496_v32 = vadd.f32 %v12927_v3, %v12540_v52  ;;  %v14255_v17 = vpack.c.bf16 %v14253_v27, %v14254_v18  ;;  %v14262_v18 = vld [vmem:[#allocation75_spill] sm:$0xff] }
 0x4d6   : > { %v7165_v11 = vadd.f32 %v8356_v15, %v12946_v16  ;;  %v8469_v14 = vpop.f32.mrf.mxu1  ;;  %vm5905_vm8 = vcmp.gt.f32.partialorder %v5663_v40, 0.0  ;;  %v6425_v8 = vsel %vm5913_vm7, %v5667_v6, %v6169_v5  ;;  %v5480_v48 = vadd.f32 %v12863_v51, %v12573_v1  ;;  %v14256_v5 = vld [vmem:[#allocation39_spill] sm:$0xff] }
 0x4d7   : > { %v8358_v12 = vpop.f32.mrf.mxu0  ;;  %vm5930_vm9 = vcmp.gt.f32.partialorder %v5679_v13, 0.0  ;;  %v6178_v58 = vmul.f32 0.2, %v5675_v33  ;;  %v5492_v3 = vadd.f32 %v12911_v39, %v12540_v52  ;;  %vm5922_vm10 = vcmp.gt.f32.partialorder %v5675_v33, 0.0 }
 0x4d8   : > { %v13039_v23 = vadd.f32 %v8468_v19, %v7165_v11  ;;  %v8359_v46 = vadd.f32 %v8358_v12, %v8357_v30  ;;  %v8470_v7 = vpop.f32.mrf.mxu1  ;;  %v5677_v22 = vadd.f32 %v12887_v20, %v5484_v25  ;;  %v6417_v6 = vsel %vm5905_vm8, %v5663_v40, %v6161_v54  ;;  %v14260_v25 = vld [vmem:[#allocation116_spill] sm:$0xff] }
 0x4d9   : > { %v8471_v55 = vadd.f32 %v8470_v7, %v8469_v14  ;;  %v8360_v28 = vpop.f32.mrf.mxu0  ;;  %7557 = vmatmul.mubr.bf16.gmra.mxu0 %v14252_v42  ;;  %v5689_v10 = vadd.f32 %v12930_v45, %v5496_v32  ;;  %v6442_v56 = vsel %vm5930_vm9, %v5679_v13, %v6186_v29  ;;  %v6569_v38 = vpack.c.bf16 %v6425_v8, %v6417_v6  ;;  %v14257_v13 = vld [vmem:[#allocation113_spill] sm:$0xff] }
 0x4da   : > { %v7168_v36 = vadd.f32 %v8359_v46, %v12946_v16  ;;  %7564 = vmatprep.mubr.bf16.mxu0 %v14255_v17  ;;  %v5673_v52 = vadd.f32 %v12870_v35, %v5480_v48  ;;  %v5685_v19 = vadd.f32 %v12916_v9, %v5492_v3  ;;  %v6434_v14 = vsel %vm5922_vm10, %v5675_v33, %v6178_v58 }
 0x4db   : > { %v8472_v24 = vpop.f32.mrf.mxu1  ;;  %7718 = vmatmul.mubr.bf16.gmra.mxu1 %v6561_v60  ;;  %v8361_v26 = vpop.f32.mrf.mxu0  ;;  %v6185_v40 = vmul.f32 0.2, %v5677_v22  ;;  %v5494_v45 = vadd.f32 %v12919_v49, %v12573_v1  ;;  %v14258_v12 = vpack.c.bf16 %v14256_v5, %v14257_v13  ;;  %v6578_v35 = vpack.c.bf16 %v6442_v56, %v6434_v14  ;;  %v14266_v56 = vld [vmem:[#allocation63_spill] sm:$0xff] }
 0x4dc   : > { %7725 = vmatprep.mubr.bf16.mxu1 %v6570_v57  ;;  %v13058_v21 = vadd.f32 %v8471_v55, %v7168_v36  ;;  %v8362_v43 = vadd.f32 %v8361_v26, %v8360_v28  ;;  %vm5929_vm11 = vcmp.gt.f32.partialorder %v5677_v22, 0.0  ;;  %v6202_v46 = vmul.f32 0.2, %v5689_v10 }
 0x4dd   : > { %v8473_v41 = vpop.f32.mrf.mxu1  ;;  %v8363_v31 = vpop.f32.mrf.mxu0  ;;  %v14261_v33 = vpack.c.bf16 %v14259_v61, %v14260_v25  ;;  %v6177_v55 = vmul.f32 0.2, %v5673_v52  ;;  %v5490_v49 = vadd.f32 %v12897_v50, %v12573_v1  ;;  %vm5946_vm12 = vcmp.gt.f32.partialorder %v5689_v10, 0.0 }
 0x4de   : > { %v8474_v2 = vadd.f32 %v8473_v41, %v8472_v24  ;;  %v7173_v51 = vadd.f32 %v8362_v43, %v12946_v16  ;;  %vm5921_vm13 = vcmp.gt.f32.partialorder %v5673_v52, 0.0  ;;  %v6194_v47 = vmul.f32 0.2, %v5685_v19 }
 0x4df   : > { %v8475_v15 = vpop.f32.mrf.mxu1  ;;  %v8364_v39 = vpop.f32.mrf.mxu0  ;;  %v6441_v54 = vsel %vm5929_vm11, %v5677_v22, %v6185_v40  ;;  %vm5938_vm14 = vcmp.gt.f32.partialorder %v5685_v19, 0.0  ;;  %v5687_v29 = vadd.f32 %v12923_v0, %v5494_v45  ;;  %v6458_v1 = vsel %vm5946_vm12, %v5689_v10, %v6202_v46  ;;  %v14263_v0 = vld [vmem:[#allocation65_spill] sm:$0xff] }
 0x4e0   : > { %v13066_v30 = vadd.f32 %v8474_v2, %v7173_v51  ;;  %v8365_v11 = vadd.f32 %v8364_v39, %v8363_v31  ;;  %v6433_v50 = vsel %vm5921_vm13, %v5673_v52, %v6177_v55  ;;  %v5683_v17 = vadd.f32 %v14262_v18, %v5490_v49  ;;  %v14264_v31 = vld [vmem:[#allocation45_spill] sm:$0xff] }
 0x4e1   : > { %v8476_v20 = vpop.f32.mrf.mxu1  ;;  %v8366_v60 = vpop.f32.mrf.mxu0  ;;  %7565 = vmatmul.mubr.bf16.gmra.mxu0 %v14258_v12  ;;  %v6577_v48 = vpack.c.bf16 %v6441_v54, %v6433_v50  ;;  %v6450_v43 = vsel %vm5938_vm14, %v5685_v19, %v6194_v47  ;;  %v6201_v41 = vmul.f32 0.2, %v5687_v29  ;;  %v14265_v6 = vpack.c.bf16 %v14263_v0, %v14264_v31  ;;  %v14270_v55 = vld [vmem:[#allocation117_spill] sm:$0xff] }
 0x4e2   : > { %v8477_v62 = vadd.f32 %v8476_v20, %v8475_v15  ;;  %v7176_v9 = vadd.f32 %v8365_v11, %v12946_v16  ;;  %7572 = vmatprep.mubr.bf16.mxu0 %v14261_v33  ;;  %v6586_v51 = vpack.c.bf16 %v6458_v1, %v6450_v43  ;;  %vm5945_vm15 = vcmp.gt.f32.partialorder %v5687_v29, 0.0  ;;  %v14269_v33 = vld [vmem:[#allocation64_spill] sm:$0xff] }
 0x4e3   : > { %v8478_v7 = vpop.f32.mrf.mxu1  ;;  %7726 = vmatmul.mubr.bf16.gmra.mxu1 %v6569_v38  ;;  %v8367_v28 = vpop.f32.mrf.mxu0  ;;  %v14267_v38 = vld [vmem:[#allocation115_spill] sm:$0xff]  ;;  %v6193_v39 = vmul.f32 0.2, %v5683_v17  ;;  %vm5937_vm0 = vcmp.gt.f32.partialorder %v5683_v17, 0.0  ;;  %v6457_v40 = vsel %vm5945_vm15, %v5687_v29, %v6201_v41  ;;  %v14271_v49 = vpack.c.bf16 %v14269_v33, %v14270_v55 }
 0x4e4   : > { %7733 = vmatprep.mubr.bf16.mxu1 %v6578_v35  ;;  %v13080_v63 = vadd.f32 %v8477_v62, %v7176_v9  ;;  %v8368_v42 = vadd.f32 %v8367_v28, %v8366_v60  ;;  %v14268_v52 = vpack.c.bf16 %v14266_v56, %v14267_v38 }
 0x4e5   : > { %v8479_v57 = vpop.f32.mrf.mxu1  ;;  %v8369_v36 = vpop.f32.mrf.mxu0  ;;  %v6449_v13 = vsel %vm5937_vm0, %v5683_v17, %v6193_v39 }
 0x4e6   : > { %v8480_v32 = vadd.f32 %v8479_v57, %v8478_v7  ;;  %v7181_v24 = vadd.f32 %v8368_v42, %v12946_v16  ;;  %v6585_v35 = vpack.c.bf16 %v6457_v40, %v6449_v13 }
 0x4e7   : > { %v8481_v27 = vpop.f32.mrf.mxu1  ;;  %v8370_v8 = vpop.f32.mrf.mxu0 }
 0x4e8   : > { %v13086_v26 = vadd.f32 %v8480_v32, %v7181_v24  ;;  %v8371_v58 = vadd.f32 %v8370_v8, %v8369_v36 }
 0x4e9   : > { %v8482_v3 = vpop.f32.mrf.mxu1  ;;  %v8372_v2 = vpop.f32.mrf.mxu0  ;;  %7573 = vmatmul.mubr.bf16.gmra.mxu0 %v14265_v6 }
 0x4ea   : > { %v8483_v22 = vadd.f32 %v8482_v3, %v8481_v27  ;;  %v7184_v10 = vadd.f32 %v8371_v58, %v12946_v16  ;;  %7580 = vmatprep.mubr.bf16.mxu0 %v14268_v52 }
 0x4eb   : > { %v8484_v15 = vpop.f32.mrf.mxu1  ;;  %7734 = vmatmul.mubr.bf16.gmra.mxu1 %v6577_v48  ;;  %v8373_v19 = vpop.f32.mrf.mxu0 }
 0x4ec   : > { %7741 = vmatprep.mubr.bf16.mxu1 %v6586_v51  ;;  %v13095_v11 = vadd.f32 %v8483_v22, %v7184_v10  ;;  %v8374_v20 = vadd.f32 %v8373_v19, %v8372_v2 }
 0x4ed   : > { %v8485_v14 = vpop.f32.mrf.mxu1  ;;  %v8375_v62 = vpop.f32.mrf.mxu0 }
 0x4ee   : > { %v8486_v45 = vadd.f32 %v8485_v14, %v8484_v15  ;;  %v7189_v60 = vadd.f32 %v8374_v20, %v12946_v16 }
 0x4ef   : > { %v8487_v5 = vpop.f32.mrf.mxu1  ;;  %v8376_v12 = vpop.f32.mrf.mxu0 }
 0x4f0   : > { %v13098_v46 = vadd.f32 %v8486_v45, %v7189_v60  ;;  %v8377_v9 = vadd.f32 %v8376_v12, %v8375_v62 }
 0x4f1   : > { %v8488_v7 = vpop.f32.mrf.mxu1  ;;  %v8378_v25 = vpop.f32.mrf.mxu0  ;;  %7581 = vmatmul.mubr.bf16.gmra.mxu0 %v14271_v49 }
 0x4f2   : > { %v8489_v61 = vadd.f32 %v8488_v7, %v8487_v5  ;;  %v7192_v28 = vadd.f32 %v8377_v9, %v12946_v16 }
 0x4f3   : > { %v8490_v47 = vpop.f32.mrf.mxu1  ;;  %7742 = vmatmul.mubr.bf16.gmra.mxu1 %v6585_v35  ;;  %v8379_v42 = vpop.f32.mrf.mxu0 }
 0x4f4   : > { %v13104_v57 = vadd.f32 %v8489_v61, %v7192_v28  ;;  %v8380_v54 = vadd.f32 %v8379_v42, %v8378_v25 }
 0x4f5   : > { %v8491_v29 = vpop.f32.mrf.mxu1  ;;  %v8381_v36 = vpop.f32.mrf.mxu0 }
 0x4f6   : > { %v8492_v32 = vadd.f32 %v8491_v29, %v8490_v47  ;;  %v7197_v24 = vadd.f32 %v8380_v54, %v12946_v16 }
 0x4f7   : > { %v8493_v27 = vpop.f32.mrf.mxu1  ;;  %v8382_v1 = vpop.f32.mrf.mxu0 }
 0x4f8   : > { %v13107_v50 = vadd.f32 %v8492_v32, %v7197_v24  ;;  %v8383_v18 = vadd.f32 %v8382_v1, %v8381_v36 }
 0x4f9   : > { %v8494_v17 = vpop.f32.mrf.mxu1  ;;  %v8384_v48 = vpop.f32.mrf.mxu0 }
 0x4fa   : > { %v8495_v8 = vadd.f32 %v8494_v17, %v8493_v27  ;;  %v7200_v58 = vadd.f32 %v8383_v18, %v12946_v16 }
 0x4fb   : > { %v8496_v3 = vpop.f32.mrf.mxu1  ;;  %v8385_v43 = vpop.f32.mrf.mxu0 }
 0x4fc   : > { %v13110_v41 = vadd.f32 %v8495_v8, %v7200_v58  ;;  %v8386_v22 = vadd.f32 %v8385_v43, %v8384_v48 }
 0x4fd   : > { %v8497_v2 = vpop.f32.mrf.mxu1  ;;  %v8387_v31 = vpop.f32.mrf.mxu0 }
 0x4fe   : > { %v8498_v0 = vadd.f32 %v8497_v2, %v8496_v3  ;;  %v7205_v6 = vadd.f32 %v8386_v22, %v12946_v16 }
 0x4ff   : > { %v8499_v51 = vpop.f32.mrf.mxu1  ;;  %v8388_v10 = vpop.f32.mrf.mxu0 }
 0x500   : > { %v13113_v15 = vadd.f32 %v8498_v0, %v7205_v6  ;;  %v8389_v56 = vadd.f32 %v8388_v10, %v8387_v31 }
 0x501   : > { %v8500_v38 = vpop.f32.mrf.mxu1  ;;  %v8390_v39 = vpop.f32.mrf.mxu0 }
 0x502   : > { %v8501_v52 = vadd.f32 %v8500_v38, %v8499_v51  ;;  %v7208_v19 = vadd.f32 %v8389_v56, %v12946_v16 }
 0x503   : > { %v8502_v20 = vpop.f32.mrf.mxu1  ;;  %v8391_v14 = vpop.f32.mrf.mxu0 }
 0x504   : > { %v13116_v40 = vadd.f32 %v8501_v52, %v7208_v19  ;;  %v8392_v45 = vadd.f32 %v8391_v14, %v8390_v39 }
 0x505   : > { %v8503_v62 = vpop.f32.mrf.mxu1  ;;  %v8393_v5 = vpop.f32.mrf.mxu0 }
 0x506   : > { %v8504_v60 = vadd.f32 %v8503_v62, %v8502_v20  ;;  %v7213_v13 = vadd.f32 %v8392_v45, %v12946_v16 }
 0x507   : > { %v8505_v12 = vpop.f32.mrf.mxu1  ;;  %v8394_v35 = vpop.f32.mrf.mxu0 }
 0x508   : > { %v13119_v9 = vadd.f32 %v8504_v60, %v7213_v13  ;;  %v8395_v7 = vadd.f32 %v8394_v35, %v8393_v5 }
 0x509   : > { %v8506_v61 = vpop.f32.mrf.mxu1  ;;  %v8396_v33 = vpop.f32.mrf.mxu0 }
 0x50a   : > { %v8507_v25 = vadd.f32 %v8506_v61, %v8505_v12  ;;  %v7216_v55 = vadd.f32 %v8395_v7, %v12946_v16 }
 0x50b   : > { %v8508_v49 = vpop.f32.mrf.mxu1  ;;  %v8397_v28 = vpop.f32.mrf.mxu0 }
 0x50c   : > { %v13122_v47 = vadd.f32 %v8507_v25, %v7216_v55  ;;  %v8398_v42 = vadd.f32 %v8397_v28, %v8396_v33 }
 0x50d   : > { %v8509_v54 = vpop.f32.mrf.mxu1  ;;  %v8399_v32 = vpop.f32.mrf.mxu0 }
 0x50e   : > { %v8510_v29 = vadd.f32 %v8509_v54, %v8508_v49  ;;  %v7221_v36 = vadd.f32 %v8398_v42, %v12946_v16 }
 0x50f   : > { %v8511_v24 = vpop.f32.mrf.mxu1  ;;  %v8400_v27 = vpop.f32.mrf.mxu0 }
 0x510   : > { %v13125_v1 = vadd.f32 %v8510_v29, %v7221_v36  ;;  %v8401_v18 = vadd.f32 %v8400_v27, %v8399_v32 }
 0x511   : > { %v8512_v17 = vpop.f32.mrf.mxu1  ;;  %v8402_v48 = vpop.f32.mrf.mxu0 }
 0x512   : > { %v8513_v8 = vadd.f32 %v8512_v17, %v8511_v24  ;;  %v7224_v58 = vadd.f32 %v8401_v18, %v12946_v16 }
 0x513   : > { %v8514_v3 = vpop.f32.mrf.mxu1  ;;  %v8403_v43 = vpop.f32.mrf.mxu0 }
 0x514   : > { %v13128_v22 = vadd.f32 %v8513_v8, %v7224_v58  ;;  %v8404_v2 = vadd.f32 %v8403_v43, %v8402_v48 }
 0x515   : > { %v8515_v0 = vpop.f32.mrf.mxu1  ;;  %v8405_v6 = vpop.f32.mrf.mxu0 }
 0x516   : > { %v8516_v31 = vadd.f32 %v8515_v0, %v8514_v3  ;;  %v7229_v51 = vadd.f32 %v8404_v2, %v12946_v16 }
 0x517   : > { %v8517_v10 = vpop.f32.mrf.mxu1  ;;  %v8406_v56 = vpop.f32.mrf.mxu0 }
 0x518   : > { %v13131_v38 = vadd.f32 %v8516_v31, %v7229_v51  ;;  %v8407_v52 = vadd.f32 %v8406_v56, %v8405_v6 }
 0x519   : > { %v8518_v39 = vpop.f32.mrf.mxu1  ;;  %v8408_v20 = vpop.f32.mrf.mxu0 }
 0x51a   : > { %v8519_v19 = vadd.f32 %v8518_v39, %v8517_v10  ;;  %v7232_v14 = vadd.f32 %v8407_v52, %v12946_v16 }
 0x51b   : > { %v8520_v45 = vpop.f32.mrf.mxu1  ;;  %v8409_v62 = vpop.f32.mrf.mxu0 }
 0x51c   : > { %v13134_v60 = vadd.f32 %v8519_v19, %v7232_v14  ;;  %v8410_v5 = vadd.f32 %v8409_v62, %v8408_v20 }
 0x51d   : > { %v8521_v13 = vpop.f32.mrf.mxu1  ;;  %v8411_v35 = vpop.f32.mrf.mxu0 }
 0x51e   : > { %v8522_v12 = vadd.f32 %v8521_v13, %v8520_v45  ;;  %v7237_v7 = vadd.f32 %v8410_v5, %v12946_v16 }
 0x51f   : > { %v8523_v61 = vpop.f32.mrf.mxu1  ;;  %v8412_v25 = vpop.f32.mrf.mxu0 }
 0x520   : > { %v13137_v33 = vadd.f32 %v8522_v12, %v7237_v7  ;;  %v8413_v55 = vadd.f32 %v8412_v25, %v8411_v35 }
 0x521   : > { %v8524_v49 = vpop.f32.mrf.mxu1  ;;  %v8414_v42 = vpop.f32.mrf.mxu0 }
 0x522   : > { %v8525_v28 = vadd.f32 %v8524_v49, %v8523_v61  ;;  %v7240_v54 = vadd.f32 %v8413_v55, %v12946_v16 }
 0x523   : > { %v8526_v29 = vpop.f32.mrf.mxu1  ;;  %v8415_v32 = vpop.f32.mrf.mxu0 }
 0x524   : > { %v13140_v36 = vadd.f32 %v8525_v28, %v7240_v54  ;;  %v8416_v24 = vadd.f32 %v8415_v32, %v8414_v42 }
 0x525   : > { %v8527_v27 = vpop.f32.mrf.mxu1  ;;  %v8417_v17 = vpop.f32.mrf.mxu0 }
 0x526   : > { %v8528_v18 = vadd.f32 %v8527_v27, %v8526_v29  ;;  %v7245_v8 = vadd.f32 %v8416_v24, %v12946_v16 }
 0x527   : > { %v8529_v48 = vpop.f32.mrf.mxu1  ;;  %v8418_v58 = vpop.f32.mrf.mxu0 }
 0x528   : > { %v13143_v3 = vadd.f32 %v8528_v18, %v7245_v8  ;;  %v8419_v43 = vadd.f32 %v8418_v58, %v8417_v17 }
 0x529   : > { %v8530_v2 = vpop.f32.mrf.mxu1  ;;  %v8420_v31 = vpop.f32.mrf.mxu0 }
 0x52a   : > { %v8531_v0 = vadd.f32 %v8530_v2, %v8529_v48  ;;  %v7248_v6 = vadd.f32 %v8419_v43, %v12946_v16 }
 0x52b   : > { %v8532_v51 = vpop.f32.mrf.mxu1  ;;  %v8421_v10 = vpop.f32.mrf.mxu0 }
 0x52c   : > { %v13146_v56 = vadd.f32 %v8531_v0, %v7248_v6  ;;  %v8422_v52 = vadd.f32 %v8421_v10, %v8420_v31 }
 0x52d   : > { %v8533_v39 = vpop.f32.mrf.mxu1  ;;  %v8423_v20 = vpop.f32.mrf.mxu0 }
 0x52e   : > { %v8534_v19 = vadd.f32 %v8533_v39, %v8532_v51  ;;  %v7253_v14 = vadd.f32 %v8422_v52, %v12946_v16 }
 0x52f   : > { %v8535_v45 = vpop.f32.mrf.mxu1  ;;  %v8424_v62 = vpop.f32.mrf.mxu0 }
 0x530   : > { %v13149_v5 = vadd.f32 %v8534_v19, %v7253_v14  ;;  %v8425_v13 = vadd.f32 %v8424_v62, %v8423_v20 }
 0x531   : > { %v8536_v12 = vpop.f32.mrf.mxu1  ;;  %v8426_v7 = vpop.f32.mrf.mxu0 }
 0x532   : > { %v8537_v35 = vadd.f32 %v8536_v12, %v8535_v45  ;;  %v7256_v61 = vadd.f32 %v8425_v13, %v12946_v16 }
 0x533   : > { %v8538_v25 = vpop.f32.mrf.mxu1  ;;  %v8427_v55 = vpop.f32.mrf.mxu0 }
 0x534   : > { %v13152_v49 = vadd.f32 %v8537_v35, %v7256_v61  ;;  %v8428_v28 = vadd.f32 %v8427_v55, %v8426_v7 }
 0x535   : > { %v8539_v42 = vpop.f32.mrf.mxu1  ;;  %v8429_v29 = vpop.f32.mrf.mxu0 }
 0x536   : > { %v8540_v54 = vadd.f32 %v8539_v42, %v8538_v25  ;;  %v7261_v32 = vadd.f32 %v8428_v28, %v12946_v16 }
 0x537   : > { %v8541_v24 = vpop.f32.mrf.mxu1  ;;  %v8430_v27 = vpop.f32.mrf.mxu0 }
 0x538   : > { %v13155_v18 = vadd.f32 %v8540_v54, %v7261_v32  ;;  %v8431_v17 = vadd.f32 %v8430_v27, %v8429_v29 }
 0x539   : > { %v8542_v8 = vpop.f32.mrf.mxu1  ;;  %v8560_v58 = vpop.f32.mrf.mxu0 }
 0x53a   : > { %v8543_v48 = vadd.f32 %v8542_v8, %v8541_v24  ;;  %v7264_v43 = vadd.f32 %v8431_v17, %v12946_v16 }
 0x53b   : > { %v8672_v2 = vpop.f32.mrf.mxu1  ;;  %v8561_v0 = vpop.f32.mrf.mxu0 }
 0x53c   : > { %v13159_v31 = vadd.f32 %v8543_v48, %v7264_v43  ;;  %v8562_v6 = vadd.f32 %v8561_v0, %v8560_v58 }
 0x53d   : > { %v8673_v51 = vpop.f32.mrf.mxu1  ;;  %v8563_v10 = vpop.f32.mrf.mxu0 }
 0x53e   : > { %v7463_v52 = vadd.f32 %v8562_v6, %v12958_v37  ;;  %v8674_v39 = vadd.f32 %v8673_v51, %v8672_v2 }
 0x53f   : > { %v8675_v19 = vpop.f32.mrf.mxu1  ;;  %v8564_v20 = vpop.f32.mrf.mxu0 }
 0x540   : > { %v7624_v14 = vadd.f32 %v8674_v39, %v7463_v52  ;;  %v8565_v45 = vadd.f32 %v8564_v20, %v8563_v10 }
 0x541   : > { %v8676_v62 = vpop.f32.mrf.mxu1  ;;  %v8566_v13 = vpop.f32.mrf.mxu0 }
 0x542   : > { %7750 = vst [vmem:[%s13164_s25] sm:$0xff] %v7624_v14  ;;  %v7466_v16 = vadd.f32 %v8565_v45, %v12976_v59  ;;  %v8677_v12 = vadd.f32 %v8676_v62, %v8675_v19 }
 0x543   : > { %v8678_v35 = vpop.f32.mrf.mxu1  ;;  %v8567_v7 = vpop.f32.mrf.mxu0 }
 0x544   : > { %v7627_v61 = vadd.f32 %v8677_v12, %v7466_v16  ;;  %v8568_v37 = vadd.f32 %v8567_v7, %v8566_v13 }
 0x545   : > { %v8679_v25 = vpop.f32.mrf.mxu1  ;;  %v8569_v55 = vpop.f32.mrf.mxu0 }
 0x546   : > { %7751 = vst [vmem:[%s13164_s25 + $0x8] sm:$0xff] %v7627_v61  ;;  %v7471_v28 = vadd.f32 %v8568_v37, %v12986_v4  ;;  %v8680_v42 = vadd.f32 %v8679_v25, %v8678_v35 }
 0x547   : > { %v8681_v54 = vpop.f32.mrf.mxu1  ;;  %v8570_v29 = vpop.f32.mrf.mxu0 }
 0x548   : > { %v7632_v32 = vadd.f32 %v8680_v42, %v7471_v28  ;;  %v8571_v24 = vadd.f32 %v8570_v29, %v8569_v55 }
 0x549   : > { %v8682_v27 = vpop.f32.mrf.mxu1  ;;  %v8572_v17 = vpop.f32.mrf.mxu0 }
 0x54a   : > { %7752 = vst [vmem:[%s13164_s25 + $0x10] sm:$0xff] %v7632_v32  ;;  %v7474_v59 = vadd.f32 %v8571_v24, %v13004_v44  ;;  %v8683_v8 = vadd.f32 %v8682_v27, %v8681_v54 }
 0x54b   : > { %v8684_v48 = vpop.f32.mrf.mxu1  ;;  %v8573_v58 = vpop.f32.mrf.mxu0 }
 0x54c   : > { %v7635_v43 = vadd.f32 %v8683_v8, %v7474_v59  ;;  %v8574_v2 = vadd.f32 %v8573_v58, %v8572_v17 }
 0x54d   : > { %v8685_v0 = vpop.f32.mrf.mxu1  ;;  %v8575_v6 = vpop.f32.mrf.mxu0 }
 0x54e   : > { %7753 = vst [vmem:[%s13164_s25 + $0x18] sm:$0xff] %v7635_v43  ;;  %v7479_v4 = vadd.f32 %v8574_v2, %v13013_v34  ;;  %v8686_v51 = vadd.f32 %v8685_v0, %v8684_v48 }
 0x54f   : > { %v8687_v10 = vpop.f32.mrf.mxu1  ;;  %v8576_v52 = vpop.f32.mrf.mxu0 }
 0x550   : > { %v7640_v39 = vadd.f32 %v8686_v51, %v7479_v4  ;;  %v8577_v19 = vadd.f32 %v8576_v52, %v8575_v6 }
 0x551   : > { %v8688_v20 = vpop.f32.mrf.mxu1  ;;  %v8578_v14 = vpop.f32.mrf.mxu0 }
 0x552   : > { %7754 = vst [vmem:[%s13164_s25 + $0x20] sm:$0xff] %v7640_v39  ;;  %v7482_v44 = vadd.f32 %v8577_v19, %v13031_v53  ;;  %v8689_v45 = vadd.f32 %v8688_v20, %v8687_v10 }
 0x553   : > { %v8690_v62 = vpop.f32.mrf.mxu1  ;;  %v8579_v13 = vpop.f32.mrf.mxu0 }
 0x554   : > { %v7643_v16 = vadd.f32 %v8689_v45, %v7482_v44  ;;  %v8580_v12 = vadd.f32 %v8579_v13, %v8578_v14 }
 0x555   : > { %v8691_v35 = vpop.f32.mrf.mxu1  ;;  %v8581_v7 = vpop.f32.mrf.mxu0 }
 0x556   : > { %7755 = vst [vmem:[%s13164_s25 + $0x28] sm:$0xff] %v7643_v16  ;;  %v7487_v34 = vadd.f32 %v8580_v12, %v13039_v23  ;;  %v8692_v61 = vadd.f32 %v8691_v35, %v8690_v62 }
 0x557   : > { %v8693_v37 = vpop.f32.mrf.mxu1  ;;  %v8582_v25 = vpop.f32.mrf.mxu0 }
 0x558   : > { %v7648_v55 = vadd.f32 %v8692_v61, %v7487_v34  ;;  %v8583_v28 = vadd.f32 %v8582_v25, %v8581_v7 }
 0x559   : > { %v8694_v42 = vpop.f32.mrf.mxu1  ;;  %v8584_v54 = vpop.f32.mrf.mxu0 }
 0x55a   : > { %7756 = vst [vmem:[%s13164_s25 + $0x30] sm:$0xff] %v7648_v55  ;;  %v7490_v53 = vadd.f32 %v8583_v28, %v13058_v21  ;;  %v8695_v29 = vadd.f32 %v8694_v42, %v8693_v37 }
 0x55b   : > { %v8696_v32 = vpop.f32.mrf.mxu1  ;;  %v8585_v24 = vpop.f32.mrf.mxu0 }
 0x55c   : > { %v7651_v27 = vadd.f32 %v8695_v29, %v7490_v53  ;;  %v8586_v17 = vadd.f32 %v8585_v24, %v8584_v54 }
 0x55d   : > { %v8697_v59 = vpop.f32.mrf.mxu1  ;;  %v8587_v8 = vpop.f32.mrf.mxu0 }
 0x55e   : > { %7757 = vst [vmem:[%s13164_s25 + $0x38] sm:$0xff] %v7651_v27  ;;  %v7495_v23 = vadd.f32 %v8586_v17, %v13066_v30  ;;  %v8698_v48 = vadd.f32 %v8697_v59, %v8696_v32 }
 0x55f   : > { %v8699_v58 = vpop.f32.mrf.mxu1  ;;  %v8588_v43 = vpop.f32.mrf.mxu0 }
 0x560   : > { %v7656_v2 = vadd.f32 %v8698_v48, %v7495_v23  ;;  %v8589_v0 = vadd.f32 %v8588_v43, %v8587_v8 }
 0x561   : > { %v8700_v6 = vpop.f32.mrf.mxu1  ;;  %v8590_v4 = vpop.f32.mrf.mxu0 }
 0x562   : > { %7758 = vst [vmem:[%s13164_s25 + $0x40] sm:$0xff] %v7656_v2  ;;  %v7498_v21 = vadd.f32 %v8589_v0, %v13080_v63  ;;  %v8701_v51 = vadd.f32 %v8700_v6, %v8699_v58 }
 0x563   : > { %v8702_v10 = vpop.f32.mrf.mxu1  ;;  %v8591_v52 = vpop.f32.mrf.mxu0 }
 0x564   : > { %v7659_v39 = vadd.f32 %v8701_v51, %v7498_v21  ;;  %v8592_v19 = vadd.f32 %v8591_v52, %v8590_v4 }
 0x565   : > { %v8703_v20 = vpop.f32.mrf.mxu1  ;;  %v8593_v14 = vpop.f32.mrf.mxu0 }
 0x566   : > { %7759 = vst [vmem:[%s13164_s25 + $0x48] sm:$0xff] %v7659_v39  ;;  %v7503_v30 = vadd.f32 %v8592_v19, %v13086_v26  ;;  %v8704_v44 = vadd.f32 %v8703_v20, %v8702_v10 }
 0x567   : > { %v8705_v45 = vpop.f32.mrf.mxu1  ;;  %v8594_v62 = vpop.f32.mrf.mxu0 }
 0x568   : > { %v7664_v13 = vadd.f32 %v8704_v44, %v7503_v30  ;;  %v8595_v16 = vadd.f32 %v8594_v62, %v8593_v14 }
 0x569   : > { %v8706_v12 = vpop.f32.mrf.mxu1  ;;  %v8596_v35 = vpop.f32.mrf.mxu0 }
 0x56a   : > { %7760 = vst [vmem:[%s13164_s25 + $0x50] sm:$0xff] %v7664_v13  ;;  %v7506_v63 = vadd.f32 %v8595_v16, %v13095_v11  ;;  %v8707_v7 = vadd.f32 %v8706_v12, %v8705_v45 }
 0x56b   : > { %v8708_v34 = vpop.f32.mrf.mxu1  ;;  %v8597_v61 = vpop.f32.mrf.mxu0 }
 0x56c   : > { %v7667_v37 = vadd.f32 %v8707_v7, %v7506_v63  ;;  %v8598_v25 = vadd.f32 %v8597_v61, %v8596_v35 }
 0x56d   : > { %v8709_v55 = vpop.f32.mrf.mxu1  ;;  %v8599_v28 = vpop.f32.mrf.mxu0 }
 0x56e   : > { %7761 = vst [vmem:[%s13164_s25 + $0x58] sm:$0xff] %v7667_v37  ;;  %v7511_v26 = vadd.f32 %v8598_v25, %v13098_v46  ;;  %v8710_v42 = vadd.f32 %v8709_v55, %v8708_v34 }
 0x56f   : > { %v8711_v54 = vpop.f32.mrf.mxu1  ;;  %v8600_v53 = vpop.f32.mrf.mxu0 }
 0x570   : > { %v7672_v29 = vadd.f32 %v8710_v42, %v7511_v26  ;;  %v8601_v32 = vadd.f32 %v8600_v53, %v8599_v28 }
 0x571   : > { %v8712_v24 = vpop.f32.mrf.mxu1  ;;  %v8602_v27 = vpop.f32.mrf.mxu0 }
 0x572   : > { %7762 = vst [vmem:[%s13164_s25 + $0x60] sm:$0xff] %v7672_v29  ;;  %v7514_v11 = vadd.f32 %v8601_v32, %v13104_v57  ;;  %v8713_v17 = vadd.f32 %v8712_v24, %v8711_v54 }
 0x573   : > { %v8714_v59 = vpop.f32.mrf.mxu1  ;;  %v8603_v8 = vpop.f32.mrf.mxu0 }
 0x574   : > { %v7675_v23 = vadd.f32 %v8713_v17, %v7514_v11  ;;  %v8604_v48 = vadd.f32 %v8603_v8, %v8602_v27 }
 0x575   : > { %v8715_v58 = vpop.f32.mrf.mxu1  ;;  %v8605_v43 = vpop.f32.mrf.mxu0 }
 0x576   : > { %7763 = vst [vmem:[%s13164_s25 + $0x68] sm:$0xff] %v7675_v23  ;;  %v7519_v46 = vadd.f32 %v8604_v48, %v13107_v50  ;;  %v8716_v2 = vadd.f32 %v8715_v58, %v8714_v59 }
 0x577   : > { %v8717_v0 = vpop.f32.mrf.mxu1  ;;  %v8606_v6 = vpop.f32.mrf.mxu0 }
 0x578   : > { %v7680_v4 = vadd.f32 %v8716_v2, %v7519_v46  ;;  %v8607_v21 = vadd.f32 %v8606_v6, %v8605_v43 }
 0x579   : > { %v8718_v51 = vpop.f32.mrf.mxu1  ;;  %v8608_v10 = vpop.f32.mrf.mxu0 }
 0x57a   : > { %7764 = vst [vmem:[%s13164_s25 + $0x70] sm:$0xff] %v7680_v4  ;;  %v7522_v57 = vadd.f32 %v8607_v21, %v13110_v41  ;;  %v8719_v52 = vadd.f32 %v8718_v51, %v8717_v0 }
 0x57b   : > { %v8720_v39 = vpop.f32.mrf.mxu1  ;;  %v8609_v19 = vpop.f32.mrf.mxu0 }
 0x57c   : > { %v7683_v20 = vadd.f32 %v8719_v52, %v7522_v57  ;;  %v8610_v14 = vadd.f32 %v8609_v19, %v8608_v10 }
 0x57d   : > { %v8721_v30 = vpop.f32.mrf.mxu1  ;;  %v8611_v44 = vpop.f32.mrf.mxu0 }
 0x57e   : > { %7765 = vst [vmem:[%s13164_s25 + $0x78] sm:$0xff] %v7683_v20  ;;  %v7527_v50 = vadd.f32 %v8610_v14, %v13113_v15  ;;  %v8722_v45 = vadd.f32 %v8721_v30, %v8720_v39 }
 0x57f   : > { %v8723_v62 = vpop.f32.mrf.mxu1  ;;  %v8612_v13 = vpop.f32.mrf.mxu0 }
 0x580   : > { %v7688_v16 = vadd.f32 %v8722_v45, %v7527_v50  ;;  %v8613_v12 = vadd.f32 %v8612_v13, %v8611_v44 }
 0x581   : > { %v8724_v35 = vpop.f32.mrf.mxu1  ;;  %v8614_v63 = vpop.f32.mrf.mxu0 }
 0x582   : > { %7766 = vst [vmem:[%s13164_s25 + $0x80] sm:$0xff] %v7688_v16  ;;  %v7530_v41 = vadd.f32 %v8613_v12, %v13116_v40  ;;  %v8725_v7 = vadd.f32 %v8724_v35, %v8723_v62 }
 0x583   : > { %v8726_v34 = vpop.f32.mrf.mxu1  ;;  %v8615_v61 = vpop.f32.mrf.mxu0 }
 0x584   : > { %v7691_v37 = vadd.f32 %v8725_v7, %v7530_v41  ;;  %v8616_v25 = vadd.f32 %v8615_v61, %v8614_v63 }
 0x585   : > { %v8727_v55 = vpop.f32.mrf.mxu1  ;;  %v8617_v28 = vpop.f32.mrf.mxu0 }
 0x586   : > { %7767 = vst [vmem:[%s13164_s25 + $0x88] sm:$0xff] %v7691_v37  ;;  %v7535_v15 = vadd.f32 %v8616_v25, %v13119_v9  ;;  %v8728_v26 = vadd.f32 %v8727_v55, %v8726_v34 }
 0x587   : > { %v8729_v42 = vpop.f32.mrf.mxu1  ;;  %v8618_v54 = vpop.f32.mrf.mxu0 }
 0x588   : > { %v7696_v53 = vadd.f32 %v8728_v26, %v7535_v15  ;;  %v8619_v29 = vadd.f32 %v8618_v54, %v8617_v28 }
 0x589   : > { %v8730_v32 = vpop.f32.mrf.mxu1  ;;  %v8620_v24 = vpop.f32.mrf.mxu0 }
 0x58a   : > { %7768 = vst [vmem:[%s13164_s25 + $0x90] sm:$0xff] %v7696_v53  ;;  %v7538_v40 = vadd.f32 %v8619_v29, %v13122_v47  ;;  %v8731_v27 = vadd.f32 %v8730_v32, %v8729_v42 }
 0x58b   : > { %v8732_v11 = vpop.f32.mrf.mxu1  ;;  %v8621_v17 = vpop.f32.mrf.mxu0 }
 0x58c   : > { %v7699_v59 = vadd.f32 %v8731_v27, %v7538_v40  ;;  %v8622_v8 = vadd.f32 %v8621_v17, %v8620_v24 }
 0x58d   : > { %v8733_v23 = vpop.f32.mrf.mxu1  ;;  %v8623_v48 = vpop.f32.mrf.mxu0 }
 0x58e   : > { %7769 = vst [vmem:[%s13164_s25 + $0x98] sm:$0xff] %v7699_v59  ;;  %v7543_v9 = vadd.f32 %v8622_v8, %v13125_v1  ;;  %v8734_v58 = vadd.f32 %v8733_v23, %v8732_v11 }
 0x58f   : > { %v8735_v43 = vpop.f32.mrf.mxu1  ;;  %v8624_v46 = vpop.f32.mrf.mxu0 }
 0x590   : > { %v7704_v2 = vadd.f32 %v8734_v58, %v7543_v9  ;;  %v8625_v0 = vadd.f32 %v8624_v46, %v8623_v48 }
 0x591   : > { %v8736_v6 = vpop.f32.mrf.mxu1  ;;  %v8626_v4 = vpop.f32.mrf.mxu0 }
 0x592   : > { %7770 = vst [vmem:[%s13164_s25 + $0xa0] sm:$0xff] %v7704_v2  ;;  %v7546_v47 = vadd.f32 %v8625_v0, %v13128_v22  ;;  %v8737_v21 = vadd.f32 %v8736_v6, %v8735_v43 }
 0x593   : > { %v8738_v51 = vpop.f32.mrf.mxu1  ;;  %v8627_v10 = vpop.f32.mrf.mxu0 }
 0x594   : > { %v7707_v57 = vadd.f32 %v8737_v21, %v7546_v47  ;;  %v8628_v52 = vadd.f32 %v8627_v10, %v8626_v4 }
 0x595   : > { %v8739_v39 = vpop.f32.mrf.mxu1  ;;  %v8629_v19 = vpop.f32.mrf.mxu0 }
 0x596   : > { %7771 = vst [vmem:[%s13164_s25 + $0xa8] sm:$0xff] %v7707_v57  ;;  %v7551_v1 = vadd.f32 %v8628_v52, %v13131_v38  ;;  %v8740_v20 = vadd.f32 %v8739_v39, %v8738_v51 }
 0x597   : > { %v8741_v14 = vpop.f32.mrf.mxu1  ;;  %v8630_v30 = vpop.f32.mrf.mxu0 }
 0x598   : > { %v7712_v44 = vadd.f32 %v8740_v20, %v7551_v1  ;;  %v8631_v50 = vadd.f32 %v8630_v30, %v8629_v19 }
 0x599   : > { %v8742_v45 = vpop.f32.mrf.mxu1  ;;  %v8632_v62 = vpop.f32.mrf.mxu0 }
 0x59a   : > { %7772 = vst [vmem:[%s13164_s25 + $0xb0] sm:$0xff] %v7712_v44  ;;  %v7554_v22 = vadd.f32 %v8631_v50, %v13134_v60  ;;  %v8743_v13 = vadd.f32 %v8742_v45, %v8741_v14 }
 0x59b   : > { %v8744_v16 = vpop.f32.mrf.mxu1  ;;  %v8633_v12 = vpop.f32.mrf.mxu0 }
 0x59c   : > { %v7715_v35 = vadd.f32 %v8743_v13, %v7554_v22  ;;  %v8634_v63 = vadd.f32 %v8633_v12, %v8632_v62 }
 0x59d   : > { %v8745_v41 = vpop.f32.mrf.mxu1  ;;  %v8635_v7 = vpop.f32.mrf.mxu0 }
 0x59e   : > { %7773 = vst [vmem:[%s13164_s25 + $0xb8] sm:$0xff] %v7715_v35  ;;  %v7559_v38 = vadd.f32 %v8634_v63, %v13137_v33  ;;  %v8746_v34 = vadd.f32 %v8745_v41, %v8744_v16 }
 0x59f   : > { %v8747_v61 = vpop.f32.mrf.mxu1  ;;  %v8636_v37 = vpop.f32.mrf.mxu0 }
 0x5a0   : > { %v7720_v25 = vadd.f32 %v8746_v34, %v7559_v38  ;;  %v8637_v55 = vadd.f32 %v8636_v37, %v8635_v7 }
 0x5a1   : > { %v8748_v28 = vpop.f32.mrf.mxu1  ;;  %v8638_v15 = vpop.f32.mrf.mxu0 }
 0x5a2   : > { %7774 = vst [vmem:[%s13164_s25 + $0xc0] sm:$0xff] %v7720_v25  ;;  %v7562_v60 = vadd.f32 %v8637_v55, %v13140_v36  ;;  %v8749_v26 = vadd.f32 %v8748_v28, %v8747_v61 }
 0x5a3   : > { %v8750_v42 = vpop.f32.mrf.mxu1  ;;  %v8639_v54 = vpop.f32.mrf.mxu0 }
 0x5a4   : > { %v7723_v53 = vadd.f32 %v8749_v26, %v7562_v60  ;;  %v8640_v29 = vadd.f32 %v8639_v54, %v8638_v15 }
 0x5a5   : > { %v8751_v32 = vpop.f32.mrf.mxu1  ;;  %v8641_v24 = vpop.f32.mrf.mxu0 }
 0x5a6   : > { %7775 = vst [vmem:[%s13164_s25 + $0xc8] sm:$0xff] %v7723_v53  ;;  %v7567_v33 = vadd.f32 %v8640_v29, %v13143_v3  ;;  %v8752_v40 = vadd.f32 %v8751_v32, %v8750_v42 }
 0x5a7   : > { %v8753_v27 = vpop.f32.mrf.mxu1  ;;  %v8642_v11 = vpop.f32.mrf.mxu0 }
 0x5a8   : > { %v7728_v17 = vadd.f32 %v8752_v40, %v7567_v33  ;;  %v8643_v59 = vadd.f32 %v8642_v11, %v8641_v24 }
 0x5a9   : > { %v8754_v8 = vpop.f32.mrf.mxu1  ;;  %v8644_v23 = vpop.f32.mrf.mxu0 }
 0x5aa   : > { %7776 = vst [vmem:[%s13164_s25 + $0xd0] sm:$0xff] %v7728_v17  ;;  %v7570_v36 = vadd.f32 %v8643_v59, %v13146_v56  ;;  %v8755_v48 = vadd.f32 %v8754_v8, %v8753_v27 }
 0x5ab   : > { %v8756_v9 = vpop.f32.mrf.mxu1  ;;  %v8645_v58 = vpop.f32.mrf.mxu0 }
 0x5ac   : > { %v7731_v43 = vadd.f32 %v8755_v48, %v7570_v36  ;;  %v8646_v46 = vadd.f32 %v8645_v58, %v8644_v23 }
 0x5ad   : > { %v8757_v2 = vpop.f32.mrf.mxu1  ;;  %v8647_v0 = vpop.f32.mrf.mxu0 }
 0x5ae   : > { %7777 = vst [vmem:[%s13164_s25 + $0xd8] sm:$0xff] %v7731_v43  ;;  %v7575_v3 = vadd.f32 %v8646_v46, %v13149_v5  ;;  %v8758_v6 = vadd.f32 %v8757_v2, %v8756_v9 }
 0x5af   : > { %v8759_v4 = vpop.f32.mrf.mxu1  ;;  %v8648_v47 = vpop.f32.mrf.mxu0 }
 0x5b0   : > { %v7736_v21 = vadd.f32 %v8758_v6, %v7575_v3  ;;  %v8649_v51 = vadd.f32 %v8648_v47, %v8647_v0 }
 0x5b1   : > { %v8760_v10 = vpop.f32.mrf.mxu1  ;;  %v8650_v57 = vpop.f32.mrf.mxu0 }
 0x5b2   : > { %7778 = vst [vmem:[%s13164_s25 + $0xe0] sm:$0xff] %v7736_v21  ;;  %v7578_v56 = vadd.f32 %v8649_v51, %v13152_v49  ;;  %v8761_v52 = vadd.f32 %v8760_v10, %v8759_v4 }
 0x5b3   : > { %v8762_v39 = vpop.f32.mrf.mxu1  ;;  %v8651_v19 = vpop.f32.mrf.mxu0 }
 0x5b4   : > { %v7739_v1 = vadd.f32 %v8761_v52, %v7578_v56  ;;  %v8652_v20 = vadd.f32 %v8651_v19, %v8650_v57 }
 0x5b5   : > { %v8763_v5 = vpop.f32.mrf.mxu1  ;;  %v8653_v14 = vpop.f32.mrf.mxu0 }
 0x5b6   : > { %7779 = vst [vmem:[%s13164_s25 + $0xe8] sm:$0xff] %v7739_v1  ;;  %v7583_v30 = vadd.f32 %v8652_v20, %v13155_v18  ;;  %v8764_v44 = vadd.f32 %v8763_v5, %v8762_v39 }
 0x5b7   : > { %v8765_v50 = vpop.f32.mrf.mxu1  ;;  %v8654_v45 = vpop.f32.mrf.mxu0 }
 0x5b8   : > { %v7744_v49 = vadd.f32 %v8764_v44, %v7583_v30  ;;  %v8655_v62 = vadd.f32 %v8654_v45, %v8653_v14 }
 0x5b9   : > { %v8766_v22 = vpop.f32.mrf.mxu1 }
 0x5ba   : > { %7780 = vst [vmem:[%s13164_s25 + $0xf0] sm:$0xff] %v7744_v49  ;;  %v7586_v13 = vadd.f32 %v8655_v62, %v13159_v31  ;;  %v8767_v16 = vadd.f32 %v8766_v22, %v8765_v50 }
 0x5bc   : > { %v7747_v18 = vadd.f32 %v8767_v16, %v7586_v13 }
 0x5be   : > { %7781 = vst [vmem:[%s13164_s25 + $0xf8] sm:$0xff] %v7747_v18 }
 0x5bf   : > { %9031 = shalt.err (!%p9028_p0)
}
 0x5c0   : > { %s9032_s29 = scalar_lea.hbm %s13233_s30, 4096  ;;  %s9036_s26 = scalar_lea.hbm %s13291_s11, 8192 }
 0x5c1   : > { %p9033_p1 = scmp.ne.s32.totalorder %s13233_s30, %s9032_s29  ;;  %p9037_p4 = scmp.lt.s32.totalorder %s13233_s30, %s13291_s11 }
 0x5c2   : > { %p9038_p7 = scmp.lt.s32.totalorder %s9036_s26, %s9032_s29 }
 0x5c3   : > { %p9034_p2 = pnand %p9033_p1, %p9189_p5 }
 0x5c4   : > { %p9039_p6 = por %p9038_p7, %p9037_p4 }
 0x5c5   : > { %p9035_p3 = pneg %p9034_p2 }
 0x5c7   : > { %p9040_p8 = pnand %p9039_p6, %p9035_p3 }
 0x5c9   : > { %9043 = shalt.err (!%p9040_p8)
}
 0x5ca   : > { %s9089_s16 = smov 128   ;;  %s9090_s24 = smov 8  }
 0x5cb   : > { %8772 = dma.vmem_to_hbm [thread:$0]  (%p9189_p5), %s13235_s15, 4096, %s13233_s30, %s13240_s12, %s9089_s16, %s9089_s16, %s9090_s24  }
 0x5cc PF: > { %p8784_p9 = scmp.ge.s32.totalorder %s9082_s20, 2  ;;  %s7811_s21 = sand.u32 1, %s9070_s17  }
 0x5cd   : > { %p14272_p10 = scmp.ne.s32.totalorder %s13591_s28, 0  ;;  %s7812_s13 = scalar_lea.sflag [#allocation4], %s7811_s21 }
 0x5cf   : > { %p8779_p11 = pnand %p8784_p9, %p14272_p10 }
 0x5d1   : > { %p8780_p12 = pneg %p8779_p11 }
 0x5d3   : > { %9065 = dma.done.wait (%p8780_p12), %s7812_s13, 4096  }
 0x5d4   : > { %9067 = vsyncadd (%p8780_p12), %s7812_s13, 4294963200  ;;  %s14273_s0 = sld [smem:[#allocation8_spill]]  ;;  %p22_p13 = scmp.ge.s32.totalorder %s9176_s23, 4  }
 0x5d5   : > { %s14274_s17 = smov %s9074_s18  ;;  %s14275_s18 = smov %s9078_s19 }
 0x5d6   : > { %s14277_s20 = smov %s9176_s23  ;;  %24 = sbr.rel (!%p22_p13) target bundleno = 8 (0x8), region = 107 }
 0x5da   : > { %s14276_s19 = smov %s14273_s0 }
 0x5db   :  { %7817 = vsyncpa [#allocation3], 1 }
 0x5dc   :  { %7819 = vsyncpa [#allocation3 + $0x1], 1 }
 0x5dd   :  { %7820 = vsyncpa [#allocation4], 1 }
 0x5de   :  { %7822 = vsyncpa [#allocation4 + $0x1], 1 }

</bundles_post_ra>
